<compile_context>
chip_gen: v7x
topology: tpu7x:2x2x1
jax: 0.10.0
libtpu: 0.0.40
codegen_flags: <defaults>
</compile_context>

<pallas_src>
import functools

import numpy as np
import jax
import jax.numpy as jnp
from jax.experimental import pallas as pl
from jax.experimental.pallas import tpu as pltpu

VMEM_LIMIT = 32 * 1024 * 1024   # safe on v5e / v6e / v7x; kernels here need <5 MiB
TM_MAX = 512                    # row-tile target (~85% of HBM roofline per review)


# --------------------------------------------------------------------------- helpers

def _round_up(x, m):
    return (x + m - 1) // m * m


def _tile_rows(M, tm_max=TM_MAX):
    """Pick a sublane-aligned row tile and the padded row count."""
    m8 = _round_up(M, 8)
    tm = min(tm_max, m8)
    return tm, _round_up(m8, tm)


def _apply_act(v, act):
    if act == "relu":
        return jnp.maximum(v, 0.0)
    if act == "lrelu":
        return jnp.where(v > 0, v, 0.1 * v)
    return v


# --------------------------------------------------------------------------- kernels

def _mm_kernel(act, has_res, x_ref, w_ref, b_ref, *rest):
    """o = act(x @ w + b) [+ residual].  x:(tm,K) w:(K,N) b:(1,N)."""
    if has_res:
        res_ref, o_ref = rest
    else:
        (o_ref,) = rest
    acc = jnp.dot(x_ref[...].astype(jnp.bfloat16), w_ref[...],
                  preferred_element_type=jnp.float32)
    acc = _apply_act(acc + b_ref[...], act)
    if has_res:
        acc = acc + res_ref[...]
    o_ref[...] = acc.astype(o_ref.dtype)


def _dconv_kernel(kh, kw, wo, act, has_res, *refs):
    """Direct (no-im2col) stride-1 conv: one output row per grid step.

    refs = (row_0..row_{kh-1}, w:(kh*kw,Cin,Cout), b:(1,Cout), [res:(Wo,Cout)], o:(Wo,Cout))
    Each row_i is the padded input row y+i, shape (Wp, Cin).
    """
    row_refs = refs[:kh]
    w_ref = refs[kh]
    b_ref = refs[kh + 1]
    res_ref = refs[kh + 2] if has_res else None
    o_ref = refs[-1]
    cout = o_ref.shape[-1]

    acc = jnp.zeros((wo, cout), jnp.float32)
    for i in range(kh):
        row = row_refs[i][...]                      # (Wp, Cin) f32
        for j in range(kw):
            xs = row[j:j + wo, :].astype(jnp.bfloat16)
            acc = acc + jnp.dot(xs, w_ref[i * kw + j],
                                preferred_element_type=jnp.float32)
    y = _apply_act(acc + b_ref[...], act)
    if has_res:
        y = y + res_ref[...]
    o_ref[...] = y.astype(o_ref.dtype)


def _sft_kernel(x_ref, c_ref, w0_ref, b0_ref, ws_ref, bs_ref, wh_ref, bh_ref, o_ref):
    """Fused SFTLayer: merged first-layer matmul, zero-padded second layers,
    '+1' folded into the scale bias, modulation x0*scale1 + shift."""
    c = c_ref[...].astype(jnp.bfloat16)                            # (tm, 32)
    h = jnp.dot(c, w0_ref[...], preferred_element_type=jnp.float32) + b0_ref[...]
    h = jnp.where(h > 0, h, 0.1 * h)                               # (tm, 64) f32
    hb = h.astype(jnp.bfloat16)
    scale1 = jnp.dot(hb, ws_ref[...], preferred_element_type=jnp.float32) + bs_ref[...]
    shift = jnp.dot(hb, wh_ref[...], preferred_element_type=jnp.float32) + bh_ref[...]
    o_ref[...] = (x_ref[...] * scale1 + shift).astype(o_ref.dtype)


# ------------------------------------------------------------------ pallas wrappers

def matmul_bias_act(x, w, b, act="none", residual=None):
    """Tiled (over M) matmul with fused bias / activation / residual."""
    M, K = x.shape
    N = w.shape[1]
    tm, Mp = _tile_rows(M)
    if Mp != M:
        x = jnp.pad(x, ((0, Mp - M), (0, 0)))
        if residual is not None:
            residual = jnp.pad(residual, ((0, Mp - M), (0, 0)))
    b2 = b.reshape(1, N).astype(jnp.float32)

    inputs = [x, w, b2]
    in_specs = [pl.BlockSpec((tm, K), lambda i: (i, 0)),
                pl.BlockSpec((K, N), lambda i: (0, 0)),     # resident weights
                pl.BlockSpec((1, N), lambda i: (0, 0))]     # resident bias
    if residual is not None:
        inputs.append(residual)
        in_specs.append(pl.BlockSpec((tm, N), lambda i: (i, 0)))

    out = pl.pallas_call(
        functools.partial(_mm_kernel, act, residual is not None),
        out_shape=jax.ShapeDtypeStruct((Mp, N), jnp.float32),
        grid=(Mp // tm,),
        in_specs=in_specs,
        out_specs=pl.BlockSpec((tm, N), lambda i: (i, 0)),
        compiler_params=pltpu.CompilerParams(
            dimension_semantics=("parallel",), vmem_limit_bytes=VMEM_LIMIT),
    )(*inputs)
    return out[:M] if Mp != M else out


def _row_shift_map(i):
    def index_map(b, y):
        return (b, y + i, 0, 0)
    return index_map


def conv2d_direct(x, w, b, pad, act, residual):
    """Stride-1 conv without HBM im2col. x NHWC, w OIHW."""
    B, H, W, cin = x.shape
    cout, _, kh, kw = w.shape
    Ho = H + 2 * pad - kh + 1
    Wo = W + 2 * pad - kw + 1
    Wp = W + 2 * pad
    xp = jnp.pad(x, ((0, 0), (pad, pad), (pad, pad), (0, 0)))
    wd = jnp.transpose(w, (2, 3, 1, 0)).reshape(kh * kw, cin, cout).astype(jnp.bfloat16)
    b2 = b.reshape(1, cout).astype(jnp.float32)

    inputs = [xp] * kh + [wd, b2]
    in_specs = [pl.BlockSpec((None, None, Wp, cin), _row_shift_map(i)) for i in range(kh)]
    in_specs += [pl.BlockSpec((kh * kw, cin, cout), lambda bb, yy: (0, 0, 0)),
                 pl.BlockSpec((1, cout), lambda bb, yy: (0, 0))]
    if residual is not None:
        inputs.append(residual)
        in_specs.append(pl.BlockSpec((None, None, Wo, cout), lambda bb, yy: (bb, yy, 0, 0)))

    return pl.pallas_call(
        functools.partial(_dconv_kernel, kh, kw, Wo, act, residual is not None),
        out_shape=jax.ShapeDtypeStruct((B, Ho, Wo, cout), jnp.float32),
        grid=(B, Ho),
        in_specs=in_specs,
        out_specs=pl.BlockSpec((None, None, Wo, cout), lambda bb, yy: (bb, yy, 0, 0)),
        compiler_params=pltpu.CompilerParams(
            dimension_semantics=("parallel", "parallel"),
            vmem_limit_bytes=VMEM_LIMIT),
    )(*inputs)


def conv2d_1x1(x, w, b, act, residual):
    B, H, W, cin = x.shape
    cout = w.shape[0]
    wm = jnp.transpose(w.reshape(cout, cin), (1, 0)).astype(jnp.bfloat16)
    xm = x.reshape(B * H * W, cin)
    resm = residual.reshape(B * H * W, cout) if residual is not None else None
    y = matmul_bias_act(xm, wm, b, act, resm)
    return y.reshape(B, H, W, cout)


def conv2d_im2col(x, w, b, stride, pad, act, residual):
    """Strided convs (4x4 s2/s4): bf16 im2col feeding the tiled matmul kernel."""
    cout, cin, kh, kw = w.shape
    B, H, W, _ = x.shape
    xp = jnp.pad(x, ((0, 0), (pad, pad), (pad, pad), (0, 0)))
    Ho = (H + 2 * pad - kh) // stride + 1
    Wo = (W + 2 * pad - kw) // stride + 1
    cols = [xp[:, i:i + stride * Ho:stride, j:j + stride * Wo:stride, :]
            for i in range(kh) for j in range(kw)]
    patches = jnp.concatenate(cols, axis=-1).astype(jnp.bfloat16)   # (B,Ho,Wo,kh*kw*Cin)
    xm = patches.reshape(B * Ho * Wo, kh * kw * cin)
    wm = jnp.transpose(w, (2, 3, 1, 0)).reshape(kh * kw * cin, cout).astype(jnp.bfloat16)
    resm = residual.reshape(B * Ho * Wo, cout) if residual is not None else None
    y = matmul_bias_act(xm, wm, b, act, resm)
    return y.reshape(B, Ho, Wo, cout)


def conv2d(x, w, b, stride=1, pad=0, act="none", residual=None):
    cout, cin, kh, kw = w.shape
    if kh == 1 and kw == 1 and stride == 1 and pad == 0:
        return conv2d_1x1(x, w, b, act, residual)
    if stride == 1:
        return conv2d_direct(x, w, b, pad, act, residual)
    return conv2d_im2col(x, w, b, stride, pad, act, residual)


def sft_layer(x0, cond, p):
    """x0: (B,H,W,64), cond: (B,H,W,32). Fully fused SFT modulation."""
    B, H, W, _ = x0.shape
    M = B * H * W
    tm, Mp = _tile_rows(M)
    x2 = x0.reshape(M, 64)
    c2 = cond.reshape(M, 32)
    if Mp != M:
        x2 = jnp.pad(x2, ((0, Mp - M), (0, 0)))
        c2 = jnp.pad(c2, ((0, Mp - M), (0, 0)))

    def m2(w):  # (Cout,Cin,1,1) -> (Cin,Cout)
        return jnp.transpose(w.reshape(w.shape[0], w.shape[1]), (1, 0))

    ws0, bs0 = p["scale0"]; ws1, bs1 = p["scale1"]
    wh0, bh0 = p["shift0"]; wh1, bh1 = p["shift1"]
    w0 = jnp.concatenate([m2(ws0), m2(wh0)], axis=1).astype(jnp.bfloat16)      # (32,64)
    b0 = jnp.concatenate([bs0, bh0]).reshape(1, 64).astype(jnp.float32)
    z32 = jnp.zeros((32, 64), jnp.float32)
    wsf = jnp.concatenate([m2(ws1), z32], axis=0).astype(jnp.bfloat16)         # (64,64)
    whf = jnp.concatenate([z32, m2(wh1)], axis=0).astype(jnp.bfloat16)         # (64,64)
    bsf = (bs1 + 1.0).reshape(1, 64).astype(jnp.float32)                       # fold "+1"
    bhf = bh1.reshape(1, 64).astype(jnp.float32)

    inputs = [x2, c2, w0, b0, wsf, bsf, whf, bhf]
    in_specs = [pl.BlockSpec((tm, 64), lambda i: (i, 0)),
                pl.BlockSpec((tm, 32), lambda i: (i, 0)),
                pl.BlockSpec((32, 64), lambda i: (0, 0)),
                pl.BlockSpec((1, 64), lambda i: (0, 0)),
                pl.BlockSpec((64, 64), lambda i: (0, 0)),
                pl.BlockSpec((1, 64), lambda i: (0, 0)),
                pl.BlockSpec((64, 64), lambda i: (0, 0)),
                pl.BlockSpec((1, 64), lambda i: (0, 0))]
    out = pl.pallas_call(
        _sft_kernel,
        out_shape=jax.ShapeDtypeStruct((Mp, 64), jnp.float32),
        grid=(Mp // tm,),
        in_specs=in_specs,
        out_specs=pl.BlockSpec((tm, 64), lambda i: (i, 0)),
        compiler_params=pltpu.CompilerParams(
            dimension_semantics=("parallel",), vmem_limit_bytes=VMEM_LIMIT),
    )(*inputs)
    out = out[:M] if Mp != M else out
    return out.reshape(B, H, W, 64)


def pixel_shuffle(x, r):
    """NHWC pixel shuffle matching torch.nn.PixelShuffle semantics."""
    B, H, W, C = x.shape
    Co = C // (r * r)
    x = x.reshape(B, H, W, Co, r, r)
    x = jnp.transpose(x, (0, 1, 4, 2, 5, 3))
    return x.reshape(B, H * r, W * r, Co)


# ------------------------------------------------------------------------------ params

class ParamGen:
    def __init__(self, key):
        self.key = key
        self.i = 0

    def conv(self, cout, cin, kh, kw):
        k = jax.random.fold_in(self.key, self.i)
        self.i += 1
        kw_, kb_ = jax.random.split(k)
        bound = 1.0 / np.sqrt(cin * kh * kw)
        w = jax.random.uniform(kw_, (cout, cin, kh, kw), jnp.float32, -bound, bound)
        b = jax.random.uniform(kb_, (cout,), jnp.float32, -bound, bound)
        return (w, b)


def init_sft_layer(g):
    return {"scale0": g.conv(32, 32, 1, 1), "scale1": g.conv(64, 32, 1, 1),
            "shift0": g.conv(32, 32, 1, 1), "shift1": g.conv(64, 32, 1, 1)}


def init_resblock(g):
    return {"sft0": init_sft_layer(g), "conv0": g.conv(64, 64, 3, 3),
            "sft1": init_sft_layer(g), "conv1": g.conv(64, 64, 3, 3)}


def init_params(key):
    g = ParamGen(key)
    params = {
        "conv0": g.conv(64, 3, 3, 3),
        "conv1": g.conv(64, 64, 4, 4),
        "conv2": g.conv(64, 64, 4, 4),
        "res": [init_resblock(g) for _ in range(16)],
        "sft_final": init_sft_layer(g),
        "branch_conv": g.conv(64, 64, 3, 3),
        "hr1": g.conv(256, 128, 3, 3),
        "hr2": g.conv(256, 128, 3, 3),
        "hr3a": g.conv(64, 128, 3, 3),
        "hr3b": g.conv(3, 64, 3, 3),
        "cond": [g.conv(128, 8, 4, 4), g.conv(128, 128, 1, 1), g.conv(128, 128, 1, 1),
                 g.conv(128, 128, 1, 1), g.conv(32, 128, 1, 1)],
    }
    # stack the 16 identical ResBlocks so we can lax.scan over them
    params["res"] = jax.tree_util.tree_map(lambda *xs: jnp.stack(xs), *params["res"])
    return params


# ------------------------------------------------------------------------------ forward

def resblock_sft(x0, cond, p):
    fea = sft_layer(x0, cond, p["sft0"])
    fea = conv2d(fea, p["conv0"][0], p["conv0"][1], 1, 1, act="relu")
    fea = sft_layer(fea, cond, p["sft1"])
    # residual add fused into the conv epilogue
    return conv2d(fea, p["conv1"][0], p["conv1"][1], 1, 1, act="none", residual=x0)


def sft_net_forward(params, img, cond_in):
    # img: (B,3,H,W) NCHW, cond_in: (B,8,H,W) NCHW  ->  output (B,3,H,W) NCHW
    x = jnp.transpose(img, (0, 2, 3, 1))
    c = jnp.transpose(cond_in, (0, 2, 3, 1))

    # CondNet
    cw = params["cond"]
    cond = conv2d(c, cw[0][0], cw[0][1], stride=4, pad=0, act="lrelu")
    cond = conv2d(cond, cw[1][0], cw[1][1], act="lrelu")
    cond = conv2d(cond, cw[2][0], cw[2][1], act="lrelu")
    cond = conv2d(cond, cw[3][0], cw[3][1], act="lrelu")
    cond = conv2d(cond, cw[4][0], cw[4][1], act="none")

    # trunk downsampling
    fea = conv2d(x, params["conv0"][0], params["conv0"][1], 1, 1)
    fea1 = conv2d(fea, params["conv1"][0], params["conv1"][1], stride=2, pad=1)
    fea2 = conv2d(fea1, params["conv2"][0], params["conv2"][1], stride=2, pad=1)

    # 16 SFT residual blocks (scanned), final SFT + conv (+ fused fea2 skip)
    def scan_body(h, rp):
        return resblock_sft(h, cond, rp), None

    h, _ = jax.lax.scan(scan_body, fea2, params["res"])
    h = sft_layer(h, cond, params["sft_final"])
    fea3 = conv2d(h, params["branch_conv"][0], params["branch_conv"][1], 1, 1,
                  act="none", residual=fea2)

    # HR branches (ReLU commutes with PixelShuffle, so it is fused into the conv)
    out = jnp.concatenate([fea2, fea3], axis=-1)
    out1 = pixel_shuffle(conv2d(out, params["hr1"][0], params["hr1"][1], 1, 1, act="relu"), 2)
    out2 = jnp.concatenate([fea1, out1], axis=-1)
    out3 = pixel_shuffle(conv2d(out2, params["hr2"][0], params["hr2"][1], 1, 1, act="relu"), 2)
    out_hr = jnp.concatenate([fea, out3], axis=-1)
    out4 = conv2d(out_hr, params["hr3a"][0], params["hr3a"][1], 1, 1, act="relu")

    # final conv: pad Cout 3 -> 8 for denser stores, slice back in JAX
    w3, b3 = params["hr3b"]
    w3p = jnp.pad(w3, ((0, 5), (0, 0), (0, 0), (0, 0)))
    b3p = jnp.pad(b3, ((0, 5),))
    out4 = conv2d(out4, w3p, b3p, 1, 1, act="none")[..., :3]
    return jnp.transpose(out4, (0, 3, 1, 2))


# -------------------------------------------------------------------------------- main

if __name__ == "__main__":
    key = jax.random.PRNGKey(0)
    kp, kx, kc = jax.random.split(key, 3)
    params = init_params(kp)

    B, H, W = 2, 16, 16
    img = jax.random.normal(kx, (B, 3, H, W), jnp.float32)      # x[0]
    cond_in = jax.random.normal(kc, (B, 8, H, W), jnp.float32)  # x[1]

    fwd = jax.jit(sft_net_forward)
    out = fwd(params, img, cond_in)
    jax.block_until_ready(out)

    assert out.shape == (B, 3, H, W), out.shape
    assert jnp.all(jnp.isfinite(out))
    print("KERNEL_OK")
</pallas_src>

<mosaic_0001>
module attributes {stable_mosaic.version = 11 : i64} {
  func.func @_dconv_kernel(%arg0: i32, %arg1: i32, %arg2: memref<1x1x18x3xf32, #tpu.memory_space<vmem>>, %arg3: memref<1x1x18x3xf32, #tpu.memory_space<vmem>>, %arg4: memref<1x1x18x3xf32, #tpu.memory_space<vmem>>, %arg5: memref<9x3x64xbf16, #tpu.memory_space<vmem>>, %arg6: memref<1x64xf32, #tpu.memory_space<vmem>>, %arg7: memref<1x1x16x64xf32, #tpu.memory_space<vmem>>) attributes {dimension_semantics = [#tpu.dimension_semantics<parallel>, #tpu.dimension_semantics<parallel>], iteration_bounds = array<i64: 2, 16>, scalar_prefetch = 0 : i64, scratch_operands = 0 : i64, tpu.core_type = #tpu.core_type<tc>, window_params = [{transform_indices = @transform_0, window_bounds = array<i64: 1, 1, 18, 3>}, {transform_indices = @transform_1, window_bounds = array<i64: 1, 1, 18, 3>}, {transform_indices = @transform_2, window_bounds = array<i64: 1, 1, 18, 3>}, {pipeline_mode = #tpu.pipeline_mode<synchronous>, transform_indices = @transform_3, window_bounds = array<i64: 9, 3, 64>}, {pipeline_mode = #tpu.pipeline_mode<synchronous>, transform_indices = @transform_4, window_bounds = array<i64: 1, 64>}, {transform_indices = @transform_5, window_bounds = array<i64: 1, 1, 16, 64>}]} {
    %cst = arith.constant 0.000000e+00 : f32
    %0 = vector.broadcast %cst : f32 to vector<16x64xf32>
    %c0 = arith.constant 0 : index
    %c0_0 = arith.constant 0 : index
    %c0_1 = arith.constant 0 : index
    %c0_2 = arith.constant 0 : index
    %1 = vector.load %arg2[%c0, %c0_0, %c0_1, %c0_2] : memref<1x1x18x3xf32, #tpu.memory_space<vmem>>, vector<1x1x18x3xf32>
    %2 = vector.shape_cast %1 : vector<1x1x18x3xf32> to vector<18x3xf32>
    %3 = vector.extract_strided_slice %2 {offsets = [0, 0], sizes = [16, 3], strides = [1, 1]} : vector<18x3xf32> to vector<16x3xf32>
    %4 = arith.truncf %3 : vector<16x3xf32> to vector<16x3xbf16>
    %c0_3 = arith.constant 0 : index
    %c0_4 = arith.constant 0 : index
    %c0_5 = arith.constant 0 : index
    %5 = vector.load %arg5[%c0_3, %c0_4, %c0_5] : memref<9x3x64xbf16, #tpu.memory_space<vmem>>, vector<1x3x64xbf16>
    %6 = vector.shape_cast %5 : vector<1x3x64xbf16> to vector<3x64xbf16>
    %cst_6 = arith.constant dense<0.000000e+00> : vector<16x64xf32>
    %7 = tpu.matmul %4, %6, %cst_6 {dimension_numbers = #tpu.dot_dimension_numbers<[1], [0], [0], [1], [0, 0, 1, 1], [], []>} : vector<16x3xbf16>, vector<3x64xbf16>, vector<16x64xf32> -> vector<16x64xf32>
    %8 = arith.addf %0, %7 : vector<16x64xf32>
    %9 = vector.extract_strided_slice %2 {offsets = [1, 0], sizes = [16, 3], strides = [1, 1]} : vector<18x3xf32> to vector<16x3xf32>
    %10 = arith.truncf %9 : vector<16x3xf32> to vector<16x3xbf16>
    %c1 = arith.constant 1 : index
    %c0_7 = arith.constant 0 : index
    %c0_8 = arith.constant 0 : index
    %11 = vector.load %arg5[%c1, %c0_7, %c0_8] : memref<9x3x64xbf16, #tpu.memory_space<vmem>>, vector<1x3x64xbf16>
    %12 = vector.shape_cast %11 : vector<1x3x64xbf16> to vector<3x64xbf16>
    %cst_9 = arith.constant dense<0.000000e+00> : vector<16x64xf32>
    %13 = tpu.matmul %10, %12, %cst_9 {dimension_numbers = #tpu.dot_dimension_numbers<[1], [0], [0], [1], [0, 0, 1, 1], [], []>} : vector<16x3xbf16>, vector<3x64xbf16>, vector<16x64xf32> -> vector<16x64xf32>
    %14 = arith.addf %8, %13 : vector<16x64xf32>
    %15 = vector.extract_strided_slice %2 {offsets = [2, 0], sizes = [16, 3], strides = [1, 1]} : vector<18x3xf32> to vector<16x3xf32>
    %16 = arith.truncf %15 : vector<16x3xf32> to vector<16x3xbf16>
    %c2 = arith.constant 2 : index
    %c0_10 = arith.constant 0 : index
    %c0_11 = arith.constant 0 : index
    %17 = vector.load %arg5[%c2, %c0_10, %c0_11] : memref<9x3x64xbf16, #tpu.memory_space<vmem>>, vector<1x3x64xbf16>
    %18 = vector.shape_cast %17 : vector<1x3x64xbf16> to vector<3x64xbf16>
    %cst_12 = arith.constant dense<0.000000e+00> : vector<16x64xf32>
    %19 = tpu.matmul %16, %18, %cst_12 {dimension_numbers = #tpu.dot_dimension_numbers<[1], [0], [0], [1], [0, 0, 1, 1], [], []>} : vector<16x3xbf16>, vector<3x64xbf16>, vector<16x64xf32> -> vector<16x64xf32>
    %20 = arith.addf %14, %19 : vector<16x64xf32>
    %c0_13 = arith.constant 0 : index
    %c0_14 = arith.constant 0 : index
    %c0_15 = arith.constant 0 : index
    %c0_16 = arith.constant 0 : index
    %21 = vector.load %arg3[%c0_13, %c0_14, %c0_15, %c0_16] : memref<1x1x18x3xf32, #tpu.memory_space<vmem>>, vector<1x1x18x3xf32>
    %22 = vector.shape_cast %21 : vector<1x1x18x3xf32> to vector<18x3xf32>
    %23 = vector.extract_strided_slice %22 {offsets = [0, 0], sizes = [16, 3], strides = [1, 1]} : vector<18x3xf32> to vector<16x3xf32>
    %24 = arith.truncf %23 : vector<16x3xf32> to vector<16x3xbf16>
    %c3 = arith.constant 3 : index
    %c0_17 = arith.constant 0 : index
    %c0_18 = arith.constant 0 : index
    %25 = vector.load %arg5[%c3, %c0_17, %c0_18] : memref<9x3x64xbf16, #tpu.memory_space<vmem>>, vector<1x3x64xbf16>
    %26 = vector.shape_cast %25 : vector<1x3x64xbf16> to vector<3x64xbf16>
    %cst_19 = arith.constant dense<0.000000e+00> : vector<16x64xf32>
    %27 = tpu.matmul %24, %26, %cst_19 {dimension_numbers = #tpu.dot_dimension_numbers<[1], [0], [0], [1], [0, 0, 1, 1], [], []>} : vector<16x3xbf16>, vector<3x64xbf16>, vector<16x64xf32> -> vector<16x64xf32>
    %28 = arith.addf %20, %27 : vector<16x64xf32>
    %29 = vector.extract_strided_slice %22 {offsets = [1, 0], sizes = [16, 3], strides = [1, 1]} : vector<18x3xf32> to vector<16x3xf32>
    %30 = arith.truncf %29 : vector<16x3xf32> to vector<16x3xbf16>
    %c4 = arith.constant 4 : index
    %c0_20 = arith.constant 0 : index
    %c0_21 = arith.constant 0 : index
    %31 = vector.load %arg5[%c4, %c0_20, %c0_21] : memref<9x3x64xbf16, #tpu.memory_space<vmem>>, vector<1x3x64xbf16>
    %32 = vector.shape_cast %31 : vector<1x3x64xbf16> to vector<3x64xbf16>
    %cst_22 = arith.constant dense<0.000000e+00> : vector<16x64xf32>
    %33 = tpu.matmul %30, %32, %cst_22 {dimension_numbers = #tpu.dot_dimension_numbers<[1], [0], [0], [1], [0, 0, 1, 1], [], []>} : vector<16x3xbf16>, vector<3x64xbf16>, vector<16x64xf32> -> vector<16x64xf32>
    %34 = arith.addf %28, %33 : vector<16x64xf32>
    %35 = vector.extract_strided_slice %22 {offsets = [2, 0], sizes = [16, 3], strides = [1, 1]} : vector<18x3xf32> to vector<16x3xf32>
    %36 = arith.truncf %35 : vector<16x3xf32> to vector<16x3xbf16>
    %c5 = arith.constant 5 : index
    %c0_23 = arith.constant 0 : index
    %c0_24 = arith.constant 0 : index
    %37 = vector.load %arg5[%c5, %c0_23, %c0_24] : memref<9x3x64xbf16, #tpu.memory_space<vmem>>, vector<1x3x64xbf16>
    %38 = vector.shape_cast %37 : vector<1x3x64xbf16> to vector<3x64xbf16>
    %cst_25 = arith.constant dense<0.000000e+00> : vector<16x64xf32>
    %39 = tpu.matmul %36, %38, %cst_25 {dimension_numbers = #tpu.dot_dimension_numbers<[1], [0], [0], [1], [0, 0, 1, 1], [], []>} : vector<16x3xbf16>, vector<3x64xbf16>, vector<16x64xf32> -> vector<16x64xf32>
    %40 = arith.addf %34, %39 : vector<16x64xf32>
    %c0_26 = arith.constant 0 : index
    %c0_27 = arith.constant 0 : index
    %c0_28 = arith.constant 0 : index
    %c0_29 = arith.constant 0 : index
    %41 = vector.load %arg4[%c0_26, %c0_27, %c0_28, %c0_29] : memref<1x1x18x3xf32, #tpu.memory_space<vmem>>, vector<1x1x18x3xf32>
    %42 = vector.shape_cast %41 : vector<1x1x18x3xf32> to vector<18x3xf32>
    %43 = vector.extract_strided_slice %42 {offsets = [0, 0], sizes = [16, 3], strides = [1, 1]} : vector<18x3xf32> to vector<16x3xf32>
    %44 = arith.truncf %43 : vector<16x3xf32> to vector<16x3xbf16>
    %c6 = arith.constant 6 : index
    %c0_30 = arith.constant 0 : index
    %c0_31 = arith.constant 0 : index
    %45 = vector.load %arg5[%c6, %c0_30, %c0_31] : memref<9x3x64xbf16, #tpu.memory_space<vmem>>, vector<1x3x64xbf16>
    %46 = vector.shape_cast %45 : vector<1x3x64xbf16> to vector<3x64xbf16>
    %cst_32 = arith.constant dense<0.000000e+00> : vector<16x64xf32>
    %47 = tpu.matmul %44, %46, %cst_32 {dimension_numbers = #tpu.dot_dimension_numbers<[1], [0], [0], [1], [0, 0, 1, 1], [], []>} : vector<16x3xbf16>, vector<3x64xbf16>, vector<16x64xf32> -> vector<16x64xf32>
    %48 = arith.addf %40, %47 : vector<16x64xf32>
    %49 = vector.extract_strided_slice %42 {offsets = [1, 0], sizes = [16, 3], strides = [1, 1]} : vector<18x3xf32> to vector<16x3xf32>
    %50 = arith.truncf %49 : vector<16x3xf32> to vector<16x3xbf16>
    %c7 = arith.constant 7 : index
    %c0_33 = arith.constant 0 : index
    %c0_34 = arith.constant 0 : index
    %51 = vector.load %arg5[%c7, %c0_33, %c0_34] : memref<9x3x64xbf16, #tpu.memory_space<vmem>>, vector<1x3x64xbf16>
    %52 = vector.shape_cast %51 : vector<1x3x64xbf16> to vector<3x64xbf16>
    %cst_35 = arith.constant dense<0.000000e+00> : vector<16x64xf32>
    %53 = tpu.matmul %50, %52, %cst_35 {dimension_numbers = #tpu.dot_dimension_numbers<[1], [0], [0], [1], [0, 0, 1, 1], [], []>} : vector<16x3xbf16>, vector<3x64xbf16>, vector<16x64xf32> -> vector<16x64xf32>
    %54 = arith.addf %48, %53 : vector<16x64xf32>
    %55 = vector.extract_strided_slice %42 {offsets = [2, 0], sizes = [16, 3], strides = [1, 1]} : vector<18x3xf32> to vector<16x3xf32>
    %56 = arith.truncf %55 : vector<16x3xf32> to vector<16x3xbf16>
    %c8 = arith.constant 8 : index
    %c0_36 = arith.constant 0 : index
    %c0_37 = arith.constant 0 : index
    %57 = vector.load %arg5[%c8, %c0_36, %c0_37] : memref<9x3x64xbf16, #tpu.memory_space<vmem>>, vector<1x3x64xbf16>
    %58 = vector.shape_cast %57 : vector<1x3x64xbf16> to vector<3x64xbf16>
    %cst_38 = arith.constant dense<0.000000e+00> : vector<16x64xf32>
    %59 = tpu.matmul %56, %58, %cst_38 {dimension_numbers = #tpu.dot_dimension_numbers<[1], [0], [0], [1], [0, 0, 1, 1], [], []>} : vector<16x3xbf16>, vector<3x64xbf16>, vector<16x64xf32> -> vector<16x64xf32>
    %60 = arith.addf %54, %59 : vector<16x64xf32>
    %c0_39 = arith.constant 0 : index
    %c0_40 = arith.constant 0 : index
    %61 = vector.load %arg6[%c0_39, %c0_40] : memref<1x64xf32, #tpu.memory_space<vmem>>, vector<1x64xf32>
    %62 = vector.broadcast %61 : vector<1x64xf32> to vector<16x64xf32>
    %63 = arith.addf %60, %62 : vector<16x64xf32>
    %c0_41 = arith.constant 0 : index
    %c0_42 = arith.constant 0 : index
    %c0_43 = arith.constant 0 : index
    %c0_44 = arith.constant 0 : index
    %64 = vector.load %arg7[%c0_41, %c0_42, %c0_43, %c0_44] : memref<1x1x16x64xf32, #tpu.memory_space<vmem>>, vector<1x1x16x64xf32>
    %65 = vector.shape_cast %64 : vector<1x1x16x64xf32> to vector<16x64xf32>
    %66 = vector.shape_cast %63 : vector<16x64xf32> to vector<1x1x16x64xf32>
    tpu.vector_store %arg7[%c0_41, %c0_42, %c0_43, %c0_44], %66 {strides = array<i32>} : memref<1x1x16x64xf32, #tpu.memory_space<vmem>>, vector<1x1x16x64xf32>,
    return
  }
  func.func @transform_0(%arg0: i32, %arg1: i32) -> (i32, i32, i32, i32) {
    %c0_i32 = arith.constant 0 : i32
    %0 = arith.addi %arg1, %c0_i32 : i32
    %c0_i32_0 = arith.constant 0 : i32
    %c0_i32_1 = arith.constant 0 : i32
    %c0_i32_2 = arith.constant 0 : i32
    return %arg0, %0, %c0_i32_0, %c0_i32_1 : i32, i32, i32, i32
  }
  func.func @transform_1(%arg0: i32, %arg1: i32) -> (i32, i32, i32, i32) {
    %c1_i32 = arith.constant 1 : i32
    %0 = arith.addi %arg1, %c1_i32 : i32
    %c0_i32 = arith.constant 0 : i32
    %c0_i32_0 = arith.constant 0 : i32
    %c0_i32_1 = arith.constant 0 : i32
    return %arg0, %0, %c0_i32, %c0_i32_0 : i32, i32, i32, i32
  }
  func.func @transform_2(%arg0: i32, %arg1: i32) -> (i32, i32, i32, i32) {
    %c2_i32 = arith.constant 2 : i32
    %0 = arith.addi %arg1, %c2_i32 : i32
    %c0_i32 = arith.constant 0 : i32
    %c0_i32_0 = arith.constant 0 : i32
    %c0_i32_1 = arith.constant 0 : i32
    return %arg0, %0, %c0_i32, %c0_i32_0 : i32, i32, i32, i32
  }
  func.func @transform_3(%arg0: i32, %arg1: i32) -> (i32, i32, i32) {
    %c0_i32 = arith.constant 0 : i32
    %c0_i32_0 = arith.constant 0 : i32
    %c0_i32_1 = arith.constant 0 : i32
    %c0_i32_2 = arith.constant 0 : i32
    return %c0_i32, %c0_i32_0, %c0_i32_1 : i32, i32, i32
  }
  func.func @transform_4(%arg0: i32, %arg1: i32) -> (i32, i32) {
    %c0_i32 = arith.constant 0 : i32
    %c0_i32_0 = arith.constant 0 : i32
    %c0_i32_1 = arith.constant 0 : i32
    return %c0_i32, %c0_i32_0 : i32, i32
  }
  func.func @transform_5(%arg0: i32, %arg1: i32) -> (i32, i32, i32, i32) {
    %c0_i32 = arith.constant 0 : i32
    %c0_i32_0 = arith.constant 0 : i32
    %c0_i32_1 = arith.constant 0 : i32
    return %arg0, %arg1, %c0_i32, %c0_i32_0 : i32, i32, i32, i32
  }
}

module attributes {stable_mosaic.version = 11 : i64} {
  func.func @_mm_kernel(%arg0: i32, %arg1: memref<128x1024xbf16, #tpu.memory_space<vmem>>, %arg2: memref<1024x64xbf16, #tpu.memory_space<vmem>>, %arg3: memref<1x64xf32, #tpu.memory_space<vmem>>, %arg4: memref<128x64xf32, #tpu.memory_space<vmem>>) attributes {dimension_semantics = [#tpu.dimension_semantics<parallel>], iteration_bounds = array<i64: 1>, scalar_prefetch = 0 : i64, scratch_operands = 0 : i64, tpu.core_type = #tpu.core_type<tc>, window_params = [{transform_indices = @transform_0, window_bounds = array<i64: 128, 1024>}, {pipeline_mode = #tpu.pipeline_mode<synchronous>, transform_indices = @transform_1, window_bounds = array<i64: 1024, 64>}, {pipeline_mode = #tpu.pipeline_mode<synchronous>, transform_indices = @transform_2, window_bounds = array<i64: 1, 64>}, {transform_indices = @transform_3, window_bounds = array<i64: 128, 64>}]} {
    %c0 = arith.constant 0 : index
    %c0_0 = arith.constant 0 : index
    %0 = vector.load %arg1[%c0, %c0_0] : memref<128x1024xbf16, #tpu.memory_space<vmem>>, vector<128x1024xbf16>
    %c0_1 = arith.constant 0 : index
    %c0_2 = arith.constant 0 : index
    %1 = vector.load %arg2[%c0_1, %c0_2] : memref<1024x64xbf16, #tpu.memory_space<vmem>>, vector<1024x64xbf16>
    %cst = arith.constant dense<0.000000e+00> : vector<128x64xf32>
    %2 = tpu.matmul %0, %1, %cst {dimension_numbers = #tpu.dot_dimension_numbers<[1], [0], [0], [1], [0, 0, 1, 1], [], []>} : vector<128x1024xbf16>, vector<1024x64xbf16>, vector<128x64xf32> -> vector<128x64xf32>
    %c0_3 = arith.constant 0 : index
    %c0_4 = arith.constant 0 : index
    %3 = vector.load %arg3[%c0_3, %c0_4] : memref<1x64xf32, #tpu.memory_space<vmem>>, vector<1x64xf32>
    %4 = vector.broadcast %3 : vector<1x64xf32> to vector<128x64xf32>
    %5 = arith.addf %2, %4 : vector<128x64xf32>
    %c0_5 = arith.constant 0 : index
    %c0_6 = arith.constant 0 : index
    %6 = vector.load %arg4[%c0_5, %c0_6] : memref<128x64xf32, #tpu.memory_space<vmem>>, vector<128x64xf32>
    tpu.vector_store %arg4[%c0_5, %c0_6], %5 {strides = array<i32>} : memref<128x64xf32, #tpu.memory_space<vmem>>, vector<128x64xf32>,
    return
  }
  func.func @transform_0(%arg0: i32) -> (i32, i32) {
    %c0_i32 = arith.constant 0 : i32
    %c0_i32_0 = arith.constant 0 : i32
    return %arg0, %c0_i32 : i32, i32
  }
  func.func @transform_1(%arg0: i32) -> (i32, i32) {
    %c0_i32 = arith.constant 0 : i32
    %c0_i32_0 = arith.constant 0 : i32
    %c0_i32_1 = arith.constant 0 : i32
    return %c0_i32, %c0_i32_0 : i32, i32
  }
  func.func @transform_2(%arg0: i32) -> (i32, i32) {
    %c0_i32 = arith.constant 0 : i32
    %c0_i32_0 = arith.constant 0 : i32
    %c0_i32_1 = arith.constant 0 : i32
    return %c0_i32, %c0_i32_0 : i32, i32
  }
  func.func @transform_3(%arg0: i32) -> (i32, i32) {
    %c0_i32 = arith.constant 0 : i32
    %c0_i32_0 = arith.constant 0 : i32
    return %arg0, %c0_i32 : i32, i32
  }
}

module attributes {stable_mosaic.version = 11 : i64} {
  func.func @_mm_kernel(%arg0: i32, %arg1: memref<32x1024xbf16, #tpu.memory_space<vmem>>, %arg2: memref<1024x64xbf16, #tpu.memory_space<vmem>>, %arg3: memref<1x64xf32, #tpu.memory_space<vmem>>, %arg4: memref<32x64xf32, #tpu.memory_space<vmem>>) attributes {dimension_semantics = [#tpu.dimension_semantics<parallel>], iteration_bounds = array<i64: 1>, scalar_prefetch = 0 : i64, scratch_operands = 0 : i64, tpu.core_type = #tpu.core_type<tc>, window_params = [{transform_indices = @transform_0, window_bounds = array<i64: 32, 1024>}, {pipeline_mode = #tpu.pipeline_mode<synchronous>, transform_indices = @transform_1, window_bounds = array<i64: 1024, 64>}, {pipeline_mode = #tpu.pipeline_mode<synchronous>, transform_indices = @transform_2, window_bounds = array<i64: 1, 64>}, {transform_indices = @transform_3, window_bounds = array<i64: 32, 64>}]} {
    %c0 = arith.constant 0 : index
    %c0_0 = arith.constant 0 : index
    %0 = vector.load %arg1[%c0, %c0_0] : memref<32x1024xbf16, #tpu.memory_space<vmem>>, vector<32x1024xbf16>
    %c0_1 = arith.constant 0 : index
    %c0_2 = arith.constant 0 : index
    %1 = vector.load %arg2[%c0_1, %c0_2] : memref<1024x64xbf16, #tpu.memory_space<vmem>>, vector<1024x64xbf16>
    %cst = arith.constant dense<0.000000e+00> : vector<32x64xf32>
    %2 = tpu.matmul %0, %1, %cst {dimension_numbers = #tpu.dot_dimension_numbers<[1], [0], [0], [1], [0, 0, 1, 1], [], []>} : vector<32x1024xbf16>, vector<1024x64xbf16>, vector<32x64xf32> -> vector<32x64xf32>
    %c0_3 = arith.constant 0 : index
    %c0_4 = arith.constant 0 : index
    %3 = vector.load %arg3[%c0_3, %c0_4] : memref<1x64xf32, #tpu.memory_space<vmem>>, vector<1x64xf32>
    %4 = vector.broadcast %3 : vector<1x64xf32> to vector<32x64xf32>
    %5 = arith.addf %2, %4 : vector<32x64xf32>
    %c0_5 = arith.constant 0 : index
    %c0_6 = arith.constant 0 : index
    %6 = vector.load %arg4[%c0_5, %c0_6] : memref<32x64xf32, #tpu.memory_space<vmem>>, vector<32x64xf32>
    tpu.vector_store %arg4[%c0_5, %c0_6], %5 {strides = array<i32>} : memref<32x64xf32, #tpu.memory_space<vmem>>, vector<32x64xf32>,
    return
  }
  func.func @transform_0(%arg0: i32) -> (i32, i32) {
    %c0_i32 = arith.constant 0 : i32
    %c0_i32_0 = arith.constant 0 : i32
    return %arg0, %c0_i32 : i32, i32
  }
  func.func @transform_1(%arg0: i32) -> (i32, i32) {
    %c0_i32 = arith.constant 0 : i32
    %c0_i32_0 = arith.constant 0 : i32
    %c0_i32_1 = arith.constant 0 : i32
    return %c0_i32, %c0_i32_0 : i32, i32
  }
  func.func @transform_2(%arg0: i32) -> (i32, i32) {
    %c0_i32 = arith.constant 0 : i32
    %c0_i32_0 = arith.constant 0 : i32
    %c0_i32_1 = arith.constant 0 : i32
    return %c0_i32, %c0_i32_0 : i32, i32
  }
  func.func @transform_3(%arg0: i32) -> (i32, i32) {
    %c0_i32 = arith.constant 0 : i32
    %c0_i32_0 = arith.constant 0 : i32
    return %arg0, %c0_i32 : i32, i32
  }
}

module attributes {stable_mosaic.version = 11 : i64} {
  func.func @_mm_kernel(%arg0: i32, %arg1: memref<32x128xbf16, #tpu.memory_space<vmem>>, %arg2: memref<128x128xbf16, #tpu.memory_space<vmem>>, %arg3: memref<1x128xf32, #tpu.memory_space<vmem>>, %arg4: memref<32x128xf32, #tpu.memory_space<vmem>>) attributes {dimension_semantics = [#tpu.dimension_semantics<parallel>], iteration_bounds = array<i64: 1>, scalar_prefetch = 0 : i64, scratch_operands = 0 : i64, tpu.core_type = #tpu.core_type<tc>, window_params = [{transform_indices = @transform_0, window_bounds = array<i64: 32, 128>}, {pipeline_mode = #tpu.pipeline_mode<synchronous>, transform_indices = @transform_1, window_bounds = array<i64: 128, 128>}, {pipeline_mode = #tpu.pipeline_mode<synchronous>, transform_indices = @transform_2, window_bounds = array<i64: 1, 128>}, {transform_indices = @transform_3, window_bounds = array<i64: 32, 128>}]} {
    %c0 = arith.constant 0 : index
    %c0_0 = arith.constant 0 : index
    %0 = vector.load %arg1[%c0, %c0_0] : memref<32x128xbf16, #tpu.memory_space<vmem>>, vector<32x128xbf16>
    %c0_1 = arith.constant 0 : index
    %c0_2 = arith.constant 0 : index
    %1 = vector.load %arg2[%c0_1, %c0_2] : memref<128x128xbf16, #tpu.memory_space<vmem>>, vector<128x128xbf16>
    %cst = arith.constant dense<0.000000e+00> : vector<32x128xf32>
    %2 = tpu.matmul %0, %1, %cst {dimension_numbers = #tpu.dot_dimension_numbers<[1], [0], [0], [1], [0, 0, 1, 1], [], []>} : vector<32x128xbf16>, vector<128x128xbf16>, vector<32x128xf32> -> vector<32x128xf32>
    %c0_3 = arith.constant 0 : index
    %c0_4 = arith.constant 0 : index
    %3 = vector.load %arg3[%c0_3, %c0_4] : memref<1x128xf32, #tpu.memory_space<vmem>>, vector<1x128xf32>
    %4 = vector.broadcast %3 : vector<1x128xf32> to vector<32x128xf32>
    %5 = arith.addf %2, %4 : vector<32x128xf32>
    %cst_5 = arith.constant 0.000000e+00 : f32
    %6 = vector.broadcast %cst_5 : f32 to vector<32x128xf32>
    %7 = arith.cmpf ogt, %5, %6 : vector<32x128xf32>
    %cst_6 = arith.constant 1.000000e-01 : f32
    %8 = vector.broadcast %cst_6 : f32 to vector<32x128xf32>
    %9 = arith.mulf %8, %5 : vector<32x128xf32>
    %10 = arith.select %7, %5, %9 : vector<32x128xi1>, vector<32x128xf32>
    %c0_7 = arith.constant 0 : index
    %c0_8 = arith.constant 0 : index
    %11 = vector.load %arg4[%c0_7, %c0_8] : memref<32x128xf32, #tpu.memory_space<vmem>>, vector<32x128xf32>
    tpu.vector_store %arg4[%c0_7, %c0_8], %10 {strides = array<i32>} : memref<32x128xf32, #tpu.memory_space<vmem>>, vector<32x128xf32>,
    return
  }
  func.func @transform_0(%arg0: i32) -> (i32, i32) {
    %c0_i32 = arith.constant 0 : i32
    %c0_i32_0 = arith.constant 0 : i32
    return %arg0, %c0_i32 : i32, i32
  }
  func.func @transform_1(%arg0: i32) -> (i32, i32) {
    %c0_i32 = arith.constant 0 : i32
    %c0_i32_0 = arith.constant 0 : i32
    %c0_i32_1 = arith.constant 0 : i32
    return %c0_i32, %c0_i32_0 : i32, i32
  }
  func.func @transform_2(%arg0: i32) -> (i32, i32) {
    %c0_i32 = arith.constant 0 : i32
    %c0_i32_0 = arith.constant 0 : i32
    %c0_i32_1 = arith.constant 0 : i32
    return %c0_i32, %c0_i32_0 : i32, i32
  }
  func.func @transform_3(%arg0: i32) -> (i32, i32) {
    %c0_i32 = arith.constant 0 : i32
    %c0_i32_0 = arith.constant 0 : i32
    return %arg0, %c0_i32 : i32, i32
  }
}

module attributes {stable_mosaic.version = 11 : i64} {
  func.func @_mm_kernel(%arg0: i32, %arg1: memref<32x128xf32, #tpu.memory_space<vmem>>, %arg2: memref<128x32xbf16, #tpu.memory_space<vmem>>, %arg3: memref<1x32xf32, #tpu.memory_space<vmem>>, %arg4: memref<32x32xf32, #tpu.memory_space<vmem>>) attributes {dimension_semantics = [#tpu.dimension_semantics<parallel>], iteration_bounds = array<i64: 1>, scalar_prefetch = 0 : i64, scratch_operands = 0 : i64, tpu.core_type = #tpu.core_type<tc>, window_params = [{transform_indices = @transform_0, window_bounds = array<i64: 32, 128>}, {pipeline_mode = #tpu.pipeline_mode<synchronous>, transform_indices = @transform_1, window_bounds = array<i64: 128, 32>}, {pipeline_mode = #tpu.pipeline_mode<synchronous>, transform_indices = @transform_2, window_bounds = array<i64: 1, 32>}, {transform_indices = @transform_3, window_bounds = array<i64: 32, 32>}]} {
    %c0 = arith.constant 0 : index
    %c0_0 = arith.constant 0 : index
    %0 = vector.load %arg1[%c0, %c0_0] : memref<32x128xf32, #tpu.memory_space<vmem>>, vector<32x128xf32>
    %1 = arith.truncf %0 : vector<32x128xf32> to vector<32x128xbf16>
    %c0_1 = arith.constant 0 : index
    %c0_2 = arith.constant 0 : index
    %2 = vector.load %arg2[%c0_1, %c0_2] : memref<128x32xbf16, #tpu.memory_space<vmem>>, vector<128x32xbf16>
    %cst = arith.constant dense<0.000000e+00> : vector<32x32xf32>
    %3 = tpu.matmul %1, %2, %cst {dimension_numbers = #tpu.dot_dimension_numbers<[1], [0], [0], [1], [0, 0, 1, 1], [], []>} : vector<32x128xbf16>, vector<128x32xbf16>, vector<32x32xf32> -> vector<32x32xf32>
    %c0_3 = arith.constant 0 : index
    %c0_4 = arith.constant 0 : index
    %4 = vector.load %arg3[%c0_3, %c0_4] : memref<1x32xf32, #tpu.memory_space<vmem>>, vector<1x32xf32>
    %5 = vector.broadcast %4 : vector<1x32xf32> to vector<32x32xf32>
    %6 = arith.addf %3, %5 : vector<32x32xf32>
    %c0_5 = arith.constant 0 : index
    %c0_6 = arith.constant 0 : index
    %7 = vector.load %arg4[%c0_5, %c0_6] : memref<32x32xf32, #tpu.memory_space<vmem>>, vector<32x32xf32>
    tpu.vector_store %arg4[%c0_5, %c0_6], %6 {strides = array<i32>} : memref<32x32xf32, #tpu.memory_space<vmem>>, vector<32x32xf32>,
    return
  }
  func.func @transform_0(%arg0: i32) -> (i32, i32) {
    %c0_i32 = arith.constant 0 : i32
    %c0_i32_0 = arith.constant 0 : i32
    return %arg0, %c0_i32 : i32, i32
  }
  func.func @transform_1(%arg0: i32) -> (i32, i32) {
    %c0_i32 = arith.constant 0 : i32
    %c0_i32_0 = arith.constant 0 : i32
    %c0_i32_1 = arith.constant 0 : i32
    return %c0_i32, %c0_i32_0 : i32, i32
  }
  func.func @transform_2(%arg0: i32) -> (i32, i32) {
    %c0_i32 = arith.constant 0 : i32
    %c0_i32_0 = arith.constant 0 : i32
    %c0_i32_1 = arith.constant 0 : i32
    return %c0_i32, %c0_i32_0 : i32, i32
  }
  func.func @transform_3(%arg0: i32) -> (i32, i32) {
    %c0_i32 = arith.constant 0 : i32
    %c0_i32_0 = arith.constant 0 : i32
    return %arg0, %c0_i32 : i32, i32
  }
}

module attributes {stable_mosaic.version = 11 : i64} {
  func.func @_mm_kernel(%arg0: i32, %arg1: memref<32x128xf32, #tpu.memory_space<vmem>>, %arg2: memref<128x128xbf16, #tpu.memory_space<vmem>>, %arg3: memref<1x128xf32, #tpu.memory_space<vmem>>, %arg4: memref<32x128xf32, #tpu.memory_space<vmem>>) attributes {dimension_semantics = [#tpu.dimension_semantics<parallel>], iteration_bounds = array<i64: 1>, scalar_prefetch = 0 : i64, scratch_operands = 0 : i64, tpu.core_type = #tpu.core_type<tc>, window_params = [{transform_indices = @transform_0, window_bounds = array<i64: 32, 128>}, {pipeline_mode = #tpu.pipeline_mode<synchronous>, transform_indices = @transform_1, window_bounds = array<i64: 128, 128>}, {pipeline_mode = #tpu.pipeline_mode<synchronous>, transform_indices = @transform_2, window_bounds = array<i64: 1, 128>}, {transform_indices = @transform_3, window_bounds = array<i64: 32, 128>}]} {
    %c0 = arith.constant 0 : index
    %c0_0 = arith.constant 0 : index
    %0 = vector.load %arg1[%c0, %c0_0] : memref<32x128xf32, #tpu.memory_space<vmem>>, vector<32x128xf32>
    %1 = arith.truncf %0 : vector<32x128xf32> to vector<32x128xbf16>
    %c0_1 = arith.constant 0 : index
    %c0_2 = arith.constant 0 : index
    %2 = vector.load %arg2[%c0_1, %c0_2] : memref<128x128xbf16, #tpu.memory_space<vmem>>, vector<128x128xbf16>
    %cst = arith.constant dense<0.000000e+00> : vector<32x128xf32>
    %3 = tpu.matmul %1, %2, %cst {dimension_numbers = #tpu.dot_dimension_numbers<[1], [0], [0], [1], [0, 0, 1, 1], [], []>} : vector<32x128xbf16>, vector<128x128xbf16>, vector<32x128xf32> -> vector<32x128xf32>
    %c0_3 = arith.constant 0 : index
    %c0_4 = arith.constant 0 : index
    %4 = vector.load %arg3[%c0_3, %c0_4] : memref<1x128xf32, #tpu.memory_space<vmem>>, vector<1x128xf32>
    %5 = vector.broadcast %4 : vector<1x128xf32> to vector<32x128xf32>
    %6 = arith.addf %3, %5 : vector<32x128xf32>
    %cst_5 = arith.constant 0.000000e+00 : f32
    %7 = vector.broadcast %cst_5 : f32 to vector<32x128xf32>
    %8 = arith.cmpf ogt, %6, %7 : vector<32x128xf32>
    %cst_6 = arith.constant 1.000000e-01 : f32
    %9 = vector.broadcast %cst_6 : f32 to vector<32x128xf32>
    %10 = arith.mulf %9, %6 : vector<32x128xf32>
    %11 = arith.select %8, %6, %10 : vector<32x128xi1>, vector<32x128xf32>
    %c0_7 = arith.constant 0 : index
    %c0_8 = arith.constant 0 : index
    %12 = vector.load %arg4[%c0_7, %c0_8] : memref<32x128xf32, #tpu.memory_space<vmem>>, vector<32x128xf32>
    tpu.vector_store %arg4[%c0_7, %c0_8], %11 {strides = array<i32>} : memref<32x128xf32, #tpu.memory_space<vmem>>, vector<32x128xf32>,
    return
  }
  func.func @transform_0(%arg0: i32) -> (i32, i32) {
    %c0_i32 = arith.constant 0 : i32
    %c0_i32_0 = arith.constant 0 : i32
    return %arg0, %c0_i32 : i32, i32
  }
  func.func @transform_1(%arg0: i32) -> (i32, i32) {
    %c0_i32 = arith.constant 0 : i32
    %c0_i32_0 = arith.constant 0 : i32
    %c0_i32_1 = arith.constant 0 : i32
    return %c0_i32, %c0_i32_0 : i32, i32
  }
  func.func @transform_2(%arg0: i32) -> (i32, i32) {
    %c0_i32 = arith.constant 0 : i32
    %c0_i32_0 = arith.constant 0 : i32
    %c0_i32_1 = arith.constant 0 : i32
    return %c0_i32, %c0_i32_0 : i32, i32
  }
  func.func @transform_3(%arg0: i32) -> (i32, i32) {
    %c0_i32 = arith.constant 0 : i32
    %c0_i32_0 = arith.constant 0 : i32
    return %arg0, %c0_i32 : i32, i32
  }
}

module attributes {stable_mosaic.version = 11 : i64} {
  func.func @_sft_kernel(%arg0: i32, %arg1: memref<32x64xf32, #tpu.memory_space<vmem>>, %arg2: memref<32x32xf32, #tpu.memory_space<vmem>>, %arg3: memref<32x64xbf16, #tpu.memory_space<vmem>>, %arg4: memref<1x64xf32, #tpu.memory_space<vmem>>, %arg5: memref<64x64xbf16, #tpu.memory_space<vmem>>, %arg6: memref<1x64xf32, #tpu.memory_space<vmem>>, %arg7: memref<64x64xbf16, #tpu.memory_space<vmem>>, %arg8: memref<1x64xf32, #tpu.memory_space<vmem>>, %arg9: memref<32x64xf32, #tpu.memory_space<vmem>>) attributes {dimension_semantics = [#tpu.dimension_semantics<parallel>], iteration_bounds = array<i64: 1>, scalar_prefetch = 0 : i64, scratch_operands = 0 : i64, tpu.core_type = #tpu.core_type<tc>, window_params = [{transform_indices = @transform_0, window_bounds = array<i64: 32, 64>}, {transform_indices = @transform_1, window_bounds = array<i64: 32, 32>}, {pipeline_mode = #tpu.pipeline_mode<synchronous>, transform_indices = @transform_2, window_bounds = array<i64: 32, 64>}, {pipeline_mode = #tpu.pipeline_mode<synchronous>, transform_indices = @transform_3, window_bounds = array<i64: 1, 64>}, {pipeline_mode = #tpu.pipeline_mode<synchronous>, transform_indices = @transform_4, window_bounds = array<i64: 64, 64>}, {pipeline_mode = #tpu.pipeline_mode<synchronous>, transform_indices = @transform_5, window_bounds = array<i64: 1, 64>}, {pipeline_mode = #tpu.pipeline_mode<synchronous>, transform_indices = @transform_6, window_bounds = array<i64: 64, 64>}, {pipeline_mode = #tpu.pipeline_mode<synchronous>, transform_indices = @transform_7, window_bounds = array<i64: 1, 64>}, {transform_indices = @transform_8, window_bounds = array<i64: 32, 64>}]} {
    %c0 = arith.constant 0 : index
    %c0_0 = arith.constant 0 : index
    %0 = vector.load %arg2[%c0, %c0_0] : memref<32x32xf32, #tpu.memory_space<vmem>>, vector<32x32xf32>
    %1 = arith.truncf %0 : vector<32x32xf32> to vector<32x32xbf16>
    %c0_1 = arith.constant 0 : index
    %c0_2 = arith.constant 0 : index
    %2 = vector.load %arg3[%c0_1, %c0_2] : memref<32x64xbf16, #tpu.memory_space<vmem>>, vector<32x64xbf16>
    %cst = arith.constant dense<0.000000e+00> : vector<32x64xf32>
    %3 = tpu.matmul %1, %2, %cst {dimension_numbers = #tpu.dot_dimension_numbers<[1], [0], [0], [1], [0, 0, 1, 1], [], []>} : vector<32x32xbf16>, vector<32x64xbf16>, vector<32x64xf32> -> vector<32x64xf32>
    %c0_3 = arith.constant 0 : index
    %c0_4 = arith.constant 0 : index
    %4 = vector.load %arg4[%c0_3, %c0_4] : memref<1x64xf32, #tpu.memory_space<vmem>>, vector<1x64xf32>
    %5 = vector.broadcast %4 : vector<1x64xf32> to vector<32x64xf32>
    %6 = arith.addf %3, %5 : vector<32x64xf32>
    %cst_5 = arith.constant 0.000000e+00 : f32
    %7 = vector.broadcast %cst_5 : f32 to vector<32x64xf32>
    %8 = arith.cmpf ogt, %6, %7 : vector<32x64xf32>
    %cst_6 = arith.constant 1.000000e-01 : f32
    %9 = vector.broadcast %cst_6 : f32 to vector<32x64xf32>
    %10 = arith.mulf %9, %6 : vector<32x64xf32>
    %11 = arith.select %8, %6, %10 : vector<32x64xi1>, vector<32x64xf32>
    %12 = arith.truncf %11 : vector<32x64xf32> to vector<32x64xbf16>
    %c0_7 = arith.constant 0 : index
    %c0_8 = arith.constant 0 : index
    %13 = vector.load %arg5[%c0_7, %c0_8] : memref<64x64xbf16, #tpu.memory_space<vmem>>, vector<64x64xbf16>
    %cst_9 = arith.constant dense<0.000000e+00> : vector<32x64xf32>
    %14 = tpu.matmul %12, %13, %cst_9 {dimension_numbers = #tpu.dot_dimension_numbers<[1], [0], [0], [1], [0, 0, 1, 1], [], []>} : vector<32x64xbf16>, vector<64x64xbf16>, vector<32x64xf32> -> vector<32x64xf32>
    %c0_10 = arith.constant 0 : index
    %c0_11 = arith.constant 0 : index
    %15 = vector.load %arg6[%c0_10, %c0_11] : memref<1x64xf32, #tpu.memory_space<vmem>>, vector<1x64xf32>
    %16 = vector.broadcast %15 : vector<1x64xf32> to vector<32x64xf32>
    %17 = arith.addf %14, %16 : vector<32x64xf32>
    %c0_12 = arith.constant 0 : index
    %c0_13 = arith.constant 0 : index
    %18 = vector.load %arg7[%c0_12, %c0_13] : memref<64x64xbf16, #tpu.memory_space<vmem>>, vector<64x64xbf16>
    %cst_14 = arith.constant dense<0.000000e+00> : vector<32x64xf32>
    %19 = tpu.matmul %12, %18, %cst_14 {dimension_numbers = #tpu.dot_dimension_numbers<[1], [0], [0], [1], [0, 0, 1, 1], [], []>} : vector<32x64xbf16>, vector<64x64xbf16>, vector<32x64xf32> -> vector<32x64xf32>
    %c0_15 = arith.constant 0 : index
    %c0_16 = arith.constant 0 : index
    %20 = vector.load %arg8[%c0_15, %c0_16] : memref<1x64xf32, #tpu.memory_space<vmem>>, vector<1x64xf32>
    %21 = vector.broadcast %20 : vector<1x64xf32> to vector<32x64xf32>
    %22 = arith.addf %19, %21 : vector<32x64xf32>
    %c0_17 = arith.constant 0 : index
    %c0_18 = arith.constant 0 : index
    %23 = vector.load %arg1[%c0_17, %c0_18] : memref<32x64xf32, #tpu.memory_space<vmem>>, vector<32x64xf32>
    %24 = arith.mulf %23, %17 : vector<32x64xf32>
    %25 = arith.addf %24, %22 : vector<32x64xf32>
    %c0_19 = arith.constant 0 : index
    %c0_20 = arith.constant 0 : index
    %26 = vector.load %arg9[%c0_19, %c0_20] : memref<32x64xf32, #tpu.memory_space<vmem>>, vector<32x64xf32>
    tpu.vector_store %arg9[%c0_19, %c0_20], %25 {strides = array<i32>} : memref<32x64xf32, #tpu.memory_space<vmem>>, vector<32x64xf32>,
    return
  }
  func.func @transform_0(%arg0: i32) -> (i32, i32) {
    %c0_i32 = arith.constant 0 : i32
    %c0_i32_0 = arith.constant 0 : i32
    return %arg0, %c0_i32 : i32, i32
  }
  func.func @transform_1(%arg0: i32) -> (i32, i32) {
    %c0_i32 = arith.constant 0 : i32
    %c0_i32_0 = arith.constant 0 : i32
    return %arg0, %c0_i32 : i32, i32
  }
  func.func @transform_2(%arg0: i32) -> (i32, i32) {
    %c0_i32 = arith.constant 0 : i32
    %c0_i32_0 = arith.constant 0 : i32
    %c0_i32_1 = arith.constant 0 : i32
    return %c0_i32, %c0_i32_0 : i32, i32
  }
  func.func @transform_3(%arg0: i32) -> (i32, i32) {
    %c0_i32 = arith.constant 0 : i32
    %c0_i32_0 = arith.constant 0 : i32
    %c0_i32_1 = arith.constant 0 : i32
    return %c0_i32, %c0_i32_0 : i32, i32
  }
  func.func @transform_4(%arg0: i32) -> (i32, i32) {
    %c0_i32 = arith.constant 0 : i32
    %c0_i32_0 = arith.constant 0 : i32
    %c0_i32_1 = arith.constant 0 : i32
    return %c0_i32, %c0_i32_0 : i32, i32
  }
  func.func @transform_5(%arg0: i32) -> (i32, i32) {
    %c0_i32 = arith.constant 0 : i32
    %c0_i32_0 = arith.constant 0 : i32
    %c0_i32_1 = arith.constant 0 : i32
    return %c0_i32, %c0_i32_0 : i32, i32
  }
  func.func @transform_6(%arg0: i32) -> (i32, i32) {
    %c0_i32 = arith.constant 0 : i32
    %c0_i32_0 = arith.constant 0 : i32
    %c0_i32_1 = arith.constant 0 : i32
    return %c0_i32, %c0_i32_0 : i32, i32
  }
  func.func @transform_7(%arg0: i32) -> (i32, i32) {
    %c0_i32 = arith.constant 0 : i32
    %c0_i32_0 = arith.constant 0 : i32
    %c0_i32_1 = arith.constant 0 : i32
    return %c0_i32, %c0_i32_0 : i32, i32
  }
  func.func @transform_8(%arg0: i32) -> (i32, i32) {
    %c0_i32 = arith.constant 0 : i32
    %c0_i32_0 = arith.constant 0 : i32
    return %arg0, %c0_i32 : i32, i32
  }
}

module attributes {stable_mosaic.version = 11 : i64} {
  func.func @_dconv_kernel(%arg0: i32, %arg1: i32, %arg2: memref<1x1x6x64xf32, #tpu.memory_space<vmem>>, %arg3: memref<1x1x6x64xf32, #tpu.memory_space<vmem>>, %arg4: memref<1x1x6x64xf32, #tpu.memory_space<vmem>>, %arg5: memref<9x64x64xbf16, #tpu.memory_space<vmem>>, %arg6: memref<1x64xf32, #tpu.memory_space<vmem>>, %arg7: memref<1x1x4x64xf32, #tpu.memory_space<vmem>>) attributes {dimension_semantics = [#tpu.dimension_semantics<parallel>, #tpu.dimension_semantics<parallel>], iteration_bounds = array<i64: 2, 4>, scalar_prefetch = 0 : i64, scratch_operands = 0 : i64, tpu.core_type = #tpu.core_type<tc>, window_params = [{transform_indices = @transform_0, window_bounds = array<i64: 1, 1, 6, 64>}, {transform_indices = @transform_1, window_bounds = array<i64: 1, 1, 6, 64>}, {transform_indices = @transform_2, window_bounds = array<i64: 1, 1, 6, 64>}, {pipeline_mode = #tpu.pipeline_mode<synchronous>, transform_indices = @transform_3, window_bounds = array<i64: 9, 64, 64>}, {pipeline_mode = #tpu.pipeline_mode<synchronous>, transform_indices = @transform_4, window_bounds = array<i64: 1, 64>}, {transform_indices = @transform_5, window_bounds = array<i64: 1, 1, 4, 64>}]} {
    %cst = arith.constant 0.000000e+00 : f32
    %0 = vector.broadcast %cst : f32 to vector<4x64xf32>
    %c0 = arith.constant 0 : index
    %c0_0 = arith.constant 0 : index
    %c0_1 = arith.constant 0 : index
    %c0_2 = arith.constant 0 : index
    %1 = vector.load %arg2[%c0, %c0_0, %c0_1, %c0_2] : memref<1x1x6x64xf32, #tpu.memory_space<vmem>>, vector<1x1x6x64xf32>
    %2 = vector.shape_cast %1 : vector<1x1x6x64xf32> to vector<6x64xf32>
    %3 = vector.extract_strided_slice %2 {offsets = [0, 0], sizes = [4, 64], strides = [1, 1]} : vector<6x64xf32> to vector<4x64xf32>
    %4 = arith.truncf %3 : vector<4x64xf32> to vector<4x64xbf16>
    %c0_3 = arith.constant 0 : index
    %c0_4 = arith.constant 0 : index
    %c0_5 = arith.constant 0 : index
    %5 = vector.load %arg5[%c0_3, %c0_4, %c0_5] : memref<9x64x64xbf16, #tpu.memory_space<vmem>>, vector<1x64x64xbf16>
    %6 = vector.shape_cast %5 : vector<1x64x64xbf16> to vector<64x64xbf16>
    %cst_6 = arith.constant dense<0.000000e+00> : vector<4x64xf32>
    %7 = tpu.matmul %4, %6, %cst_6 {dimension_numbers = #tpu.dot_dimension_numbers<[1], [0], [0], [1], [0, 0, 1, 1], [], []>} : vector<4x64xbf16>, vector<64x64xbf16>, vector<4x64xf32> -> vector<4x64xf32>
    %8 = arith.addf %0, %7 : vector<4x64xf32>
    %9 = vector.extract_strided_slice %2 {offsets = [1, 0], sizes = [4, 64], strides = [1, 1]} : vector<6x64xf32> to vector<4x64xf32>
    %10 = arith.truncf %9 : vector<4x64xf32> to vector<4x64xbf16>
    %c1 = arith.constant 1 : index
    %c0_7 = arith.constant 0 : index
    %c0_8 = arith.constant 0 : index
    %11 = vector.load %arg5[%c1, %c0_7, %c0_8] : memref<9x64x64xbf16, #tpu.memory_space<vmem>>, vector<1x64x64xbf16>
    %12 = vector.shape_cast %11 : vector<1x64x64xbf16> to vector<64x64xbf16>
    %cst_9 = arith.constant dense<0.000000e+00> : vector<4x64xf32>
    %13 = tpu.matmul %10, %12, %cst_9 {dimension_numbers = #tpu.dot_dimension_numbers<[1], [0], [0], [1], [0, 0, 1, 1], [], []>} : vector<4x64xbf16>, vector<64x64xbf16>, vector<4x64xf32> -> vector<4x64xf32>
    %14 = arith.addf %8, %13 : vector<4x64xf32>
    %15 = vector.extract_strided_slice %2 {offsets = [2, 0], sizes = [4, 64], strides = [1, 1]} : vector<6x64xf32> to vector<4x64xf32>
    %16 = arith.truncf %15 : vector<4x64xf32> to vector<4x64xbf16>
    %c2 = arith.constant 2 : index
    %c0_10 = arith.constant 0 : index
    %c0_11 = arith.constant 0 : index
    %17 = vector.load %arg5[%c2, %c0_10, %c0_11] : memref<9x64x64xbf16, #tpu.memory_space<vmem>>, vector<1x64x64xbf16>
    %18 = vector.shape_cast %17 : vector<1x64x64xbf16> to vector<64x64xbf16>
    %cst_12 = arith.constant dense<0.000000e+00> : vector<4x64xf32>
    %19 = tpu.matmul %16, %18, %cst_12 {dimension_numbers = #tpu.dot_dimension_numbers<[1], [0], [0], [1], [0, 0, 1, 1], [], []>} : vector<4x64xbf16>, vector<64x64xbf16>, vector<4x64xf32> -> vector<4x64xf32>
    %20 = arith.addf %14, %19 : vector<4x64xf32>
    %c0_13 = arith.constant 0 : index
    %c0_14 = arith.constant 0 : index
    %c0_15 = arith.constant 0 : index
    %c0_16 = arith.constant 0 : index
    %21 = vector.load %arg3[%c0_13, %c0_14, %c0_15, %c0_16] : memref<1x1x6x64xf32, #tpu.memory_space<vmem>>, vector<1x1x6x64xf32>
    %22 = vector.shape_cast %21 : vector<1x1x6x64xf32> to vector<6x64xf32>
    %23 = vector.extract_strided_slice %22 {offsets = [0, 0], sizes = [4, 64], strides = [1, 1]} : vector<6x64xf32> to vector<4x64xf32>
    %24 = arith.truncf %23 : vector<4x64xf32> to vector<4x64xbf16>
    %c3 = arith.constant 3 : index
    %c0_17 = arith.constant 0 : index
    %c0_18 = arith.constant 0 : index
    %25 = vector.load %arg5[%c3, %c0_17, %c0_18] : memref<9x64x64xbf16, #tpu.memory_space<vmem>>, vector<1x64x64xbf16>
    %26 = vector.shape_cast %25 : vector<1x64x64xbf16> to vector<64x64xbf16>
    %cst_19 = arith.constant dense<0.000000e+00> : vector<4x64xf32>
    %27 = tpu.matmul %24, %26, %cst_19 {dimension_numbers = #tpu.dot_dimension_numbers<[1], [0], [0], [1], [0, 0, 1, 1], [], []>} : vector<4x64xbf16>, vector<64x64xbf16>, vector<4x64xf32> -> vector<4x64xf32>
    %28 = arith.addf %20, %27 : vector<4x64xf32>
    %29 = vector.extract_strided_slice %22 {offsets = [1, 0], sizes = [4, 64], strides = [1, 1]} : vector<6x64xf32> to vector<4x64xf32>
    %30 = arith.truncf %29 : vector<4x64xf32> to vector<4x64xbf16>
    %c4 = arith.constant 4 : index
    %c0_20 = arith.constant 0 : index
    %c0_21 = arith.constant 0 : index
    %31 = vector.load %arg5[%c4, %c0_20, %c0_21] : memref<9x64x64xbf16, #tpu.memory_space<vmem>>, vector<1x64x64xbf16>
    %32 = vector.shape_cast %31 : vector<1x64x64xbf16> to vector<64x64xbf16>
    %cst_22 = arith.constant dense<0.000000e+00> : vector<4x64xf32>
    %33 = tpu.matmul %30, %32, %cst_22 {dimension_numbers = #tpu.dot_dimension_numbers<[1], [0], [0], [1], [0, 0, 1, 1], [], []>} : vector<4x64xbf16>, vector<64x64xbf16>, vector<4x64xf32> -> vector<4x64xf32>
    %34 = arith.addf %28, %33 : vector<4x64xf32>
    %35 = vector.extract_strided_slice %22 {offsets = [2, 0], sizes = [4, 64], strides = [1, 1]} : vector<6x64xf32> to vector<4x64xf32>
    %36 = arith.truncf %35 : vector<4x64xf32> to vector<4x64xbf16>
    %c5 = arith.constant 5 : index
    %c0_23 = arith.constant 0 : index
    %c0_24 = arith.constant 0 : index
    %37 = vector.load %arg5[%c5, %c0_23, %c0_24] : memref<9x64x64xbf16, #tpu.memory_space<vmem>>, vector<1x64x64xbf16>
    %38 = vector.shape_cast %37 : vector<1x64x64xbf16> to vector<64x64xbf16>
    %cst_25 = arith.constant dense<0.000000e+00> : vector<4x64xf32>
    %39 = tpu.matmul %36, %38, %cst_25 {dimension_numbers = #tpu.dot_dimension_numbers<[1], [0], [0], [1], [0, 0, 1, 1], [], []>} : vector<4x64xbf16>, vector<64x64xbf16>, vector<4x64xf32> -> vector<4x64xf32>
    %40 = arith.addf %34, %39 : vector<4x64xf32>
    %c0_26 = arith.constant 0 : index
    %c0_27 = arith.constant 0 : index
    %c0_28 = arith.constant 0 : index
    %c0_29 = arith.constant 0 : index
    %41 = vector.load %arg4[%c0_26, %c0_27, %c0_28, %c0_29] : memref<1x1x6x64xf32, #tpu.memory_space<vmem>>, vector<1x1x6x64xf32>
    %42 = vector.shape_cast %41 : vector<1x1x6x64xf32> to vector<6x64xf32>
    %43 = vector.extract_strided_slice %42 {offsets = [0, 0], sizes = [4, 64], strides = [1, 1]} : vector<6x64xf32> to vector<4x64xf32>
    %44 = arith.truncf %43 : vector<4x64xf32> to vector<4x64xbf16>
    %c6 = arith.constant 6 : index
    %c0_30 = arith.constant 0 : index
    %c0_31 = arith.constant 0 : index
    %45 = vector.load %arg5[%c6, %c0_30, %c0_31] : memref<9x64x64xbf16, #tpu.memory_space<vmem>>, vector<1x64x64xbf16>
    %46 = vector.shape_cast %45 : vector<1x64x64xbf16> to vector<64x64xbf16>
    %cst_32 = arith.constant dense<0.000000e+00> : vector<4x64xf32>
    %47 = tpu.matmul %44, %46, %cst_32 {dimension_numbers = #tpu.dot_dimension_numbers<[1], [0], [0], [1], [0, 0, 1, 1], [], []>} : vector<4x64xbf16>, vector<64x64xbf16>, vector<4x64xf32> -> vector<4x64xf32>
    %48 = arith.addf %40, %47 : vector<4x64xf32>
    %49 = vector.extract_strided_slice %42 {offsets = [1, 0], sizes = [4, 64], strides = [1, 1]} : vector<6x64xf32> to vector<4x64xf32>
    %50 = arith.truncf %49 : vector<4x64xf32> to vector<4x64xbf16>
    %c7 = arith.constant 7 : index
    %c0_33 = arith.constant 0 : index
    %c0_34 = arith.constant 0 : index
    %51 = vector.load %arg5[%c7, %c0_33, %c0_34] : memref<9x64x64xbf16, #tpu.memory_space<vmem>>, vector<1x64x64xbf16>
    %52 = vector.shape_cast %51 : vector<1x64x64xbf16> to vector<64x64xbf16>
    %cst_35 = arith.constant dense<0.000000e+00> : vector<4x64xf32>
    %53 = tpu.matmul %50, %52, %cst_35 {dimension_numbers = #tpu.dot_dimension_numbers<[1], [0], [0], [1], [0, 0, 1, 1], [], []>} : vector<4x64xbf16>, vector<64x64xbf16>, vector<4x64xf32> -> vector<4x64xf32>
    %54 = arith.addf %48, %53 : vector<4x64xf32>
    %55 = vector.extract_strided_slice %42 {offsets = [2, 0], sizes = [4, 64], strides = [1, 1]} : vector<6x64xf32> to vector<4x64xf32>
    %56 = arith.truncf %55 : vector<4x64xf32> to vector<4x64xbf16>
    %c8 = arith.constant 8 : index
    %c0_36 = arith.constant 0 : index
    %c0_37 = arith.constant 0 : index
    %57 = vector.load %arg5[%c8, %c0_36, %c0_37] : memref<9x64x64xbf16, #tpu.memory_space<vmem>>, vector<1x64x64xbf16>
    %58 = vector.shape_cast %57 : vector<1x64x64xbf16> to vector<64x64xbf16>
    %cst_38 = arith.constant dense<0.000000e+00> : vector<4x64xf32>
    %59 = tpu.matmul %56, %58, %cst_38 {dimension_numbers = #tpu.dot_dimension_numbers<[1], [0], [0], [1], [0, 0, 1, 1], [], []>} : vector<4x64xbf16>, vector<64x64xbf16>, vector<4x64xf32> -> vector<4x64xf32>
    %60 = arith.addf %54, %59 : vector<4x64xf32>
    %c0_39 = arith.constant 0 : index
    %c0_40 = arith.constant 0 : index
    %61 = vector.load %arg6[%c0_39, %c0_40] : memref<1x64xf32, #tpu.memory_space<vmem>>, vector<1x64xf32>
    %62 = vector.broadcast %61 : vector<1x64xf32> to vector<4x64xf32>
    %63 = arith.addf %60, %62 : vector<4x64xf32>
    %cst_41 = arith.constant 0.000000e+00 : f32
    %64 = vector.broadcast %cst_41 : f32 to vector<4x64xf32>
    %65 = arith.maximumf %63, %64 : vector<4x64xf32>
    %c0_42 = arith.constant 0 : index
    %c0_43 = arith.constant 0 : index
    %c0_44 = arith.constant 0 : index
    %c0_45 = arith.constant 0 : index
    %66 = vector.load %arg7[%c0_42, %c0_43, %c0_44, %c0_45] : memref<1x1x4x64xf32, #tpu.memory_space<vmem>>, vector<1x1x4x64xf32>
    %67 = vector.shape_cast %66 : vector<1x1x4x64xf32> to vector<4x64xf32>
    %68 = vector.shape_cast %65 : vector<4x64xf32> to vector<1x1x4x64xf32>
    tpu.vector_store %arg7[%c0_42, %c0_43, %c0_44, %c0_45], %68 {strides = array<i32>} : memref<1x1x4x64xf32, #tpu.memory_space<vmem>>, vector<1x1x4x64xf32>,
    return
  }
  func.func @transform_0(%arg0: i32, %arg1: i32) -> (i32, i32, i32, i32) {
    %c0_i32 = arith.constant 0 : i32
    %0 = arith.addi %arg1, %c0_i32 : i32
    %c0_i32_0 = arith.constant 0 : i32
    %c0_i32_1 = arith.constant 0 : i32
    %c0_i32_2 = arith.constant 0 : i32
    return %arg0, %0, %c0_i32_0, %c0_i32_1 : i32, i32, i32, i32
  }
  func.func @transform_1(%arg0: i32, %arg1: i32) -> (i32, i32, i32, i32) {
    %c1_i32 = arith.constant 1 : i32
    %0 = arith.addi %arg1, %c1_i32 : i32
    %c0_i32 = arith.constant 0 : i32
    %c0_i32_0 = arith.constant 0 : i32
    %c0_i32_1 = arith.constant 0 : i32
    return %arg0, %0, %c0_i32, %c0_i32_0 : i32, i32, i32, i32
  }
  func.func @transform_2(%arg0: i32, %arg1: i32) -> (i32, i32, i32, i32) {
    %c2_i32 = arith.constant 2 : i32
    %0 = arith.addi %arg1, %c2_i32 : i32
    %c0_i32 = arith.constant 0 : i32
    %c0_i32_0 = arith.constant 0 : i32
    %c0_i32_1 = arith.constant 0 : i32
    return %arg0, %0, %c0_i32, %c0_i32_0 : i32, i32, i32, i32
  }
  func.func @transform_3(%arg0: i32, %arg1: i32) -> (i32, i32, i32) {
    %c0_i32 = arith.constant 0 : i32
    %c0_i32_0 = arith.constant 0 : i32
    %c0_i32_1 = arith.constant 0 : i32
    %c0_i32_2 = arith.constant 0 : i32
    return %c0_i32, %c0_i32_0, %c0_i32_1 : i32, i32, i32
  }
  func.func @transform_4(%arg0: i32, %arg1: i32) -> (i32, i32) {
    %c0_i32 = arith.constant 0 : i32
    %c0_i32_0 = arith.constant 0 : i32
    %c0_i32_1 = arith.constant 0 : i32
    return %c0_i32, %c0_i32_0 : i32, i32
  }
  func.func @transform_5(%arg0: i32, %arg1: i32) -> (i32, i32, i32, i32) {
    %c0_i32 = arith.constant 0 : i32
    %c0_i32_0 = arith.constant 0 : i32
    %c0_i32_1 = arith.constant 0 : i32
    return %arg0, %arg1, %c0_i32, %c0_i32_0 : i32, i32, i32, i32
  }
}

module attributes {stable_mosaic.version = 11 : i64} {
  func.func @_dconv_kernel(%arg0: i32, %arg1: i32, %arg2: memref<1x1x6x64xf32, #tpu.memory_space<vmem>>, %arg3: memref<1x1x6x64xf32, #tpu.memory_space<vmem>>, %arg4: memref<1x1x6x64xf32, #tpu.memory_space<vmem>>, %arg5: memref<9x64x64xbf16, #tpu.memory_space<vmem>>, %arg6: memref<1x64xf32, #tpu.memory_space<vmem>>, %arg7: memref<1x1x4x64xf32, #tpu.memory_space<vmem>>, %arg8: memref<1x1x4x64xf32, #tpu.memory_space<vmem>>) attributes {dimension_semantics = [#tpu.dimension_semantics<parallel>, #tpu.dimension_semantics<parallel>], iteration_bounds = array<i64: 2, 4>, scalar_prefetch = 0 : i64, scratch_operands = 0 : i64, tpu.core_type = #tpu.core_type<tc>, window_params = [{transform_indices = @transform_0, window_bounds = array<i64: 1, 1, 6, 64>}, {transform_indices = @transform_1, window_bounds = array<i64: 1, 1, 6, 64>}, {transform_indices = @transform_2, window_bounds = array<i64: 1, 1, 6, 64>}, {pipeline_mode = #tpu.pipeline_mode<synchronous>, transform_indices = @transform_3, window_bounds = array<i64: 9, 64, 64>}, {pipeline_mode = #tpu.pipeline_mode<synchronous>, transform_indices = @transform_4, window_bounds = array<i64: 1, 64>}, {transform_indices = @transform_5, window_bounds = array<i64: 1, 1, 4, 64>}, {transform_indices = @transform_6, window_bounds = array<i64: 1, 1, 4, 64>}]} {
    %cst = arith.constant 0.000000e+00 : f32
    %0 = vector.broadcast %cst : f32 to vector<4x64xf32>
    %c0 = arith.constant 0 : index
    %c0_0 = arith.constant 0 : index
    %c0_1 = arith.constant 0 : index
    %c0_2 = arith.constant 0 : index
    %1 = vector.load %arg2[%c0, %c0_0, %c0_1, %c0_2] : memref<1x1x6x64xf32, #tpu.memory_space<vmem>>, vector<1x1x6x64xf32>
    %2 = vector.shape_cast %1 : vector<1x1x6x64xf32> to vector<6x64xf32>
    %3 = vector.extract_strided_slice %2 {offsets = [0, 0], sizes = [4, 64], strides = [1, 1]} : vector<6x64xf32> to vector<4x64xf32>
    %4 = arith.truncf %3 : vector<4x64xf32> to vector<4x64xbf16>
    %c0_3 = arith.constant 0 : index
    %c0_4 = arith.constant 0 : index
    %c0_5 = arith.constant 0 : index
    %5 = vector.load %arg5[%c0_3, %c0_4, %c0_5] : memref<9x64x64xbf16, #tpu.memory_space<vmem>>, vector<1x64x64xbf16>
    %6 = vector.shape_cast %5 : vector<1x64x64xbf16> to vector<64x64xbf16>
    %cst_6 = arith.constant dense<0.000000e+00> : vector<4x64xf32>
    %7 = tpu.matmul %4, %6, %cst_6 {dimension_numbers = #tpu.dot_dimension_numbers<[1], [0], [0], [1], [0, 0, 1, 1], [], []>} : vector<4x64xbf16>, vector<64x64xbf16>, vector<4x64xf32> -> vector<4x64xf32>
    %8 = arith.addf %0, %7 : vector<4x64xf32>
    %9 = vector.extract_strided_slice %2 {offsets = [1, 0], sizes = [4, 64], strides = [1, 1]} : vector<6x64xf32> to vector<4x64xf32>
    %10 = arith.truncf %9 : vector<4x64xf32> to vector<4x64xbf16>
    %c1 = arith.constant 1 : index
    %c0_7 = arith.constant 0 : index
    %c0_8 = arith.constant 0 : index
    %11 = vector.load %arg5[%c1, %c0_7, %c0_8] : memref<9x64x64xbf16, #tpu.memory_space<vmem>>, vector<1x64x64xbf16>
    %12 = vector.shape_cast %11 : vector<1x64x64xbf16> to vector<64x64xbf16>
    %cst_9 = arith.constant dense<0.000000e+00> : vector<4x64xf32>
    %13 = tpu.matmul %10, %12, %cst_9 {dimension_numbers = #tpu.dot_dimension_numbers<[1], [0], [0], [1], [0, 0, 1, 1], [], []>} : vector<4x64xbf16>, vector<64x64xbf16>, vector<4x64xf32> -> vector<4x64xf32>
    %14 = arith.addf %8, %13 : vector<4x64xf32>
    %15 = vector.extract_strided_slice %2 {offsets = [2, 0], sizes = [4, 64], strides = [1, 1]} : vector<6x64xf32> to vector<4x64xf32>
    %16 = arith.truncf %15 : vector<4x64xf32> to vector<4x64xbf16>
    %c2 = arith.constant 2 : index
    %c0_10 = arith.constant 0 : index
    %c0_11 = arith.constant 0 : index
    %17 = vector.load %arg5[%c2, %c0_10, %c0_11] : memref<9x64x64xbf16, #tpu.memory_space<vmem>>, vector<1x64x64xbf16>
    %18 = vector.shape_cast %17 : vector<1x64x64xbf16> to vector<64x64xbf16>
    %cst_12 = arith.constant dense<0.000000e+00> : vector<4x64xf32>
    %19 = tpu.matmul %16, %18, %cst_12 {dimension_numbers = #tpu.dot_dimension_numbers<[1], [0], [0], [1], [0, 0, 1, 1], [], []>} : vector<4x64xbf16>, vector<64x64xbf16>, vector<4x64xf32> -> vector<4x64xf32>
    %20 = arith.addf %14, %19 : vector<4x64xf32>
    %c0_13 = arith.constant 0 : index
    %c0_14 = arith.constant 0 : index
    %c0_15 = arith.constant 0 : index
    %c0_16 = arith.constant 0 : index
    %21 = vector.load %arg3[%c0_13, %c0_14, %c0_15, %c0_16] : memref<1x1x6x64xf32, #tpu.memory_space<vmem>>, vector<1x1x6x64xf32>
    %22 = vector.shape_cast %21 : vector<1x1x6x64xf32> to vector<6x64xf32>
    %23 = vector.extract_strided_slice %22 {offsets = [0, 0], sizes = [4, 64], strides = [1, 1]} : vector<6x64xf32> to vector<4x64xf32>
    %24 = arith.truncf %23 : vector<4x64xf32> to vector<4x64xbf16>
    %c3 = arith.constant 3 : index
    %c0_17 = arith.constant 0 : index
    %c0_18 = arith.constant 0 : index
    %25 = vector.load %arg5[%c3, %c0_17, %c0_18] : memref<9x64x64xbf16, #tpu.memory_space<vmem>>, vector<1x64x64xbf16>
    %26 = vector.shape_cast %25 : vector<1x64x64xbf16> to vector<64x64xbf16>
    %cst_19 = arith.constant dense<0.000000e+00> : vector<4x64xf32>
    %27 = tpu.matmul %24, %26, %cst_19 {dimension_numbers = #tpu.dot_dimension_numbers<[1], [0], [0], [1], [0, 0, 1, 1], [], []>} : vector<4x64xbf16>, vector<64x64xbf16>, vector<4x64xf32> -> vector<4x64xf32>
    %28 = arith.addf %20, %27 : vector<4x64xf32>
    %29 = vector.extract_strided_slice %22 {offsets = [1, 0], sizes = [4, 64], strides = [1, 1]} : vector<6x64xf32> to vector<4x64xf32>
    %30 = arith.truncf %29 : vector<4x64xf32> to vector<4x64xbf16>
    %c4 = arith.constant 4 : index
    %c0_20 = arith.constant 0 : index
    %c0_21 = arith.constant 0 : index
    %31 = vector.load %arg5[%c4, %c0_20, %c0_21] : memref<9x64x64xbf16, #tpu.memory_space<vmem>>, vector<1x64x64xbf16>
    %32 = vector.shape_cast %31 : vector<1x64x64xbf16> to vector<64x64xbf16>
    %cst_22 = arith.constant dense<0.000000e+00> : vector<4x64xf32>
    %33 = tpu.matmul %30, %32, %cst_22 {dimension_numbers = #tpu.dot_dimension_numbers<[1], [0], [0], [1], [0, 0, 1, 1], [], []>} : vector<4x64xbf16>, vector<64x64xbf16>, vector<4x64xf32> -> vector<4x64xf32>
    %34 = arith.addf %28, %33 : vector<4x64xf32>
    %35 = vector.extract_strided_slice %22 {offsets = [2, 0], sizes = [4, 64], strides = [1, 1]} : vector<6x64xf32> to vector<4x64xf32>
    %36 = arith.truncf %35 : vector<4x64xf32> to vector<4x64xbf16>
    %c5 = arith.constant 5 : index
    %c0_23 = arith.constant 0 : index
    %c0_24 = arith.constant 0 : index
    %37 = vector.load %arg5[%c5, %c0_23, %c0_24] : memref<9x64x64xbf16, #tpu.memory_space<vmem>>, vector<1x64x64xbf16>
    %38 = vector.shape_cast %37 : vector<1x64x64xbf16> to vector<64x64xbf16>
    %cst_25 = arith.constant dense<0.000000e+00> : vector<4x64xf32>
    %39 = tpu.matmul %36, %38, %cst_25 {dimension_numbers = #tpu.dot_dimension_numbers<[1], [0], [0], [1], [0, 0, 1, 1], [], []>} : vector<4x64xbf16>, vector<64x64xbf16>, vector<4x64xf32> -> vector<4x64xf32>
    %40 = arith.addf %34, %39 : vector<4x64xf32>
    %c0_26 = arith.constant 0 : index
    %c0_27 = arith.constant 0 : index
    %c0_28 = arith.constant 0 : index
    %c0_29 = arith.constant 0 : index
    %41 = vector.load %arg4[%c0_26, %c0_27, %c0_28, %c0_29] : memref<1x1x6x64xf32, #tpu.memory_space<vmem>>, vector<1x1x6x64xf32>
    %42 = vector.shape_cast %41 : vector<1x1x6x64xf32> to vector<6x64xf32>
    %43 = vector.extract_strided_slice %42 {offsets = [0, 0], sizes = [4, 64], strides = [1, 1]} : vector<6x64xf32> to vector<4x64xf32>
    %44 = arith.truncf %43 : vector<4x64xf32> to vector<4x64xbf16>
    %c6 = arith.constant 6 : index
    %c0_30 = arith.constant 0 : index
    %c0_31 = arith.constant 0 : index
    %45 = vector.load %arg5[%c6, %c0_30, %c0_31] : memref<9x64x64xbf16, #tpu.memory_space<vmem>>, vector<1x64x64xbf16>
    %46 = vector.shape_cast %45 : vector<1x64x64xbf16> to vector<64x64xbf16>
    %cst_32 = arith.constant dense<0.000000e+00> : vector<4x64xf32>
    %47 = tpu.matmul %44, %46, %cst_32 {dimension_numbers = #tpu.dot_dimension_numbers<[1], [0], [0], [1], [0, 0, 1, 1], [], []>} : vector<4x64xbf16>, vector<64x64xbf16>, vector<4x64xf32> -> vector<4x64xf32>
    %48 = arith.addf %40, %47 : vector<4x64xf32>
    %49 = vector.extract_strided_slice %42 {offsets = [1, 0], sizes = [4, 64], strides = [1, 1]} : vector<6x64xf32> to vector<4x64xf32>
    %50 = arith.truncf %49 : vector<4x64xf32> to vector<4x64xbf16>
    %c7 = arith.constant 7 : index
    %c0_33 = arith.constant 0 : index
    %c0_34 = arith.constant 0 : index
    %51 = vector.load %arg5[%c7, %c0_33, %c0_34] : memref<9x64x64xbf16, #tpu.memory_space<vmem>>, vector<1x64x64xbf16>
    %52 = vector.shape_cast %51 : vector<1x64x64xbf16> to vector<64x64xbf16>
    %cst_35 = arith.constant dense<0.000000e+00> : vector<4x64xf32>
    %53 = tpu.matmul %50, %52, %cst_35 {dimension_numbers = #tpu.dot_dimension_numbers<[1], [0], [0], [1], [0, 0, 1, 1], [], []>} : vector<4x64xbf16>, vector<64x64xbf16>, vector<4x64xf32> -> vector<4x64xf32>
    %54 = arith.addf %48, %53 : vector<4x64xf32>
    %55 = vector.extract_strided_slice %42 {offsets = [2, 0], sizes = [4, 64], strides = [1, 1]} : vector<6x64xf32> to vector<4x64xf32>
    %56 = arith.truncf %55 : vector<4x64xf32> to vector<4x64xbf16>
    %c8 = arith.constant 8 : index
    %c0_36 = arith.constant 0 : index
    %c0_37 = arith.constant 0 : index
    %57 = vector.load %arg5[%c8, %c0_36, %c0_37] : memref<9x64x64xbf16, #tpu.memory_space<vmem>>, vector<1x64x64xbf16>
    %58 = vector.shape_cast %57 : vector<1x64x64xbf16> to vector<64x64xbf16>
    %cst_38 = arith.constant dense<0.000000e+00> : vector<4x64xf32>
    %59 = tpu.matmul %56, %58, %cst_38 {dimension_numbers = #tpu.dot_dimension_numbers<[1], [0], [0], [1], [0, 0, 1, 1], [], []>} : vector<4x64xbf16>, vector<64x64xbf16>, vector<4x64xf32> -> vector<4x64xf32>
    %60 = arith.addf %54, %59 : vector<4x64xf32>
    %c0_39 = arith.constant 0 : index
    %c0_40 = arith.constant 0 : index
    %61 = vector.load %arg6[%c0_39, %c0_40] : memref<1x64xf32, #tpu.memory_space<vmem>>, vector<1x64xf32>
    %62 = vector.broadcast %61 : vector<1x64xf32> to vector<4x64xf32>
    %63 = arith.addf %60, %62 : vector<4x64xf32>
    %c0_41 = arith.constant 0 : index
    %c0_42 = arith.constant 0 : index
    %c0_43 = arith.constant 0 : index
    %c0_44 = arith.constant 0 : index
    %64 = vector.load %arg7[%c0_41, %c0_42, %c0_43, %c0_44] : memref<1x1x4x64xf32, #tpu.memory_space<vmem>>, vector<1x1x4x64xf32>
    %65 = vector.shape_cast %64 : vector<1x1x4x64xf32> to vector<4x64xf32>
    %66 = arith.addf %63, %65 : vector<4x64xf32>
    %c0_45 = arith.constant 0 : index
    %c0_46 = arith.constant 0 : index
    %c0_47 = arith.constant 0 : index
    %c0_48 = arith.constant 0 : index
    %67 = vector.load %arg8[%c0_45, %c0_46, %c0_47, %c0_48] : memref<1x1x4x64xf32, #tpu.memory_space<vmem>>, vector<1x1x4x64xf32>
    %68 = vector.shape_cast %67 : vector<1x1x4x64xf32> to vector<4x64xf32>
    %69 = vector.shape_cast %66 : vector<4x64xf32> to vector<1x1x4x64xf32>
    tpu.vector_store %arg8[%c0_45, %c0_46, %c0_47, %c0_48], %69 {strides = array<i32>} : memref<1x1x4x64xf32, #tpu.memory_space<vmem>>, vector<1x1x4x64xf32>,
    return
  }
  func.func @transform_0(%arg0: i32, %arg1: i32) -> (i32, i32, i32, i32) {
    %c0_i32 = arith.constant 0 : i32
    %0 = arith.addi %arg1, %c0_i32 : i32
    %c0_i32_0 = arith.constant 0 : i32
    %c0_i32_1 = arith.constant 0 : i32
    %c0_i32_2 = arith.constant 0 : i32
    return %arg0, %0, %c0_i32_0, %c0_i32_1 : i32, i32, i32, i32
  }
  func.func @transform_1(%arg0: i32, %arg1: i32) -> (i32, i32, i32, i32) {
    %c1_i32 = arith.constant 1 : i32
    %0 = arith.addi %arg1, %c1_i32 : i32
    %c0_i32 = arith.constant 0 : i32
    %c0_i32_0 = arith.constant 0 : i32
    %c0_i32_1 = arith.constant 0 : i32
    return %arg0, %0, %c0_i32, %c0_i32_0 : i32, i32, i32, i32
  }
  func.func @transform_2(%arg0: i32, %arg1: i32) -> (i32, i32, i32, i32) {
    %c2_i32 = arith.constant 2 : i32
    %0 = arith.addi %arg1, %c2_i32 : i32
    %c0_i32 = arith.constant 0 : i32
    %c0_i32_0 = arith.constant 0 : i32
    %c0_i32_1 = arith.constant 0 : i32
    return %arg0, %0, %c0_i32, %c0_i32_0 : i32, i32, i32, i32
  }
  func.func @transform_3(%arg0: i32, %arg1: i32) -> (i32, i32, i32) {
    %c0_i32 = arith.constant 0 : i32
    %c0_i32_0 = arith.constant 0 : i32
    %c0_i32_1 = arith.constant 0 : i32
    %c0_i32_2 = arith.constant 0 : i32
    return %c0_i32, %c0_i32_0, %c0_i32_1 : i32, i32, i32
  }
  func.func @transform_4(%arg0: i32, %arg1: i32) -> (i32, i32) {
    %c0_i32 = arith.constant 0 : i32
    %c0_i32_0 = arith.constant 0 : i32
    %c0_i32_1 = arith.constant 0 : i32
    return %c0_i32, %c0_i32_0 : i32, i32
  }
  func.func @transform_5(%arg0: i32, %arg1: i32) -> (i32, i32, i32, i32) {
    %c0_i32 = arith.constant 0 : i32
    %c0_i32_0 = arith.constant 0 : i32
    %c0_i32_1 = arith.constant 0 : i32
    return %arg0, %arg1, %c0_i32, %c0_i32_0 : i32, i32, i32, i32
  }
  func.func @transform_6(%arg0: i32, %arg1: i32) -> (i32, i32, i32, i32) {
    %c0_i32 = arith.constant 0 : i32
    %c0_i32_0 = arith.constant 0 : i32
    %c0_i32_1 = arith.constant 0 : i32
    return %arg0, %arg1, %c0_i32, %c0_i32_0 : i32, i32, i32, i32
  }
}

module attributes {stable_mosaic.version = 11 : i64} {
  func.func @_dconv_kernel(%arg0: i32, %arg1: i32, %arg2: memref<1x1x6x128xf32, #tpu.memory_space<vmem>>, %arg3: memref<1x1x6x128xf32, #tpu.memory_space<vmem>>, %arg4: memref<1x1x6x128xf32, #tpu.memory_space<vmem>>, %arg5: memref<9x128x256xbf16, #tpu.memory_space<vmem>>, %arg6: memref<1x256xf32, #tpu.memory_space<vmem>>, %arg7: memref<1x1x4x256xf32, #tpu.memory_space<vmem>>) attributes {dimension_semantics = [#tpu.dimension_semantics<parallel>, #tpu.dimension_semantics<parallel>], iteration_bounds = array<i64: 2, 4>, scalar_prefetch = 0 : i64, scratch_operands = 0 : i64, tpu.core_type = #tpu.core_type<tc>, window_params = [{transform_indices = @transform_0, window_bounds = array<i64: 1, 1, 6, 128>}, {transform_indices = @transform_1, window_bounds = array<i64: 1, 1, 6, 128>}, {transform_indices = @transform_2, window_bounds = array<i64: 1, 1, 6, 128>}, {pipeline_mode = #tpu.pipeline_mode<synchronous>, transform_indices = @transform_3, window_bounds = array<i64: 9, 128, 256>}, {pipeline_mode = #tpu.pipeline_mode<synchronous>, transform_indices = @transform_4, window_bounds = array<i64: 1, 256>}, {transform_indices = @transform_5, window_bounds = array<i64: 1, 1, 4, 256>}]} {
    %cst = arith.constant 0.000000e+00 : f32
    %0 = vector.broadcast %cst : f32 to vector<4x256xf32>
    %c0 = arith.constant 0 : index
    %c0_0 = arith.constant 0 : index
    %c0_1 = arith.constant 0 : index
    %c0_2 = arith.constant 0 : index
    %1 = vector.load %arg2[%c0, %c0_0, %c0_1, %c0_2] : memref<1x1x6x128xf32, #tpu.memory_space<vmem>>, vector<1x1x6x128xf32>
    %2 = vector.shape_cast %1 : vector<1x1x6x128xf32> to vector<6x128xf32>
    %3 = vector.extract_strided_slice %2 {offsets = [0, 0], sizes = [4, 128], strides = [1, 1]} : vector<6x128xf32> to vector<4x128xf32>
    %4 = arith.truncf %3 : vector<4x128xf32> to vector<4x128xbf16>
    %c0_3 = arith.constant 0 : index
    %c0_4 = arith.constant 0 : index
    %c0_5 = arith.constant 0 : index
    %5 = vector.load %arg5[%c0_3, %c0_4, %c0_5] : memref<9x128x256xbf16, #tpu.memory_space<vmem>>, vector<1x128x256xbf16>
    %6 = vector.shape_cast %5 : vector<1x128x256xbf16> to vector<128x256xbf16>
    %cst_6 = arith.constant dense<0.000000e+00> : vector<4x256xf32>
    %7 = tpu.matmul %4, %6, %cst_6 {dimension_numbers = #tpu.dot_dimension_numbers<[1], [0], [0], [1], [0, 0, 1, 1], [], []>} : vector<4x128xbf16>, vector<128x256xbf16>, vector<4x256xf32> -> vector<4x256xf32>
    %8 = arith.addf %0, %7 : vector<4x256xf32>
    %9 = vector.extract_strided_slice %2 {offsets = [1, 0], sizes = [4, 128], strides = [1, 1]} : vector<6x128xf32> to vector<4x128xf32>
    %10 = arith.truncf %9 : vector<4x128xf32> to vector<4x128xbf16>
    %c1 = arith.constant 1 : index
    %c0_7 = arith.constant 0 : index
    %c0_8 = arith.constant 0 : index
    %11 = vector.load %arg5[%c1, %c0_7, %c0_8] : memref<9x128x256xbf16, #tpu.memory_space<vmem>>, vector<1x128x256xbf16>
    %12 = vector.shape_cast %11 : vector<1x128x256xbf16> to vector<128x256xbf16>
    %cst_9 = arith.constant dense<0.000000e+00> : vector<4x256xf32>
    %13 = tpu.matmul %10, %12, %cst_9 {dimension_numbers = #tpu.dot_dimension_numbers<[1], [0], [0], [1], [0, 0, 1, 1], [], []>} : vector<4x128xbf16>, vector<128x256xbf16>, vector<4x256xf32> -> vector<4x256xf32>
    %14 = arith.addf %8, %13 : vector<4x256xf32>
    %15 = vector.extract_strided_slice %2 {offsets = [2, 0], sizes = [4, 128], strides = [1, 1]} : vector<6x128xf32> to vector<4x128xf32>
    %16 = arith.truncf %15 : vector<4x128xf32> to vector<4x128xbf16>
    %c2 = arith.constant 2 : index
    %c0_10 = arith.constant 0 : index
    %c0_11 = arith.constant 0 : index
    %17 = vector.load %arg5[%c2, %c0_10, %c0_11] : memref<9x128x256xbf16, #tpu.memory_space<vmem>>, vector<1x128x256xbf16>
    %18 = vector.shape_cast %17 : vector<1x128x256xbf16> to vector<128x256xbf16>
    %cst_12 = arith.constant dense<0.000000e+00> : vector<4x256xf32>
    %19 = tpu.matmul %16, %18, %cst_12 {dimension_numbers = #tpu.dot_dimension_numbers<[1], [0], [0], [1], [0, 0, 1, 1], [], []>} : vector<4x128xbf16>, vector<128x256xbf16>, vector<4x256xf32> -> vector<4x256xf32>
    %20 = arith.addf %14, %19 : vector<4x256xf32>
    %c0_13 = arith.constant 0 : index
    %c0_14 = arith.constant 0 : index
    %c0_15 = arith.constant 0 : index
    %c0_16 = arith.constant 0 : index
    %21 = vector.load %arg3[%c0_13, %c0_14, %c0_15, %c0_16] : memref<1x1x6x128xf32, #tpu.memory_space<vmem>>, vector<1x1x6x128xf32>
    %22 = vector.shape_cast %21 : vector<1x1x6x128xf32> to vector<6x128xf32>
    %23 = vector.extract_strided_slice %22 {offsets = [0, 0], sizes = [4, 128], strides = [1, 1]} : vector<6x128xf32> to vector<4x128xf32>
    %24 = arith.truncf %23 : vector<4x128xf32> to vector<4x128xbf16>
    %c3 = arith.constant 3 : index
    %c0_17 = arith.constant 0 : index
    %c0_18 = arith.constant 0 : index
    %25 = vector.load %arg5[%c3, %c0_17, %c0_18] : memref<9x128x256xbf16, #tpu.memory_space<vmem>>, vector<1x128x256xbf16>
    %26 = vector.shape_cast %25 : vector<1x128x256xbf16> to vector<128x256xbf16>
    %cst_19 = arith.constant dense<0.000000e+00> : vector<4x256xf32>
    %27 = tpu.matmul %24, %26, %cst_19 {dimension_numbers = #tpu.dot_dimension_numbers<[1], [0], [0], [1], [0, 0, 1, 1], [], []>} : vector<4x128xbf16>, vector<128x256xbf16>, vector<4x256xf32> -> vector<4x256xf32>
    %28 = arith.addf %20, %27 : vector<4x256xf32>
    %29 = vector.extract_strided_slice %22 {offsets = [1, 0], sizes = [4, 128], strides = [1, 1]} : vector<6x128xf32> to vector<4x128xf32>
    %30 = arith.truncf %29 : vector<4x128xf32> to vector<4x128xbf16>
    %c4 = arith.constant 4 : index
    %c0_20 = arith.constant 0 : index
    %c0_21 = arith.constant 0 : index
    %31 = vector.load %arg5[%c4, %c0_20, %c0_21] : memref<9x128x256xbf16, #tpu.memory_space<vmem>>, vector<1x128x256xbf16>
    %32 = vector.shape_cast %31 : vector<1x128x256xbf16> to vector<128x256xbf16>
    %cst_22 = arith.constant dense<0.000000e+00> : vector<4x256xf32>
    %33 = tpu.matmul %30, %32, %cst_22 {dimension_numbers = #tpu.dot_dimension_numbers<[1], [0], [0], [1], [0, 0, 1, 1], [], []>} : vector<4x128xbf16>, vector<128x256xbf16>, vector<4x256xf32> -> vector<4x256xf32>
    %34 = arith.addf %28, %33 : vector<4x256xf32>
    %35 = vector.extract_strided_slice %22 {offsets = [2, 0], sizes = [4, 128], strides = [1, 1]} : vector<6x128xf32> to vector<4x128xf32>
    %36 = arith.truncf %35 : vector<4x128xf32> to vector<4x128xbf16>
    %c5 = arith.constant 5 : index
    %c0_23 = arith.constant 0 : index
    %c0_24 = arith.constant 0 : index
    %37 = vector.load %arg5[%c5, %c0_23, %c0_24] : memref<9x128x256xbf16, #tpu.memory_space<vmem>>, vector<1x128x256xbf16>
    %38 = vector.shape_cast %37 : vector<1x128x256xbf16> to vector<128x256xbf16>
    %cst_25 = arith.constant dense<0.000000e+00> : vector<4x256xf32>
    %39 = tpu.matmul %36, %38, %cst_25 {dimension_numbers = #tpu.dot_dimension_numbers<[1], [0], [0], [1], [0, 0, 1, 1], [], []>} : vector<4x128xbf16>, vector<128x256xbf16>, vector<4x256xf32> -> vector<4x256xf32>
    %40 = arith.addf %34, %39 : vector<4x256xf32>
    %c0_26 = arith.constant 0 : index
    %c0_27 = arith.constant 0 : index
    %c0_28 = arith.constant 0 : index
    %c0_29 = arith.constant 0 : index
    %41 = vector.load %arg4[%c0_26, %c0_27, %c0_28, %c0_29] : memref<1x1x6x128xf32, #tpu.memory_space<vmem>>, vector<1x1x6x128xf32>
    %42 = vector.shape_cast %41 : vector<1x1x6x128xf32> to vector<6x128xf32>
    %43 = vector.extract_strided_slice %42 {offsets = [0, 0], sizes = [4, 128], strides = [1, 1]} : vector<6x128xf32> to vector<4x128xf32>
    %44 = arith.truncf %43 : vector<4x128xf32> to vector<4x128xbf16>
    %c6 = arith.constant 6 : index
    %c0_30 = arith.constant 0 : index
    %c0_31 = arith.constant 0 : index
    %45 = vector.load %arg5[%c6, %c0_30, %c0_31] : memref<9x128x256xbf16, #tpu.memory_space<vmem>>, vector<1x128x256xbf16>
    %46 = vector.shape_cast %45 : vector<1x128x256xbf16> to vector<128x256xbf16>
    %cst_32 = arith.constant dense<0.000000e+00> : vector<4x256xf32>
    %47 = tpu.matmul %44, %46, %cst_32 {dimension_numbers = #tpu.dot_dimension_numbers<[1], [0], [0], [1], [0, 0, 1, 1], [], []>} : vector<4x128xbf16>, vector<128x256xbf16>, vector<4x256xf32> -> vector<4x256xf32>
    %48 = arith.addf %40, %47 : vector<4x256xf32>
    %49 = vector.extract_strided_slice %42 {offsets = [1, 0], sizes = [4, 128], strides = [1, 1]} : vector<6x128xf32> to vector<4x128xf32>
    %50 = arith.truncf %49 : vector<4x128xf32> to vector<4x128xbf16>
    %c7 = arith.constant 7 : index
    %c0_33 = arith.constant 0 : index
    %c0_34 = arith.constant 0 : index
    %51 = vector.load %arg5[%c7, %c0_33, %c0_34] : memref<9x128x256xbf16, #tpu.memory_space<vmem>>, vector<1x128x256xbf16>
    %52 = vector.shape_cast %51 : vector<1x128x256xbf16> to vector<128x256xbf16>
    %cst_35 = arith.constant dense<0.000000e+00> : vector<4x256xf32>
    %53 = tpu.matmul %50, %52, %cst_35 {dimension_numbers = #tpu.dot_dimension_numbers<[1], [0], [0], [1], [0, 0, 1, 1], [], []>} : vector<4x128xbf16>, vector<128x256xbf16>, vector<4x256xf32> -> vector<4x256xf32>
    %54 = arith.addf %48, %53 : vector<4x256xf32>
    %55 = vector.extract_strided_slice %42 {offsets = [2, 0], sizes = [4, 128], strides = [1, 1]} : vector<6x128xf32> to vector<4x128xf32>
    %56 = arith.truncf %55 : vector<4x128xf32> to vector<4x128xbf16>
    %c8 = arith.constant 8 : index
    %c0_36 = arith.constant 0 : index
    %c0_37 = arith.constant 0 : index
    %57 = vector.load %arg5[%c8, %c0_36, %c0_37] : memref<9x128x256xbf16, #tpu.memory_space<vmem>>, vector<1x128x256xbf16>
    %58 = vector.shape_cast %57 : vector<1x128x256xbf16> to vector<128x256xbf16>
    %cst_38 = arith.constant dense<0.000000e+00> : vector<4x256xf32>
    %59 = tpu.matmul %56, %58, %cst_38 {dimension_numbers = #tpu.dot_dimension_numbers<[1], [0], [0], [1], [0, 0, 1, 1], [], []>} : vector<4x128xbf16>, vector<128x256xbf16>, vector<4x256xf32> -> vector<4x256xf32>
    %60 = arith.addf %54, %59 : vector<4x256xf32>
    %c0_39 = arith.constant 0 : index
    %c0_40 = arith.constant 0 : index
    %61 = vector.load %arg6[%c0_39, %c0_40] : memref<1x256xf32, #tpu.memory_space<vmem>>, vector<1x256xf32>
    %62 = vector.broadcast %61 : vector<1x256xf32> to vector<4x256xf32>
    %63 = arith.addf %60, %62 : vector<4x256xf32>
    %cst_41 = arith.constant 0.000000e+00 : f32
    %64 = vector.broadcast %cst_41 : f32 to vector<4x256xf32>
    %65 = arith.maximumf %63, %64 : vector<4x256xf32>
    %c0_42 = arith.constant 0 : index
    %c0_43 = arith.constant 0 : index
    %c0_44 = arith.constant 0 : index
    %c0_45 = arith.constant 0 : index
    %66 = vector.load %arg7[%c0_42, %c0_43, %c0_44, %c0_45] : memref<1x1x4x256xf32, #tpu.memory_space<vmem>>, vector<1x1x4x256xf32>
    %67 = vector.shape_cast %66 : vector<1x1x4x256xf32> to vector<4x256xf32>
    %68 = vector.shape_cast %65 : vector<4x256xf32> to vector<1x1x4x256xf32>
    tpu.vector_store %arg7[%c0_42, %c0_43, %c0_44, %c0_45], %68 {strides = array<i32>} : memref<1x1x4x256xf32, #tpu.memory_space<vmem>>, vector<1x1x4x256xf32>,
    return
  }
  func.func @transform_0(%arg0: i32, %arg1: i32) -> (i32, i32, i32, i32) {
    %c0_i32 = arith.constant 0 : i32
    %0 = arith.addi %arg1, %c0_i32 : i32
    %c0_i32_0 = arith.constant 0 : i32
    %c0_i32_1 = arith.constant 0 : i32
    %c0_i32_2 = arith.constant 0 : i32
    return %arg0, %0, %c0_i32_0, %c0_i32_1 : i32, i32, i32, i32
  }
  func.func @transform_1(%arg0: i32, %arg1: i32) -> (i32, i32, i32, i32) {
    %c1_i32 = arith.constant 1 : i32
    %0 = arith.addi %arg1, %c1_i32 : i32
    %c0_i32 = arith.constant 0 : i32
    %c0_i32_0 = arith.constant 0 : i32
    %c0_i32_1 = arith.constant 0 : i32
    return %arg0, %0, %c0_i32, %c0_i32_0 : i32, i32, i32, i32
  }
  func.func @transform_2(%arg0: i32, %arg1: i32) -> (i32, i32, i32, i32) {
    %c2_i32 = arith.constant 2 : i32
    %0 = arith.addi %arg1, %c2_i32 : i32
    %c0_i32 = arith.constant 0 : i32
    %c0_i32_0 = arith.constant 0 : i32
    %c0_i32_1 = arith.constant 0 : i32
    return %arg0, %0, %c0_i32, %c0_i32_0 : i32, i32, i32, i32
  }
  func.func @transform_3(%arg0: i32, %arg1: i32) -> (i32, i32, i32) {
    %c0_i32 = arith.constant 0 : i32
    %c0_i32_0 = arith.constant 0 : i32
    %c0_i32_1 = arith.constant 0 : i32
    %c0_i32_2 = arith.constant 0 : i32
    return %c0_i32, %c0_i32_0, %c0_i32_1 : i32, i32, i32
  }
  func.func @transform_4(%arg0: i32, %arg1: i32) -> (i32, i32) {
    %c0_i32 = arith.constant 0 : i32
    %c0_i32_0 = arith.constant 0 : i32
    %c0_i32_1 = arith.constant 0 : i32
    return %c0_i32, %c0_i32_0 : i32, i32
  }
  func.func @transform_5(%arg0: i32, %arg1: i32) -> (i32, i32, i32, i32) {
    %c0_i32 = arith.constant 0 : i32
    %c0_i32_0 = arith.constant 0 : i32
    %c0_i32_1 = arith.constant 0 : i32
    return %arg0, %arg1, %c0_i32, %c0_i32_0 : i32, i32, i32, i32
  }
}

module attributes {stable_mosaic.version = 11 : i64} {
  func.func @_dconv_kernel(%arg0: i32, %arg1: i32, %arg2: memref<1x1x10x128xf32, #tpu.memory_space<vmem>>, %arg3: memref<1x1x10x128xf32, #tpu.memory_space<vmem>>, %arg4: memref<1x1x10x128xf32, #tpu.memory_space<vmem>>, %arg5: memref<9x128x256xbf16, #tpu.memory_space<vmem>>, %arg6: memref<1x256xf32, #tpu.memory_space<vmem>>, %arg7: memref<1x1x8x256xf32, #tpu.memory_space<vmem>>) attributes {dimension_semantics = [#tpu.dimension_semantics<parallel>, #tpu.dimension_semantics<parallel>], iteration_bounds = array<i64: 2, 8>, scalar_prefetch = 0 : i64, scratch_operands = 0 : i64, tpu.core_type = #tpu.core_type<tc>, window_params = [{transform_indices = @transform_0, window_bounds = array<i64: 1, 1, 10, 128>}, {transform_indices = @transform_1, window_bounds = array<i64: 1, 1, 10, 128>}, {transform_indices = @transform_2, window_bounds = array<i64: 1, 1, 10, 128>}, {pipeline_mode = #tpu.pipeline_mode<synchronous>, transform_indices = @transform_3, window_bounds = array<i64: 9, 128, 256>}, {pipeline_mode = #tpu.pipeline_mode<synchronous>, transform_indices = @transform_4, window_bounds = array<i64: 1, 256>}, {transform_indices = @transform_5, window_bounds = array<i64: 1, 1, 8, 256>}]} {
    %cst = arith.constant 0.000000e+00 : f32
    %0 = vector.broadcast %cst : f32 to vector<8x256xf32>
    %c0 = arith.constant 0 : index
    %c0_0 = arith.constant 0 : index
    %c0_1 = arith.constant 0 : index
    %c0_2 = arith.constant 0 : index
    %1 = vector.load %arg2[%c0, %c0_0, %c0_1, %c0_2] : memref<1x1x10x128xf32, #tpu.memory_space<vmem>>, vector<1x1x10x128xf32>
    %2 = vector.shape_cast %1 : vector<1x1x10x128xf32> to vector<10x128xf32>
    %3 = vector.extract_strided_slice %2 {offsets = [0, 0], sizes = [8, 128], strides = [1, 1]} : vector<10x128xf32> to vector<8x128xf32>
    %4 = arith.truncf %3 : vector<8x128xf32> to vector<8x128xbf16>
    %c0_3 = arith.constant 0 : index
    %c0_4 = arith.constant 0 : index
    %c0_5 = arith.constant 0 : index
    %5 = vector.load %arg5[%c0_3, %c0_4, %c0_5] : memref<9x128x256xbf16, #tpu.memory_space<vmem>>, vector<1x128x256xbf16>
    %6 = vector.shape_cast %5 : vector<1x128x256xbf16> to vector<128x256xbf16>
    %cst_6 = arith.constant dense<0.000000e+00> : vector<8x256xf32>
    %7 = tpu.matmul %4, %6, %cst_6 {dimension_numbers = #tpu.dot_dimension_numbers<[1], [0], [0], [1], [0, 0, 1, 1], [], []>} : vector<8x128xbf16>, vector<128x256xbf16>, vector<8x256xf32> -> vector<8x256xf32>
    %8 = arith.addf %0, %7 : vector<8x256xf32>
    %9 = vector.extract_strided_slice %2 {offsets = [1, 0], sizes = [8, 128], strides = [1, 1]} : vector<10x128xf32> to vector<8x128xf32>
    %10 = arith.truncf %9 : vector<8x128xf32> to vector<8x128xbf16>
    %c1 = arith.constant 1 : index
    %c0_7 = arith.constant 0 : index
    %c0_8 = arith.constant 0 : index
    %11 = vector.load %arg5[%c1, %c0_7, %c0_8] : memref<9x128x256xbf16, #tpu.memory_space<vmem>>, vector<1x128x256xbf16>
    %12 = vector.shape_cast %11 : vector<1x128x256xbf16> to vector<128x256xbf16>
    %cst_9 = arith.constant dense<0.000000e+00> : vector<8x256xf32>
    %13 = tpu.matmul %10, %12, %cst_9 {dimension_numbers = #tpu.dot_dimension_numbers<[1], [0], [0], [1], [0, 0, 1, 1], [], []>} : vector<8x128xbf16>, vector<128x256xbf16>, vector<8x256xf32> -> vector<8x256xf32>
    %14 = arith.addf %8, %13 : vector<8x256xf32>
    %15 = vector.extract_strided_slice %2 {offsets = [2, 0], sizes = [8, 128], strides = [1, 1]} : vector<10x128xf32> to vector<8x128xf32>
    %16 = arith.truncf %15 : vector<8x128xf32> to vector<8x128xbf16>
    %c2 = arith.constant 2 : index
    %c0_10 = arith.constant 0 : index
    %c0_11 = arith.constant 0 : index
    %17 = vector.load %arg5[%c2, %c0_10, %c0_11] : memref<9x128x256xbf16, #tpu.memory_space<vmem>>, vector<1x128x256xbf16>
    %18 = vector.shape_cast %17 : vector<1x128x256xbf16> to vector<128x256xbf16>
    %cst_12 = arith.constant dense<0.000000e+00> : vector<8x256xf32>
    %19 = tpu.matmul %16, %18, %cst_12 {dimension_numbers = #tpu.dot_dimension_numbers<[1], [0], [0], [1], [0, 0, 1, 1], [], []>} : vector<8x128xbf16>, vector<128x256xbf16>, vector<8x256xf32> -> vector<8x256xf32>
    %20 = arith.addf %14, %19 : vector<8x256xf32>
    %c0_13 = arith.constant 0 : index
    %c0_14 = arith.constant 0 : index
    %c0_15 = arith.constant 0 : index
    %c0_16 = arith.constant 0 : index
    %21 = vector.load %arg3[%c0_13, %c0_14, %c0_15, %c0_16] : memref<1x1x10x128xf32, #tpu.memory_space<vmem>>, vector<1x1x10x128xf32>
    %22 = vector.shape_cast %21 : vector<1x1x10x128xf32> to vector<10x128xf32>
    %23 = vector.extract_strided_slice %22 {offsets = [0, 0], sizes = [8, 128], strides = [1, 1]} : vector<10x128xf32> to vector<8x128xf32>
    %24 = arith.truncf %23 : vector<8x128xf32> to vector<8x128xbf16>
    %c3 = arith.constant 3 : index
    %c0_17 = arith.constant 0 : index
    %c0_18 = arith.constant 0 : index
    %25 = vector.load %arg5[%c3, %c0_17, %c0_18] : memref<9x128x256xbf16, #tpu.memory_space<vmem>>, vector<1x128x256xbf16>
    %26 = vector.shape_cast %25 : vector<1x128x256xbf16> to vector<128x256xbf16>
    %cst_19 = arith.constant dense<0.000000e+00> : vector<8x256xf32>
    %27 = tpu.matmul %24, %26, %cst_19 {dimension_numbers = #tpu.dot_dimension_numbers<[1], [0], [0], [1], [0, 0, 1, 1], [], []>} : vector<8x128xbf16>, vector<128x256xbf16>, vector<8x256xf32> -> vector<8x256xf32>
    %28 = arith.addf %20, %27 : vector<8x256xf32>
    %29 = vector.extract_strided_slice %22 {offsets = [1, 0], sizes = [8, 128], strides = [1, 1]} : vector<10x128xf32> to vector<8x128xf32>
    %30 = arith.truncf %29 : vector<8x128xf32> to vector<8x128xbf16>
    %c4 = arith.constant 4 : index
    %c0_20 = arith.constant 0 : index
    %c0_21 = arith.constant 0 : index
    %31 = vector.load %arg5[%c4, %c0_20, %c0_21] : memref<9x128x256xbf16, #tpu.memory_space<vmem>>, vector<1x128x256xbf16>
    %32 = vector.shape_cast %31 : vector<1x128x256xbf16> to vector<128x256xbf16>
    %cst_22 = arith.constant dense<0.000000e+00> : vector<8x256xf32>
    %33 = tpu.matmul %30, %32, %cst_22 {dimension_numbers = #tpu.dot_dimension_numbers<[1], [0], [0], [1], [0, 0, 1, 1], [], []>} : vector<8x128xbf16>, vector<128x256xbf16>, vector<8x256xf32> -> vector<8x256xf32>
    %34 = arith.addf %28, %33 : vector<8x256xf32>
    %35 = vector.extract_strided_slice %22 {offsets = [2, 0], sizes = [8, 128], strides = [1, 1]} : vector<10x128xf32> to vector<8x128xf32>
    %36 = arith.truncf %35 : vector<8x128xf32> to vector<8x128xbf16>
    %c5 = arith.constant 5 : index
    %c0_23 = arith.constant 0 : index
    %c0_24 = arith.constant 0 : index
    %37 = vector.load %arg5[%c5, %c0_23, %c0_24] : memref<9x128x256xbf16, #tpu.memory_space<vmem>>, vector<1x128x256xbf16>
    %38 = vector.shape_cast %37 : vector<1x128x256xbf16> to vector<128x256xbf16>
    %cst_25 = arith.constant dense<0.000000e+00> : vector<8x256xf32>
    %39 = tpu.matmul %36, %38, %cst_25 {dimension_numbers = #tpu.dot_dimension_numbers<[1], [0], [0], [1], [0, 0, 1, 1], [], []>} : vector<8x128xbf16>, vector<128x256xbf16>, vector<8x256xf32> -> vector<8x256xf32>
    %40 = arith.addf %34, %39 : vector<8x256xf32>
    %c0_26 = arith.constant 0 : index
    %c0_27 = arith.constant 0 : index
    %c0_28 = arith.constant 0 : index
    %c0_29 = arith.constant 0 : index
    %41 = vector.load %arg4[%c0_26, %c0_27, %c0_28, %c0_29] : memref<1x1x10x128xf32, #tpu.memory_space<vmem>>, vector<1x1x10x128xf32>
    %42 = vector.shape_cast %41 : vector<1x1x10x128xf32> to vector<10x128xf32>
    %43 = vector.extract_strided_slice %42 {offsets = [0, 0], sizes = [8, 128], strides = [1, 1]} : vector<10x128xf32> to vector<8x128xf32>
    %44 = arith.truncf %43 : vector<8x128xf32> to vector<8x128xbf16>
    %c6 = arith.constant 6 : index
    %c0_30 = arith.constant 0 : index
    %c0_31 = arith.constant 0 : index
    %45 = vector.load %arg5[%c6, %c0_30, %c0_31] : memref<9x128x256xbf16, #tpu.memory_space<vmem>>, vector<1x128x256xbf16>
    %46 = vector.shape_cast %45 : vector<1x128x256xbf16> to vector<128x256xbf16>
    %cst_32 = arith.constant dense<0.000000e+00> : vector<8x256xf32>
    %47 = tpu.matmul %44, %46, %cst_32 {dimension_numbers = #tpu.dot_dimension_numbers<[1], [0], [0], [1], [0, 0, 1, 1], [], []>} : vector<8x128xbf16>, vector<128x256xbf16>, vector<8x256xf32> -> vector<8x256xf32>
    %48 = arith.addf %40, %47 : vector<8x256xf32>
    %49 = vector.extract_strided_slice %42 {offsets = [1, 0], sizes = [8, 128], strides = [1, 1]} : vector<10x128xf32> to vector<8x128xf32>
    %50 = arith.truncf %49 : vector<8x128xf32> to vector<8x128xbf16>
    %c7 = arith.constant 7 : index
    %c0_33 = arith.constant 0 : index
    %c0_34 = arith.constant 0 : index
    %51 = vector.load %arg5[%c7, %c0_33, %c0_34] : memref<9x128x256xbf16, #tpu.memory_space<vmem>>, vector<1x128x256xbf16>
    %52 = vector.shape_cast %51 : vector<1x128x256xbf16> to vector<128x256xbf16>
    %cst_35 = arith.constant dense<0.000000e+00> : vector<8x256xf32>
    %53 = tpu.matmul %50, %52, %cst_35 {dimension_numbers = #tpu.dot_dimension_numbers<[1], [0], [0], [1], [0, 0, 1, 1], [], []>} : vector<8x128xbf16>, vector<128x256xbf16>, vector<8x256xf32> -> vector<8x256xf32>
    %54 = arith.addf %48, %53 : vector<8x256xf32>
    %55 = vector.extract_strided_slice %42 {offsets = [2, 0], sizes = [8, 128], strides = [1, 1]} : vector<10x128xf32> to vector<8x128xf32>
    %56 = arith.truncf %55 : vector<8x128xf32> to vector<8x128xbf16>
    %c8 = arith.constant 8 : index
    %c0_36 = arith.constant 0 : index
    %c0_37 = arith.constant 0 : index
    %57 = vector.load %arg5[%c8, %c0_36, %c0_37] : memref<9x128x256xbf16, #tpu.memory_space<vmem>>, vector<1x128x256xbf16>
    %58 = vector.shape_cast %57 : vector<1x128x256xbf16> to vector<128x256xbf16>
    %cst_38 = arith.constant dense<0.000000e+00> : vector<8x256xf32>
    %59 = tpu.matmul %56, %58, %cst_38 {dimension_numbers = #tpu.dot_dimension_numbers<[1], [0], [0], [1], [0, 0, 1, 1], [], []>} : vector<8x128xbf16>, vector<128x256xbf16>, vector<8x256xf32> -> vector<8x256xf32>
    %60 = arith.addf %54, %59 : vector<8x256xf32>
    %c0_39 = arith.constant 0 : index
    %c0_40 = arith.constant 0 : index
    %61 = vector.load %arg6[%c0_39, %c0_40] : memref<1x256xf32, #tpu.memory_space<vmem>>, vector<1x256xf32>
    %62 = vector.broadcast %61 : vector<1x256xf32> to vector<8x256xf32>
    %63 = arith.addf %60, %62 : vector<8x256xf32>
    %cst_41 = arith.constant 0.000000e+00 : f32
    %64 = vector.broadcast %cst_41 : f32 to vector<8x256xf32>
    %65 = arith.maximumf %63, %64 : vector<8x256xf32>
    %c0_42 = arith.constant 0 : index
    %c0_43 = arith.constant 0 : index
    %c0_44 = arith.constant 0 : index
    %c0_45 = arith.constant 0 : index
    %66 = vector.load %arg7[%c0_42, %c0_43, %c0_44, %c0_45] : memref<1x1x8x256xf32, #tpu.memory_space<vmem>>, vector<1x1x8x256xf32>
    %67 = vector.shape_cast %66 : vector<1x1x8x256xf32> to vector<8x256xf32>
    %68 = vector.shape_cast %65 : vector<8x256xf32> to vector<1x1x8x256xf32>
    tpu.vector_store %arg7[%c0_42, %c0_43, %c0_44, %c0_45], %68 {strides = array<i32>} : memref<1x1x8x256xf32, #tpu.memory_space<vmem>>, vector<1x1x8x256xf32>,
    return
  }
  func.func @transform_0(%arg0: i32, %arg1: i32) -> (i32, i32, i32, i32) {
    %c0_i32 = arith.constant 0 : i32
    %0 = arith.addi %arg1, %c0_i32 : i32
    %c0_i32_0 = arith.constant 0 : i32
    %c0_i32_1 = arith.constant 0 : i32
    %c0_i32_2 = arith.constant 0 : i32
    return %arg0, %0, %c0_i32_0, %c0_i32_1 : i32, i32, i32, i32
  }
  func.func @transform_1(%arg0: i32, %arg1: i32) -> (i32, i32, i32, i32) {
    %c1_i32 = arith.constant 1 : i32
    %0 = arith.addi %arg1, %c1_i32 : i32
    %c0_i32 = arith.constant 0 : i32
    %c0_i32_0 = arith.constant 0 : i32
    %c0_i32_1 = arith.constant 0 : i32
    return %arg0, %0, %c0_i32, %c0_i32_0 : i32, i32, i32, i32
  }
  func.func @transform_2(%arg0: i32, %arg1: i32) -> (i32, i32, i32, i32) {
    %c2_i32 = arith.constant 2 : i32
    %0 = arith.addi %arg1, %c2_i32 : i32
    %c0_i32 = arith.constant 0 : i32
    %c0_i32_0 = arith.constant 0 : i32
    %c0_i32_1 = arith.constant 0 : i32
    return %arg0, %0, %c0_i32, %c0_i32_0 : i32, i32, i32, i32
  }
  func.func @transform_3(%arg0: i32, %arg1: i32) -> (i32, i32, i32) {
    %c0_i32 = arith.constant 0 : i32
    %c0_i32_0 = arith.constant 0 : i32
    %c0_i32_1 = arith.constant 0 : i32
    %c0_i32_2 = arith.constant 0 : i32
    return %c0_i32, %c0_i32_0, %c0_i32_1 : i32, i32, i32
  }
  func.func @transform_4(%arg0: i32, %arg1: i32) -> (i32, i32) {
    %c0_i32 = arith.constant 0 : i32
    %c0_i32_0 = arith.constant 0 : i32
    %c0_i32_1 = arith.constant 0 : i32
    return %c0_i32, %c0_i32_0 : i32, i32
  }
  func.func @transform_5(%arg0: i32, %arg1: i32) -> (i32, i32, i32, i32) {
    %c0_i32 = arith.constant 0 : i32
    %c0_i32_0 = arith.constant 0 : i32
    %c0_i32_1 = arith.constant 0 : i32
    return %arg0, %arg1, %c0_i32, %c0_i32_0 : i32, i32, i32, i32
  }
}

module attributes {stable_mosaic.version = 11 : i64} {
  func.func @_dconv_kernel(%arg0: i32, %arg1: i32, %arg2: memref<1x1x18x128xf32, #tpu.memory_space<vmem>>, %arg3: memref<1x1x18x128xf32, #tpu.memory_space<vmem>>, %arg4: memref<1x1x18x128xf32, #tpu.memory_space<vmem>>, %arg5: memref<9x128x64xbf16, #tpu.memory_space<vmem>>, %arg6: memref<1x64xf32, #tpu.memory_space<vmem>>, %arg7: memref<1x1x16x64xf32, #tpu.memory_space<vmem>>) attributes {dimension_semantics = [#tpu.dimension_semantics<parallel>, #tpu.dimension_semantics<parallel>], iteration_bounds = array<i64: 2, 16>, scalar_prefetch = 0 : i64, scratch_operands = 0 : i64, tpu.core_type = #tpu.core_type<tc>, window_params = [{transform_indices = @transform_0, window_bounds = array<i64: 1, 1, 18, 128>}, {transform_indices = @transform_1, window_bounds = array<i64: 1, 1, 18, 128>}, {transform_indices = @transform_2, window_bounds = array<i64: 1, 1, 18, 128>}, {pipeline_mode = #tpu.pipeline_mode<synchronous>, transform_indices = @transform_3, window_bounds = array<i64: 9, 128, 64>}, {pipeline_mode = #tpu.pipeline_mode<synchronous>, transform_indices = @transform_4, window_bounds = array<i64: 1, 64>}, {transform_indices = @transform_5, window_bounds = array<i64: 1, 1, 16, 64>}]} {
    %cst = arith.constant 0.000000e+00 : f32
    %0 = vector.broadcast %cst : f32 to vector<16x64xf32>
    %c0 = arith.constant 0 : index
    %c0_0 = arith.constant 0 : index
    %c0_1 = arith.constant 0 : index
    %c0_2 = arith.constant 0 : index
    %1 = vector.load %arg2[%c0, %c0_0, %c0_1, %c0_2] : memref<1x1x18x128xf32, #tpu.memory_space<vmem>>, vector<1x1x18x128xf32>
    %2 = vector.shape_cast %1 : vector<1x1x18x128xf32> to vector<18x128xf32>
    %3 = vector.extract_strided_slice %2 {offsets = [0, 0], sizes = [16, 128], strides = [1, 1]} : vector<18x128xf32> to vector<16x128xf32>
    %4 = arith.truncf %3 : vector<16x128xf32> to vector<16x128xbf16>
    %c0_3 = arith.constant 0 : index
    %c0_4 = arith.constant 0 : index
    %c0_5 = arith.constant 0 : index
    %5 = vector.load %arg5[%c0_3, %c0_4, %c0_5] : memref<9x128x64xbf16, #tpu.memory_space<vmem>>, vector<1x128x64xbf16>
    %6 = vector.shape_cast %5 : vector<1x128x64xbf16> to vector<128x64xbf16>
    %cst_6 = arith.constant dense<0.000000e+00> : vector<16x64xf32>
    %7 = tpu.matmul %4, %6, %cst_6 {dimension_numbers = #tpu.dot_dimension_numbers<[1], [0], [0], [1], [0, 0, 1, 1], [], []>} : vector<16x128xbf16>, vector<128x64xbf16>, vector<16x64xf32> -> vector<16x64xf32>
    %8 = arith.addf %0, %7 : vector<16x64xf32>
    %9 = vector.extract_strided_slice %2 {offsets = [1, 0], sizes = [16, 128], strides = [1, 1]} : vector<18x128xf32> to vector<16x128xf32>
    %10 = arith.truncf %9 : vector<16x128xf32> to vector<16x128xbf16>
    %c1 = arith.constant 1 : index
    %c0_7 = arith.constant 0 : index
    %c0_8 = arith.constant 0 : index
    %11 = vector.load %arg5[%c1, %c0_7, %c0_8] : memref<9x128x64xbf16, #tpu.memory_space<vmem>>, vector<1x128x64xbf16>
    %12 = vector.shape_cast %11 : vector<1x128x64xbf16> to vector<128x64xbf16>
    %cst_9 = arith.constant dense<0.000000e+00> : vector<16x64xf32>
    %13 = tpu.matmul %10, %12, %cst_9 {dimension_numbers = #tpu.dot_dimension_numbers<[1], [0], [0], [1], [0, 0, 1, 1], [], []>} : vector<16x128xbf16>, vector<128x64xbf16>, vector<16x64xf32> -> vector<16x64xf32>
    %14 = arith.addf %8, %13 : vector<16x64xf32>
    %15 = vector.extract_strided_slice %2 {offsets = [2, 0], sizes = [16, 128], strides = [1, 1]} : vector<18x128xf32> to vector<16x128xf32>
    %16 = arith.truncf %15 : vector<16x128xf32> to vector<16x128xbf16>
    %c2 = arith.constant 2 : index
    %c0_10 = arith.constant 0 : index
    %c0_11 = arith.constant 0 : index
    %17 = vector.load %arg5[%c2, %c0_10, %c0_11] : memref<9x128x64xbf16, #tpu.memory_space<vmem>>, vector<1x128x64xbf16>
    %18 = vector.shape_cast %17 : vector<1x128x64xbf16> to vector<128x64xbf16>
    %cst_12 = arith.constant dense<0.000000e+00> : vector<16x64xf32>
    %19 = tpu.matmul %16, %18, %cst_12 {dimension_numbers = #tpu.dot_dimension_numbers<[1], [0], [0], [1], [0, 0, 1, 1], [], []>} : vector<16x128xbf16>, vector<128x64xbf16>, vector<16x64xf32> -> vector<16x64xf32>
    %20 = arith.addf %14, %19 : vector<16x64xf32>
    %c0_13 = arith.constant 0 : index
    %c0_14 = arith.constant 0 : index
    %c0_15 = arith.constant 0 : index
    %c0_16 = arith.constant 0 : index
    %21 = vector.load %arg3[%c0_13, %c0_14, %c0_15, %c0_16] : memref<1x1x18x128xf32, #tpu.memory_space<vmem>>, vector<1x1x18x128xf32>
    %22 = vector.shape_cast %21 : vector<1x1x18x128xf32> to vector<18x128xf32>
    %23 = vector.extract_strided_slice %22 {offsets = [0, 0], sizes = [16, 128], strides = [1, 1]} : vector<18x128xf32> to vector<16x128xf32>
    %24 = arith.truncf %23 : vector<16x128xf32> to vector<16x128xbf16>
    %c3 = arith.constant 3 : index
    %c0_17 = arith.constant 0 : index
    %c0_18 = arith.constant 0 : index
    %25 = vector.load %arg5[%c3, %c0_17, %c0_18] : memref<9x128x64xbf16, #tpu.memory_space<vmem>>, vector<1x128x64xbf16>
    %26 = vector.shape_cast %25 : vector<1x128x64xbf16> to vector<128x64xbf16>
    %cst_19 = arith.constant dense<0.000000e+00> : vector<16x64xf32>
    %27 = tpu.matmul %24, %26, %cst_19 {dimension_numbers = #tpu.dot_dimension_numbers<[1], [0], [0], [1], [0, 0, 1, 1], [], []>} : vector<16x128xbf16>, vector<128x64xbf16>, vector<16x64xf32> -> vector<16x64xf32>
    %28 = arith.addf %20, %27 : vector<16x64xf32>
    %29 = vector.extract_strided_slice %22 {offsets = [1, 0], sizes = [16, 128], strides = [1, 1]} : vector<18x128xf32> to vector<16x128xf32>
    %30 = arith.truncf %29 : vector<16x128xf32> to vector<16x128xbf16>
    %c4 = arith.constant 4 : index
    %c0_20 = arith.constant 0 : index
    %c0_21 = arith.constant 0 : index
    %31 = vector.load %arg5[%c4, %c0_20, %c0_21] : memref<9x128x64xbf16, #tpu.memory_space<vmem>>, vector<1x128x64xbf16>
    %32 = vector.shape_cast %31 : vector<1x128x64xbf16> to vector<128x64xbf16>
    %cst_22 = arith.constant dense<0.000000e+00> : vector<16x64xf32>
    %33 = tpu.matmul %30, %32, %cst_22 {dimension_numbers = #tpu.dot_dimension_numbers<[1], [0], [0], [1], [0, 0, 1, 1], [], []>} : vector<16x128xbf16>, vector<128x64xbf16>, vector<16x64xf32> -> vector<16x64xf32>
    %34 = arith.addf %28, %33 : vector<16x64xf32>
    %35 = vector.extract_strided_slice %22 {offsets = [2, 0], sizes = [16, 128], strides = [1, 1]} : vector<18x128xf32> to vector<16x128xf32>
    %36 = arith.truncf %35 : vector<16x128xf32> to vector<16x128xbf16>
    %c5 = arith.constant 5 : index
    %c0_23 = arith.constant 0 : index
    %c0_24 = arith.constant 0 : index
    %37 = vector.load %arg5[%c5, %c0_23, %c0_24] : memref<9x128x64xbf16, #tpu.memory_space<vmem>>, vector<1x128x64xbf16>
    %38 = vector.shape_cast %37 : vector<1x128x64xbf16> to vector<128x64xbf16>
    %cst_25 = arith.constant dense<0.000000e+00> : vector<16x64xf32>
    %39 = tpu.matmul %36, %38, %cst_25 {dimension_numbers = #tpu.dot_dimension_numbers<[1], [0], [0], [1], [0, 0, 1, 1], [], []>} : vector<16x128xbf16>, vector<128x64xbf16>, vector<16x64xf32> -> vector<16x64xf32>
    %40 = arith.addf %34, %39 : vector<16x64xf32>
    %c0_26 = arith.constant 0 : index
    %c0_27 = arith.constant 0 : index
    %c0_28 = arith.constant 0 : index
    %c0_29 = arith.constant 0 : index
    %41 = vector.load %arg4[%c0_26, %c0_27, %c0_28, %c0_29] : memref<1x1x18x128xf32, #tpu.memory_space<vmem>>, vector<1x1x18x128xf32>
    %42 = vector.shape_cast %41 : vector<1x1x18x128xf32> to vector<18x128xf32>
    %43 = vector.extract_strided_slice %42 {offsets = [0, 0], sizes = [16, 128], strides = [1, 1]} : vector<18x128xf32> to vector<16x128xf32>
    %44 = arith.truncf %43 : vector<16x128xf32> to vector<16x128xbf16>
    %c6 = arith.constant 6 : index
    %c0_30 = arith.constant 0 : index
    %c0_31 = arith.constant 0 : index
    %45 = vector.load %arg5[%c6, %c0_30, %c0_31] : memref<9x128x64xbf16, #tpu.memory_space<vmem>>, vector<1x128x64xbf16>
    %46 = vector.shape_cast %45 : vector<1x128x64xbf16> to vector<128x64xbf16>
    %cst_32 = arith.constant dense<0.000000e+00> : vector<16x64xf32>
    %47 = tpu.matmul %44, %46, %cst_32 {dimension_numbers = #tpu.dot_dimension_numbers<[1], [0], [0], [1], [0, 0, 1, 1], [], []>} : vector<16x128xbf16>, vector<128x64xbf16>, vector<16x64xf32> -> vector<16x64xf32>
    %48 = arith.addf %40, %47 : vector<16x64xf32>
    %49 = vector.extract_strided_slice %42 {offsets = [1, 0], sizes = [16, 128], strides = [1, 1]} : vector<18x128xf32> to vector<16x128xf32>
    %50 = arith.truncf %49 : vector<16x128xf32> to vector<16x128xbf16>
    %c7 = arith.constant 7 : index
    %c0_33 = arith.constant 0 : index
    %c0_34 = arith.constant 0 : index
    %51 = vector.load %arg5[%c7, %c0_33, %c0_34] : memref<9x128x64xbf16, #tpu.memory_space<vmem>>, vector<1x128x64xbf16>
    %52 = vector.shape_cast %51 : vector<1x128x64xbf16> to vector<128x64xbf16>
    %cst_35 = arith.constant dense<0.000000e+00> : vector<16x64xf32>
    %53 = tpu.matmul %50, %52, %cst_35 {dimension_numbers = #tpu.dot_dimension_numbers<[1], [0], [0], [1], [0, 0, 1, 1], [], []>} : vector<16x128xbf16>, vector<128x64xbf16>, vector<16x64xf32> -> vector<16x64xf32>
    %54 = arith.addf %48, %53 : vector<16x64xf32>
    %55 = vector.extract_strided_slice %42 {offsets = [2, 0], sizes = [16, 128], strides = [1, 1]} : vector<18x128xf32> to vector<16x128xf32>
    %56 = arith.truncf %55 : vector<16x128xf32> to vector<16x128xbf16>
    %c8 = arith.constant 8 : index
    %c0_36 = arith.constant 0 : index
    %c0_37 = arith.constant 0 : index
    %57 = vector.load %arg5[%c8, %c0_36, %c0_37] : memref<9x128x64xbf16, #tpu.memory_space<vmem>>, vector<1x128x64xbf16>
    %58 = vector.shape_cast %57 : vector<1x128x64xbf16> to vector<128x64xbf16>
    %cst_38 = arith.constant dense<0.000000e+00> : vector<16x64xf32>
    %59 = tpu.matmul %56, %58, %cst_38 {dimension_numbers = #tpu.dot_dimension_numbers<[1], [0], [0], [1], [0, 0, 1, 1], [], []>} : vector<16x128xbf16>, vector<128x64xbf16>, vector<16x64xf32> -> vector<16x64xf32>
    %60 = arith.addf %54, %59 : vector<16x64xf32>
    %c0_39 = arith.constant 0 : index
    %c0_40 = arith.constant 0 : index
    %61 = vector.load %arg6[%c0_39, %c0_40] : memref<1x64xf32, #tpu.memory_space<vmem>>, vector<1x64xf32>
    %62 = vector.broadcast %61 : vector<1x64xf32> to vector<16x64xf32>
    %63 = arith.addf %60, %62 : vector<16x64xf32>
    %cst_41 = arith.constant 0.000000e+00 : f32
    %64 = vector.broadcast %cst_41 : f32 to vector<16x64xf32>
    %65 = arith.maximumf %63, %64 : vector<16x64xf32>
    %c0_42 = arith.constant 0 : index
    %c0_43 = arith.constant 0 : index
    %c0_44 = arith.constant 0 : index
    %c0_45 = arith.constant 0 : index
    %66 = vector.load %arg7[%c0_42, %c0_43, %c0_44, %c0_45] : memref<1x1x16x64xf32, #tpu.memory_space<vmem>>, vector<1x1x16x64xf32>
    %67 = vector.shape_cast %66 : vector<1x1x16x64xf32> to vector<16x64xf32>
    %68 = vector.shape_cast %65 : vector<16x64xf32> to vector<1x1x16x64xf32>
    tpu.vector_store %arg7[%c0_42, %c0_43, %c0_44, %c0_45], %68 {strides = array<i32>} : memref<1x1x16x64xf32, #tpu.memory_space<vmem>>, vector<1x1x16x64xf32>,
    return
  }
  func.func @transform_0(%arg0: i32, %arg1: i32) -> (i32, i32, i32, i32) {
    %c0_i32 = arith.constant 0 : i32
    %0 = arith.addi %arg1, %c0_i32 : i32
    %c0_i32_0 = arith.constant 0 : i32
    %c0_i32_1 = arith.constant 0 : i32
    %c0_i32_2 = arith.constant 0 : i32
    return %arg0, %0, %c0_i32_0, %c0_i32_1 : i32, i32, i32, i32
  }
  func.func @transform_1(%arg0: i32, %arg1: i32) -> (i32, i32, i32, i32) {
    %c1_i32 = arith.constant 1 : i32
    %0 = arith.addi %arg1, %c1_i32 : i32
    %c0_i32 = arith.constant 0 : i32
    %c0_i32_0 = arith.constant 0 : i32
    %c0_i32_1 = arith.constant 0 : i32
    return %arg0, %0, %c0_i32, %c0_i32_0 : i32, i32, i32, i32
  }
  func.func @transform_2(%arg0: i32, %arg1: i32) -> (i32, i32, i32, i32) {
    %c2_i32 = arith.constant 2 : i32
    %0 = arith.addi %arg1, %c2_i32 : i32
    %c0_i32 = arith.constant 0 : i32
    %c0_i32_0 = arith.constant 0 : i32
    %c0_i32_1 = arith.constant 0 : i32
    return %arg0, %0, %c0_i32, %c0_i32_0 : i32, i32, i32, i32
  }
  func.func @transform_3(%arg0: i32, %arg1: i32) -> (i32, i32, i32) {
    %c0_i32 = arith.constant 0 : i32
    %c0_i32_0 = arith.constant 0 : i32
    %c0_i32_1 = arith.constant 0 : i32
    %c0_i32_2 = arith.constant 0 : i32
    return %c0_i32, %c0_i32_0, %c0_i32_1 : i32, i32, i32
  }
  func.func @transform_4(%arg0: i32, %arg1: i32) -> (i32, i32) {
    %c0_i32 = arith.constant 0 : i32
    %c0_i32_0 = arith.constant 0 : i32
    %c0_i32_1 = arith.constant 0 : i32
    return %c0_i32, %c0_i32_0 : i32, i32
  }
  func.func @transform_5(%arg0: i32, %arg1: i32) -> (i32, i32, i32, i32) {
    %c0_i32 = arith.constant 0 : i32
    %c0_i32_0 = arith.constant 0 : i32
    %c0_i32_1 = arith.constant 0 : i32
    return %arg0, %arg1, %c0_i32, %c0_i32_0 : i32, i32, i32, i32
  }
}

module attributes {stable_mosaic.version = 11 : i64} {
  func.func @_dconv_kernel(%arg0: i32, %arg1: i32, %arg2: memref<1x1x18x64xf32, #tpu.memory_space<vmem>>, %arg3: memref<1x1x18x64xf32, #tpu.memory_space<vmem>>, %arg4: memref<1x1x18x64xf32, #tpu.memory_space<vmem>>, %arg5: memref<9x64x8xbf16, #tpu.memory_space<vmem>>, %arg6: memref<1x8xf32, #tpu.memory_space<vmem>>, %arg7: memref<1x1x16x8xf32, #tpu.memory_space<vmem>>) attributes {dimension_semantics = [#tpu.dimension_semantics<parallel>, #tpu.dimension_semantics<parallel>], iteration_bounds = array<i64: 2, 16>, scalar_prefetch = 0 : i64, scratch_operands = 0 : i64, tpu.core_type = #tpu.core_type<tc>, window_params = [{transform_indices = @transform_0, window_bounds = array<i64: 1, 1, 18, 64>}, {transform_indices = @transform_1, window_bounds = array<i64: 1, 1, 18, 64>}, {transform_indices = @transform_2, window_bounds = array<i64: 1, 1, 18, 64>}, {pipeline_mode = #tpu.pipeline_mode<synchronous>, transform_indices = @transform_3, window_bounds = array<i64: 9, 64, 8>}, {pipeline_mode = #tpu.pipeline_mode<synchronous>, transform_indices = @transform_4, window_bounds = array<i64: 1, 8>}, {transform_indices = @transform_5, window_bounds = array<i64: 1, 1, 16, 8>}]} {
    %cst = arith.constant 0.000000e+00 : f32
    %0 = vector.broadcast %cst : f32 to vector<16x8xf32>
    %c0 = arith.constant 0 : index
    %c0_0 = arith.constant 0 : index
    %c0_1 = arith.constant 0 : index
    %c0_2 = arith.constant 0 : index
    %1 = vector.load %arg2[%c0, %c0_0, %c0_1, %c0_2] : memref<1x1x18x64xf32, #tpu.memory_space<vmem>>, vector<1x1x18x64xf32>
    %2 = vector.shape_cast %1 : vector<1x1x18x64xf32> to vector<18x64xf32>
    %3 = vector.extract_strided_slice %2 {offsets = [0, 0], sizes = [16, 64], strides = [1, 1]} : vector<18x64xf32> to vector<16x64xf32>
    %4 = arith.truncf %3 : vector<16x64xf32> to vector<16x64xbf16>
    %c0_3 = arith.constant 0 : index
    %c0_4 = arith.constant 0 : index
    %c0_5 = arith.constant 0 : index
    %5 = vector.load %arg5[%c0_3, %c0_4, %c0_5] : memref<9x64x8xbf16, #tpu.memory_space<vmem>>, vector<1x64x8xbf16>
    %6 = vector.shape_cast %5 : vector<1x64x8xbf16> to vector<64x8xbf16>
    %cst_6 = arith.constant dense<0.000000e+00> : vector<16x8xf32>
    %7 = tpu.matmul %4, %6, %cst_6 {dimension_numbers = #tpu.dot_dimension_numbers<[1], [0], [0], [1], [0, 0, 1, 1], [], []>} : vector<16x64xbf16>, vector<64x8xbf16>, vector<16x8xf32> -> vector<16x8xf32>
    %8 = arith.addf %0, %7 : vector<16x8xf32>
    %9 = vector.extract_strided_slice %2 {offsets = [1, 0], sizes = [16, 64], strides = [1, 1]} : vector<18x64xf32> to vector<16x64xf32>
    %10 = arith.truncf %9 : vector<16x64xf32> to vector<16x64xbf16>
    %c1 = arith.constant 1 : index
    %c0_7 = arith.constant 0 : index
    %c0_8 = arith.constant 0 : index
    %11 = vector.load %arg5[%c1, %c0_7, %c0_8] : memref<9x64x8xbf16, #tpu.memory_space<vmem>>, vector<1x64x8xbf16>
    %12 = vector.shape_cast %11 : vector<1x64x8xbf16> to vector<64x8xbf16>
    %cst_9 = arith.constant dense<0.000000e+00> : vector<16x8xf32>
    %13 = tpu.matmul %10, %12, %cst_9 {dimension_numbers = #tpu.dot_dimension_numbers<[1], [0], [0], [1], [0, 0, 1, 1], [], []>} : vector<16x64xbf16>, vector<64x8xbf16>, vector<16x8xf32> -> vector<16x8xf32>
    %14 = arith.addf %8, %13 : vector<16x8xf32>
    %15 = vector.extract_strided_slice %2 {offsets = [2, 0], sizes = [16, 64], strides = [1, 1]} : vector<18x64xf32> to vector<16x64xf32>
    %16 = arith.truncf %15 : vector<16x64xf32> to vector<16x64xbf16>
    %c2 = arith.constant 2 : index
    %c0_10 = arith.constant 0 : index
    %c0_11 = arith.constant 0 : index
    %17 = vector.load %arg5[%c2, %c0_10, %c0_11] : memref<9x64x8xbf16, #tpu.memory_space<vmem>>, vector<1x64x8xbf16>
    %18 = vector.shape_cast %17 : vector<1x64x8xbf16> to vector<64x8xbf16>
    %cst_12 = arith.constant dense<0.000000e+00> : vector<16x8xf32>
    %19 = tpu.matmul %16, %18, %cst_12 {dimension_numbers = #tpu.dot_dimension_numbers<[1], [0], [0], [1], [0, 0, 1, 1], [], []>} : vector<16x64xbf16>, vector<64x8xbf16>, vector<16x8xf32> -> vector<16x8xf32>
    %20 = arith.addf %14, %19 : vector<16x8xf32>
    %c0_13 = arith.constant 0 : index
    %c0_14 = arith.constant 0 : index
    %c0_15 = arith.constant 0 : index
    %c0_16 = arith.constant 0 : index
    %21 = vector.load %arg3[%c0_13, %c0_14, %c0_15, %c0_16] : memref<1x1x18x64xf32, #tpu.memory_space<vmem>>, vector<1x1x18x64xf32>
    %22 = vector.shape_cast %21 : vector<1x1x18x64xf32> to vector<18x64xf32>
    %23 = vector.extract_strided_slice %22 {offsets = [0, 0], sizes = [16, 64], strides = [1, 1]} : vector<18x64xf32> to vector<16x64xf32>
    %24 = arith.truncf %23 : vector<16x64xf32> to vector<16x64xbf16>
    %c3 = arith.constant 3 : index
    %c0_17 = arith.constant 0 : index
    %c0_18 = arith.constant 0 : index
    %25 = vector.load %arg5[%c3, %c0_17, %c0_18] : memref<9x64x8xbf16, #tpu.memory_space<vmem>>, vector<1x64x8xbf16>
    %26 = vector.shape_cast %25 : vector<1x64x8xbf16> to vector<64x8xbf16>
    %cst_19 = arith.constant dense<0.000000e+00> : vector<16x8xf32>
    %27 = tpu.matmul %24, %26, %cst_19 {dimension_numbers = #tpu.dot_dimension_numbers<[1], [0], [0], [1], [0, 0, 1, 1], [], []>} : vector<16x64xbf16>, vector<64x8xbf16>, vector<16x8xf32> -> vector<16x8xf32>
    %28 = arith.addf %20, %27 : vector<16x8xf32>
    %29 = vector.extract_strided_slice %22 {offsets = [1, 0], sizes = [16, 64], strides = [1, 1]} : vector<18x64xf32> to vector<16x64xf32>
    %30 = arith.truncf %29 : vector<16x64xf32> to vector<16x64xbf16>
    %c4 = arith.constant 4 : index
    %c0_20 = arith.constant 0 : index
    %c0_21 = arith.constant 0 : index
    %31 = vector.load %arg5[%c4, %c0_20, %c0_21] : memref<9x64x8xbf16, #tpu.memory_space<vmem>>, vector<1x64x8xbf16>
    %32 = vector.shape_cast %31 : vector<1x64x8xbf16> to vector<64x8xbf16>
    %cst_22 = arith.constant dense<0.000000e+00> : vector<16x8xf32>
    %33 = tpu.matmul %30, %32, %cst_22 {dimension_numbers = #tpu.dot_dimension_numbers<[1], [0], [0], [1], [0, 0, 1, 1], [], []>} : vector<16x64xbf16>, vector<64x8xbf16>, vector<16x8xf32> -> vector<16x8xf32>
    %34 = arith.addf %28, %33 : vector<16x8xf32>
    %35 = vector.extract_strided_slice %22 {offsets = [2, 0], sizes = [16, 64], strides = [1, 1]} : vector<18x64xf32> to vector<16x64xf32>
    %36 = arith.truncf %35 : vector<16x64xf32> to vector<16x64xbf16>
    %c5 = arith.constant 5 : index
    %c0_23 = arith.constant 0 : index
    %c0_24 = arith.constant 0 : index
    %37 = vector.load %arg5[%c5, %c0_23, %c0_24] : memref<9x64x8xbf16, #tpu.memory_space<vmem>>, vector<1x64x8xbf16>
    %38 = vector.shape_cast %37 : vector<1x64x8xbf16> to vector<64x8xbf16>
    %cst_25 = arith.constant dense<0.000000e+00> : vector<16x8xf32>
    %39 = tpu.matmul %36, %38, %cst_25 {dimension_numbers = #tpu.dot_dimension_numbers<[1], [0], [0], [1], [0, 0, 1, 1], [], []>} : vector<16x64xbf16>, vector<64x8xbf16>, vector<16x8xf32> -> vector<16x8xf32>
    %40 = arith.addf %34, %39 : vector<16x8xf32>
    %c0_26 = arith.constant 0 : index
    %c0_27 = arith.constant 0 : index
    %c0_28 = arith.constant 0 : index
    %c0_29 = arith.constant 0 : index
    %41 = vector.load %arg4[%c0_26, %c0_27, %c0_28, %c0_29] : memref<1x1x18x64xf32, #tpu.memory_space<vmem>>, vector<1x1x18x64xf32>
    %42 = vector.shape_cast %41 : vector<1x1x18x64xf32> to vector<18x64xf32>
    %43 = vector.extract_strided_slice %42 {offsets = [0, 0], sizes = [16, 64], strides = [1, 1]} : vector<18x64xf32> to vector<16x64xf32>
    %44 = arith.truncf %43 : vector<16x64xf32> to vector<16x64xbf16>
    %c6 = arith.constant 6 : index
    %c0_30 = arith.constant 0 : index
    %c0_31 = arith.constant 0 : index
    %45 = vector.load %arg5[%c6, %c0_30, %c0_31] : memref<9x64x8xbf16, #tpu.memory_space<vmem>>, vector<1x64x8xbf16>
    %46 = vector.shape_cast %45 : vector<1x64x8xbf16> to vector<64x8xbf16>
    %cst_32 = arith.constant dense<0.000000e+00> : vector<16x8xf32>
    %47 = tpu.matmul %44, %46, %cst_32 {dimension_numbers = #tpu.dot_dimension_numbers<[1], [0], [0], [1], [0, 0, 1, 1], [], []>} : vector<16x64xbf16>, vector<64x8xbf16>, vector<16x8xf32> -> vector<16x8xf32>
    %48 = arith.addf %40, %47 : vector<16x8xf32>
    %49 = vector.extract_strided_slice %42 {offsets = [1, 0], sizes = [16, 64], strides = [1, 1]} : vector<18x64xf32> to vector<16x64xf32>
    %50 = arith.truncf %49 : vector<16x64xf32> to vector<16x64xbf16>
    %c7 = arith.constant 7 : index
    %c0_33 = arith.constant 0 : index
    %c0_34 = arith.constant 0 : index
    %51 = vector.load %arg5[%c7, %c0_33, %c0_34] : memref<9x64x8xbf16, #tpu.memory_space<vmem>>, vector<1x64x8xbf16>
    %52 = vector.shape_cast %51 : vector<1x64x8xbf16> to vector<64x8xbf16>
    %cst_35 = arith.constant dense<0.000000e+00> : vector<16x8xf32>
    %53 = tpu.matmul %50, %52, %cst_35 {dimension_numbers = #tpu.dot_dimension_numbers<[1], [0], [0], [1], [0, 0, 1, 1], [], []>} : vector<16x64xbf16>, vector<64x8xbf16>, vector<16x8xf32> -> vector<16x8xf32>
    %54 = arith.addf %48, %53 : vector<16x8xf32>
    %55 = vector.extract_strided_slice %42 {offsets = [2, 0], sizes = [16, 64], strides = [1, 1]} : vector<18x64xf32> to vector<16x64xf32>
    %56 = arith.truncf %55 : vector<16x64xf32> to vector<16x64xbf16>
    %c8 = arith.constant 8 : index
    %c0_36 = arith.constant 0 : index
    %c0_37 = arith.constant 0 : index
    %57 = vector.load %arg5[%c8, %c0_36, %c0_37] : memref<9x64x8xbf16, #tpu.memory_space<vmem>>, vector<1x64x8xbf16>
    %58 = vector.shape_cast %57 : vector<1x64x8xbf16> to vector<64x8xbf16>
    %cst_38 = arith.constant dense<0.000000e+00> : vector<16x8xf32>
    %59 = tpu.matmul %56, %58, %cst_38 {dimension_numbers = #tpu.dot_dimension_numbers<[1], [0], [0], [1], [0, 0, 1, 1], [], []>} : vector<16x64xbf16>, vector<64x8xbf16>, vector<16x8xf32> -> vector<16x8xf32>
    %60 = arith.addf %54, %59 : vector<16x8xf32>
    %c0_39 = arith.constant 0 : index
    %c0_40 = arith.constant 0 : index
    %61 = vector.load %arg6[%c0_39, %c0_40] : memref<1x8xf32, #tpu.memory_space<vmem>>, vector<1x8xf32>
    %62 = vector.broadcast %61 : vector<1x8xf32> to vector<16x8xf32>
    %63 = arith.addf %60, %62 : vector<16x8xf32>
    %c0_41 = arith.constant 0 : index
    %c0_42 = arith.constant 0 : index
    %c0_43 = arith.constant 0 : index
    %c0_44 = arith.constant 0 : index
    %64 = vector.load %arg7[%c0_41, %c0_42, %c0_43, %c0_44] : memref<1x1x16x8xf32, #tpu.memory_space<vmem>>, vector<1x1x16x8xf32>
    %65 = vector.shape_cast %64 : vector<1x1x16x8xf32> to vector<16x8xf32>
    %66 = vector.shape_cast %63 : vector<16x8xf32> to vector<1x1x16x8xf32>
    tpu.vector_store %arg7[%c0_41, %c0_42, %c0_43, %c0_44], %66 {strides = array<i32>} : memref<1x1x16x8xf32, #tpu.memory_space<vmem>>, vector<1x1x16x8xf32>,
    return
  }
  func.func @transform_0(%arg0: i32, %arg1: i32) -> (i32, i32, i32, i32) {
    %c0_i32 = arith.constant 0 : i32
    %0 = arith.addi %arg1, %c0_i32 : i32
    %c0_i32_0 = arith.constant 0 : i32
    %c0_i32_1 = arith.constant 0 : i32
    %c0_i32_2 = arith.constant 0 : i32
    return %arg0, %0, %c0_i32_0, %c0_i32_1 : i32, i32, i32, i32
  }
  func.func @transform_1(%arg0: i32, %arg1: i32) -> (i32, i32, i32, i32) {
    %c1_i32 = arith.constant 1 : i32
    %0 = arith.addi %arg1, %c1_i32 : i32
    %c0_i32 = arith.constant 0 : i32
    %c0_i32_0 = arith.constant 0 : i32
    %c0_i32_1 = arith.constant 0 : i32
    return %arg0, %0, %c0_i32, %c0_i32_0 : i32, i32, i32, i32
  }
  func.func @transform_2(%arg0: i32, %arg1: i32) -> (i32, i32, i32, i32) {
    %c2_i32 = arith.constant 2 : i32
    %0 = arith.addi %arg1, %c2_i32 : i32
    %c0_i32 = arith.constant 0 : i32
    %c0_i32_0 = arith.constant 0 : i32
    %c0_i32_1 = arith.constant 0 : i32
    return %arg0, %0, %c0_i32, %c0_i32_0 : i32, i32, i32, i32
  }
  func.func @transform_3(%arg0: i32, %arg1: i32) -> (i32, i32, i32) {
    %c0_i32 = arith.constant 0 : i32
    %c0_i32_0 = arith.constant 0 : i32
    %c0_i32_1 = arith.constant 0 : i32
    %c0_i32_2 = arith.constant 0 : i32
    return %c0_i32, %c0_i32_0, %c0_i32_1 : i32, i32, i32
  }
  func.func @transform_4(%arg0: i32, %arg1: i32) -> (i32, i32) {
    %c0_i32 = arith.constant 0 : i32
    %c0_i32_0 = arith.constant 0 : i32
    %c0_i32_1 = arith.constant 0 : i32
    return %c0_i32, %c0_i32_0 : i32, i32
  }
  func.func @transform_5(%arg0: i32, %arg1: i32) -> (i32, i32, i32, i32) {
    %c0_i32 = arith.constant 0 : i32
    %c0_i32_0 = arith.constant 0 : i32
    %c0_i32_1 = arith.constant 0 : i32
    return %arg0, %arg1, %c0_i32, %c0_i32_0 : i32, i32, i32, i32
  }
}

</mosaic_0001>

<bundles_post_ra>
// kernel: sft_net_forward.19
= control target key start
LH: loop header
LB: loop body
LE: loop exit
PB: predicated region body
PF: predicated region fallthrough
CT: control target
= control target key end

     0   :  { %10 = vsyncpa [#allocation3], 0  ;;  %s1312_s18 = smov 0   ;;  %s1314_s19 = smov 0   ;;  %s1521_s0 = inlined_call_operand.vmem [shape: f32[2,18,18,3], index: 0, kind: input, shape index: {}, may-alias: {0,1,2}]   ;;  %s1522_s1 = inlined_call_operand.vmem [shape: f32[2,18,18,3], index: 1, kind: input, shape index: {}, may-alias: {0,1,2}]   ;;  %s1523_s2 = inlined_call_operand.vmem [shape: f32[2,18,18,3], index: 2, kind: input, shape index: {}, may-alias: {0,1,2}]   ;;  %s1524_s3 = inlined_call_operand.vmem [shape: bf16[9,3,64], index: 3, kind: input, shape index: {}]   ;;  %s1525_s4 = inlined_call_operand.hbm [shape: f32[1,64], index: 4, kind: input, shape index: {}]   ;;  %s1526_s5 = inlined_call_operand.vmem [shape: f32[2,16,16,64], index: 5, kind: output, shape index: {}]  }
   0x1   :  { %s1316_s20 = smov 0   ;;  %s1318_s21 = smov 0  }
   0x2   :  { %s1320_s22 = smov 0  }
   0x3 LB: > { %s1043_s23 = sadd.s32 4294967295, %s1276_s22   ;;  %s25_s24 = sadd.s32 1, %s1268_s20  ;;  %s1276_s22 = sphi %s1320_s22, %s16_s22   ;;  %s1272_s21 = sphi %s1318_s21, %s1540_s21   ;;  %s1268_s20 = sphi %s1316_s20, %s1539_s20   ;;  %s1264_s19 = sphi %s1314_s19, %s1538_s19   ;;  %s1260_s18 = sphi %s1312_s18, %s1537_s18  }
   0x4   : > { %p26_p0 = scmp.ge.s32.totalorder %s25_s24, 16  ;;  %s28_s25 = sadd.s32 1, %s1272_s21 }
   0x5   : > { %p1045_p1 = scmp.ge.s32.totalorder %s1276_s22, 1  ;;  %p191_p2 = scmp.lt.s32.totalorder %s1276_s22, 33 }
   0x6   : > { %s1542_s24 = smov (%p26_p0, %s25_s24), 0  ;;  %s1544_s25 = smov (!%p26_p0, %s28_s25), %s1272_s21 }
   0x7   : > { %p1345_p3 = pnand %p1045_p1, %p191_p2  ;;  %p30_p4 = scmp.ge.s32.totalorder %s1544_s25, 2 }
   0x8   : > { %p1349_p5 = scmp.eq.s32.totalorder %s1043_s23, 0  ;;  %s1278_s28 = smov [#allocation2]  }
   0x9   : > { %s1530_s26 = scalar_select %p1345_p3, 1, 0 }
   0xa   : > { %s1531_s27 = scalar_select %p1349_p5, 1, 0 }
   0xb   : > { %p1156_p6 = pneg %p1345_p3  ;;  %s1546_s25 = smov (%p30_p4, %s1544_s25), 0 }
   0xc   : > { %s207_s29 = sshll.u32 %s1278_s28, 4  ;;  %s1206_s8 = scalar_lea.hbm %s1525_s4, 16  ;;  %s208_s29 = int_to_ptr.vmem [resolvable:$true] %s207_s29 }
   0xd   : > { %p1359_p7 = pnand %p1349_p5, %p1156_p6  ;;  %p1207_p8 = scmp.ne.s32.totalorder %s1525_s4, %s1206_s8 }
   0xe   : > { %p1213_p12 = scmp.lt.u32.totalorder %s1206_s8, %s1525_s4 }
   0xf   : > { %p1208_p9 = pneg %p1359_p7 }
  0x11   : > { %p1209_p10 = pnand %p1208_p9, %p1207_p8 }
  0x13   : > { %p1210_p11 = pneg %p1209_p10 }
  0x15   : > { %p1215_p13 = pnand %p1213_p12, %p1210_p11 }
  0x17   : > { %1218 = shalt.err (!%p1215_p13)
}
  0x18   : > { %s1219_s13 = scalar_lea.vmem %s208_s29, 16  ;;  %s1226_s14 = scalar_lea.vmem %s208_s29, 32 }
  0x19   : > { %p1220_p0 = scmp.ne.s32.totalorder %s208_s29, %s1219_s13  ;;  %p1227_p4 = scmp.lt.s32.totalorder %s208_s29, %s208_s29 }
  0x1a   : > { %p1228_p6 = scmp.lt.s32.totalorder %s1226_s14, %s1219_s13 }
  0x1b   : > { %p1222_p1 = pnand %p1220_p0, %p1208_p9 }
  0x1c   : > { %p1229_p5 = por %p1228_p6, %p1227_p4 }
  0x1d   : > { %p1223_p2 = pneg %p1222_p1 }
  0x1f   : > { %p1230_p3 = pnand %p1229_p5, %p1223_p2 }
  0x21   : > { %1233 = shalt.err (!%p1230_p3)
}
  0x22   : > { %1159 = dma.hbm_to_vmem [thread:$0]  (!%p1359_p7), %s1525_s4, 16, %s208_s29, [#allocation3]  }
  0x23   : > { %p1533_p8 = scmp.ne.s32.totalorder %s1530_s26, 0 }
  0x24   : > { %p1534_p10 = scmp.ne.s32.totalorder (!%p1533_p8), %s1531_s27, 0 }
  0x25   : > { %260 = sbr.rel (%p1533_p8) target bundleno = 316 (0x13c), region = 40 }
  0x2c   : > { %1255 = dma.done.wait (%p1534_p10), [#allocation3], 16  }
  0x2d   : > { %1257 = vsyncadd (%p1534_p10), [#allocation3], 4294967280  ;;  %vm382_vm0 = vcmask 1040384   ;;  %v1279_v0 = vmov 0.0   ;;  %p316_p3 = scmp.lt.s32.totalorder %s1264_s19, 1  ;;  %p318_p5 = scmp.lt.s32.totalorder %s1260_s18, 17 }
  0x2e   : > { %1094 = vmatprep.subr.bf16.mxu0 %v1279_v0  ;;  %1100 = vmatprep.subr.bf16.mxu1 %v1279_v0  ;;  %vm383_vm1 = vcmask 1041408   ;;  %v1280_v1 = vmov 65535   ;;  %vm1281_vm2 = vmmov 0   ;;  %s325_s17 = sadd.s32 1, %s1260_s18  ;;  %s336_s27 = sadd.s32 2, %s1260_s18  ;;  %vm378_vm3 = vcmask 23552  }
  0x2f   : > { %v384_v2 = vsel %vm382_vm0, 4294967295, %v1280_v1  ;;  %1096 = vmatprep.mubr.msk.bf16.mxu0 %vm1281_vm2, %v1279_v0  ;;  %1102 = vmatprep.mubr.msk.bf16.mxu1 %vm1281_vm2, %v1279_v0  ;;  %s1548_s19 = smov (!%p316_p3, %s1264_s19), 1  ;;  %v1056_v4 = vld [vmem:[%s1524_s3 + $0x2] sm:$0x3]  ;;  %v361_v5 = vld [vmem:[%s1524_s3] sm:$0x3] }
  0x30   : > { %s319_s23 = scalar_select %p318_p5, %s1260_s18, 17  ;;  %v1398_v3 = vsel %vm383_vm1, %v384_v2, 0  ;;  %v1061_v8 = vld [vmem:[%s1524_s3 + $0x6] sm:$0x3]  ;;  %v1059_v18 = vld [vmem:[%s1524_s3 + $0x4] sm:$0x3] }
  0x31   : > { %s1401_s26 = smul.u32 54, %s1548_s19  ;;  %p1410_p7 = scmp.lt.s32.totalorder %s325_s17, 17  ;;  %v387_v6 = vand.u32 %v1056_v4, %v1398_v3  ;;  %v433_v7 = vand.u32 %v1398_v3, %v361_v5  ;;  %v543_v12 = vand.u32 %v1061_v8, %v1398_v3  ;;  %vm365_vm4 = vsmask.f32 7424  ;;  %v1065_v21 = vld [vmem:[%s1524_s3 + $0xa] sm:$0x3] }
  0x32   : > { %s1148_s28 = smul.u32 3, %s319_s23  ;;  %p1420_p9 = scmp.lt.s32.totalorder %s336_s27, 17  ;;  %v488_v23 = vand.u32 %v1059_v18, %v1398_v3  ;;  %v662_v31 = vand.u32 %v1065_v21, %v1398_v3  ;;  %v1063_v36 = vld [vmem:[%s1524_s3 + $0x8] sm:$0x3]  ;;  %vm480_vm5 = vcmask 1046528   ;;  %vm890_vm6 = vcmask 523264  }
  0x33   : > { %1095 = vmatpush3.bf16.msra.mxu0 %v387_v6  ;;  %1101 = vmatpush3.bf16.msra.mxu1 %v433_v7  ;;  %s1550_s17 = smov (!%p1410_p7, %s325_s17), 17  ;;  %v1069_v41 = vld [vmem:[%s1524_s3 + $0xe] sm:$0x3]  ;;  %v606_v44 = vand.u32 %v1063_v36, %v1398_v3  ;;  %v1067_v56 = vld [vmem:[%s1524_s3 + $0xc] sm:$0x3]  ;;  %p349_p11 = scmp.lt.s32.totalorder %s1260_s18, 15 }
  0x34   : > { %s322_s9 = sadd.s32 %s1401_s26, %s1148_s28  ;;  %1106 = vmatprep.subr.bf16.mxu0 %v1279_v0  ;;  %1112 = vmatprep.subr.bf16.mxu1 %v1279_v0  ;;  %s1552_s27 = smov (!%p1420_p9, %s336_s27), 17  ;;  %v780_v49 = vand.u32 %v1069_v41, %v1398_v3  ;;  %v717_v60 = vand.u32 %v1067_v56, %v1398_v3  ;;  %v1071_v62 = vld [vmem:[%s1524_s3 + $0x10] sm:$0x3] }
  0x35   : > { %s1050_s13 = sshll.u32 %s322_s9, 3  ;;  %s1150_s23 = smul.u32 3, %s1550_s17  ;;  %v836_v63 = vand.u32 %v1071_v62, %v1398_v3 }
  0x36   : > { %s324_s16 = scalar_lea.vmem %s1521_s0, %s1050_s13  ;;  %s1151_s28 = smul.u32 3, %s1552_s27 }
  0x37   : > { %v357_v9 = vld [vmem:[%s324_s16] sm:$0xff]  ;;  %v358_v10 = vld [vmem:[%s324_s16 + $0x8] sm:$0xff]  ;;  %v359_v11 = vld [vmem:[%s324_s16 + $0x10] sm:$0x3]  ;;  %s332_s6 = sadd.s32 %s1150_s23, %s1401_s26  ;;  %s1554_s18 = smov (!%p349_p11, %s1260_s18), 15 }
  0x38   : > { %v360_v13 = vpack.c.bf16 %v358_v10, %v357_v9  ;;  %v362_v14 = vpack.c.bf16 %v359_v11, %v359_v11  ;;  %s1051_s7 = sshll.u32 %s332_s6, 3  ;;  %s343_s17 = sadd.s32 %s1151_s28, %s1401_s26 }
  0x39   : > { %s334_s27 = scalar_lea.vmem %s1522_s1, %s1051_s7  ;;  %s1052_s12 = sshll.u32 %s343_s17, 3 }
  0x3a   : > { %v367_v15 = vshrl.u32 %v360_v13, 16  ;;  %v369_v16 = vshll.u32 %v360_v13, 16  ;;  %v374_v17 = vshll.u32 %v362_v14, 16  ;;  %1103 = vmatmul.mubr.msk.bf16.vlgmr.msra.gmra.mrb[0].mxu1 %vm378_vm3, %v360_v13  ;;  %v533_v24 = vld [vmem:[%s334_s27] sm:$0xff]  ;;  %v534_v25 = vld [vmem:[%s334_s27 + $0x8] sm:$0xff]  ;;  %s345_s15 = scalar_lea.vmem %s1523_s2, %s1052_s12  ;;  %v481_v34 = vrot.slane %v360_v13, 1 }
  0x3b   : > { %1113 = vmatpush3.bf16.msra.mxu1 %v543_v12  ;;  %1114 = vmatprep.mubr.msk.bf16.mxu1 %vm1281_vm2, %v1279_v0  ;;  %v536_v26 = vpack.c.bf16 %v534_v25, %v533_v24  ;;  %v535_v27 = vld [vmem:[%s334_s27 + $0x10] sm:$0x3]  ;;  %v707_v28 = vld [vmem:[%s345_s15] sm:$0xff]  ;;  %v708_v29 = vld [vmem:[%s345_s15 + $0x8] sm:$0xff]  ;;  %v482_v35 = vrot.slane %v362_v14, 1  ;;  %s1053_s17 = sshll.u32 %s1554_s18, 1 }
  0x3c   : > { %v371_v19 = vrot.slane %v369_v16, 1  ;;  %v376_v20 = vrot.slane %v374_v17, 1  ;;  %1124 = vmatprep.subr.bf16.mxu1 %v1279_v0  ;;  %v710_v32 = vpack.c.bf16 %v708_v29, %v707_v28  ;;  %v709_v33 = vld [vmem:[%s345_s15 + $0x10] sm:$0x3]  ;;  %v588_v37 = vpack.c.bf16 %v535_v27, %v535_v27  ;;  %s1054_s8 = sshll.u32 %s1548_s19, 5 }
  0x3d   : > { %v593_v38 = vshll.u32 %v536_v26, 16  ;;  %v655_v39 = vrot.slane %v536_v26, 1  ;;  %v762_v42 = vpack.c.bf16 %v709_v33, %v709_v33  ;;  %v483_v45 = vsel %vm480_vm5, %v481_v34, %v482_v35  ;;  %s353_s9 = sadd.s32 %s1054_s8, %s1053_s17 }
  0x3e   : > { %v372_v22 = vor.u32 %v371_v19, %v367_v15  ;;  %v656_v40 = vrot.slane %v588_v37, 1  ;;  %v767_v43 = vshll.u32 %v710_v32, 16  ;;  %v591_v46 = vshrl.u32 %v536_v26, 16  ;;  %s1055_s27 = sshll.u32 %s353_s9, 3 }
  0x3f   : > { %v595_v47 = vrot.slane %v593_v38, 1  ;;  %v598_v48 = vshll.u32 %v588_v37, 16  ;;  %v765_v51 = vshrl.u32 %v710_v32, 16  ;;  %v772_v53 = vshll.u32 %v762_v42, 16  ;;  %s355_s12 = scalar_lea.vmem %s1526_s5, %s1055_s27 }
  0x40   : > { %v377_v30 = vsel %vm365_vm4, %v372_v22, %v376_v20  ;;  %v657_v50 = vsel %vm480_vm5, %v655_v39, %v656_v40  ;;  %v769_v52 = vrot.slane %v767_v43, 1  ;;  %v829_v1 = vrot.slane %v710_v32, 1 }
  0x41   : > { %1097 = vmatmul.mubr.msk.bf16.vlgmr.msra.gmra.mrb[0].mxu0 %vm378_vm3, %v377_v30  ;;  %v596_v54 = vor.u32 %v595_v47, %v591_v46  ;;  %v600_v55 = vrot.slane %v598_v48, 1  ;;  %v774_v58 = vrot.slane %v772_v53, 1  ;;  %v830_v2 = vrot.slane %v762_v42, 1 }
  0x42   : > { %1107 = vmatpush3.bf16.msra.mxu0 %v488_v23  ;;  %1108 = vmatprep.mubr.msk.bf16.mxu0 %vm1281_vm2, %v1279_v0  ;;  %v770_v57 = vor.u32 %v769_v52, %v765_v51 }
  0x43   : > { %1118 = vmatprep.subr.bf16.mxu0 %v1279_v0  ;;  %1115 = vmatmul.mubr.msk.bf16.vlgmr.msra.gmra.mrb[4].mxu1 %vm378_vm3, %v536_v26  ;;  %v601_v59 = vsel %vm365_vm4, %v596_v54, %v600_v55  ;;  %v831_v4 = vsel %vm480_vm5, %v829_v1, %v830_v2 }
  0x44   : > { %1125 = vmatpush3.bf16.msra.mxu1 %v662_v31  ;;  %1126 = vmatprep.mubr.msk.bf16.mxu1 %vm1281_vm2, %v1279_v0  ;;  %v775_v61 = vsel %vm365_vm4, %v770_v57, %v774_v58 }
  0x45   : > { %1136 = vmatprep.subr.bf16.mxu1 %v1279_v0 }
  0x49   : > { %1109 = vmatmul.mubr.msk.bf16.vlgmr.msra.gmra.mrb[4].mxu0 %vm378_vm3, %v483_v45 }
  0x4a   : > { %1119 = vmatpush3.bf16.msra.mxu0 %v606_v44  ;;  %1120 = vmatprep.mubr.msk.bf16.mxu0 %vm1281_vm2, %v1279_v0 }
  0x4b   : > { %1130 = vmatprep.subr.bf16.mxu0 %v1279_v0  ;;  %1127 = vmatmul.mubr.msk.bf16.vlgmr.msra.gmra.mrb[8].mxu1 %vm378_vm3, %v657_v50  ;;  %v1073_v50 = vld [vmem:[#allocation2] ss:$0 sm:$0xff] }
  0x4c   : > { %1137 = vmatpush3.bf16.msra.mxu1 %v780_v49  ;;  %1138 = vmatprep.mubr.msk.bf16.mxu1 %vm1281_vm2, %v1279_v0 }
  0x51   : > { %1121 = vmatmul.mubr.msk.bf16.vlgmr.msra.gmra.mrb[8].mxu0 %vm378_vm3, %v601_v59 }
  0x52   : > { %1131 = vmatpush3.bf16.msra.mxu0 %v717_v60  ;;  %1132 = vmatprep.mubr.msk.bf16.mxu0 %vm1281_vm2, %v1279_v0 }
  0x53   : > { %1142 = vmatprep.subr.bf16.mxu0 %v1279_v0  ;;  %1139 = vmatmul.mubr.msk.bf16.vlgmr.msra.gmra.mrb[12].mxu1 %vm378_vm3, %v775_v61 }
  0x59   : > { %1133 = vmatmul.mubr.msk.bf16.vlgmr.msra.gmra.mrb[12].mxu0 %vm378_vm3, %v710_v32 }
  0x5a   : > { %1143 = vmatpush3.bf16.msra.mxu0 %v836_v63  ;;  %1144 = vmatprep.mubr.msk.bf16.mxu0 %vm1281_vm2, %v1279_v0 }
  0x61   : > { %1145 = vmatmul.mubr.msk.bf16.vlgmr.msra.gmra.mrb[16].mxu0 %vm378_vm3, %v831_v4 }
 0x10d   : > { %v469_v5 = vpop.f32.mrb[0].mxu1 }
 0x10e   : > { %v1104_v6 = vpop.f32.mrb[1].mxu1 }
 0x10f   : > { %v472_v7 = vpop.f32.mrb[2].mxu1 }
 0x110   : > { %v1105_v8 = vpop.f32.mrb[3].mxu1 }
 0x114   : > { %v423_v9 = vpop.f32.mrb[0].mxu0 }
 0x115   : > { %v470_v10 = vadd.f32 %v469_v5, %v423_v9  ;;  %v1098_v11 = vpop.f32.mrb[1].mxu0 }
 0x116   : > { %v426_v3 = vpop.f32.mrb[2].mxu0  ;;  %v579_v12 = vpop.f32.mrb[4].mxu1 }
 0x117   : > { %v473_v13 = vadd.f32 %v472_v7, %v426_v3  ;;  %v1099_v14 = vpop.f32.mrb[3].mxu0  ;;  %v1116_v15 = vpop.f32.mrb[5].mxu1 }
 0x118   : > { %v582_v16 = vpop.f32.mrb[6].mxu1 }
 0x119   : > { %v1117_v0 = vpop.f32.mrb[7].mxu1 }
 0x11c   : > { %v524_v17 = vpop.f32.mrb[4].mxu0 }
 0x11d   : > { %v531_v18 = vadd.f32 %v524_v17, %v470_v10  ;;  %v1110_v19 = vpop.f32.mrb[5].mxu0 }
 0x11e   : > { %v527_v20 = vpop.f32.mrb[6].mxu0  ;;  %v698_v21 = vpop.f32.mrb[8].mxu1 }
 0x11f   : > { %v532_v22 = vadd.f32 %v527_v20, %v473_v13  ;;  %v586_v23 = vadd.f32 %v579_v12, %v531_v18  ;;  %v1111_v24 = vpop.f32.mrb[7].mxu0  ;;  %v1128_v25 = vpop.f32.mrb[9].mxu1 }
 0x120   : > { %v701_v26 = vpop.f32.mrb[10].mxu1 }
 0x121   : > { %v587_v27 = vadd.f32 %v582_v16, %v532_v22  ;;  %v1129_v28 = vpop.f32.mrb[11].mxu1 }
 0x124   : > { %v642_v29 = vpop.f32.mrb[8].mxu0 }
 0x125   : > { %v649_v30 = vadd.f32 %v642_v29, %v586_v23  ;;  %v1122_v31 = vpop.f32.mrb[9].mxu0 }
 0x126   : > { %v645_v32 = vpop.f32.mrb[10].mxu0  ;;  %v816_v33 = vpop.f32.mrb[12].mxu1 }
 0x127   : > { %v650_v34 = vadd.f32 %v645_v32, %v587_v27  ;;  %v705_v35 = vadd.f32 %v698_v21, %v649_v30  ;;  %v1123_v36 = vpop.f32.mrb[11].mxu0  ;;  %v1140_v37 = vpop.f32.mrb[13].mxu1 }
 0x128   : > { %v819_v38 = vpop.f32.mrb[14].mxu1 }
 0x129   : > { %v706_v39 = vadd.f32 %v701_v26, %v650_v34  ;;  %v1141_v40 = vpop.f32.mrb[15].mxu1 }
 0x12c   : > { %v753_v41 = vpop.f32.mrb[12].mxu0 }
 0x12d   : > { %v760_v42 = vadd.f32 %v753_v41, %v705_v35  ;;  %v1134_v43 = vpop.f32.mrb[13].mxu0 }
 0x12e   : > { %v756_v44 = vpop.f32.mrb[14].mxu0 }
 0x12f   : > { %v761_v45 = vadd.f32 %v756_v44, %v706_v39  ;;  %v823_v46 = vadd.f32 %v816_v33, %v760_v42  ;;  %v1135_v47 = vpop.f32.mrb[15].mxu0 }
 0x131   : > { %v824_v48 = vadd.f32 %v819_v38, %v761_v45 }
 0x134   : > { %v872_v49 = vpop.f32.mrb[16].mxu0 }
 0x135   : > { %v879_v51 = vadd.f32 %v872_v49, %v823_v46  ;;  %v1146_v52 = vpop.f32.mrb[17].mxu0 }
 0x136   : > { %v875_v53 = vpop.f32.mrb[18].mxu0 }
 0x137   : > { %v888_v54 = vadd.f32 %v1073_v50, %v879_v51  ;;  %v880_v55 = vadd.f32 %v875_v53, %v824_v48  ;;  %v1147_v56 = vpop.f32.mrb[19].mxu0 }
 0x139   : > { %891 = vst.msk [vmem:[%s355_s12] sm:$0xff] %vm890_vm6, %v888_v54  ;;  %v889_v57 = vadd.f32 %v1073_v50, %v880_v55 }
 0x13b   : > { %892 = vst.msk [vmem:[%s355_s12 + $0x8] sm:$0xff] %vm890_vm6, %v889_v57 }
 0x13c PF: > { %s16_s22 = sadd.s32 1, %s1276_s22   ;;  %s1537_s18 = smov %s1268_s20 }
 0x13d   : > { %p13_p12 = scmp.ge.s32.totalorder %s16_s22, 34   ;;  %s1538_s19 = smov %s1272_s21 }
 0x13e   : > { %s1539_s20 = smov %s1542_s24  ;;  %s1540_s21 = smov %s1546_s25 }
 0x13f   :  { %15 = sbr.rel (!%p13_p12) target bundleno = 3 (0x3), region = 89 }
 0x146   :  { %922 = vsyncpa [#allocation3], 1 }
 0x147   :  { %924 = vsyncpa [#allocation3 + $0x1], 1 }

// kernel: sft_net_forward.20
= control target key start
LH: loop header
LB: loop body
LE: loop exit
PB: predicated region body
PF: predicated region fallthrough
CT: control target
= control target key end

     0   :  { %vm1306_vm0 = vcmask 523264   ;;  %s2313_s1 = inlined_call_operand.vmem [shape: bf16[1024,64], index: 1, kind: input, shape index: {}]   ;;  %s2314_s0 = inlined_call_operand.vmem [shape: bf16[128,1024], index: 0, kind: input, shape index: {}]   ;;  %s2315_s2 = inlined_call_operand.vmem [shape: f32[1,64], index: 2, kind: input, shape index: {}]   ;;  %s2316_s3 = inlined_call_operand.vmem [shape: f32[128,64], index: 3, kind: output, shape index: {}]  }
   0x1   :  { %v1712_v0 = vld [vmem:[%s2313_s1 + $0x40] sm:$0xff]   ;;  %v1716_v4 = vld [vmem:[%s2313_s1 + $0x48] sm:$0xff]   ;;  %v1720_v8 = vld [vmem:[%s2313_s1 + $0x50] sm:$0xff]  }
   0x2   :  { %v1713_v1 = vld [vmem:[%s2313_s1 + $0xc0] sm:$0xff]   ;;  %1456 = vmatprep.subr.bf16.mxu0 %v1712_v0  ;;  %v1717_v5 = vld [vmem:[%s2313_s1 + $0xc8] sm:$0xff]   ;;  %v1721_v9 = vld [vmem:[%s2313_s1 + $0xd0] sm:$0xff]  }
   0x3   :  { %v1714_v2 = vld [vmem:[%s2313_s1] sm:$0xff]   ;;  %1520 = vmatprep.subr.bf16.mxu1 %v1713_v1  ;;  %v1718_v6 = vld [vmem:[%s2313_s1 + $0x8] sm:$0xff]   ;;  %v1722_v10 = vld [vmem:[%s2313_s1 + $0x10] sm:$0xff]  }
   0x4   :  { %v1715_v3 = vld [vmem:[%s2313_s1 + $0x80] sm:$0xff]   ;;  %1457 = vmatpush3.bf16.msra.mxu0 %v1714_v2  ;;  %v1719_v7 = vld [vmem:[%s2313_s1 + $0x88] sm:$0xff]   ;;  %v1723_v11 = vld [vmem:[%s2313_s1 + $0x90] sm:$0xff]  }
   0x5   :  { %1521 = vmatpush3.bf16.msra.mxu1 %v1715_v3  ;;  %1458 = vmatprep.subr.bf16.mxu0 %v1716_v4  ;;  %v1724_v12 = vld [vmem:[%s2313_s1 + $0x58] sm:$0xff]   ;;  %v1728_v16 = vld [vmem:[%s2313_s1 + $0x60] sm:$0xff]   ;;  %v1732_v20 = vld [vmem:[%s2313_s1 + $0x68] sm:$0xff]  }
   0x6   :  { %1522 = vmatprep.subr.bf16.mxu1 %v1717_v5  ;;  %v1725_v13 = vld [vmem:[%s2313_s1 + $0xd8] sm:$0xff]   ;;  %v1729_v17 = vld [vmem:[%s2313_s1 + $0xe0] sm:$0xff]   ;;  %v1733_v21 = vld [vmem:[%s2313_s1 + $0xe8] sm:$0xff]  }
   0x7   :  { %v1726_v14 = vld [vmem:[%s2313_s1 + $0x18] sm:$0xff]   ;;  %v1730_v18 = vld [vmem:[%s2313_s1 + $0x20] sm:$0xff]   ;;  %v1734_v22 = vld [vmem:[%s2313_s1 + $0x28] sm:$0xff]  }
   0x8   :  { %1459 = vmatpush3.bf16.msra.mxu0 %v1718_v6  ;;  %v1727_v15 = vld [vmem:[%s2313_s1 + $0x98] sm:$0xff]   ;;  %v1731_v19 = vld [vmem:[%s2313_s1 + $0xa0] sm:$0xff]   ;;  %v1735_v23 = vld [vmem:[%s2313_s1 + $0xa8] sm:$0xff]  }
   0x9   :  { %1523 = vmatpush3.bf16.msra.mxu1 %v1719_v7  ;;  %1460 = vmatprep.subr.bf16.mxu0 %v1720_v8  ;;  %v1736_v24 = vld [vmem:[%s2313_s1 + $0x70] sm:$0xff]   ;;  %v1740_v28 = vld [vmem:[%s2313_s1 + $0x78] sm:$0xff]   ;;  %v15_v32 = vld [vmem:[%s2314_s0] sm:$0xff] }
   0xa   :  { %1524 = vmatprep.subr.bf16.mxu1 %v1721_v9  ;;  %v1737_v25 = vld [vmem:[%s2313_s1 + $0xf0] sm:$0xff]   ;;  %v1741_v29 = vld [vmem:[%s2313_s1 + $0xf8] sm:$0xff]   ;;  %v19_v33 = vld [vmem:[%s2314_s0 + $0x20] sm:$0xff] }
   0xb   :  { %v1738_v26 = vld [vmem:[%s2313_s1 + $0x30] sm:$0xff]   ;;  %v1742_v30 = vld [vmem:[%s2313_s1 + $0x38] sm:$0xff]   ;;  %v16_v34 = vld [vmem:[%s2314_s0 + $0x8] sm:$0xff]  ;;  %v1328_v35 = vcombine.low %v15_v32, %v19_v33  ;;  %v1329_v36 = vcombine.high %v15_v32, %v19_v33 }
   0xc   :  { %1461 = vmatpush3.bf16.msra.mxu0 %v1722_v10  ;;  %v1739_v27 = vld [vmem:[%s2313_s1 + $0xb0] sm:$0xff]   ;;  %v1743_v31 = vld [vmem:[%s2313_s1 + $0xb8] sm:$0xff]   ;;  %v20_v37 = vld [vmem:[%s2314_s0 + $0x28] sm:$0xff] }
   0xd   :  { %1525 = vmatpush3.bf16.msra.mxu1 %v1723_v11  ;;  %1462 = vmatprep.subr.bf16.mxu0 %v1724_v12  ;;  %v1330_v38 = vcombine.low %v16_v34, %v20_v37  ;;  %v1331_v39 = vcombine.high %v16_v34, %v20_v37  ;;  %v1744_v40 = vld [vmem:[%s2313_s1 + $0x140] sm:$0xff]   ;;  %v24_v47 = vld [vmem:[%s2314_s0 + $0x48] sm:$0xff]  ;;  %v1752_v62 = vld [vmem:[%s2313_s1 + $0x150] sm:$0xff]  }
   0xe   :  { %1526 = vmatprep.subr.bf16.mxu1 %v1725_v13  ;;  %950 = vmatprep.mubr.bf16.mxu0 %v1329_v36  ;;  %v1745_v41 = vld [vmem:[%s2313_s1 + $0x100] sm:$0xff]   ;;  %v28_v48 = vld [vmem:[%s2314_s0 + $0x68] sm:$0xff]  ;;  %v1753_v63 = vld [vmem:[%s2313_s1 + $0x110] sm:$0xff]  }
   0xf   :  { %1047 = vmatprep.mubr.bf16.mxu1 %v1331_v39  ;;  %v1746_v42 = vld [vmem:[%s2313_s1 + $0x1c0] sm:$0xff]   ;;  %v1339_v49 = vcombine.high %v24_v47, %v28_v48  ;;  %v1748_v50 = vld [vmem:[%s2313_s1 + $0x148] sm:$0xff]   ;;  %v1338_v53 = vcombine.low %v24_v47, %v28_v48  ;;  %v1754_v0 = vld [vmem:[%s2313_s1 + $0x1d0] sm:$0xff]  }
  0x10   :  { %1463 = vmatpush3.bf16.msra.mxu0 %v1726_v14  ;;  %v1747_v43 = vld [vmem:[%s2313_s1 + $0x180] sm:$0xff]   ;;  %v1749_v52 = vld [vmem:[%s2313_s1 + $0x108] sm:$0xff]   ;;  %v1755_v1 = vld [vmem:[%s2313_s1 + $0x190] sm:$0xff]  }
  0x11   :  { %1527 = vmatpush3.bf16.msra.mxu1 %v1727_v15  ;;  %1464 = vmatprep.subr.bf16.mxu0 %v1728_v16  ;;  %v23_v44 = vld [vmem:[%s2314_s0 + $0x40] sm:$0xff]  ;;  %v1750_v54 = vld [vmem:[%s2313_s1 + $0x1c8] sm:$0xff]   ;;  %v1756_v10 = vld [vmem:[%s2313_s1 + $0x158] sm:$0xff]  }
  0x12   :  { %1528 = vmatprep.subr.bf16.mxu1 %v1729_v17  ;;  %v27_v45 = vld [vmem:[%s2314_s0 + $0x60] sm:$0xff]  ;;  %v1751_v55 = vld [vmem:[%s2313_s1 + $0x188] sm:$0xff]   ;;  %v1757_v11 = vld [vmem:[%s2313_s1 + $0x118] sm:$0xff]  }
  0x13   :  { %v1337_v46 = vcombine.high %v23_v44, %v27_v45  ;;  %v1336_v51 = vcombine.low %v23_v44, %v27_v45  ;;  %v31_v56 = vld [vmem:[%s2314_s0 + $0x80] sm:$0xff]  ;;  %v32_v58 = vld [vmem:[%s2314_s0 + $0x88] sm:$0xff]  ;;  %v1758_v12 = vld [vmem:[%s2313_s1 + $0x1d8] sm:$0xff]  }
  0x14   :  { %1465 = vmatpush3.bf16.msra.mxu0 %v1730_v18  ;;  %v35_v57 = vld [vmem:[%s2314_s0 + $0xa0] sm:$0xff]  ;;  %v36_v59 = vld [vmem:[%s2314_s0 + $0xa8] sm:$0xff]  ;;  %v1759_v13 = vld [vmem:[%s2313_s1 + $0x198] sm:$0xff]  }
  0x15   :  { %1529 = vmatpush3.bf16.msra.mxu1 %v1731_v19  ;;  %1466 = vmatprep.subr.bf16.mxu0 %v1732_v20  ;;  %v1345_v60 = vcombine.high %v31_v56, %v35_v57  ;;  %v1347_v61 = vcombine.high %v32_v58, %v36_v59  ;;  %v1344_v2 = vcombine.low %v31_v56, %v35_v57  ;;  %v39_v3 = vld [vmem:[%s2314_s0 + $0xc0] sm:$0xff]  ;;  %v40_v5 = vld [vmem:[%s2314_s0 + $0xc8] sm:$0xff]  ;;  %v1769_v39 = vld [vmem:[%s2313_s1 + $0x130] sm:$0xff]  }
  0x16   :  { %1530 = vmatprep.subr.bf16.mxu1 %v1733_v21  ;;  %v43_v4 = vld [vmem:[%s2314_s0 + $0xe0] sm:$0xff]  ;;  %v1346_v6 = vcombine.low %v32_v58, %v36_v59  ;;  %v44_v8 = vld [vmem:[%s2314_s0 + $0xe8] sm:$0xff]  ;;  %v1773_v48 = vld [vmem:[%s2313_s1 + $0x138] sm:$0xff]  }
  0x17   :  { %v1353_v7 = vcombine.high %v39_v3, %v43_v4  ;;  %v1355_v9 = vcombine.high %v40_v5, %v44_v8  ;;  %v47_v14 = vld [vmem:[%s2314_s0 + $0x100] sm:$0xff]  ;;  %v48_v16 = vld [vmem:[%s2314_s0 + $0x108] sm:$0xff]  ;;  %v1352_v19 = vcombine.low %v39_v3, %v43_v4  ;;  %v1354_v21 = vcombine.low %v40_v5, %v44_v8  ;;  %v26_v8 = vld [vmem:[%s2314_s0 + $0x58] sm:$0xff] }
  0x18   :  { %1467 = vmatpush3.bf16.msra.mxu0 %v1734_v22  ;;  %v51_v15 = vld [vmem:[%s2314_s0 + $0x120] sm:$0xff]  ;;  %v52_v17 = vld [vmem:[%s2314_s0 + $0x128] sm:$0xff] }
  0x19   :  { %1531 = vmatpush3.bf16.msra.mxu1 %v1735_v23  ;;  %1468 = vmatprep.subr.bf16.mxu0 %v1736_v24  ;;  %v1760_v18 = vld [vmem:[%s2313_s1 + $0x160] sm:$0xff]   ;;  %v1361_v22 = vcombine.high %v47_v14, %v51_v15  ;;  %v1363_v24 = vcombine.high %v48_v16, %v52_v17  ;;  %v1766_v32 = vld [vmem:[%s2313_s1 + $0x1e8] sm:$0xff]   ;;  %v1360_v34 = vcombine.low %v47_v14, %v51_v15  ;;  %v33_v14 = vld [vmem:[%s2314_s0 + $0x90] sm:$0xff] }
  0x1a   :  { %1532 = vmatprep.subr.bf16.mxu1 %v1737_v25  ;;  %v1761_v20 = vld [vmem:[%s2313_s1 + $0x120] sm:$0xff]   ;;  %v1767_v33 = vld [vmem:[%s2313_s1 + $0x1a8] sm:$0xff]   ;;  %v37_v15 = vld [vmem:[%s2314_s0 + $0xb0] sm:$0xff] }
  0x1b   :  { %v1762_v23 = vld [vmem:[%s2313_s1 + $0x1e0] sm:$0xff]   ;;  %v64_v44 = vld [vmem:[%s2314_s0 + $0x188] sm:$0xff] }
  0x1c   :  { %1469 = vmatpush3.bf16.msra.mxu0 %v1738_v26  ;;  %v1763_v25 = vld [vmem:[%s2313_s1 + $0x1a0] sm:$0xff]   ;;  %v68_v45 = vld [vmem:[%s2314_s0 + $0x1a8] sm:$0xff] }
  0x1d   :  { %1533 = vmatpush3.bf16.msra.mxu1 %v1739_v27  ;;  %1470 = vmatprep.subr.bf16.mxu0 %v1740_v28  ;;  %v55_v26 = vld [vmem:[%s2314_s0 + $0x140] sm:$0xff]  ;;  %v1764_v28 = vld [vmem:[%s2313_s1 + $0x168] sm:$0xff]   ;;  %v1378_v59 = vcombine.low %v64_v44, %v68_v45 }
  0x1e   :  { %1534 = vmatprep.subr.bf16.mxu1 %v1741_v29  ;;  %v59_v27 = vld [vmem:[%s2314_s0 + $0x160] sm:$0xff]  ;;  %v56_v29 = vld [vmem:[%s2314_s0 + $0x148] sm:$0xff] }
  0x1f   :  { %v1369_v36 = vcombine.high %v55_v26, %v59_v27  ;;  %v1368_v47 = vcombine.low %v55_v26, %v59_v27  ;;  %v72_v56 = vld [vmem:[%s2314_s0 + $0x1c8] sm:$0xff]  ;;  %v1348_v26 = vcombine.low %v33_v14, %v37_v15 }
  0x20   :  { %1471 = vmatpush3.bf16.msra.mxu0 %v1742_v30  ;;  %v60_v30 = vld [vmem:[%s2314_s0 + $0x168] sm:$0xff] }
  0x21   :  { %1535 = vmatpush3.bf16.msra.mxu1 %v1743_v31  ;;  %1584 = vmatprep.subr.bf16.mxu0 %v1744_v40  ;;  %v1765_v31 = vld [vmem:[%s2313_s1 + $0x128] sm:$0xff]   ;;  %v1371_v37 = vcombine.high %v56_v29, %v60_v30  ;;  %v1770_v40 = vld [vmem:[%s2313_s1 + $0x1f0] sm:$0xff]  }
  0x22   :  { %1648 = vmatprep.subr.bf16.mxu1 %v1746_v42  ;;  %v67_v42 = vld [vmem:[%s2314_s0 + $0x1a0] sm:$0xff]  ;;  %v76_v57 = vld [vmem:[%s2314_s0 + $0x1e8] sm:$0xff] }
  0x23   :  { %951 = vmatmul.mubr.bf16.vlgmr.msra.gmra.mrb[0].mxu0 %v1328_v35  ;;  %v1362_v35 = vcombine.low %v48_v16, %v52_v17  ;;  %v1386_v3 = vcombine.low %v72_v56, %v76_v57  ;;  %v34_v16 = vld [vmem:[%s2314_s0 + $0x98] sm:$0xff] }
  0x24   :  { %1048 = vmatmul.mubr.bf16.vlgmr.msra.gmra.mrb[0].mxu1 %v1330_v38  ;;  %1585 = vmatpush3.bf16.msra.mxu0 %v1745_v41  ;;  %v1768_v38 = vld [vmem:[%s2313_s1 + $0x170] sm:$0xff]   ;;  %v63_v41 = vld [vmem:[%s2314_s0 + $0x180] sm:$0xff]  ;;  %v38_v17 = vld [vmem:[%s2314_s0 + $0xb8] sm:$0xff] }
  0x25   :  { %1649 = vmatpush3.bf16.msra.mxu1 %v1747_v43  ;;  %958 = vmatprep.mubr.bf16.mxu0 %v1337_v46  ;;  %v1771_v43 = vld [vmem:[%s2313_s1 + $0x1b0] sm:$0xff]   ;;  %v1772_v46 = vld [vmem:[%s2313_s1 + $0x178] sm:$0xff]   ;;  %v1376_v58 = vcombine.low %v63_v41, %v67_v42  ;;  %v1350_v27 = vcombine.low %v34_v16, %v38_v17 }
  0x26   :  { %1055 = vmatprep.mubr.bf16.mxu1 %v1339_v49  ;;  %1586 = vmatprep.subr.bf16.mxu0 %v1748_v50  ;;  %v1370_v49 = vcombine.low %v56_v29, %v60_v30  ;;  %v1377_v50 = vcombine.high %v63_v41, %v67_v42  ;;  %v49_v30 = vld [vmem:[%s2314_s0 + $0x110] sm:$0xff]  ;;  %v62_v41 = vld [vmem:[%s2314_s0 + $0x178] sm:$0xff] }
  0x27   :  { %1650 = vmatprep.subr.bf16.mxu1 %v1750_v54  ;;  %v71_v54 = vld [vmem:[%s2314_s0 + $0x1c0] sm:$0xff] }
  0x28   :  { %1587 = vmatpush3.bf16.msra.mxu0 %v1749_v52  ;;  %v1379_v52 = vcombine.high %v64_v44, %v68_v45 }
  0x29   :  { %1651 = vmatpush3.bf16.msra.mxu1 %v1751_v55  ;;  %1588 = vmatprep.subr.bf16.mxu0 %v1752_v62  ;;  %v75_v55 = vld [vmem:[%s2314_s0 + $0x1e0] sm:$0xff]  ;;  %v17_v62 = vld [vmem:[%s2314_s0 + $0x10] sm:$0xff] }
  0x2a   :  { %1652 = vmatprep.subr.bf16.mxu1 %v1754_v0  ;;  %v18_v0 = vld [vmem:[%s2314_s0 + $0x18] sm:$0xff] }
  0x2b   :  { %959 = vmatmul.mubr.bf16.gmra.mrb[4].mxu0 %v1336_v51  ;;  %v1774_v51 = vld [vmem:[%s2313_s1 + $0x1f8] sm:$0xff]  }
  0x2c   :  { %1056 = vmatmul.mubr.bf16.gmra.mrb[4].mxu1 %v1338_v53  ;;  %966 = vmatprep.mubr.bf16.mxu0 %v1345_v60  ;;  %v1775_v53 = vld [vmem:[%s2313_s1 + $0x1b8] sm:$0xff]   ;;  %v1385_v60 = vcombine.high %v71_v54, %v75_v55 }
  0x2d   :  { %1063 = vmatprep.mubr.bf16.mxu1 %v1347_v61  ;;  %1589 = vmatpush3.bf16.msra.mxu0 %v1753_v63  ;;  %v1387_v61 = vcombine.high %v72_v56, %v76_v57  ;;  %v21_v63 = vld [vmem:[%s2314_s0 + $0x30] sm:$0xff]  ;;  %v74_v56 = vld [vmem:[%s2314_s0 + $0x1d8] sm:$0xff] }
  0x2e   :  { %1653 = vmatpush3.bf16.msra.mxu1 %v1755_v1  ;;  %1590 = vmatprep.subr.bf16.mxu0 %v1756_v10  ;;  %v22_v1 = vld [vmem:[%s2314_s0 + $0x38] sm:$0xff]  ;;  %v1333_v4 = vcombine.high %v17_v62, %v21_v63  ;;  %v1332_v10 = vcombine.low %v17_v62, %v21_v63 }
  0x2f   :  { %1654 = vmatprep.subr.bf16.mxu1 %v1758_v12  ;;  %v1335_v5 = vcombine.high %v18_v0, %v22_v1  ;;  %v78_v57 = vld [vmem:[%s2314_s0 + $0x1f8] sm:$0xff] }
  0x30   :  { %v1390_v63 = vcombine.low %v74_v56, %v78_v57 }
  0x31   :  { %1591 = vmatpush3.bf16.msra.mxu0 %v1757_v11  ;;  %v1334_v11 = vcombine.low %v18_v0, %v22_v1 }
  0x32   :  { %1655 = vmatpush3.bf16.msra.mxu1 %v1759_v13  ;;  %1592 = vmatprep.subr.bf16.mxu0 %v1760_v18 }
  0x33   :  { %967 = vmatmul.mubr.bf16.gmra.mrb[8].mxu0 %v1344_v2  ;;  %1656 = vmatprep.subr.bf16.mxu1 %v1762_v23  ;;  %v1384_v2 = vcombine.low %v71_v54, %v75_v55  ;;  %v45_v23 = vld [vmem:[%s2314_s0 + $0xf0] sm:$0xff] }
  0x34   :  { %1064 = vmatmul.mubr.bf16.gmra.mrb[8].mxu1 %v1346_v6  ;;  %974 = vmatprep.mubr.bf16.mxu0 %v1353_v7  ;;  %v25_v6 = vld [vmem:[%s2314_s0 + $0x50] sm:$0xff] }
  0x35   :  { %1071 = vmatprep.mubr.bf16.mxu1 %v1355_v9  ;;  %1593 = vmatpush3.bf16.msra.mxu0 %v1761_v20  ;;  %v29_v7 = vld [vmem:[%s2314_s0 + $0x70] sm:$0xff]  ;;  %v30_v9 = vld [vmem:[%s2314_s0 + $0x78] sm:$0xff]  ;;  %v1349_v20 = vcombine.high %v33_v14, %v37_v15 }
  0x36   :  { %1657 = vmatpush3.bf16.msra.mxu1 %v1763_v25  ;;  %1594 = vmatprep.subr.bf16.mxu0 %v1764_v28  ;;  %v1341_v12 = vcombine.high %v25_v6, %v29_v7  ;;  %v1343_v13 = vcombine.high %v26_v8, %v30_v9  ;;  %v1340_v18 = vcombine.low %v25_v6, %v29_v7  ;;  %v46_v25 = vld [vmem:[%s2314_s0 + $0xf8] sm:$0xff]  ;;  %v73_v54 = vld [vmem:[%s2314_s0 + $0x1d0] sm:$0xff] }
  0x37   :  { %1658 = vmatprep.subr.bf16.mxu1 %v1766_v32  ;;  %v50_v32 = vld [vmem:[%s2314_s0 + $0x118] sm:$0xff]  ;;  %v77_v55 = vld [vmem:[%s2314_s0 + $0x1f0] sm:$0xff] }
  0x38   :  { %v1388_v62 = vcombine.low %v73_v54, %v77_v55 }
  0x39   :  { %1595 = vmatpush3.bf16.msra.mxu0 %v1765_v31  ;;  %v53_v31 = vld [vmem:[%s2314_s0 + $0x130] sm:$0xff] }
  0x3a   :  { %1659 = vmatpush3.bf16.msra.mxu1 %v1767_v33  ;;  %1596 = vmatprep.subr.bf16.mxu0 %v1768_v38  ;;  %v54_v33 = vld [vmem:[%s2314_s0 + $0x138] sm:$0xff]  ;;  %v57_v38 = vld [vmem:[%s2314_s0 + $0x150] sm:$0xff]  ;;  %v1364_v42 = vcombine.low %v49_v30, %v53_v31 }
  0x3b   :  { %975 = vmatmul.mubr.bf16.gmra.mrb[12].mxu0 %v1352_v19  ;;  %1660 = vmatprep.subr.bf16.mxu1 %v1770_v40  ;;  %v1342_v19 = vcombine.low %v26_v8, %v30_v9  ;;  %v58_v40 = vld [vmem:[%s2314_s0 + $0x158] sm:$0xff] }
  0x3c   :  { %1072 = vmatmul.mubr.bf16.gmra.mrb[12].mxu1 %v1354_v21  ;;  %982 = vmatprep.mubr.bf16.mxu0 %v1361_v22  ;;  %v1351_v21 = vcombine.high %v34_v16, %v38_v17  ;;  %v41_v22 = vld [vmem:[%s2314_s0 + $0xd0] sm:$0xff]  ;;  %v1375_v45 = vcombine.high %v58_v40, %v62_v41 }
  0x3d   :  { %1079 = vmatprep.mubr.bf16.mxu1 %v1363_v24  ;;  %1597 = vmatpush3.bf16.msra.mxu0 %v1769_v39  ;;  %v42_v24 = vld [vmem:[%s2314_s0 + $0xd8] sm:$0xff]  ;;  %v1357_v28 = vcombine.high %v41_v22, %v45_v23  ;;  %v61_v39 = vld [vmem:[%s2314_s0 + $0x170] sm:$0xff] }
  0x3e   :  { %1661 = vmatpush3.bf16.msra.mxu1 %v1771_v43  ;;  %1598 = vmatprep.subr.bf16.mxu0 %v1772_v46  ;;  %v1359_v29 = vcombine.high %v42_v24, %v46_v25  ;;  %v1366_v43 = vcombine.low %v50_v32, %v54_v33  ;;  %v1373_v44 = vcombine.high %v57_v38, %v61_v39  ;;  %v65_v46 = vld [vmem:[%s2314_s0 + $0x190] sm:$0xff] }
  0x3f   :  { %1662 = vmatprep.subr.bf16.mxu1 %v1774_v51  ;;  %v1374_v51 = vcombine.low %v58_v40, %v62_v41 }
  0x41   :  { %1599 = vmatpush3.bf16.msra.mxu0 %v1773_v48  ;;  %v66_v48 = vld [vmem:[%s2314_s0 + $0x198] sm:$0xff] }
  0x42   :  { %1663 = vmatpush3.bf16.msra.mxu1 %v1775_v53 }
  0x43   :  { %983 = vmatmul.mubr.bf16.gmra.mrb[16].mxu0 %v1360_v34  ;;  %v1356_v34 = vcombine.low %v41_v22, %v45_v23 }
  0x44   :  { %1080 = vmatmul.mubr.bf16.gmra.mrb[16].mxu1 %v1362_v35  ;;  %990 = vmatprep.mubr.bf16.mxu0 %v1369_v36  ;;  %v1358_v35 = vcombine.low %v42_v24, %v46_v25  ;;  %v1365_v36 = vcombine.high %v49_v30, %v53_v31 }
  0x45   :  { %1087 = vmatprep.mubr.bf16.mxu1 %v1371_v37  ;;  %v1367_v37 = vcombine.high %v50_v32, %v54_v33 }
  0x4b   :  { %991 = vmatmul.mubr.bf16.gmra.mrb[20].mxu0 %v1368_v47  ;;  %v69_v47 = vld [vmem:[%s2314_s0 + $0x1b0] sm:$0xff] }
  0x4c   :  { %1088 = vmatmul.mubr.bf16.gmra.mrb[20].mxu1 %v1370_v49  ;;  %998 = vmatprep.mubr.bf16.mxu0 %v1377_v50  ;;  %v70_v49 = vld [vmem:[%s2314_s0 + $0x1b8] sm:$0xff]  ;;  %v1372_v50 = vcombine.low %v57_v38, %v61_v39 }
  0x4d   :  { %1095 = vmatprep.mubr.bf16.mxu1 %v1379_v52  ;;  %v1381_v52 = vcombine.high %v65_v46, %v69_v47  ;;  %v1383_v53 = vcombine.high %v66_v48, %v70_v49 }
  0x53   :  { %999 = vmatmul.mubr.bf16.gmra.mrb[24].mxu0 %v1376_v58  ;;  %v1380_v58 = vcombine.low %v65_v46, %v69_v47 }
  0x54   :  { %1096 = vmatmul.mubr.bf16.gmra.mrb[24].mxu1 %v1378_v59  ;;  %1006 = vmatprep.mubr.bf16.mxu0 %v1385_v60  ;;  %v1382_v59 = vcombine.low %v66_v48, %v70_v49  ;;  %v1389_v60 = vcombine.high %v73_v54, %v77_v55 }
  0x55   :  { %1103 = vmatprep.mubr.bf16.mxu1 %v1387_v61  ;;  %v1391_v61 = vcombine.high %v74_v56, %v78_v57 }
  0x5b   :  { %1007 = vmatmul.mubr.bf16.gmra.mrb[28].mxu0 %v1384_v2  ;;  %v2183_v2 = vld [vmem:[%s2315_s2] ss:$0 sm:$0xff] }
  0x5c   :  { %1104 = vmatmul.mubr.bf16.gmra.mrb[28].mxu1 %v1386_v3  ;;  %1144 = vmatprep.mubr.bf16.mxu0 %v1333_v4 }
  0x5d   :  { %1241 = vmatprep.mubr.bf16.mxu1 %v1335_v5 }
  0x63   :  { %1145 = vmatmul.mubr.bf16.vlgmr.msra.gmra.mrb[32].mxu0 %v1332_v10 }
  0x64   :  { %1242 = vmatmul.mubr.bf16.vlgmr.msra.gmra.mrb[32].mxu1 %v1334_v11  ;;  %1152 = vmatprep.mubr.bf16.mxu0 %v1341_v12 }
  0x65   :  { %1249 = vmatprep.mubr.bf16.mxu1 %v1343_v13 }
  0x6b   :  { %1153 = vmatmul.mubr.bf16.gmra.mrb[36].mxu0 %v1340_v18 }
  0x6c   :  { %1250 = vmatmul.mubr.bf16.gmra.mrb[36].mxu1 %v1342_v19  ;;  %1160 = vmatprep.mubr.bf16.mxu0 %v1349_v20 }
  0x6d   :  { %1257 = vmatprep.mubr.bf16.mxu1 %v1351_v21 }
  0x73   :  { %1161 = vmatmul.mubr.bf16.gmra.mrb[40].mxu0 %v1348_v26 }
  0x74   :  { %1258 = vmatmul.mubr.bf16.gmra.mrb[40].mxu1 %v1350_v27  ;;  %1168 = vmatprep.mubr.bf16.mxu0 %v1357_v28 }
  0x75   :  { %1265 = vmatprep.mubr.bf16.mxu1 %v1359_v29 }
  0x7b   :  { %1169 = vmatmul.mubr.bf16.gmra.mrb[44].mxu0 %v1356_v34 }
  0x7c   :  { %1266 = vmatmul.mubr.bf16.gmra.mrb[44].mxu1 %v1358_v35  ;;  %1176 = vmatprep.mubr.bf16.mxu0 %v1365_v36 }
  0x7d   :  { %1273 = vmatprep.mubr.bf16.mxu1 %v1367_v37 }
  0x83   :  { %1177 = vmatmul.mubr.bf16.gmra.mrb[48].mxu0 %v1364_v42 }
  0x84   :  { %1274 = vmatmul.mubr.bf16.gmra.mrb[48].mxu1 %v1366_v43  ;;  %1184 = vmatprep.mubr.bf16.mxu0 %v1373_v44 }
  0x85   :  { %1281 = vmatprep.mubr.bf16.mxu1 %v1375_v45 }
  0x8b   :  { %1185 = vmatmul.mubr.bf16.gmra.mrb[52].mxu0 %v1372_v50 }
  0x8c   :  { %1282 = vmatmul.mubr.bf16.gmra.mrb[52].mxu1 %v1374_v51  ;;  %1192 = vmatprep.mubr.bf16.mxu0 %v1381_v52 }
  0x8d   :  { %1289 = vmatprep.mubr.bf16.mxu1 %v1383_v53 }
  0x93   :  { %1193 = vmatmul.mubr.bf16.gmra.mrb[56].mxu0 %v1380_v58 }
  0x94   :  { %1290 = vmatmul.mubr.bf16.gmra.mrb[56].mxu1 %v1382_v59  ;;  %1200 = vmatprep.mubr.bf16.mxu0 %v1389_v60 }
  0x95   :  { %1297 = vmatprep.mubr.bf16.mxu1 %v1391_v61 }
  0x9b   :  { %1201 = vmatmul.mubr.bf16.gmra.mrb[60].mxu0 %v1388_v62 }
  0x9c   :  { %1298 = vmatmul.mubr.bf16.gmra.mrb[60].mxu1 %v1390_v63 }
  0xf6   :  { %v1472_v0 = vpop.f32.mrb[0].mxu0 }
  0xf7   :  { %v1536_v1 = vpop.f32.mrb[0].mxu1  ;;  %v1473_v3 = vpop.f32.mrb[1].mxu0 }
  0xf8   :  { %v1474_v4 = vadd.f32 %v1473_v3, %v1472_v0  ;;  %v1537_v5 = vpop.f32.mrb[1].mxu1  ;;  %v1475_v6 = vpop.f32.mrb[2].mxu0 }
  0xf9   :  { %v1538_v7 = vadd.f32 %v1537_v5, %v1536_v1  ;;  %v1539_v8 = vpop.f32.mrb[2].mxu1  ;;  %v1476_v9 = vpop.f32.mrb[3].mxu0 }
  0xfa   :  { %v953_v10 = vadd.f32 %v1474_v4, %v2183_v2  ;;  %v1477_v11 = vadd.f32 %v1476_v9, %v1475_v6  ;;  %v1540_v12 = vpop.f32.mrb[3].mxu1 }
  0xfb   :  { %v1541_v13 = vadd.f32 %v1540_v12, %v1539_v8 }
  0xfc   :  { %v2186_v14 = vadd.f32 %v1538_v7, %v953_v10  ;;  %v956_v15 = vadd.f32 %v1477_v11, %v2183_v2 }
  0xfe   :  { %v2189_v16 = vadd.f32 %v1541_v13, %v956_v15  ;;  %v1478_v17 = vpop.f32.mrb[4].mxu0 }
  0xff   :  { %v1542_v18 = vpop.f32.mrb[4].mxu1  ;;  %v1479_v19 = vpop.f32.mrb[5].mxu0 }
 0x100   :  { %v1480_v20 = vadd.f32 %v1479_v19, %v1478_v17  ;;  %v1543_v21 = vpop.f32.mrb[5].mxu1  ;;  %v1481_v22 = vpop.f32.mrb[6].mxu0 }
 0x101   :  { %v1544_v23 = vadd.f32 %v1543_v21, %v1542_v18  ;;  %v1545_v24 = vpop.f32.mrb[6].mxu1  ;;  %v1482_v25 = vpop.f32.mrb[7].mxu0 }
 0x102   :  { %v961_v26 = vadd.f32 %v1480_v20, %v2183_v2  ;;  %v1483_v27 = vadd.f32 %v1482_v25, %v1481_v22  ;;  %v1546_v28 = vpop.f32.mrb[7].mxu1 }
 0x103   :  { %v1547_v29 = vadd.f32 %v1546_v28, %v1545_v24 }
 0x104   :  { %v2192_v30 = vadd.f32 %v1544_v23, %v961_v26  ;;  %v964_v31 = vadd.f32 %v1483_v27, %v2183_v2 }
 0x106   :  { %v2195_v32 = vadd.f32 %v1547_v29, %v964_v31  ;;  %v1484_v33 = vpop.f32.mrb[8].mxu0 }
 0x107   :  { %v1548_v34 = vpop.f32.mrb[8].mxu1  ;;  %v1485_v35 = vpop.f32.mrb[9].mxu0 }
 0x108   :  { %v1486_v36 = vadd.f32 %v1485_v35, %v1484_v33  ;;  %v1549_v37 = vpop.f32.mrb[9].mxu1  ;;  %v1487_v38 = vpop.f32.mrb[10].mxu0 }
 0x109   :  { %v1550_v39 = vadd.f32 %v1549_v37, %v1548_v34  ;;  %v1551_v40 = vpop.f32.mrb[10].mxu1  ;;  %v1488_v41 = vpop.f32.mrb[11].mxu0 }
 0x10a   :  { %v969_v42 = vadd.f32 %v1486_v36, %v2183_v2  ;;  %v1489_v43 = vadd.f32 %v1488_v41, %v1487_v38  ;;  %v1552_v44 = vpop.f32.mrb[11].mxu1 }
 0x10b   :  { %v1553_v45 = vadd.f32 %v1552_v44, %v1551_v40 }
 0x10c   :  { %v2198_v46 = vadd.f32 %v1550_v39, %v969_v42  ;;  %v972_v47 = vadd.f32 %v1489_v43, %v2183_v2 }
 0x10e   :  { %v2201_v48 = vadd.f32 %v1553_v45, %v972_v47  ;;  %v1490_v49 = vpop.f32.mrb[12].mxu0 }
 0x10f   :  { %v1554_v50 = vpop.f32.mrb[12].mxu1  ;;  %v1491_v51 = vpop.f32.mrb[13].mxu0 }
 0x110   :  { %v1492_v52 = vadd.f32 %v1491_v51, %v1490_v49  ;;  %v1555_v53 = vpop.f32.mrb[13].mxu1  ;;  %v1493_v54 = vpop.f32.mrb[14].mxu0 }
 0x111   :  { %v1556_v55 = vadd.f32 %v1555_v53, %v1554_v50  ;;  %v1557_v56 = vpop.f32.mrb[14].mxu1  ;;  %v1494_v57 = vpop.f32.mrb[15].mxu0 }
 0x112   :  { %v977_v58 = vadd.f32 %v1492_v52, %v2183_v2  ;;  %v1495_v59 = vadd.f32 %v1494_v57, %v1493_v54  ;;  %v1558_v60 = vpop.f32.mrb[15].mxu1 }
 0x113   :  { %v1559_v61 = vadd.f32 %v1558_v60, %v1557_v56 }
 0x114   :  { %v2204_v62 = vadd.f32 %v1556_v55, %v977_v58  ;;  %v980_v63 = vadd.f32 %v1495_v59, %v2183_v2 }
 0x116   :  { %v2207_v0 = vadd.f32 %v1559_v61, %v980_v63  ;;  %v1496_v1 = vpop.f32.mrb[16].mxu0 }
 0x117   :  { %v1560_v3 = vpop.f32.mrb[16].mxu1  ;;  %v1497_v4 = vpop.f32.mrb[17].mxu0 }
 0x118   :  { %v1498_v5 = vadd.f32 %v1497_v4, %v1496_v1  ;;  %v1561_v6 = vpop.f32.mrb[17].mxu1  ;;  %v1499_v7 = vpop.f32.mrb[18].mxu0 }
 0x119   :  { %v1562_v8 = vadd.f32 %v1561_v6, %v1560_v3  ;;  %v1563_v9 = vpop.f32.mrb[18].mxu1  ;;  %v1500_v10 = vpop.f32.mrb[19].mxu0 }
 0x11a   :  { %v985_v11 = vadd.f32 %v1498_v5, %v2183_v2  ;;  %v1501_v12 = vadd.f32 %v1500_v10, %v1499_v7  ;;  %v1564_v13 = vpop.f32.mrb[19].mxu1 }
 0x11b   :  { %v1565_v15 = vadd.f32 %v1564_v13, %v1563_v9 }
 0x11c   :  { %v2210_v17 = vadd.f32 %v1562_v8, %v985_v11  ;;  %v988_v18 = vadd.f32 %v1501_v12, %v2183_v2 }
 0x11e   :  { %v2213_v19 = vadd.f32 %v1565_v15, %v988_v18  ;;  %v1502_v20 = vpop.f32.mrb[20].mxu0 }
 0x11f   :  { %v1566_v21 = vpop.f32.mrb[20].mxu1  ;;  %v1503_v22 = vpop.f32.mrb[21].mxu0 }
 0x120   :  { %v1504_v23 = vadd.f32 %v1503_v22, %v1502_v20  ;;  %v1567_v24 = vpop.f32.mrb[21].mxu1  ;;  %v1505_v25 = vpop.f32.mrb[22].mxu0 }
 0x121   :  { %v1568_v26 = vadd.f32 %v1567_v24, %v1566_v21  ;;  %v1569_v27 = vpop.f32.mrb[22].mxu1  ;;  %v1506_v28 = vpop.f32.mrb[23].mxu0 }
 0x122   :  { %v993_v29 = vadd.f32 %v1504_v23, %v2183_v2  ;;  %v1507_v31 = vadd.f32 %v1506_v28, %v1505_v25  ;;  %v1570_v33 = vpop.f32.mrb[23].mxu1 }
 0x123   :  { %v1571_v34 = vadd.f32 %v1570_v33, %v1569_v27 }
 0x124   :  { %v2216_v35 = vadd.f32 %v1568_v26, %v993_v29  ;;  %v996_v36 = vadd.f32 %v1507_v31, %v2183_v2 }
 0x126   :  { %v2219_v37 = vadd.f32 %v1571_v34, %v996_v36  ;;  %v1508_v38 = vpop.f32.mrb[24].mxu0 }
 0x127   :  { %v1572_v39 = vpop.f32.mrb[24].mxu1  ;;  %v1509_v40 = vpop.f32.mrb[25].mxu0 }
 0x128   :  { %v1510_v41 = vadd.f32 %v1509_v40, %v1508_v38  ;;  %v1573_v42 = vpop.f32.mrb[25].mxu1  ;;  %v1511_v43 = vpop.f32.mrb[26].mxu0 }
 0x129   :  { %v1574_v44 = vadd.f32 %v1573_v42, %v1572_v39  ;;  %v1575_v45 = vpop.f32.mrb[26].mxu1  ;;  %v1512_v47 = vpop.f32.mrb[27].mxu0 }
 0x12a   :  { %v1001_v49 = vadd.f32 %v1510_v41, %v2183_v2  ;;  %v1513_v50 = vadd.f32 %v1512_v47, %v1511_v43  ;;  %v1576_v51 = vpop.f32.mrb[27].mxu1 }
 0x12b   :  { %v1577_v52 = vadd.f32 %v1576_v51, %v1575_v45 }
 0x12c   :  { %v2222_v53 = vadd.f32 %v1574_v44, %v1001_v49  ;;  %v1004_v54 = vadd.f32 %v1513_v50, %v2183_v2 }
 0x12e   :  { %v2225_v55 = vadd.f32 %v1577_v52, %v1004_v54  ;;  %v1514_v56 = vpop.f32.mrb[28].mxu0 }
 0x12f   :  { %v1578_v57 = vpop.f32.mrb[28].mxu1  ;;  %v1515_v58 = vpop.f32.mrb[29].mxu0 }
 0x130   :  { %v1516_v59 = vadd.f32 %v1515_v58, %v1514_v56  ;;  %v1579_v60 = vpop.f32.mrb[29].mxu1  ;;  %v1517_v61 = vpop.f32.mrb[30].mxu0 }
 0x131   :  { %v1580_v63 = vadd.f32 %v1579_v60, %v1578_v57  ;;  %v1581_v1 = vpop.f32.mrb[30].mxu1  ;;  %v1518_v3 = vpop.f32.mrb[31].mxu0 }
 0x132   :  { %v1009_v4 = vadd.f32 %v1516_v59, %v2183_v2  ;;  %v1519_v5 = vadd.f32 %v1518_v3, %v1517_v61  ;;  %v1582_v6 = vpop.f32.mrb[31].mxu1 }
 0x133   :  { %v1583_v7 = vadd.f32 %v1582_v6, %v1581_v1 }
 0x134   :  { %v2228_v8 = vadd.f32 %v1580_v63, %v1009_v4  ;;  %v1012_v9 = vadd.f32 %v1519_v5, %v2183_v2 }
 0x136   :  { %v2231_v10 = vadd.f32 %v1583_v7, %v1012_v9  ;;  %v1600_v11 = vpop.f32.mrb[32].mxu0 }
 0x137   :  { %v1664_v12 = vpop.f32.mrb[32].mxu1  ;;  %v1601_v13 = vpop.f32.mrb[33].mxu0 }
 0x138   :  { %v1602_v15 = vadd.f32 %v1601_v13, %v1600_v11  ;;  %v1665_v18 = vpop.f32.mrb[33].mxu1  ;;  %v1603_v20 = vpop.f32.mrb[34].mxu0 }
 0x139   :  { %v1666_v21 = vadd.f32 %v1665_v18, %v1664_v12  ;;  %v1667_v22 = vpop.f32.mrb[34].mxu1  ;;  %v1604_v23 = vpop.f32.mrb[35].mxu0 }
 0x13a   :  { %v1147_v24 = vadd.f32 %v1602_v15, %v2186_v14  ;;  %v1605_v25 = vadd.f32 %v1604_v23, %v1603_v20  ;;  %v1668_v26 = vpop.f32.mrb[35].mxu1 }
 0x13b   :  { %v1669_v27 = vadd.f32 %v1668_v26, %v1667_v22 }
 0x13c   :  { %v1244_v28 = vadd.f32 %v1666_v21, %v1147_v24  ;;  %v1150_v2 = vadd.f32 %v1605_v25, %v2189_v16 }
 0x13e   :  { %1307 = vst.msk [vmem:[%s2316_s3] sm:$0xff] %vm1306_vm0, %v1244_v28  ;;  %v1247_v29 = vadd.f32 %v1669_v27, %v1150_v2  ;;  %v1606_v31 = vpop.f32.mrb[36].mxu0 }
 0x13f   :  { %v1670_v33 = vpop.f32.mrb[36].mxu1  ;;  %v1607_v34 = vpop.f32.mrb[37].mxu0 }
 0x140   :  { %1308 = vst.msk [vmem:[%s2316_s3 + $0x8] sm:$0xff] %vm1306_vm0, %v1247_v29  ;;  %v1608_v14 = vadd.f32 %v1607_v34, %v1606_v31  ;;  %v1671_v36 = vpop.f32.mrb[37].mxu1  ;;  %v1609_v38 = vpop.f32.mrb[38].mxu0 }
 0x141   :  { %v1672_v39 = vadd.f32 %v1671_v36, %v1670_v33  ;;  %v1673_v40 = vpop.f32.mrb[38].mxu1  ;;  %v1610_v16 = vpop.f32.mrb[39].mxu0 }
 0x142   :  { %v1155_v41 = vadd.f32 %v1608_v14, %v2192_v30  ;;  %v1611_v42 = vadd.f32 %v1610_v16, %v1609_v38  ;;  %v1674_v43 = vpop.f32.mrb[39].mxu1 }
 0x143   :  { %v1675_v44 = vadd.f32 %v1674_v43, %v1673_v40 }
 0x144   :  { %v1252_v45 = vadd.f32 %v1672_v39, %v1155_v41  ;;  %v1158_v47 = vadd.f32 %v1611_v42, %v2195_v32 }
 0x146   :  { %1309 = vst.msk [vmem:[%s2316_s3 + $0x10] sm:$0xff] %vm1306_vm0, %v1252_v45  ;;  %v1255_v49 = vadd.f32 %v1675_v44, %v1158_v47  ;;  %v1612_v50 = vpop.f32.mrb[40].mxu0 }
 0x147   :  { %v1676_v51 = vpop.f32.mrb[40].mxu1  ;;  %v1613_v52 = vpop.f32.mrb[41].mxu0 }
 0x148   :  { %1310 = vst.msk [vmem:[%s2316_s3 + $0x18] sm:$0xff] %vm1306_vm0, %v1255_v49  ;;  %v1614_v30 = vadd.f32 %v1613_v52, %v1612_v50  ;;  %v1677_v54 = vpop.f32.mrb[41].mxu1  ;;  %v1615_v56 = vpop.f32.mrb[42].mxu0 }
 0x149   :  { %v1678_v57 = vadd.f32 %v1677_v54, %v1676_v51  ;;  %v1679_v58 = vpop.f32.mrb[42].mxu1  ;;  %v1616_v32 = vpop.f32.mrb[43].mxu0 }
 0x14a   :  { %v1163_v59 = vadd.f32 %v1614_v30, %v2198_v46  ;;  %v1617_v60 = vadd.f32 %v1616_v32, %v1615_v56  ;;  %v1680_v61 = vpop.f32.mrb[43].mxu1 }
 0x14b   :  { %v1681_v63 = vadd.f32 %v1680_v61, %v1679_v58 }
 0x14c   :  { %v1260_v1 = vadd.f32 %v1678_v57, %v1163_v59  ;;  %v1166_v3 = vadd.f32 %v1617_v60, %v2201_v48 }
 0x14e   :  { %1311 = vst.msk [vmem:[%s2316_s3 + $0x20] sm:$0xff] %vm1306_vm0, %v1260_v1  ;;  %v1263_v4 = vadd.f32 %v1681_v63, %v1166_v3  ;;  %v1618_v5 = vpop.f32.mrb[44].mxu0 }
 0x14f   :  { %v1682_v6 = vpop.f32.mrb[44].mxu1  ;;  %v1619_v7 = vpop.f32.mrb[45].mxu0 }
 0x150   :  { %1312 = vst.msk [vmem:[%s2316_s3 + $0x28] sm:$0xff] %vm1306_vm0, %v1263_v4  ;;  %v1620_v46 = vadd.f32 %v1619_v7, %v1618_v5  ;;  %v1683_v9 = vpop.f32.mrb[45].mxu1  ;;  %v1621_v11 = vpop.f32.mrb[46].mxu0 }
 0x151   :  { %v1684_v12 = vadd.f32 %v1683_v9, %v1682_v6  ;;  %v1685_v13 = vpop.f32.mrb[46].mxu1  ;;  %v1622_v48 = vpop.f32.mrb[47].mxu0 }
 0x152   :  { %v1171_v15 = vadd.f32 %v1620_v46, %v2204_v62  ;;  %v1623_v18 = vadd.f32 %v1622_v48, %v1621_v11  ;;  %v1686_v20 = vpop.f32.mrb[47].mxu1 }
 0x153   :  { %v1687_v21 = vadd.f32 %v1686_v20, %v1685_v13 }
 0x154   :  { %v1268_v22 = vadd.f32 %v1684_v12, %v1171_v15  ;;  %v1174_v23 = vadd.f32 %v1623_v18, %v2207_v0 }
 0x156   :  { %1313 = vst.msk [vmem:[%s2316_s3 + $0x30] sm:$0xff] %vm1306_vm0, %v1268_v22  ;;  %v1271_v24 = vadd.f32 %v1687_v21, %v1174_v23  ;;  %v1624_v25 = vpop.f32.mrb[48].mxu0 }
 0x157   :  { %v1688_v26 = vpop.f32.mrb[48].mxu1  ;;  %v1625_v27 = vpop.f32.mrb[49].mxu0 }
 0x158   :  { %1314 = vst.msk [vmem:[%s2316_s3 + $0x38] sm:$0xff] %vm1306_vm0, %v1271_v24  ;;  %v1626_v62 = vadd.f32 %v1625_v27, %v1624_v25  ;;  %v1689_v28 = vpop.f32.mrb[49].mxu1  ;;  %v1627_v2 = vpop.f32.mrb[50].mxu0 }
 0x159   :  { %v1690_v29 = vadd.f32 %v1689_v28, %v1688_v26  ;;  %v1691_v31 = vpop.f32.mrb[50].mxu1  ;;  %v1628_v0 = vpop.f32.mrb[51].mxu0 }
 0x15a   :  { %v1179_v33 = vadd.f32 %v1626_v62, %v2210_v17  ;;  %v1629_v34 = vadd.f32 %v1628_v0, %v1627_v2  ;;  %v1692_v14 = vpop.f32.mrb[51].mxu1 }
 0x15b   :  { %v1693_v36 = vadd.f32 %v1692_v14, %v1691_v31 }
 0x15c   :  { %v1276_v38 = vadd.f32 %v1690_v29, %v1179_v33  ;;  %v1182_v39 = vadd.f32 %v1629_v34, %v2213_v19 }
 0x15e   :  { %1315 = vst.msk [vmem:[%s2316_s3 + $0x40] sm:$0xff] %vm1306_vm0, %v1276_v38  ;;  %v1279_v40 = vadd.f32 %v1693_v36, %v1182_v39  ;;  %v1630_v16 = vpop.f32.mrb[52].mxu0 }
 0x15f   :  { %v1694_v41 = vpop.f32.mrb[52].mxu1  ;;  %v1631_v42 = vpop.f32.mrb[53].mxu0 }
 0x160   :  { %1316 = vst.msk [vmem:[%s2316_s3 + $0x48] sm:$0xff] %vm1306_vm0, %v1279_v40  ;;  %v1632_v17 = vadd.f32 %v1631_v42, %v1630_v16  ;;  %v1695_v43 = vpop.f32.mrb[53].mxu1  ;;  %v1633_v44 = vpop.f32.mrb[54].mxu0 }
 0x161   :  { %v1696_v45 = vadd.f32 %v1695_v43, %v1694_v41  ;;  %v1697_v47 = vpop.f32.mrb[54].mxu1  ;;  %v1634_v19 = vpop.f32.mrb[55].mxu0 }
 0x162   :  { %v1187_v49 = vadd.f32 %v1632_v17, %v2216_v35  ;;  %v1635_v50 = vadd.f32 %v1634_v19, %v1633_v44  ;;  %v1698_v51 = vpop.f32.mrb[55].mxu1 }
 0x163   :  { %v1699_v52 = vadd.f32 %v1698_v51, %v1697_v47 }
 0x164   :  { %v1284_v30 = vadd.f32 %v1696_v45, %v1187_v49  ;;  %v1190_v54 = vadd.f32 %v1635_v50, %v2219_v37 }
 0x166   :  { %1317 = vst.msk [vmem:[%s2316_s3 + $0x50] sm:$0xff] %vm1306_vm0, %v1284_v30  ;;  %v1287_v56 = vadd.f32 %v1699_v52, %v1190_v54  ;;  %v1636_v57 = vpop.f32.mrb[56].mxu0 }
 0x167   :  { %v1700_v58 = vpop.f32.mrb[56].mxu1  ;;  %v1637_v32 = vpop.f32.mrb[57].mxu0 }
 0x168   :  { %1318 = vst.msk [vmem:[%s2316_s3 + $0x58] sm:$0xff] %vm1306_vm0, %v1287_v56  ;;  %v1638_v35 = vadd.f32 %v1637_v32, %v1636_v57  ;;  %v1701_v59 = vpop.f32.mrb[57].mxu1  ;;  %v1639_v60 = vpop.f32.mrb[58].mxu0 }
 0x169   :  { %v1702_v61 = vadd.f32 %v1701_v59, %v1700_v58  ;;  %v1703_v63 = vpop.f32.mrb[58].mxu1  ;;  %v1640_v37 = vpop.f32.mrb[59].mxu0 }
 0x16a   :  { %v1195_v1 = vadd.f32 %v1638_v35, %v2222_v53  ;;  %v1641_v3 = vadd.f32 %v1640_v37, %v1639_v60  ;;  %v1704_v4 = vpop.f32.mrb[59].mxu1 }
 0x16b   :  { %v1705_v5 = vadd.f32 %v1704_v4, %v1703_v63 }
 0x16c   :  { %v1292_v6 = vadd.f32 %v1702_v61, %v1195_v1  ;;  %v1198_v7 = vadd.f32 %v1641_v3, %v2225_v55 }
 0x16e   :  { %1319 = vst.msk [vmem:[%s2316_s3 + $0x60] sm:$0xff] %vm1306_vm0, %v1292_v6  ;;  %v1295_v46 = vadd.f32 %v1705_v5, %v1198_v7  ;;  %v1642_v9 = vpop.f32.mrb[60].mxu0 }
 0x16f   :  { %v1706_v11 = vpop.f32.mrb[60].mxu1  ;;  %v1643_v12 = vpop.f32.mrb[61].mxu0 }
 0x170   :  { %1320 = vst.msk [vmem:[%s2316_s3 + $0x68] sm:$0xff] %vm1306_vm0, %v1295_v46  ;;  %v1644_v53 = vadd.f32 %v1643_v12, %v1642_v9  ;;  %v1707_v13 = vpop.f32.mrb[61].mxu1  ;;  %v1645_v48 = vpop.f32.mrb[62].mxu0 }
 0x171   :  { %v1708_v15 = vadd.f32 %v1707_v13, %v1706_v11  ;;  %v1709_v18 = vpop.f32.mrb[62].mxu1  ;;  %v1646_v55 = vpop.f32.mrb[63].mxu0 }
 0x172   :  { %v1203_v20 = vadd.f32 %v1644_v53, %v2228_v8  ;;  %v1647_v21 = vadd.f32 %v1646_v55, %v1645_v48  ;;  %v1710_v22 = vpop.f32.mrb[63].mxu1 }
 0x173   :  { %v1711_v23 = vadd.f32 %v1710_v22, %v1709_v18 }
 0x174   :  { %v1300_v24 = vadd.f32 %v1708_v15, %v1203_v20  ;;  %v1206_v25 = vadd.f32 %v1647_v21, %v2231_v10 }
 0x176   :  { %1321 = vst.msk [vmem:[%s2316_s3 + $0x70] sm:$0xff] %vm1306_vm0, %v1300_v24  ;;  %v1303_v26 = vadd.f32 %v1711_v23, %v1206_v25 }
 0x178   :  { %1322 = vst.msk [vmem:[%s2316_s3 + $0x78] sm:$0xff] %vm1306_vm0, %v1303_v26 }

// kernel: sft_net_forward.21
= control target key start
LH: loop header
LB: loop body
LE: loop exit
PB: predicated region body
PF: predicated region fallthrough
CT: control target
= control target key end

     0   :  { %vm826_vm0 = vcmask 523264   ;;  %s1371_s1 = inlined_call_operand.vmem [shape: bf16[1024,64], index: 1, kind: input, shape index: {}]   ;;  %s1372_s0 = inlined_call_operand.vmem [shape: bf16[32,1024], index: 0, kind: input, shape index: {}]   ;;  %s1373_s2 = inlined_call_operand.vmem [shape: f32[1,64], index: 2, kind: input, shape index: {}]   ;;  %s1374_s3 = inlined_call_operand.vmem [shape: f32[32,64], index: 3, kind: output, shape index: {}]  }
   0x1   :  { %v1028_v0 = vld [vmem:[%s1371_s1 + $0x40] sm:$0xff]   ;;  %v1032_v4 = vld [vmem:[%s1371_s1 + $0x48] sm:$0xff]   ;;  %v1036_v8 = vld [vmem:[%s1371_s1 + $0x50] sm:$0xff]  }
   0x2   :  { %v1029_v1 = vld [vmem:[%s1371_s1 + $0xc0] sm:$0xff]   ;;  %916 = vmatprep.subr.bf16.mxu0 %v1028_v0  ;;  %v1033_v5 = vld [vmem:[%s1371_s1 + $0xc8] sm:$0xff]   ;;  %v1037_v9 = vld [vmem:[%s1371_s1 + $0xd0] sm:$0xff]  }
   0x3   :  { %v1030_v2 = vld [vmem:[%s1371_s1] sm:$0xff]   ;;  %944 = vmatprep.subr.bf16.mxu1 %v1029_v1  ;;  %v1034_v6 = vld [vmem:[%s1371_s1 + $0x8] sm:$0xff]   ;;  %v1038_v10 = vld [vmem:[%s1371_s1 + $0x10] sm:$0xff]  }
   0x4   :  { %v1031_v3 = vld [vmem:[%s1371_s1 + $0x80] sm:$0xff]   ;;  %917 = vmatpush3.bf16.msra.mxu0 %v1030_v2  ;;  %v1035_v7 = vld [vmem:[%s1371_s1 + $0x88] sm:$0xff]   ;;  %v1039_v11 = vld [vmem:[%s1371_s1 + $0x90] sm:$0xff]  }
   0x5   :  { %945 = vmatpush3.bf16.msra.mxu1 %v1031_v3  ;;  %918 = vmatprep.subr.bf16.mxu0 %v1032_v4  ;;  %v1040_v12 = vld [vmem:[%s1371_s1 + $0x58] sm:$0xff]   ;;  %v1044_v16 = vld [vmem:[%s1371_s1 + $0x60] sm:$0xff]   ;;  %v1048_v20 = vld [vmem:[%s1371_s1 + $0x68] sm:$0xff]  }
   0x6   :  { %946 = vmatprep.subr.bf16.mxu1 %v1033_v5  ;;  %v1041_v13 = vld [vmem:[%s1371_s1 + $0xd8] sm:$0xff]   ;;  %v1045_v17 = vld [vmem:[%s1371_s1 + $0xe0] sm:$0xff]   ;;  %v1049_v21 = vld [vmem:[%s1371_s1 + $0xe8] sm:$0xff]  }
   0x7   :  { %v1042_v14 = vld [vmem:[%s1371_s1 + $0x18] sm:$0xff]   ;;  %v1046_v18 = vld [vmem:[%s1371_s1 + $0x20] sm:$0xff]   ;;  %v1050_v22 = vld [vmem:[%s1371_s1 + $0x28] sm:$0xff]  }
   0x8   :  { %919 = vmatpush3.bf16.msra.mxu0 %v1034_v6  ;;  %v1043_v15 = vld [vmem:[%s1371_s1 + $0x98] sm:$0xff]   ;;  %v1047_v19 = vld [vmem:[%s1371_s1 + $0xa0] sm:$0xff]   ;;  %v1051_v23 = vld [vmem:[%s1371_s1 + $0xa8] sm:$0xff]  }
   0x9   :  { %947 = vmatpush3.bf16.msra.mxu1 %v1035_v7  ;;  %920 = vmatprep.subr.bf16.mxu0 %v1036_v8  ;;  %v1052_v24 = vld [vmem:[%s1371_s1 + $0x70] sm:$0xff]   ;;  %v1056_v28 = vld [vmem:[%s1371_s1 + $0x78] sm:$0xff]   ;;  %v15_v32 = vld [vmem:[%s1372_s0] sm:$0xff] }
   0xa   :  { %948 = vmatprep.subr.bf16.mxu1 %v1037_v9  ;;  %v1053_v25 = vld [vmem:[%s1371_s1 + $0xf0] sm:$0xff]   ;;  %v1057_v29 = vld [vmem:[%s1371_s1 + $0xf8] sm:$0xff]   ;;  %v19_v33 = vld [vmem:[%s1372_s0 + $0x20] sm:$0xff] }
   0xb   :  { %v1054_v26 = vld [vmem:[%s1371_s1 + $0x30] sm:$0xff]   ;;  %v1058_v30 = vld [vmem:[%s1371_s1 + $0x38] sm:$0xff]   ;;  %v16_v34 = vld [vmem:[%s1372_s0 + $0x8] sm:$0xff]  ;;  %v836_v35 = vcombine.low %v15_v32, %v19_v33  ;;  %v837_v36 = vcombine.high %v15_v32, %v19_v33 }
   0xc   :  { %921 = vmatpush3.bf16.msra.mxu0 %v1038_v10  ;;  %v1055_v27 = vld [vmem:[%s1371_s1 + $0xb0] sm:$0xff]   ;;  %v1059_v31 = vld [vmem:[%s1371_s1 + $0xb8] sm:$0xff]   ;;  %v20_v37 = vld [vmem:[%s1372_s0 + $0x28] sm:$0xff] }
   0xd   :  { %949 = vmatpush3.bf16.msra.mxu1 %v1039_v11  ;;  %922 = vmatprep.subr.bf16.mxu0 %v1040_v12  ;;  %v838_v38 = vcombine.low %v16_v34, %v20_v37  ;;  %v839_v39 = vcombine.high %v16_v34, %v20_v37  ;;  %v1060_v40 = vld [vmem:[%s1371_s1 + $0x140] sm:$0xff]   ;;  %v1064_v44 = vld [vmem:[%s1371_s1 + $0x148] sm:$0xff]   ;;  %v1068_v48 = vld [vmem:[%s1371_s1 + $0x150] sm:$0xff]  }
   0xe   :  { %950 = vmatprep.subr.bf16.mxu1 %v1041_v13  ;;  %662 = vmatprep.mubr.bf16.mxu0 %v837_v36  ;;  %v1061_v41 = vld [vmem:[%s1371_s1 + $0x1c0] sm:$0xff]   ;;  %v1065_v45 = vld [vmem:[%s1371_s1 + $0x1c8] sm:$0xff]   ;;  %v1069_v49 = vld [vmem:[%s1371_s1 + $0x1d0] sm:$0xff]  }
   0xf   :  { %711 = vmatprep.mubr.bf16.mxu1 %v839_v39  ;;  %v1062_v42 = vld [vmem:[%s1371_s1 + $0x100] sm:$0xff]   ;;  %v1066_v46 = vld [vmem:[%s1371_s1 + $0x108] sm:$0xff]   ;;  %v1070_v50 = vld [vmem:[%s1371_s1 + $0x110] sm:$0xff]  }
  0x10   :  { %923 = vmatpush3.bf16.msra.mxu0 %v1042_v14  ;;  %v1063_v43 = vld [vmem:[%s1371_s1 + $0x180] sm:$0xff]   ;;  %v1067_v47 = vld [vmem:[%s1371_s1 + $0x188] sm:$0xff]   ;;  %v1071_v51 = vld [vmem:[%s1371_s1 + $0x190] sm:$0xff]  }
  0x11   :  { %951 = vmatpush3.bf16.msra.mxu1 %v1043_v15  ;;  %924 = vmatprep.subr.bf16.mxu0 %v1044_v16  ;;  %v1072_v52 = vld [vmem:[%s1371_s1 + $0x158] sm:$0xff]   ;;  %v1076_v56 = vld [vmem:[%s1371_s1 + $0x160] sm:$0xff]   ;;  %v1080_v63 = vld [vmem:[%s1371_s1 + $0x168] sm:$0xff]  }
  0x12   :  { %952 = vmatprep.subr.bf16.mxu1 %v1045_v17  ;;  %v1073_v53 = vld [vmem:[%s1371_s1 + $0x1d8] sm:$0xff]   ;;  %v1077_v57 = vld [vmem:[%s1371_s1 + $0x1e0] sm:$0xff]   ;;  %v1081_v1 = vld [vmem:[%s1371_s1 + $0x1e8] sm:$0xff]  }
  0x13   :  { %v1074_v54 = vld [vmem:[%s1371_s1 + $0x118] sm:$0xff]   ;;  %v1078_v58 = vld [vmem:[%s1371_s1 + $0x120] sm:$0xff]   ;;  %v1082_v2 = vld [vmem:[%s1371_s1 + $0x128] sm:$0xff]  }
  0x14   :  { %925 = vmatpush3.bf16.msra.mxu0 %v1046_v18  ;;  %v1075_v55 = vld [vmem:[%s1371_s1 + $0x198] sm:$0xff]   ;;  %v1079_v59 = vld [vmem:[%s1371_s1 + $0x1a0] sm:$0xff]   ;;  %v1083_v3 = vld [vmem:[%s1371_s1 + $0x1a8] sm:$0xff]  }
  0x15   :  { %953 = vmatpush3.bf16.msra.mxu1 %v1047_v19  ;;  %926 = vmatprep.subr.bf16.mxu0 %v1048_v20  ;;  %v23_v60 = vld [vmem:[%s1372_s0 + $0x40] sm:$0xff]  ;;  %v24_v4 = vld [vmem:[%s1372_s0 + $0x48] sm:$0xff]  ;;  %v1084_v8 = vld [vmem:[%s1371_s1 + $0x170] sm:$0xff]  }
  0x16   :  { %954 = vmatprep.subr.bf16.mxu1 %v1049_v21  ;;  %v27_v61 = vld [vmem:[%s1372_s0 + $0x60] sm:$0xff]  ;;  %v28_v5 = vld [vmem:[%s1372_s0 + $0x68] sm:$0xff]  ;;  %v1085_v9 = vld [vmem:[%s1371_s1 + $0x1f0] sm:$0xff]  }
  0x17   :  { %v845_v62 = vcombine.high %v23_v60, %v27_v61  ;;  %v844_v0 = vcombine.low %v23_v60, %v27_v61  ;;  %v847_v6 = vcombine.high %v24_v4, %v28_v5  ;;  %v846_v7 = vcombine.low %v24_v4, %v28_v5  ;;  %v1086_v10 = vld [vmem:[%s1371_s1 + $0x130] sm:$0xff]   ;;  %v1088_v12 = vld [vmem:[%s1371_s1 + $0x178] sm:$0xff]   ;;  %v835_v34 = vld [vmem:[%s1373_s2] ss:$0 sm:$0xff] }
  0x18   :  { %927 = vmatpush3.bf16.msra.mxu0 %v1050_v22  ;;  %v1087_v11 = vld [vmem:[%s1371_s1 + $0x1b0] sm:$0xff]   ;;  %v1089_v13 = vld [vmem:[%s1371_s1 + $0x1f8] sm:$0xff]  }
  0x19   :  { %955 = vmatpush3.bf16.msra.mxu1 %v1051_v23  ;;  %928 = vmatprep.subr.bf16.mxu0 %v1052_v24  ;;  %v1090_v14 = vld [vmem:[%s1371_s1 + $0x138] sm:$0xff]   ;;  %v17_v16 = vld [vmem:[%s1372_s0 + $0x10] sm:$0xff] }
  0x1a   :  { %956 = vmatprep.subr.bf16.mxu1 %v1053_v25  ;;  %v1091_v15 = vld [vmem:[%s1371_s1 + $0x1b8] sm:$0xff]   ;;  %v21_v17 = vld [vmem:[%s1372_s0 + $0x30] sm:$0xff] }
  0x1b   :  { %v18_v18 = vld [vmem:[%s1372_s0 + $0x18] sm:$0xff]  ;;  %v840_v20 = vcombine.low %v17_v16, %v21_v17  ;;  %v841_v21 = vcombine.high %v17_v16, %v21_v17  ;;  %v25_v24 = vld [vmem:[%s1372_s0 + $0x50] sm:$0xff] }
  0x1c   :  { %929 = vmatpush3.bf16.msra.mxu0 %v1054_v26  ;;  %v22_v19 = vld [vmem:[%s1372_s0 + $0x38] sm:$0xff]  ;;  %v29_v25 = vld [vmem:[%s1372_s0 + $0x70] sm:$0xff] }
  0x1d   :  { %957 = vmatpush3.bf16.msra.mxu1 %v1055_v27  ;;  %930 = vmatprep.subr.bf16.mxu0 %v1056_v28  ;;  %v842_v22 = vcombine.low %v18_v18, %v22_v19  ;;  %v843_v23 = vcombine.high %v18_v18, %v22_v19  ;;  %v26_v26 = vld [vmem:[%s1372_s0 + $0x58] sm:$0xff]  ;;  %v849_v27 = vcombine.high %v25_v24, %v29_v25 }
  0x1e   :  { %958 = vmatprep.subr.bf16.mxu1 %v1057_v29  ;;  %v30_v28 = vld [vmem:[%s1372_s0 + $0x78] sm:$0xff] }
  0x1f   :  { %v851_v29 = vcombine.high %v26_v26, %v30_v28 }
  0x20   :  { %931 = vmatpush3.bf16.msra.mxu0 %v1058_v30  ;;  %v848_v30 = vcombine.low %v25_v24, %v29_v25 }
  0x21   :  { %959 = vmatpush3.bf16.msra.mxu1 %v1059_v31  ;;  %972 = vmatprep.subr.bf16.mxu0 %v1060_v40  ;;  %v850_v31 = vcombine.low %v26_v26, %v30_v28 }
  0x22   :  { %1000 = vmatprep.subr.bf16.mxu1 %v1061_v41 }
  0x23   :  { %663 = vmatmul.mubr.bf16.vlgmr.msra.gmra.mrb[0].mxu0 %v836_v35 }
  0x24   :  { %712 = vmatmul.mubr.bf16.vlgmr.msra.gmra.mrb[0].mxu1 %v838_v38  ;;  %973 = vmatpush3.bf16.msra.mxu0 %v1062_v42 }
  0x25   :  { %1001 = vmatpush3.bf16.msra.mxu1 %v1063_v43  ;;  %974 = vmatprep.subr.bf16.mxu0 %v1064_v44 }
  0x26   :  { %1002 = vmatprep.subr.bf16.mxu1 %v1065_v45  ;;  %670 = vmatprep.mubr.bf16.mxu0 %v845_v62 }
  0x27   :  { %719 = vmatprep.mubr.bf16.mxu1 %v847_v6 }
  0x28   :  { %975 = vmatpush3.bf16.msra.mxu0 %v1066_v46 }
  0x29   :  { %1003 = vmatpush3.bf16.msra.mxu1 %v1067_v47  ;;  %976 = vmatprep.subr.bf16.mxu0 %v1068_v48 }
  0x2a   :  { %1004 = vmatprep.subr.bf16.mxu1 %v1069_v49 }
  0x2b   :  { %671 = vmatmul.mubr.bf16.gmra.mrb[4].mxu0 %v844_v0 }
  0x2c   :  { %977 = vmatpush3.bf16.msra.mxu0 %v1070_v50  ;;  %720 = vmatmul.mubr.bf16.gmra.mrb[4].mxu1 %v846_v7 }
  0x2d   :  { %1005 = vmatpush3.bf16.msra.mxu1 %v1071_v51  ;;  %978 = vmatprep.subr.bf16.mxu0 %v1072_v52 }
  0x2e   :  { %1006 = vmatprep.subr.bf16.mxu1 %v1073_v53  ;;  %760 = vmatprep.mubr.bf16.mxu0 %v841_v21 }
  0x2f   :  { %809 = vmatprep.mubr.bf16.mxu1 %v843_v23 }
  0x30   :  { %979 = vmatpush3.bf16.msra.mxu0 %v1074_v54 }
  0x31   :  { %1007 = vmatpush3.bf16.msra.mxu1 %v1075_v55  ;;  %980 = vmatprep.subr.bf16.mxu0 %v1076_v56 }
  0x32   :  { %1008 = vmatprep.subr.bf16.mxu1 %v1077_v57 }
  0x34   :  { %981 = vmatpush3.bf16.msra.mxu0 %v1078_v58 }
  0x35   :  { %1009 = vmatpush3.bf16.msra.mxu1 %v1079_v59  ;;  %982 = vmatprep.subr.bf16.mxu0 %v1080_v63 }
  0x36   :  { %1010 = vmatprep.subr.bf16.mxu1 %v1081_v1 }
  0x38   :  { %983 = vmatpush3.bf16.msra.mxu0 %v1082_v2 }
  0x39   :  { %1011 = vmatpush3.bf16.msra.mxu1 %v1083_v3  ;;  %984 = vmatprep.subr.bf16.mxu0 %v1084_v8 }
  0x3a   :  { %1012 = vmatprep.subr.bf16.mxu1 %v1085_v9 }
  0x3c   :  { %985 = vmatpush3.bf16.msra.mxu0 %v1086_v10 }
  0x3d   :  { %1013 = vmatpush3.bf16.msra.mxu1 %v1087_v11  ;;  %986 = vmatprep.subr.bf16.mxu0 %v1088_v12 }
  0x3e   :  { %1014 = vmatprep.subr.bf16.mxu1 %v1089_v13 }
  0x40   :  { %987 = vmatpush3.bf16.msra.mxu0 %v1090_v14 }
  0x41   :  { %1015 = vmatpush3.bf16.msra.mxu1 %v1091_v15 }
  0x43   :  { %761 = vmatmul.mubr.bf16.vlgmr.msra.gmra.mrb[8].mxu0 %v840_v20 }
  0x44   :  { %810 = vmatmul.mubr.bf16.vlgmr.msra.gmra.mrb[8].mxu1 %v842_v22  ;;  %768 = vmatprep.mubr.bf16.mxu0 %v849_v27 }
  0x45   :  { %817 = vmatprep.mubr.bf16.mxu1 %v851_v29 }
  0x4b   :  { %769 = vmatmul.mubr.bf16.gmra.mrb[12].mxu0 %v848_v30 }
  0x4c   :  { %818 = vmatmul.mubr.bf16.gmra.mrb[12].mxu1 %v850_v31 }
  0xf6   :  { %v932_v32 = vpop.f32.mrb[0].mxu0 }
  0xf7   :  { %v960_v33 = vpop.f32.mrb[0].mxu1  ;;  %v933_v35 = vpop.f32.mrb[1].mxu0 }
  0xf8   :  { %v934_v36 = vadd.f32 %v933_v35, %v932_v32  ;;  %v961_v37 = vpop.f32.mrb[1].mxu1  ;;  %v935_v38 = vpop.f32.mrb[2].mxu0 }
  0xf9   :  { %v962_v39 = vadd.f32 %v961_v37, %v960_v33  ;;  %v963_v40 = vpop.f32.mrb[2].mxu1  ;;  %v936_v41 = vpop.f32.mrb[3].mxu0 }
  0xfa   :  { %v665_v42 = vadd.f32 %v934_v36, %v835_v34  ;;  %v937_v43 = vadd.f32 %v936_v41, %v935_v38  ;;  %v964_v44 = vpop.f32.mrb[3].mxu1 }
  0xfb   :  { %v965_v45 = vadd.f32 %v964_v44, %v963_v40 }
  0xfc   :  { %v714_v46 = vadd.f32 %v962_v39, %v665_v42  ;;  %v668_v47 = vadd.f32 %v937_v43, %v835_v34 }
  0xfe   :  { %v717_v48 = vadd.f32 %v965_v45, %v668_v47  ;;  %v938_v49 = vpop.f32.mrb[4].mxu0 }
  0xff   :  { %v939_v50 = vpop.f32.mrb[5].mxu0  ;;  %v966_v56 = vpop.f32.mrb[4].mxu1 }
 0x100   :  { %v940_v51 = vadd.f32 %v939_v50, %v938_v49  ;;  %v941_v52 = vpop.f32.mrb[6].mxu0  ;;  %v967_v57 = vpop.f32.mrb[5].mxu1 }
 0x101   :  { %v942_v53 = vpop.f32.mrb[7].mxu0  ;;  %v968_v59 = vadd.f32 %v967_v57, %v966_v56  ;;  %v969_v60 = vpop.f32.mrb[6].mxu1 }
 0x102   :  { %v943_v54 = vadd.f32 %v942_v53, %v941_v52  ;;  %v673_v55 = vadd.f32 %v940_v51, %v835_v34  ;;  %v970_v61 = vpop.f32.mrb[7].mxu1 }
 0x103   :  { %v971_v63 = vadd.f32 %v970_v61, %v969_v60 }
 0x104   :  { %v676_v58 = vadd.f32 %v943_v54, %v835_v34  ;;  %v722_v62 = vadd.f32 %v968_v59, %v673_v55 }
 0x106   :  { %v725_v0 = vadd.f32 %v971_v63, %v676_v58 }
 0x116   :  { %v988_v1 = vpop.f32.mrb[8].mxu0 }
 0x117   :  { %v1016_v2 = vpop.f32.mrb[8].mxu1  ;;  %v989_v3 = vpop.f32.mrb[9].mxu0 }
 0x118   :  { %v1017_v4 = vpop.f32.mrb[9].mxu1  ;;  %v990_v5 = vadd.f32 %v989_v3, %v988_v1  ;;  %v991_v7 = vpop.f32.mrb[10].mxu0 }
 0x119   :  { %v1018_v6 = vadd.f32 %v1017_v4, %v1016_v2  ;;  %v1019_v8 = vpop.f32.mrb[10].mxu1  ;;  %v992_v9 = vpop.f32.mrb[11].mxu0 }
 0x11a   :  { %v1020_v10 = vpop.f32.mrb[11].mxu1  ;;  %v763_v11 = vadd.f32 %v990_v5, %v714_v46  ;;  %v993_v12 = vadd.f32 %v992_v9, %v991_v7 }
 0x11b   :  { %v1021_v13 = vadd.f32 %v1020_v10, %v1019_v8 }
 0x11c   :  { %v812_v14 = vadd.f32 %v1018_v6, %v763_v11  ;;  %v766_v15 = vadd.f32 %v993_v12, %v717_v48 }
 0x11e   :  { %827 = vst.msk [vmem:[%s1374_s3] sm:$0xff] %vm826_vm0, %v812_v14  ;;  %v815_v16 = vadd.f32 %v1021_v13, %v766_v15  ;;  %v994_v17 = vpop.f32.mrb[12].mxu0 }
 0x11f   :  { %v1022_v18 = vpop.f32.mrb[12].mxu1  ;;  %v995_v19 = vpop.f32.mrb[13].mxu0 }
 0x120   :  { %v1023_v20 = vpop.f32.mrb[13].mxu1  ;;  %828 = vst.msk [vmem:[%s1374_s3 + $0x8] sm:$0xff] %vm826_vm0, %v815_v16  ;;  %v996_v21 = vadd.f32 %v995_v19, %v994_v17  ;;  %v997_v23 = vpop.f32.mrb[14].mxu0 }
 0x121   :  { %v1024_v22 = vadd.f32 %v1023_v20, %v1022_v18  ;;  %v1025_v24 = vpop.f32.mrb[14].mxu1  ;;  %v998_v25 = vpop.f32.mrb[15].mxu0 }
 0x122   :  { %v1026_v26 = vpop.f32.mrb[15].mxu1  ;;  %v771_v27 = vadd.f32 %v996_v21, %v722_v62  ;;  %v999_v28 = vadd.f32 %v998_v25, %v997_v23 }
 0x123   :  { %v1027_v29 = vadd.f32 %v1026_v26, %v1025_v24 }
 0x124   :  { %v820_v30 = vadd.f32 %v1024_v22, %v771_v27  ;;  %v774_v31 = vadd.f32 %v999_v28, %v725_v0 }
 0x126   :  { %829 = vst.msk [vmem:[%s1374_s3 + $0x10] sm:$0xff] %vm826_vm0, %v820_v30  ;;  %v823_v32 = vadd.f32 %v1027_v29, %v774_v31 }
 0x128   :  { %830 = vst.msk [vmem:[%s1374_s3 + $0x18] sm:$0xff] %vm826_vm0, %v823_v32 }

// kernel: sft_net_forward.14
= control target key start
LH: loop header
LB: loop body
LE: loop exit
PB: predicated region body
PF: predicated region fallthrough
CT: control target
= control target key end

     0   :  { %s287_s1 = inlined_call_operand.vmem [shape: bf16[128,128], index: 1, kind: input, shape index: {}]   ;;  %s288_s0 = inlined_call_operand.vmem [shape: bf16[32,128], index: 0, kind: input, shape index: {}]   ;;  %s289_s2 = inlined_call_operand.vmem [shape: f32[1,128], index: 2, kind: input, shape index: {}]   ;;  %s290_s3 = inlined_call_operand.vmem [shape: f32[32,128], index: 3, kind: output, shape index: {}]  }
   0x1   :  { %v212_v0 = vld [vmem:[%s287_s1] sm:$0xff]   ;;  %v213_v1 = vld [vmem:[%s287_s1 + $0x8] sm:$0xff]   ;;  %v214_v2 = vld [vmem:[%s287_s1 + $0x10] sm:$0xff]  }
   0x2   :  { %192 = vmatprep.subr.bf16.mxu0 %v212_v0  ;;  %v215_v3 = vld [vmem:[%s287_s1 + $0x18] sm:$0xff]   ;;  %v220_v4 = vld [vmem:[%s288_s0] sm:$0xff]   ;;  %v217_v6 = vld [vmem:[%s287_s1 + $0x28] sm:$0xff]  }
   0x3   :  { %193 = vmatpush3.bf16.msra.mxu0 %v212_v0  ;;  %208 = vmatprep.mubr.bf16.mxu0 %v220_v4  ;;  %v216_v5 = vld [vmem:[%s287_s1 + $0x20] sm:$0xff]   ;;  %v218_v7 = vld [vmem:[%s287_s1 + $0x30] sm:$0xff]   ;;  %v219_v8 = vld [vmem:[%s287_s1 + $0x38] sm:$0xff]  }
   0x4   :  { %194 = vmatprep.subr.bf16.mxu0 %v213_v1  ;;  %v221_v9 = vld [vmem:[%s288_s0 + $0x8] sm:$0xff]   ;;  %v171_v10 = vld [vmem:[%s289_s2] ss:$0 sm:$0xff] }
   0x7   :  { %195 = vmatpush3.bf16.msra.mxu0 %v213_v1 }
   0x8   :  { %196 = vmatprep.subr.bf16.mxu0 %v214_v2 }
   0xb   :  { %197 = vmatpush3.bf16.msra.mxu0 %v214_v2 }
   0xc   :  { %198 = vmatprep.subr.bf16.mxu0 %v215_v3 }
   0xf   :  { %199 = vmatpush3.bf16.msra.mxu0 %v215_v3 }
  0x10   :  { %200 = vmatprep.subr.bf16.mxu0 %v216_v5 }
  0x13   :  { %201 = vmatpush3.bf16.msra.mxu0 %v216_v5 }
  0x14   :  { %202 = vmatprep.subr.bf16.mxu0 %v217_v6 }
  0x17   :  { %203 = vmatpush3.bf16.msra.mxu0 %v217_v6 }
  0x18   :  { %204 = vmatprep.subr.bf16.mxu0 %v218_v7 }
  0x1b   :  { %205 = vmatpush3.bf16.msra.mxu0 %v218_v7 }
  0x1c   :  { %206 = vmatprep.subr.bf16.mxu0 %v219_v8 }
  0x1f   :  { %207 = vmatpush3.bf16.msra.mxu0 %v219_v8 }
  0x22   :  { %209 = vmatmul.mubr.bf16.vlgmr.msra.gmra.mrb[0].mxu0 %v221_v9 }
  0xf5   :  { %v210_v11 = vpop.f32.mrb[0].mxu0 }
  0xf6   :  { %v145_v12 = vadd.f32 %v210_v11, %v171_v10  ;;  %v136_v13 = vpop.f32.mrb[1].mxu0 }
  0xf7   :  { %v137_v14 = vadd.f32 %v171_v10, %v136_v13  ;;  %v211_v15 = vpop.f32.mrb[2].mxu0 }
  0xf8   :  { %vm153_vm0 = vcmp.gt.f32.partialorder %v145_v12, 0.0  ;;  %v157_v16 = vmul.f32 0.1, %v145_v12  ;;  %v148_v17 = vadd.f32 %v211_v15, %v171_v10  ;;  %v139_v18 = vpop.f32.mrb[3].mxu0 }
  0xf9   :  { %vm151_vm1 = vcmp.gt.f32.partialorder %v137_v14, 0.0  ;;  %v155_v19 = vmul.f32 0.1, %v137_v14  ;;  %v140_v20 = vadd.f32 %v171_v10, %v139_v18 }
  0xfa   :  { %v161_v21 = vsel %vm153_vm0, %v145_v12, %v157_v16  ;;  %vm154_vm2 = vcmp.gt.f32.partialorder %v148_v17, 0.0  ;;  %v158_v22 = vmul.f32 0.1, %v148_v17 }
  0xfb   :  { %165 = vst [vmem:[%s290_s3 + $0x10] sm:$0xff] %v161_v21  ;;  %v159_v23 = vsel %vm151_vm1, %v137_v14, %v155_v19  ;;  %vm152_vm3 = vcmp.gt.f32.partialorder %v140_v20, 0.0  ;;  %v156_v24 = vmul.f32 0.1, %v140_v20 }
  0xfc   :  { %163 = vst [vmem:[%s290_s3] sm:$0xff] %v159_v23  ;;  %v162_v25 = vsel %vm154_vm2, %v148_v17, %v158_v22 }
  0xfd   :  { %166 = vst [vmem:[%s290_s3 + $0x18] sm:$0xff] %v162_v25  ;;  %v160_v26 = vsel %vm152_vm3, %v140_v20, %v156_v24 }
  0xfe   :  { %164 = vst [vmem:[%s290_s3 + $0x8] sm:$0xff] %v160_v26 }

// kernel: sft_net_forward.18
= control target key start
LH: loop header
LB: loop body
LE: loop exit
PB: predicated region body
PF: predicated region fallthrough
CT: control target
= control target key end

     0   :  { %vm141_vm0 = vcmask 261120   ;;  %s268_s1 = inlined_call_operand.vmem [shape: bf16[128,32], index: 1, kind: input, shape index: {}]   ;;  %s269_s0 = inlined_call_operand.vmem [shape: f32[32,128], index: 0, kind: input, shape index: {}]   ;;  %s270_s2 = inlined_call_operand.vmem [shape: f32[1,32], index: 2, kind: input, shape index: {}]   ;;  %s271_s3 = inlined_call_operand.vmem [shape: f32[32,32], index: 3, kind: output, shape index: {}]  }
   0x1   :  { %v189_v0 = vld [vmem:[%s268_s1] sm:$0xff]   ;;  %v190_v1 = vld [vmem:[%s268_s1 + $0x8] sm:$0xff]   ;;  %v191_v2 = vld [vmem:[%s268_s1 + $0x10] sm:$0xff]  }
   0x2   :  { %169 = vmatprep.subr.bf16.mxu0 %v189_v0  ;;  %v192_v3 = vld [vmem:[%s268_s1 + $0x18] sm:$0xff]   ;;  %v15_v4 = vld [vmem:[%s269_s0] sm:$0xff]  ;;  %v16_v5 = vld [vmem:[%s269_s0 + $0x8] sm:$0xff] }
   0x3   :  { %170 = vmatpush3.bf16.msra.mxu0 %v189_v0  ;;  %v19_v6 = vpack.c.bf16 %v16_v5, %v15_v4  ;;  %v193_v7 = vld [vmem:[%s268_s1 + $0x20] sm:$0xff]   ;;  %v194_v8 = vld [vmem:[%s268_s1 + $0x28] sm:$0xff]   ;;  %v195_v9 = vld [vmem:[%s268_s1 + $0x30] sm:$0xff]  }
   0x4   :  { %171 = vmatprep.subr.bf16.mxu0 %v190_v1  ;;  %v196_v10 = vld [vmem:[%s268_s1 + $0x38] sm:$0xff]   ;;  %v17_v11 = vld [vmem:[%s269_s0 + $0x10] sm:$0xff]  ;;  %v150_v14 = vld [vmem:[%s270_s2] ss:$0 sm:$0xff] }
   0x5   :  { %185 = vmatprep.mubr.bf16.mxu0 %v19_v6  ;;  %v18_v12 = vld [vmem:[%s269_s0 + $0x18] sm:$0xff] }
   0x6   :  { %v20_v13 = vpack.c.bf16 %v18_v12, %v17_v11 }
   0x7   :  { %172 = vmatpush3.bf16.msra.mxu0 %v190_v1 }
   0x8   :  { %173 = vmatprep.subr.bf16.mxu0 %v191_v2 }
   0xb   :  { %174 = vmatpush3.bf16.msra.mxu0 %v191_v2 }
   0xc   :  { %175 = vmatprep.subr.bf16.mxu0 %v192_v3 }
   0xf   :  { %176 = vmatpush3.bf16.msra.mxu0 %v192_v3 }
  0x10   :  { %177 = vmatprep.subr.bf16.mxu0 %v193_v7 }
  0x13   :  { %178 = vmatpush3.bf16.msra.mxu0 %v193_v7 }
  0x14   :  { %179 = vmatprep.subr.bf16.mxu0 %v194_v8 }
  0x17   :  { %180 = vmatpush3.bf16.msra.mxu0 %v194_v8 }
  0x18   :  { %181 = vmatprep.subr.bf16.mxu0 %v195_v9 }
  0x1b   :  { %182 = vmatpush3.bf16.msra.mxu0 %v195_v9 }
  0x1c   :  { %183 = vmatprep.subr.bf16.mxu0 %v196_v10 }
  0x1f   :  { %184 = vmatpush3.bf16.msra.mxu0 %v196_v10 }
  0x22   :  { %186 = vmatmul.mubr.bf16.vlgmr.msra.gmra.mrb[0].mxu0 %v20_v13 }
  0xf5   :  { %v187_v15 = vpop.f32.mrb[0].mxu0 }
  0xf6   :  { %v135_v16 = vadd.f32 %v187_v15, %v150_v14  ;;  %v126_v17 = vpop.f32.mrb[1].mxu0 }
  0xf7   :  { %v127_v18 = vadd.f32 %v150_v14, %v126_v17  ;;  %v188_v19 = vpop.f32.mrb[2].mxu0 }
  0xf8   :  { %144 = vst.msk [vmem:[%s271_s3 + $0x10] sm:$0xff] %vm141_vm0, %v135_v16  ;;  %v138_v20 = vadd.f32 %v188_v19, %v150_v14  ;;  %v129_v21 = vpop.f32.mrb[3].mxu0 }
  0xf9   :  { %142 = vst.msk [vmem:[%s271_s3] sm:$0xff] %vm141_vm0, %v127_v18  ;;  %v130_v22 = vadd.f32 %v150_v14, %v129_v21 }
  0xfa   :  { %145 = vst.msk [vmem:[%s271_s3 + $0x18] sm:$0xff] %vm141_vm0, %v138_v20 }
  0xfb   :  { %143 = vst.msk [vmem:[%s271_s3 + $0x8] sm:$0xff] %vm141_vm0, %v130_v22 }

// kernel: sft_net_forward.15
= control target key start
LH: loop header
LB: loop body
LE: loop exit
PB: predicated region body
PF: predicated region fallthrough
CT: control target
= control target key end

     0   :  { %s279_s1 = inlined_call_operand.vmem [shape: bf16[128,128], index: 1, kind: input, shape index: {}]   ;;  %s280_s0 = inlined_call_operand.vmem [shape: f32[32,128], index: 0, kind: input, shape index: {}]   ;;  %s281_s2 = inlined_call_operand.vmem [shape: f32[1,128], index: 2, kind: input, shape index: {}]   ;;  %s282_s3 = inlined_call_operand.vmem [shape: f32[32,128], index: 3, kind: output, shape index: {}]  }
   0x1   :  { %v200_v0 = vld [vmem:[%s279_s1] sm:$0xff]   ;;  %v201_v1 = vld [vmem:[%s279_s1 + $0x8] sm:$0xff]   ;;  %v202_v2 = vld [vmem:[%s279_s1 + $0x10] sm:$0xff]  }
   0x2   :  { %180 = vmatprep.subr.bf16.mxu0 %v200_v0  ;;  %v203_v3 = vld [vmem:[%s279_s1 + $0x18] sm:$0xff]   ;;  %v15_v4 = vld [vmem:[%s280_s0] sm:$0xff]  ;;  %v16_v5 = vld [vmem:[%s280_s0 + $0x8] sm:$0xff] }
   0x3   :  { %181 = vmatpush3.bf16.msra.mxu0 %v200_v0  ;;  %v19_v6 = vpack.c.bf16 %v16_v5, %v15_v4  ;;  %v204_v7 = vld [vmem:[%s279_s1 + $0x20] sm:$0xff]   ;;  %v205_v8 = vld [vmem:[%s279_s1 + $0x28] sm:$0xff]   ;;  %v206_v9 = vld [vmem:[%s279_s1 + $0x30] sm:$0xff]  }
   0x4   :  { %182 = vmatprep.subr.bf16.mxu0 %v201_v1  ;;  %v207_v10 = vld [vmem:[%s279_s1 + $0x38] sm:$0xff]   ;;  %v17_v11 = vld [vmem:[%s280_s0 + $0x10] sm:$0xff]  ;;  %v161_v14 = vld [vmem:[%s281_s2] ss:$0 sm:$0xff] }
   0x5   :  { %196 = vmatprep.mubr.bf16.mxu0 %v19_v6  ;;  %v18_v12 = vld [vmem:[%s280_s0 + $0x18] sm:$0xff] }
   0x6   :  { %v20_v13 = vpack.c.bf16 %v18_v12, %v17_v11 }
   0x7   :  { %183 = vmatpush3.bf16.msra.mxu0 %v201_v1 }
   0x8   :  { %184 = vmatprep.subr.bf16.mxu0 %v202_v2 }
   0xb   :  { %185 = vmatpush3.bf16.msra.mxu0 %v202_v2 }
   0xc   :  { %186 = vmatprep.subr.bf16.mxu0 %v203_v3 }
   0xf   :  { %187 = vmatpush3.bf16.msra.mxu0 %v203_v3 }
  0x10   :  { %188 = vmatprep.subr.bf16.mxu0 %v204_v7 }
  0x13   :  { %189 = vmatpush3.bf16.msra.mxu0 %v204_v7 }
  0x14   :  { %190 = vmatprep.subr.bf16.mxu0 %v205_v8 }
  0x17   :  { %191 = vmatpush3.bf16.msra.mxu0 %v205_v8 }
  0x18   :  { %192 = vmatprep.subr.bf16.mxu0 %v206_v9 }
  0x1b   :  { %193 = vmatpush3.bf16.msra.mxu0 %v206_v9 }
  0x1c   :  { %194 = vmatprep.subr.bf16.mxu0 %v207_v10 }
  0x1f   :  { %195 = vmatpush3.bf16.msra.mxu0 %v207_v10 }
  0x22   :  { %197 = vmatmul.mubr.bf16.vlgmr.msra.gmra.mrb[0].mxu0 %v20_v13 }
  0xf5   :  { %v198_v15 = vpop.f32.mrb[0].mxu0 }
  0xf6   :  { %v135_v16 = vadd.f32 %v198_v15, %v161_v14  ;;  %v126_v17 = vpop.f32.mrb[1].mxu0 }
  0xf7   :  { %v127_v18 = vadd.f32 %v161_v14, %v126_v17  ;;  %v199_v19 = vpop.f32.mrb[2].mxu0 }
  0xf8   :  { %vm143_vm0 = vcmp.gt.f32.partialorder %v135_v16, 0.0  ;;  %v147_v20 = vmul.f32 0.1, %v135_v16  ;;  %v138_v21 = vadd.f32 %v199_v19, %v161_v14  ;;  %v129_v22 = vpop.f32.mrb[3].mxu0 }
  0xf9   :  { %vm141_vm1 = vcmp.gt.f32.partialorder %v127_v18, 0.0  ;;  %v145_v23 = vmul.f32 0.1, %v127_v18  ;;  %v130_v24 = vadd.f32 %v161_v14, %v129_v22 }
  0xfa   :  { %v151_v25 = vsel %vm143_vm0, %v135_v16, %v147_v20  ;;  %vm144_vm2 = vcmp.gt.f32.partialorder %v138_v21, 0.0  ;;  %v148_v26 = vmul.f32 0.1, %v138_v21 }
  0xfb   :  { %155 = vst [vmem:[%s282_s3 + $0x10] sm:$0xff] %v151_v25  ;;  %v149_v27 = vsel %vm141_vm1, %v127_v18, %v145_v23  ;;  %vm142_vm3 = vcmp.gt.f32.partialorder %v130_v24, 0.0  ;;  %v146_v28 = vmul.f32 0.1, %v130_v24 }
  0xfc   :  { %153 = vst [vmem:[%s282_s3] sm:$0xff] %v149_v27  ;;  %v152_v29 = vsel %vm144_vm2, %v138_v21, %v148_v26 }
  0xfd   :  { %156 = vst [vmem:[%s282_s3 + $0x18] sm:$0xff] %v152_v29  ;;  %v150_v30 = vsel %vm142_vm3, %v130_v24, %v146_v28 }
  0xfe   :  { %154 = vst [vmem:[%s282_s3 + $0x8] sm:$0xff] %v150_v30 }

// kernel: closed_call.25
= control target key start
LH: loop header
LB: loop body
LE: loop exit
PB: predicated region body
PF: predicated region fallthrough
CT: control target
= control target key end

     0   :  { %vm59_vm0 = vcmask 261120   ;;  %vm168_vm5 = vcmask 523264   ;;  %s537_s2 = inlined_call_operand.vmem [shape: bf16[32,64], index: 2, kind: input, shape index: {}]   ;;  %s538_s1 = inlined_call_operand.vmem [shape: f32[32,32], index: 1, kind: input, shape index: {}]   ;;  %s539_s4 = inlined_call_operand.vmem [shape: bf16[64,64], index: 4, kind: input, shape index: {}]   ;;  %s540_s6 = inlined_call_operand.vmem [shape: bf16[64,64], index: 6, kind: input, shape index: {}]   ;;  %s541_s3 = inlined_call_operand.vmem [shape: f32[1,64], index: 3, kind: input, shape index: {}]   ;;  %s542_s5 = inlined_call_operand.vmem [shape: f32[1,64], index: 5, kind: input, shape index: {}]   ;;  %s543_s0 = inlined_call_operand.vmem [shape: f32[32,64], index: 0, kind: input, shape index: {}]   ;;  %s544_s7 = inlined_call_operand.vmem [shape: f32[1,64], index: 7, kind: input, shape index: {}]   ;;  %s545_s8 = inlined_call_operand.vmem [shape: f32[32,64], index: 8, kind: output, shape index: {}]  }
   0x1   :  { %v399_v0 = vld [vmem:[%s537_s2] sm:$0xff]   ;;  %v400_v1 = vld [vmem:[%s537_s2 + $0x8] sm:$0xff]   ;;  %v32_v4 = vld [vmem:[%s538_s1 + $0x10] sm:$0xff] }
   0x2   :  { %367 = vmatprep.subr.bf16.mxu0 %v399_v0  ;;  %v30_v2 = vld [vmem:[%s538_s1] sm:$0xff]  ;;  %v31_v3 = vld [vmem:[%s538_s1 + $0x8] sm:$0xff]  ;;  %v33_v6 = vld [vmem:[%s538_s1 + $0x18] sm:$0xff] }
   0x3   :  { %368 = vmatpush3.bf16.msra.mxu0 %v399_v0  ;;  %v34_v5 = vpack.c.bf16 %v31_v3, %v30_v2  ;;  %v401_v7 = vld [vmem:[%s539_s4] sm:$0xff]   ;;  %v35_v9 = vpack.c.bf16 %v33_v6, %v32_v4  ;;  %v403_v10 = vld [vmem:[%s539_s4 + $0x8] sm:$0xff]   ;;  %v405_v12 = vld [vmem:[%s539_s4 + $0x10] sm:$0xff]  }
   0x4   :  { %369 = vmatprep.subr.bf16.mxu0 %v400_v1  ;;  %v402_v8 = vld [vmem:[%s540_s6] sm:$0xff]   ;;  %375 = vmatprep.subr.bf16.mxu1 %v401_v7  ;;  %v404_v11 = vld [vmem:[%s540_s6 + $0x8] sm:$0xff]   ;;  %v406_v13 = vld [vmem:[%s540_s6 + $0x10] sm:$0xff]  }
   0x5   :  { %371 = vmatprep.mubr.msk.bf16.mxu0 %vm59_vm0, %v34_v5  ;;  %376 = vmatpush3.bf16.msra.mxu1 %v401_v7  ;;  %v407_v14 = vld [vmem:[%s539_s4 + $0x18] sm:$0xff]   ;;  %v332_v16 = vld [vmem:[%s541_s3] ss:$0 sm:$0xff]  ;;  %v314_v37 = vld [vmem:[%s543_s0 + $0x10] sm:$0xff] }
   0x6   :  { %377 = vmatprep.subr.bf16.mxu1 %v403_v10  ;;  %v408_v15 = vld [vmem:[%s540_s6 + $0x18] sm:$0xff]   ;;  %v337_v35 = vld [vmem:[%s542_s5] ss:$0 sm:$0xff]  ;;  %v313_v52 = vld [vmem:[%s543_s0 + $0x8] sm:$0xff] }
   0x7   :  { %370 = vmatpush3.bf16.msra.mxu0 %v400_v1  ;;  %v344_v39 = vld [vmem:[%s544_s7] ss:$0 sm:$0xff]  ;;  %v315_v46 = vld [vmem:[%s543_s0 + $0x18] sm:$0xff] }
   0x8   :  { %387 = vmatprep.subr.bf16.mxu0 %v402_v8  ;;  %v312_v42 = vld [vmem:[%s543_s0] sm:$0xff] }
   0x9   :  { %378 = vmatpush3.bf16.msra.mxu1 %v403_v10 }
   0xa   :  { %372 = vmatmul.mubr.msk.bf16.vlgmr.msra.gmra.mrb[0].mxu0 %vm59_vm0, %v35_v9  ;;  %379 = vmatprep.subr.bf16.mxu1 %v405_v12 }
   0xb   :  { %388 = vmatpush3.bf16.msra.mxu0 %v402_v8 }
   0xc   :  { %389 = vmatprep.subr.bf16.mxu0 %v404_v11 }
   0xd   :  { %380 = vmatpush3.bf16.msra.mxu1 %v405_v12 }
   0xe   :  { %381 = vmatprep.subr.bf16.mxu1 %v407_v14 }
   0xf   :  { %390 = vmatpush3.bf16.msra.mxu0 %v404_v11 }
  0x10   :  { %391 = vmatprep.subr.bf16.mxu0 %v406_v13 }
  0x11   :  { %382 = vmatpush3.bf16.msra.mxu1 %v407_v14 }
  0x13   :  { %392 = vmatpush3.bf16.msra.mxu0 %v406_v13 }
  0x14   :  { %393 = vmatprep.subr.bf16.mxu0 %v408_v15 }
  0x17   :  { %394 = vmatpush3.bf16.msra.mxu0 %v408_v15 }
  0xdd   :  { %v373_v17 = vpop.f32.mrb[0].mxu0 }
  0xde   :  { %v109_v18 = vadd.f32 %v373_v17, %v332_v16  ;;  %v100_v19 = vpop.f32.mrb[1].mxu0 }
  0xdf   :  { %v101_v20 = vadd.f32 %v332_v16, %v100_v19  ;;  %v374_v21 = vpop.f32.mrb[2].mxu0 }
  0xe0   :  { %v121_v22 = vmul.f32 0.1, %v109_v18  ;;  %v112_v23 = vadd.f32 %v374_v21, %v332_v16  ;;  %v103_v24 = vpop.f32.mrb[3].mxu0  ;;  %vm117_vm1 = vcmp.gt.f32.partialorder %v109_v18, 0.0 }
  0xe1   :  { %v119_v25 = vmul.f32 0.1, %v101_v20  ;;  %v104_v26 = vadd.f32 %v332_v16, %v103_v24  ;;  %vm115_vm3 = vcmp.gt.f32.partialorder %v101_v20, 0.0 }
  0xe2   :  { %vm118_vm2 = vcmp.gt.f32.partialorder %v112_v23, 0.0  ;;  %v122_v27 = vmul.f32 0.1, %v112_v23  ;;  %v125_v29 = vsel %vm117_vm1, %v109_v18, %v121_v22 }
  0xe3   :  { %v120_v28 = vmul.f32 0.1, %v104_v26  ;;  %vm116_vm4 = vcmp.gt.f32.partialorder %v104_v26, 0.0  ;;  %v123_v32 = vsel %vm115_vm3, %v101_v20, %v119_v25 }
  0xe4   :  { %v126_v30 = vsel %vm118_vm2, %v112_v23, %v122_v27 }
  0xe5   :  { %v128_v31 = vpack.c.bf16 %v126_v30, %v125_v29  ;;  %v124_v33 = vsel %vm116_vm4, %v104_v26, %v120_v28 }
  0xe6   :  { %v127_v34 = vpack.c.bf16 %v124_v33, %v123_v32 }
  0xe8   :  { %383 = vmatprep.mubr.msk.bf16.mxu1 %vm168_vm5, %v127_v34  ;;  %395 = vmatprep.mubr.msk.bf16.mxu0 %vm168_vm5, %v127_v34 }
  0xe9   :  { %384 = vmatmul.mubr.msk.bf16.vlgmr.msra.gmra.mrb[0].mxu1 %vm168_vm5, %v128_v31  ;;  %396 = vmatmul.mubr.msk.bf16.vlgmr.msra.gmra.mrb[4].mxu0 %vm168_vm5, %v128_v31 }
 0x1bc   :  { %v385_v36 = vpop.f32.mrb[0].mxu1  ;;  %v397_v38 = vpop.f32.mrb[4].mxu0 }
 0x1bd   :  { %v218_v40 = vadd.f32 %v385_v36, %v337_v35  ;;  %v209_v41 = vpop.f32.mrb[1].mxu1  ;;  %v297_v43 = vpop.f32.mrb[5].mxu0  ;;  %v306_v49 = vadd.f32 %v397_v38, %v344_v39 }
 0x1be   :  { %v210_v44 = vadd.f32 %v337_v35, %v209_v41  ;;  %v386_v45 = vpop.f32.mrb[2].mxu1  ;;  %v398_v47 = vpop.f32.mrb[6].mxu0  ;;  %v298_v55 = vadd.f32 %v344_v39, %v297_v43 }
 0x1bf   :  { %v318_v48 = vmul.f32 %v314_v37, %v218_v40  ;;  %v221_v50 = vadd.f32 %v386_v45, %v337_v35  ;;  %v212_v51 = vpop.f32.mrb[3].mxu1  ;;  %v300_v53 = vpop.f32.mrb[7].mxu0  ;;  %v309_v59 = vadd.f32 %v398_v47, %v344_v39 }
 0x1c0   :  { %v316_v54 = vmul.f32 %v312_v42, %v210_v44  ;;  %v213_v56 = vadd.f32 %v337_v35, %v212_v51  ;;  %v301_v62 = vadd.f32 %v344_v39, %v300_v53 }
 0x1c1   :  { %v322_v57 = vadd.f32 %v318_v48, %v306_v49  ;;  %v319_v58 = vmul.f32 %v315_v46, %v221_v50 }
 0x1c2   :  { %v320_v60 = vadd.f32 %v316_v54, %v298_v55  ;;  %v317_v61 = vmul.f32 %v313_v52, %v213_v56 }
 0x1c3   :  { %326 = vst.msk [vmem:[%s545_s8 + $0x10] sm:$0xff] %vm168_vm5, %v322_v57  ;;  %v323_v63 = vadd.f32 %v319_v58, %v309_v59 }
 0x1c4   :  { %324 = vst.msk [vmem:[%s545_s8] sm:$0xff] %vm168_vm5, %v320_v60  ;;  %v321_v0 = vadd.f32 %v317_v61, %v301_v62 }
 0x1c5   :  { %327 = vst.msk [vmem:[%s545_s8 + $0x18] sm:$0xff] %vm168_vm5, %v323_v63 }
 0x1c6   :  { %325 = vst.msk [vmem:[%s545_s8 + $0x8] sm:$0xff] %vm168_vm5, %v321_v0 }

// kernel: closed_call.26
= control target key start
LH: loop header
LB: loop body
LE: loop exit
PB: predicated region body
PF: predicated region fallthrough
CT: control target
= control target key end

     0   :  { %s1613_s18 = smov 0   ;;  %s1615_s19 = smov 0   ;;  %s1865_s0 = inlined_call_operand.vmem [shape: f32[2,6,6,64], index: 0, kind: input, shape index: {}, may-alias: {0,1,2}]   ;;  %s1866_s1 = inlined_call_operand.vmem [shape: f32[2,6,6,64], index: 1, kind: input, shape index: {}, may-alias: {0,1,2}]   ;;  %s1867_s2 = inlined_call_operand.vmem [shape: f32[2,6,6,64], index: 2, kind: input, shape index: {}, may-alias: {0,1,2}]   ;;  %s1868_s3 = inlined_call_operand.vmem [shape: bf16[9,64,64], index: 3, kind: input, shape index: {}]   ;;  %s1869_s4 = inlined_call_operand.vmem [shape: f32[1,64], index: 4, kind: input, shape index: {}]   ;;  %s1870_s5 = inlined_call_operand.vmem [shape: f32[2,4,4,64], index: 5, kind: output, shape index: {}]  }
   0x1   :  { %s1617_s20 = smov 0   ;;  %s1619_s21 = smov 0  }
   0x2   :  { %s1621_s22 = smov 0  }
   0x3 LB: > { %s24_s23 = sadd.s32 1, %s1571_s20  ;;  %s27_s24 = sadd.s32 1, %s1575_s21  ;;  %s1579_s22 = sphi %s1621_s22, %s15_s22   ;;  %s1575_s21 = sphi %s1619_s21, %s1874_s21   ;;  %s1571_s20 = sphi %s1617_s20, %s1873_s20   ;;  %s1567_s19 = sphi %s1615_s19, %s1872_s19   ;;  %s1563_s18 = sphi %s1613_s18, %s1871_s18  }
   0x4   : > { %p25_p0 = scmp.ge.s32.totalorder %s24_s23, 4  ;;  %p1191_p1 = scmp.ge.s32.totalorder %s1579_s22, 1 }
   0x5   : > { %p244_p2 = scmp.lt.s32.totalorder %s1579_s22, 9 }
   0x6   : > { %s1876_s23 = smov (%p25_p0, %s24_s23), 0  ;;  %s1878_s24 = smov (!%p25_p0, %s27_s24), %s1575_s21 }
   0x7   : > { %p245_p3 = pnand %p1191_p1, %p244_p2  ;;  %p29_p4 = scmp.ge.s32.totalorder %s1878_s24, 2 }
   0x8   : > { %v1505_v0 = vld [vmem:[%s1868_s3 + $0x20] sm:$0xff] (!%p245_p3)   ;;  %v1581_v1 = vmov (!%p245_p3), 0.0   ;;  %v1507_v3 = vld [vmem:[%s1868_s3 + $0x28] sm:$0xff] (!%p245_p3)   ;;  %vm1582_vm0 = vmmov (!%p245_p3), 0   ;;  %p296_p5 = scmp.lt.s32.totalorder (!%p245_p3), %s1567_s19, 1  ;;  %p298_p6 = scmp.lt.s32.totalorder (!%p245_p3), %s1563_s18, 5 }
   0x9   : > { %s1880_s24 = smov (%p29_p4, %s1878_s24), 0  ;;  %248 = sbr.rel (%p245_p3) target bundleno = 315 (0x13b), region = 40 }
   0xa   : > { %1354 = vmatprep.subr.bf16.mxu0 (!%p245_p3), %v1581_v1  ;;  %1366 = vmatprep.subr.bf16.mxu1 (!%p245_p3), %v1581_v1  ;;  %v1506_v2 = vld [vmem:[%s1868_s3] sm:$0xff] (!%p245_p3)   ;;  %v1508_v4 = vld [vmem:[%s1868_s3 + $0x8] sm:$0xff] (!%p245_p3)   ;;  %v1509_v5 = vld [vmem:[%s1868_s3 + $0x30] sm:$0xff] (!%p245_p3)   ;;  %s304_s15 = sadd.s32 (!%p245_p3), 1, %s1563_s18  ;;  %vm383_vm1 = vcmask (!%p245_p3), 523264   ;;  %p326_p9 = scmp.lt.s32.totalorder (!%p245_p3), %s1563_s18, 3 }
   0xb   : > { %1355 = vmatpush3.bf16.msra.mxu0 (!%p245_p3), %v1505_v0  ;;  %1362 = vmatprep.mubr.msk.bf16.mxu0 (!%p245_p3), %vm1582_vm0, %v1581_v1  ;;  %v1510_v6 = vld [vmem:[%s1868_s3 + $0x10] sm:$0xff] (!%p245_p3)   ;;  %v1511_v7 = vld [vmem:[%s1868_s3 + $0x38] sm:$0xff] (!%p245_p3)   ;;  %p307_p7 = scmp.lt.s32.totalorder (!%p245_p3), %s304_s15, 5  ;;  %v1514_v13 = vld [vmem:[%s1868_s3 + $0x60] sm:$0xff] (!%p245_p3)   ;;  %vm1063_vm2 = vcmask (!%p245_p3), 519168  }
   0xc   : > { %1367 = vmatpush3.bf16.msra.mxu1 (!%p245_p3), %v1506_v2  ;;  %1356 = vmatprep.subr.bf16.mxu0 (!%p245_p3), %v1581_v1  ;;  %v1512_v8 = vld [vmem:[%s1868_s3 + $0x18] sm:$0xff] (!%p245_p3)   ;;  %v1513_v15 = vld [vmem:[%s1868_s3 + $0x40] sm:$0xff] (!%p245_p3)   ;;  %v1516_v17 = vld [vmem:[%s1868_s3 + $0x68] sm:$0xff] (!%p245_p3)  }
   0xd   : > { %1368 = vmatprep.subr.bf16.mxu1 (!%p245_p3), %v1581_v1  ;;  %1374 = vmatprep.mubr.msk.bf16.mxu1 (!%p245_p3), %vm1582_vm0, %v1581_v1  ;;  %v1515_v18 = vld [vmem:[%s1868_s3 + $0x48] sm:$0xff] (!%p245_p3)   ;;  %v1518_v19 = vld [vmem:[%s1868_s3 + $0x70] sm:$0xff] (!%p245_p3)   ;;  %v1520_v21 = vld [vmem:[%s1868_s3 + $0x78] sm:$0xff] (!%p245_p3)  }
   0xe   : > { %v1517_v20 = vld [vmem:[%s1868_s3 + $0x50] sm:$0xff] (!%p245_p3)   ;;  %v1519_v23 = vld [vmem:[%s1868_s3 + $0x58] sm:$0xff] (!%p245_p3)   ;;  %v1522_v25 = vld [vmem:[%s1868_s3 + $0xa0] sm:$0xff] (!%p245_p3)  }
   0xf   : > { %1357 = vmatpush3.bf16.msra.mxu0 (!%p245_p3), %v1507_v3  ;;  %v1521_v27 = vld [vmem:[%s1868_s3 + $0x80] sm:$0xff] (!%p245_p3)   ;;  %v1524_v28 = vld [vmem:[%s1868_s3 + $0xa8] sm:$0xff] (!%p245_p3)   ;;  %v1526_v30 = vld [vmem:[%s1868_s3 + $0xb0] sm:$0xff] (!%p245_p3)  }
  0x10   : > { %s1882_s19 = smov (!%p296_p5, %s1567_s19), 1  ;;  %1369 = vmatpush3.bf16.msra.mxu1 %v1508_v4  ;;  %1358 = vmatprep.subr.bf16.mxu0 %v1581_v1  ;;  %s1884_s15 = smov (!%p307_p7, %s304_s15), 5  ;;  %v1523_v29 = vld [vmem:[%s1868_s3 + $0x88] sm:$0xff]   ;;  %v1525_v32 = vld [vmem:[%s1868_s3 + $0x90] sm:$0xff]   ;;  %v1528_v33 = vld [vmem:[%s1868_s3 + $0xb8] sm:$0xff]  }
  0x11   : > { %s299_s8 = scalar_select %p298_p6, %s1563_s18, 5  ;;  %1370 = vmatprep.subr.bf16.mxu1 %v1581_v1  ;;  %v1527_v36 = vld [vmem:[%s1868_s3 + $0x98] sm:$0xff]   ;;  %v1530_v38 = vld [vmem:[%s1868_s3 + $0xe0] sm:$0xff]   ;;  %v1532_v43 = vld [vmem:[%s1868_s3 + $0xe8] sm:$0xff]  }
  0x12   : > { %s1677_s11 = smul.u32 6, %s1882_s19  ;;  %v1529_v41 = vld [vmem:[%s1868_s3 + $0xc0] sm:$0xff]   ;;  %v1531_v44 = vld [vmem:[%s1868_s3 + $0xc8] sm:$0xff]   ;;  %v1534_v46 = vld [vmem:[%s1868_s3 + $0xf0] sm:$0xff]  }
  0x13   : > { %1359 = vmatpush3.bf16.msra.mxu0 %v1509_v5  ;;  %v1533_v47 = vld [vmem:[%s1868_s3 + $0xd0] sm:$0xff]   ;;  %v1536_v50 = vld [vmem:[%s1868_s3 + $0xf8] sm:$0xff]   ;;  %v1537_v53 = vld [vmem:[%s1868_s3 + $0x100] sm:$0xff]  }
  0x14   : > { %s301_s14 = sadd.s32 %s1677_s11, %s299_s8  ;;  %1371 = vmatpush3.bf16.msra.mxu1 %v1510_v6  ;;  %1360 = vmatprep.subr.bf16.mxu0 %v1581_v1  ;;  %s310_s10 = sadd.s32 %s1677_s11, %s1884_s15  ;;  %v1535_v51 = vld [vmem:[%s1868_s3 + $0xd8] sm:$0xff]   ;;  %v1538_v54 = vld [vmem:[%s1868_s3 + $0x108] sm:$0xff]   ;;  %v1539_v55 = vld [vmem:[%s1868_s3 + $0x110] sm:$0xff]  }
  0x15   : > { %s1192_s25 = sshll.u32 %s301_s14, 3  ;;  %1372 = vmatprep.subr.bf16.mxu1 %v1581_v1  ;;  %s1193_s15 = sshll.u32 %s310_s10, 3  ;;  %v1540_v56 = vld [vmem:[%s1868_s3 + $0x118] sm:$0xff]  }
  0x16   : > { %s303_s30 = scalar_lea.vmem %s1865_s0, %s1192_s25  ;;  %s312_s28 = scalar_lea.vmem %s1866_s1, %s1193_s15 }
  0x17   : > { %v333_v9 = vld [vmem:[%s303_s30] sm:$0x3f]  ;;  %1361 = vmatpush3.bf16.msra.mxu0 %v1511_v7  ;;  %s314_s8 = sadd.s32 2, %s1563_s18  ;;  %s1888_s18 = smov (!%p326_p9, %s1563_s18), 3 }
  0x18   : > { %v334_v10 = vpack.c.bf16 %v333_v9, %v333_v9  ;;  %1373 = vmatpush3.bf16.msra.mxu1 %v1512_v8  ;;  %1378 = vmatprep.subr.bf16.mxu0 %v1581_v1  ;;  %v572_v22 = vld [vmem:[%s312_s28] sm:$0x3f]  ;;  %p317_p8 = scmp.lt.s32.totalorder %s314_s8, 5  ;;  %s1195_s28 = sshll.u32 %s1882_s19, 2 }
  0x19   : > { %1390 = vmatprep.subr.bf16.mxu1 %v1581_v1  ;;  %v573_v24 = vpack.c.bf16 %v572_v22, %v572_v22  ;;  %s329_s29 = sadd.s32 %s1195_s28, %s1888_s18 }
  0x1a   : > { %v353_v11 = vshrl.u32 %v334_v10, 16  ;;  %v355_v12 = vshll.u32 %v334_v10, 16  ;;  %v503_v26 = vrot.slane %v334_v10, 1  ;;  %s1886_s8 = smov (!%p317_p8, %s314_s8), 5 }
  0x1b   : > { %1375 = vmatmul.mubr.msk.bf16.vlgmr.msra.gmra.mrb[0].mxu1 %vm383_vm1, %v334_v10  ;;  %s320_s27 = sadd.s32 %s1677_s11, %s1886_s8  ;;  %v662_v31 = vshll.u32 %v573_v24, 16  ;;  %v660_v34 = vshrl.u32 %v573_v24, 16  ;;  %v744_v37 = vrot.slane %v573_v24, 1 }
  0x1c   : > { %v357_v14 = vrot.slane %v355_v12, 1  ;;  %1391 = vmatpush3.bf16.msra.mxu1 %v1514_v13  ;;  %1398 = vmatprep.mubr.msk.bf16.mxu1 %vm1582_vm0, %v1581_v1  ;;  %s1194_s7 = sshll.u32 %s320_s27, 3 }
  0x1d   : > { %1392 = vmatprep.subr.bf16.mxu1 %v1581_v1  ;;  %v664_v35 = vrot.slane %v662_v31, 1  ;;  %s322_s12 = scalar_lea.vmem %s1867_s2, %s1194_s7  ;;  %s1196_s7 = sshll.u32 %s329_s29, 2 }
  0x1e   : > { %v358_v16 = vor.u32 %v357_v14, %v353_v11  ;;  %v813_v39 = vld [vmem:[%s322_s12] sm:$0x3f]  ;;  %s331_s11 = scalar_lea.vmem %s1870_s5, %s1196_s7 }
  0x1f   : > { %v665_v40 = vor.u32 %v664_v35, %v660_v34  ;;  %v814_v42 = vpack.c.bf16 %v813_v39, %v813_v39  ;;  %v1306_v34 = vld [vmem:[%s1869_s4] ss:$0 sm:$0xff] }
  0x20   : > { %1363 = vmatmul.mubr.msk.bf16.vlgmr.msra.gmra.mrb[0].mxu0 %vm383_vm1, %v358_v16  ;;  %1393 = vmatpush3.bf16.msra.mxu1 %v1516_v17 }
  0x21   : > { %1379 = vmatpush3.bf16.msra.mxu0 %v1513_v15  ;;  %1386 = vmatprep.mubr.msk.bf16.mxu0 %vm1582_vm0, %v1581_v1  ;;  %v903_v45 = vshll.u32 %v814_v42, 16  ;;  %v901_v48 = vshrl.u32 %v814_v42, 16  ;;  %v985_v57 = vrot.slane %v814_v42, 1 }
  0x22   : > { %1380 = vmatprep.subr.bf16.mxu0 %v1581_v1  ;;  %1394 = vmatprep.subr.bf16.mxu1 %v1581_v1 }
  0x23   : > { %v905_v49 = vrot.slane %v903_v45, 1 }
  0x24   : > { %1395 = vmatpush3.bf16.msra.mxu1 %v1518_v19 }
  0x25   : > { %1381 = vmatpush3.bf16.msra.mxu0 %v1515_v18  ;;  %1396 = vmatprep.subr.bf16.mxu1 %v1581_v1  ;;  %v906_v52 = vor.u32 %v905_v49, %v901_v48 }
  0x26   : > { %1382 = vmatprep.subr.bf16.mxu0 %v1581_v1 }
  0x28   : > { %1397 = vmatpush3.bf16.msra.mxu1 %v1520_v21 }
  0x29   : > { %1383 = vmatpush3.bf16.msra.mxu0 %v1517_v20  ;;  %1414 = vmatprep.subr.bf16.mxu1 %v1581_v1 }
  0x2a   : > { %1384 = vmatprep.subr.bf16.mxu0 %v1581_v1 }
  0x2b   : > { %1399 = vmatmul.mubr.msk.bf16.vlgmr.msra.gmra.mrb[4].mxu1 %vm383_vm1, %v573_v24 }
  0x2c   : > { %1415 = vmatpush3.bf16.msra.mxu1 %v1522_v25  ;;  %1422 = vmatprep.mubr.msk.bf16.mxu1 %vm1582_vm0, %v1581_v1 }
  0x2d   : > { %1385 = vmatpush3.bf16.msra.mxu0 %v1519_v23  ;;  %1416 = vmatprep.subr.bf16.mxu1 %v1581_v1 }
  0x2e   : > { %1402 = vmatprep.subr.bf16.mxu0 %v1581_v1 }
  0x30   : > { %1387 = vmatmul.mubr.msk.bf16.vlgmr.msra.gmra.mrb[4].mxu0 %vm383_vm1, %v503_v26  ;;  %1417 = vmatpush3.bf16.msra.mxu1 %v1524_v28 }
  0x31   : > { %1403 = vmatpush3.bf16.msra.mxu0 %v1521_v27  ;;  %1410 = vmatprep.mubr.msk.bf16.mxu0 %vm1582_vm0, %v1581_v1 }
  0x32   : > { %1404 = vmatprep.subr.bf16.mxu0 %v1581_v1  ;;  %1418 = vmatprep.subr.bf16.mxu1 %v1581_v1 }
  0x34   : > { %1419 = vmatpush3.bf16.msra.mxu1 %v1526_v30 }
  0x35   : > { %1405 = vmatpush3.bf16.msra.mxu0 %v1523_v29  ;;  %1420 = vmatprep.subr.bf16.mxu1 %v1581_v1 }
  0x36   : > { %1406 = vmatprep.subr.bf16.mxu0 %v1581_v1 }
  0x38   : > { %1421 = vmatpush3.bf16.msra.mxu1 %v1528_v33 }
  0x39   : > { %1407 = vmatpush3.bf16.msra.mxu0 %v1525_v32  ;;  %1438 = vmatprep.subr.bf16.mxu1 %v1581_v1 }
  0x3a   : > { %1408 = vmatprep.subr.bf16.mxu0 %v1581_v1 }
  0x3b   : > { %1423 = vmatmul.mubr.msk.bf16.vlgmr.msra.gmra.mrb[8].mxu1 %vm383_vm1, %v744_v37 }
  0x3c   : > { %1439 = vmatpush3.bf16.msra.mxu1 %v1530_v38  ;;  %1446 = vmatprep.mubr.msk.bf16.mxu1 %vm1582_vm0, %v1581_v1 }
  0x3d   : > { %1409 = vmatpush3.bf16.msra.mxu0 %v1527_v36  ;;  %1440 = vmatprep.subr.bf16.mxu1 %v1581_v1 }
  0x3e   : > { %1426 = vmatprep.subr.bf16.mxu0 %v1581_v1 }
  0x40   : > { %1411 = vmatmul.mubr.msk.bf16.vlgmr.msra.gmra.mrb[8].mxu0 %vm383_vm1, %v665_v40  ;;  %1441 = vmatpush3.bf16.msra.mxu1 %v1532_v43 }
  0x41   : > { %1427 = vmatpush3.bf16.msra.mxu0 %v1529_v41  ;;  %1434 = vmatprep.mubr.msk.bf16.mxu0 %vm1582_vm0, %v1581_v1 }
  0x42   : > { %1428 = vmatprep.subr.bf16.mxu0 %v1581_v1  ;;  %1442 = vmatprep.subr.bf16.mxu1 %v1581_v1 }
  0x44   : > { %1443 = vmatpush3.bf16.msra.mxu1 %v1534_v46 }
  0x45   : > { %1429 = vmatpush3.bf16.msra.mxu0 %v1531_v44  ;;  %1444 = vmatprep.subr.bf16.mxu1 %v1581_v1 }
  0x46   : > { %1430 = vmatprep.subr.bf16.mxu0 %v1581_v1 }
  0x48   : > { %1445 = vmatpush3.bf16.msra.mxu1 %v1536_v50 }
  0x49   : > { %1431 = vmatpush3.bf16.msra.mxu0 %v1533_v47 }
  0x4a   : > { %1432 = vmatprep.subr.bf16.mxu0 %v1581_v1 }
  0x4b   : > { %1447 = vmatmul.mubr.msk.bf16.vlgmr.msra.gmra.mrb[12].mxu1 %vm383_vm1, %v906_v52 }
  0x4d   : > { %1433 = vmatpush3.bf16.msra.mxu0 %v1535_v51 }
  0x4e   : > { %1450 = vmatprep.subr.bf16.mxu0 %v1581_v1 }
  0x50   : > { %1435 = vmatmul.mubr.msk.bf16.vlgmr.msra.gmra.mrb[12].mxu0 %vm383_vm1, %v814_v42 }
  0x51   : > { %1451 = vmatpush3.bf16.msra.mxu0 %v1537_v53  ;;  %1458 = vmatprep.mubr.msk.bf16.mxu0 %vm1582_vm0, %v1581_v1 }
  0x52   : > { %1452 = vmatprep.subr.bf16.mxu0 %v1581_v1 }
  0x55   : > { %1453 = vmatpush3.bf16.msra.mxu0 %v1538_v54 }
  0x56   : > { %1454 = vmatprep.subr.bf16.mxu0 %v1581_v1 }
  0x59   : > { %1455 = vmatpush3.bf16.msra.mxu0 %v1539_v55 }
  0x5a   : > { %1456 = vmatprep.subr.bf16.mxu0 %v1581_v1 }
  0x5d   : > { %1457 = vmatpush3.bf16.msra.mxu0 %v1540_v56 }
  0x60   : > { %1459 = vmatmul.mubr.msk.bf16.vlgmr.msra.gmra.mrb[16].mxu0 %vm383_vm1, %v985_v57 }
  0xee   : > { %v487_v58 = vpop.f32.mrb[0].mxu1 }
  0xef   : > { %v1376_v59 = vpop.f32.mrb[1].mxu1 }
  0xf0   : > { %v490_v61 = vpop.f32.mrb[2].mxu1 }
  0xf1   : > { %v1377_v0 = vpop.f32.mrb[3].mxu1 }
  0xf3   : > { %v421_v60 = vpop.f32.mrb[0].mxu0 }
  0xf4   : > { %v1364_v62 = vpop.f32.mrb[1].mxu0  ;;  %v488_v63 = vadd.f32 %v487_v58, %v421_v60 }
  0xf5   : > { %v424_v2 = vpop.f32.mrb[2].mxu0 }
  0xf6   : > { %v1365_v3 = vpop.f32.mrb[3].mxu0 }
  0xfe   : > { %v644_v4 = vpop.f32.mrb[4].mxu1 }
  0xff   : > { %v1400_v5 = vpop.f32.mrb[5].mxu1 }
 0x100   : > { %v647_v7 = vpop.f32.mrb[6].mxu1 }
 0x101   : > { %v1401_v1 = vpop.f32.mrb[7].mxu1 }
 0x103   : > { %v565_v6 = vpop.f32.mrb[4].mxu0 }
 0x104   : > { %v571_v8 = vadd.f32 %v565_v6, %v488_v63  ;;  %v1388_v9 = vpop.f32.mrb[5].mxu0 }
 0x105   : > { %v568_v10 = vpop.f32.mrb[6].mxu0 }
 0x106   : > { %v650_v11 = vadd.f32 %v644_v4, %v571_v8  ;;  %v1389_v12 = vpop.f32.mrb[7].mxu0 }
 0x10e   : > { %v806_v13 = vpop.f32.mrb[8].mxu1 }
 0x10f   : > { %v1424_v14 = vpop.f32.mrb[9].mxu1 }
 0x110   : > { %v809_v16 = vpop.f32.mrb[10].mxu1 }
 0x111   : > { %v1425_v19 = vpop.f32.mrb[11].mxu1 }
 0x113   : > { %v727_v15 = vpop.f32.mrb[8].mxu0 }
 0x114   : > { %v733_v17 = vadd.f32 %v727_v15, %v650_v11  ;;  %v1412_v18 = vpop.f32.mrb[9].mxu0 }
 0x115   : > { %v730_v20 = vpop.f32.mrb[10].mxu0 }
 0x116   : > { %v812_v21 = vadd.f32 %v806_v13, %v733_v17  ;;  %v1413_v22 = vpop.f32.mrb[11].mxu0 }
 0x11e   : > { %v968_v23 = vpop.f32.mrb[12].mxu1 }
 0x11f   : > { %v1448_v24 = vpop.f32.mrb[13].mxu1 }
 0x120   : > { %v971_v26 = vpop.f32.mrb[14].mxu1 }
 0x121   : > { %v1449_v29 = vpop.f32.mrb[15].mxu1 }
 0x123   : > { %v885_v25 = vpop.f32.mrb[12].mxu0 }
 0x124   : > { %v891_v27 = vadd.f32 %v885_v25, %v812_v21  ;;  %v1436_v28 = vpop.f32.mrb[13].mxu0 }
 0x125   : > { %v888_v30 = vpop.f32.mrb[14].mxu0 }
 0x126   : > { %v974_v31 = vadd.f32 %v968_v23, %v891_v27  ;;  %v1437_v32 = vpop.f32.mrb[15].mxu0 }
 0x133   : > { %v1047_v33 = vpop.f32.mrb[16].mxu0 }
 0x134   : > { %v1053_v35 = vadd.f32 %v1047_v33, %v974_v31  ;;  %v1460_v36 = vpop.f32.mrb[17].mxu0 }
 0x135   : > { %v1050_v37 = vpop.f32.mrb[18].mxu0 }
 0x136   : > { %v1061_v38 = vadd.f32 %v1306_v34, %v1053_v35  ;;  %v1461_v39 = vpop.f32.mrb[19].mxu0 }
 0x138   : > { %v1062_v40 = vmax.f32 %v1061_v38, 0.0 }
 0x13a   : > { %1064 = vst.msk [vmem:[%s331_s11] sm:$0xf] %vm1063_vm2, %v1062_v40 }
 0x13b PF: > { %s15_s22 = sadd.s32 1, %s1579_s22   ;;  %s1871_s18 = smov %s1571_s20 }
 0x13c   : > { %p12_p10 = scmp.ge.s32.totalorder %s15_s22, 10   ;;  %s1872_s19 = smov %s1575_s21 }
 0x13d   : > { %s1873_s20 = smov %s1876_s23  ;;  %s1874_s21 = smov %s1880_s24 }
 0x13e   :  { %14 = sbr.rel (!%p12_p10) target bundleno = 3 (0x3), region = 84 }

// kernel: closed_call.28
= control target key start
LH: loop header
LB: loop body
LE: loop exit
PB: predicated region body
PF: predicated region fallthrough
CT: control target
= control target key end

     0   :  { %s1697_s21 = smov 0   ;;  %s1699_s22 = smov 0   ;;  %s1952_s0 = inlined_call_operand.vmem [shape: f32[2,6,6,64], index: 0, kind: input, shape index: {}, may-alias: {0,1,2}]   ;;  %s1953_s1 = inlined_call_operand.vmem [shape: f32[2,6,6,64], index: 1, kind: input, shape index: {}, may-alias: {0,1,2}]   ;;  %s1954_s2 = inlined_call_operand.vmem [shape: f32[2,6,6,64], index: 2, kind: input, shape index: {}, may-alias: {0,1,2}]   ;;  %s1955_s3 = inlined_call_operand.vmem [shape: bf16[9,64,64], index: 3, kind: input, shape index: {}]   ;;  %s1956_s4 = inlined_call_operand.vmem [shape: f32[1,64], index: 4, kind: input, shape index: {}]   ;;  %s1957_s5 = inlined_call_operand.vmem [shape: f32[2,4,4,64], index: 5, kind: input, shape index: {}]   ;;  %s1958_s6 = inlined_call_operand.vmem [shape: f32[2,4,4,64], index: 6, kind: output, shape index: {}]  }
   0x1   :  { %s1701_s23 = smov 0   ;;  %s1703_s24 = smov 0  }
   0x2   :  { %s1705_s25 = smov 0  }
   0x3 LB: > { %s25_s26 = sadd.s32 1, %s1650_s23  ;;  %s28_s27 = sadd.s32 1, %s1654_s24  ;;  %s1658_s25 = sphi %s1705_s25, %s16_s25   ;;  %s1654_s24 = sphi %s1703_s24, %s1962_s24   ;;  %s1650_s23 = sphi %s1701_s23, %s1961_s23   ;;  %s1646_s22 = sphi %s1699_s22, %s1960_s22   ;;  %s1642_s21 = sphi %s1697_s21, %s1959_s21  }
   0x4   : > { %p26_p0 = scmp.ge.s32.totalorder %s25_s26, 4  ;;  %p1268_p1 = scmp.ge.s32.totalorder %s1658_s25, 1 }
   0x5   : > { %p284_p2 = scmp.lt.s32.totalorder %s1658_s25, 9 }
   0x6   : > { %s1964_s26 = smov (%p26_p0, %s25_s26), 0  ;;  %s1966_s27 = smov (!%p26_p0, %s28_s27), %s1654_s24 }
   0x7   : > { %p285_p3 = pnand %p1268_p1, %p284_p2  ;;  %p30_p4 = scmp.ge.s32.totalorder %s1966_s27, 2 }
   0x8   : > { %v1584_v0 = vld [vmem:[%s1955_s3 + $0x20] sm:$0xff] (!%p285_p3)   ;;  %v1660_v1 = vmov (!%p285_p3), 0.0   ;;  %v1586_v3 = vld [vmem:[%s1955_s3 + $0x28] sm:$0xff] (!%p285_p3)   ;;  %vm1661_vm0 = vmmov (!%p285_p3), 0   ;;  %p346_p5 = scmp.lt.s32.totalorder (!%p285_p3), %s1646_s22, 1  ;;  %p348_p6 = scmp.lt.s32.totalorder (!%p285_p3), %s1642_s21, 5 }
   0x9   : > { %s1968_s27 = smov (%p30_p4, %s1966_s27), 0  ;;  %288 = sbr.rel (%p285_p3) target bundleno = 315 (0x13b), region = 44 }
   0xa   : > { %1433 = vmatprep.subr.bf16.mxu0 (!%p285_p3), %v1660_v1  ;;  %1445 = vmatprep.subr.bf16.mxu1 (!%p285_p3), %v1660_v1  ;;  %v1585_v2 = vld [vmem:[%s1955_s3] sm:$0xff] (!%p285_p3)   ;;  %v1587_v4 = vld [vmem:[%s1955_s3 + $0x8] sm:$0xff] (!%p285_p3)   ;;  %v1588_v5 = vld [vmem:[%s1955_s3 + $0x30] sm:$0xff] (!%p285_p3)   ;;  %s354_s19 = sadd.s32 (!%p285_p3), 1, %s1642_s21  ;;  %vm441_vm1 = vcmask (!%p285_p3), 523264   ;;  %s364_s14 = sadd.s32 (!%p285_p3), 2, %s1642_s21 }
   0xb   : > { %1434 = vmatpush3.bf16.msra.mxu0 (!%p285_p3), %v1584_v0  ;;  %1441 = vmatprep.mubr.msk.bf16.mxu0 (!%p285_p3), %vm1661_vm0, %v1660_v1  ;;  %v1589_v6 = vld [vmem:[%s1955_s3 + $0x10] sm:$0xff] (!%p285_p3)   ;;  %v1590_v7 = vld [vmem:[%s1955_s3 + $0x38] sm:$0xff] (!%p285_p3)   ;;  %p357_p7 = scmp.lt.s32.totalorder (!%p285_p3), %s354_s19, 5  ;;  %v1593_v13 = vld [vmem:[%s1955_s3 + $0x60] sm:$0xff] (!%p285_p3)   ;;  %p367_p8 = scmp.lt.s32.totalorder (!%p285_p3), %s364_s14, 5  ;;  %vm1122_vm2 = vcmask (!%p285_p3), 519168  }
   0xc   : > { %1446 = vmatpush3.bf16.msra.mxu1 (!%p285_p3), %v1585_v2  ;;  %1435 = vmatprep.subr.bf16.mxu0 (!%p285_p3), %v1660_v1  ;;  %v1591_v8 = vld [vmem:[%s1955_s3 + $0x18] sm:$0xff] (!%p285_p3)   ;;  %v1592_v15 = vld [vmem:[%s1955_s3 + $0x40] sm:$0xff] (!%p285_p3)   ;;  %v1595_v17 = vld [vmem:[%s1955_s3 + $0x68] sm:$0xff] (!%p285_p3)   ;;  %p376_p9 = scmp.lt.s32.totalorder (!%p285_p3), %s1642_s21, 3 }
   0xd   : > { %1447 = vmatprep.subr.bf16.mxu1 (!%p285_p3), %v1660_v1  ;;  %1453 = vmatprep.mubr.msk.bf16.mxu1 (!%p285_p3), %vm1661_vm0, %v1660_v1  ;;  %v1594_v18 = vld [vmem:[%s1955_s3 + $0x48] sm:$0xff] (!%p285_p3)   ;;  %v1597_v19 = vld [vmem:[%s1955_s3 + $0x70] sm:$0xff] (!%p285_p3)   ;;  %v1599_v21 = vld [vmem:[%s1955_s3 + $0x78] sm:$0xff] (!%p285_p3)  }
   0xe   : > { %v1596_v20 = vld [vmem:[%s1955_s3 + $0x50] sm:$0xff] (!%p285_p3)   ;;  %v1598_v23 = vld [vmem:[%s1955_s3 + $0x58] sm:$0xff] (!%p285_p3)   ;;  %v1601_v25 = vld [vmem:[%s1955_s3 + $0xa0] sm:$0xff] (!%p285_p3)  }
   0xf   : > { %1436 = vmatpush3.bf16.msra.mxu0 (!%p285_p3), %v1586_v3  ;;  %v1600_v27 = vld [vmem:[%s1955_s3 + $0x80] sm:$0xff] (!%p285_p3)   ;;  %v1603_v28 = vld [vmem:[%s1955_s3 + $0xa8] sm:$0xff] (!%p285_p3)   ;;  %v1605_v30 = vld [vmem:[%s1955_s3 + $0xb0] sm:$0xff] (!%p285_p3)  }
  0x10   : > { %s1970_s22 = smov (!%p346_p5, %s1646_s22), 1  ;;  %1448 = vmatpush3.bf16.msra.mxu1 %v1587_v4  ;;  %1437 = vmatprep.subr.bf16.mxu0 %v1660_v1  ;;  %s1972_s19 = smov (!%p357_p7, %s354_s19), 5  ;;  %v1602_v29 = vld [vmem:[%s1955_s3 + $0x88] sm:$0xff]   ;;  %v1604_v32 = vld [vmem:[%s1955_s3 + $0x90] sm:$0xff]   ;;  %v1607_v33 = vld [vmem:[%s1955_s3 + $0xb8] sm:$0xff]  }
  0x11   : > { %s349_s12 = scalar_select %p348_p6, %s1642_s21, 5  ;;  %1449 = vmatprep.subr.bf16.mxu1 %v1660_v1  ;;  %v1606_v36 = vld [vmem:[%s1955_s3 + $0x98] sm:$0xff]   ;;  %v1609_v38 = vld [vmem:[%s1955_s3 + $0xe0] sm:$0xff]   ;;  %v1611_v43 = vld [vmem:[%s1955_s3 + $0xe8] sm:$0xff]  }
  0x12   : > { %s1761_s15 = smul.u32 6, %s1970_s22  ;;  %s1974_s14 = smov (!%p367_p8, %s364_s14), 5  ;;  %v1608_v41 = vld [vmem:[%s1955_s3 + $0xc0] sm:$0xff]   ;;  %v1610_v44 = vld [vmem:[%s1955_s3 + $0xc8] sm:$0xff]   ;;  %v1613_v46 = vld [vmem:[%s1955_s3 + $0xf0] sm:$0xff]  }
  0x13   : > { %1438 = vmatpush3.bf16.msra.mxu0 %v1588_v5  ;;  %v1612_v47 = vld [vmem:[%s1955_s3 + $0xd0] sm:$0xff]   ;;  %v1615_v50 = vld [vmem:[%s1955_s3 + $0xf8] sm:$0xff]   ;;  %v1616_v53 = vld [vmem:[%s1955_s3 + $0x100] sm:$0xff]   ;;  %s1976_s21 = smov (!%p376_p9, %s1642_s21), 3 }
  0x14   : > { %s351_s18 = sadd.s32 %s1761_s15, %s349_s12  ;;  %1450 = vmatpush3.bf16.msra.mxu1 %v1589_v6  ;;  %1439 = vmatprep.subr.bf16.mxu0 %v1660_v1  ;;  %s360_s16 = sadd.s32 %s1761_s15, %s1972_s19  ;;  %v1614_v51 = vld [vmem:[%s1955_s3 + $0xd8] sm:$0xff]   ;;  %v1617_v54 = vld [vmem:[%s1955_s3 + $0x108] sm:$0xff]   ;;  %v1618_v55 = vld [vmem:[%s1955_s3 + $0x110] sm:$0xff]  }
  0x15   : > { %s1269_s29 = sshll.u32 %s351_s18, 3  ;;  %1451 = vmatprep.subr.bf16.mxu1 %v1660_v1  ;;  %s1270_s19 = sshll.u32 %s360_s16, 3  ;;  %v1619_v56 = vld [vmem:[%s1955_s3 + $0x118] sm:$0xff]  }
  0x16   : > { %s353_s10 = scalar_lea.vmem %s1952_s0, %s1269_s29  ;;  %s362_s9 = scalar_lea.vmem %s1953_s1, %s1270_s19 }
  0x17   : > { %v391_v9 = vld [vmem:[%s353_s10] sm:$0x3f]  ;;  %1440 = vmatpush3.bf16.msra.mxu0 %v1590_v7  ;;  %s1272_s12 = sshll.u32 %s1970_s22, 2 }
  0x18   : > { %v392_v10 = vpack.c.bf16 %v391_v9, %v391_v9  ;;  %1452 = vmatpush3.bf16.msra.mxu1 %v1591_v8  ;;  %1457 = vmatprep.subr.bf16.mxu0 %v1660_v1  ;;  %v630_v22 = vld [vmem:[%s362_s9] sm:$0x3f]  ;;  %s370_s9 = sadd.s32 %s1761_s15, %s1974_s14  ;;  %s379_s13 = sadd.s32 %s1272_s12, %s1976_s21 }
  0x19   : > { %1469 = vmatprep.subr.bf16.mxu1 %v1660_v1  ;;  %v631_v24 = vpack.c.bf16 %v630_v22, %v630_v22  ;;  %s1271_s16 = sshll.u32 %s370_s9, 3 }
  0x1a   : > { %v411_v11 = vshrl.u32 %v392_v10, 16  ;;  %v413_v12 = vshll.u32 %v392_v10, 16  ;;  %v561_v26 = vrot.slane %v392_v10, 1  ;;  %s372_s20 = scalar_lea.vmem %s1954_s2, %s1271_s16  ;;  %s1273_s16 = sshll.u32 %s379_s13, 2 }
  0x1b   : > { %1454 = vmatmul.mubr.msk.bf16.vlgmr.msra.gmra.mrb[0].mxu1 %vm441_vm1, %v392_v10  ;;  %v720_v31 = vshll.u32 %v631_v24, 16  ;;  %v718_v34 = vshrl.u32 %v631_v24, 16  ;;  %v802_v37 = vrot.slane %v631_v24, 1  ;;  %v871_v39 = vld [vmem:[%s372_s20] sm:$0x3f]  ;;  %s381_s15 = scalar_lea.vmem %s1957_s5, %s1273_s16  ;;  %s389_s21 = scalar_lea.vmem %s1958_s6, %s1273_s16 }
  0x1c   : > { %v415_v14 = vrot.slane %v413_v12, 1  ;;  %1470 = vmatpush3.bf16.msra.mxu1 %v1593_v13  ;;  %1477 = vmatprep.mubr.msk.bf16.mxu1 %vm1661_vm0, %v1660_v1  ;;  %v872_v42 = vpack.c.bf16 %v871_v39, %v871_v39 }
  0x1d   : > { %1471 = vmatprep.subr.bf16.mxu1 %v1660_v1  ;;  %v722_v35 = vrot.slane %v720_v31, 1 }
  0x1e   : > { %v416_v16 = vor.u32 %v415_v14, %v411_v11  ;;  %v961_v45 = vshll.u32 %v872_v42, 16  ;;  %v959_v48 = vshrl.u32 %v872_v42, 16  ;;  %v1043_v57 = vrot.slane %v872_v42, 1 }
  0x1f   : > { %v723_v40 = vor.u32 %v722_v35, %v718_v34  ;;  %v1385_v34 = vld [vmem:[%s1956_s4] ss:$0 sm:$0xff] }
  0x20   : > { %1442 = vmatmul.mubr.msk.bf16.vlgmr.msra.gmra.mrb[0].mxu0 %vm441_vm1, %v416_v16  ;;  %1472 = vmatpush3.bf16.msra.mxu1 %v1595_v17  ;;  %v963_v49 = vrot.slane %v961_v45, 1 }
  0x21   : > { %1458 = vmatpush3.bf16.msra.mxu0 %v1592_v15  ;;  %1465 = vmatprep.mubr.msk.bf16.mxu0 %vm1661_vm0, %v1660_v1 }
  0x22   : > { %1459 = vmatprep.subr.bf16.mxu0 %v1660_v1  ;;  %1473 = vmatprep.subr.bf16.mxu1 %v1660_v1  ;;  %v964_v52 = vor.u32 %v963_v49, %v959_v48 }
  0x24   : > { %1474 = vmatpush3.bf16.msra.mxu1 %v1597_v19 }
  0x25   : > { %1460 = vmatpush3.bf16.msra.mxu0 %v1594_v18  ;;  %1475 = vmatprep.subr.bf16.mxu1 %v1660_v1 }
  0x26   : > { %1461 = vmatprep.subr.bf16.mxu0 %v1660_v1 }
  0x28   : > { %1476 = vmatpush3.bf16.msra.mxu1 %v1599_v21 }
  0x29   : > { %1462 = vmatpush3.bf16.msra.mxu0 %v1596_v20  ;;  %1493 = vmatprep.subr.bf16.mxu1 %v1660_v1 }
  0x2a   : > { %1463 = vmatprep.subr.bf16.mxu0 %v1660_v1 }
  0x2b   : > { %1478 = vmatmul.mubr.msk.bf16.vlgmr.msra.gmra.mrb[4].mxu1 %vm441_vm1, %v631_v24 }
  0x2c   : > { %1494 = vmatpush3.bf16.msra.mxu1 %v1601_v25  ;;  %1501 = vmatprep.mubr.msk.bf16.mxu1 %vm1661_vm0, %v1660_v1 }
  0x2d   : > { %1464 = vmatpush3.bf16.msra.mxu0 %v1598_v23  ;;  %1495 = vmatprep.subr.bf16.mxu1 %v1660_v1 }
  0x2e   : > { %1481 = vmatprep.subr.bf16.mxu0 %v1660_v1 }
  0x30   : > { %1466 = vmatmul.mubr.msk.bf16.vlgmr.msra.gmra.mrb[4].mxu0 %vm441_vm1, %v561_v26  ;;  %1496 = vmatpush3.bf16.msra.mxu1 %v1603_v28 }
  0x31   : > { %1482 = vmatpush3.bf16.msra.mxu0 %v1600_v27  ;;  %1489 = vmatprep.mubr.msk.bf16.mxu0 %vm1661_vm0, %v1660_v1 }
  0x32   : > { %1483 = vmatprep.subr.bf16.mxu0 %v1660_v1  ;;  %1497 = vmatprep.subr.bf16.mxu1 %v1660_v1 }
  0x34   : > { %1498 = vmatpush3.bf16.msra.mxu1 %v1605_v30 }
  0x35   : > { %1484 = vmatpush3.bf16.msra.mxu0 %v1602_v29  ;;  %1499 = vmatprep.subr.bf16.mxu1 %v1660_v1 }
  0x36   : > { %1485 = vmatprep.subr.bf16.mxu0 %v1660_v1 }
  0x38   : > { %1500 = vmatpush3.bf16.msra.mxu1 %v1607_v33 }
  0x39   : > { %1486 = vmatpush3.bf16.msra.mxu0 %v1604_v32  ;;  %1517 = vmatprep.subr.bf16.mxu1 %v1660_v1 }
  0x3a   : > { %1487 = vmatprep.subr.bf16.mxu0 %v1660_v1 }
  0x3b   : > { %1502 = vmatmul.mubr.msk.bf16.vlgmr.msra.gmra.mrb[8].mxu1 %vm441_vm1, %v802_v37  ;;  %v1120_v37 = vld [vmem:[%s381_s15] sm:$0xf] }
  0x3c   : > { %1518 = vmatpush3.bf16.msra.mxu1 %v1609_v38  ;;  %1525 = vmatprep.mubr.msk.bf16.mxu1 %vm1661_vm0, %v1660_v1 }
  0x3d   : > { %1488 = vmatpush3.bf16.msra.mxu0 %v1606_v36  ;;  %1519 = vmatprep.subr.bf16.mxu1 %v1660_v1 }
  0x3e   : > { %1505 = vmatprep.subr.bf16.mxu0 %v1660_v1 }
  0x40   : > { %1490 = vmatmul.mubr.msk.bf16.vlgmr.msra.gmra.mrb[8].mxu0 %vm441_vm1, %v723_v40  ;;  %1520 = vmatpush3.bf16.msra.mxu1 %v1611_v43 }
  0x41   : > { %1506 = vmatpush3.bf16.msra.mxu0 %v1608_v41  ;;  %1513 = vmatprep.mubr.msk.bf16.mxu0 %vm1661_vm0, %v1660_v1 }
  0x42   : > { %1507 = vmatprep.subr.bf16.mxu0 %v1660_v1  ;;  %1521 = vmatprep.subr.bf16.mxu1 %v1660_v1 }
  0x44   : > { %1522 = vmatpush3.bf16.msra.mxu1 %v1613_v46 }
  0x45   : > { %1508 = vmatpush3.bf16.msra.mxu0 %v1610_v44  ;;  %1523 = vmatprep.subr.bf16.mxu1 %v1660_v1 }
  0x46   : > { %1509 = vmatprep.subr.bf16.mxu0 %v1660_v1 }
  0x48   : > { %1524 = vmatpush3.bf16.msra.mxu1 %v1615_v50 }
  0x49   : > { %1510 = vmatpush3.bf16.msra.mxu0 %v1612_v47 }
  0x4a   : > { %1511 = vmatprep.subr.bf16.mxu0 %v1660_v1 }
  0x4b   : > { %1526 = vmatmul.mubr.msk.bf16.vlgmr.msra.gmra.mrb[12].mxu1 %vm441_vm1, %v964_v52 }
  0x4d   : > { %1512 = vmatpush3.bf16.msra.mxu0 %v1614_v51 }
  0x4e   : > { %1529 = vmatprep.subr.bf16.mxu0 %v1660_v1 }
  0x50   : > { %1514 = vmatmul.mubr.msk.bf16.vlgmr.msra.gmra.mrb[12].mxu0 %vm441_vm1, %v872_v42 }
  0x51   : > { %1530 = vmatpush3.bf16.msra.mxu0 %v1616_v53  ;;  %1537 = vmatprep.mubr.msk.bf16.mxu0 %vm1661_vm0, %v1660_v1 }
  0x52   : > { %1531 = vmatprep.subr.bf16.mxu0 %v1660_v1 }
  0x55   : > { %1532 = vmatpush3.bf16.msra.mxu0 %v1617_v54 }
  0x56   : > { %1533 = vmatprep.subr.bf16.mxu0 %v1660_v1 }
  0x59   : > { %1534 = vmatpush3.bf16.msra.mxu0 %v1618_v55 }
  0x5a   : > { %1535 = vmatprep.subr.bf16.mxu0 %v1660_v1 }
  0x5d   : > { %1536 = vmatpush3.bf16.msra.mxu0 %v1619_v56 }
  0x60   : > { %1538 = vmatmul.mubr.msk.bf16.vlgmr.msra.gmra.mrb[16].mxu0 %vm441_vm1, %v1043_v57 }
  0xee   : > { %v545_v58 = vpop.f32.mrb[0].mxu1 }
  0xef   : > { %v1455_v59 = vpop.f32.mrb[1].mxu1 }
  0xf0   : > { %v548_v61 = vpop.f32.mrb[2].mxu1 }
  0xf1   : > { %v1456_v0 = vpop.f32.mrb[3].mxu1 }
  0xf3   : > { %v479_v60 = vpop.f32.mrb[0].mxu0 }
  0xf4   : > { %v1443_v62 = vpop.f32.mrb[1].mxu0  ;;  %v546_v63 = vadd.f32 %v545_v58, %v479_v60 }
  0xf5   : > { %v482_v2 = vpop.f32.mrb[2].mxu0 }
  0xf6   : > { %v1444_v3 = vpop.f32.mrb[3].mxu0 }
  0xfe   : > { %v702_v4 = vpop.f32.mrb[4].mxu1 }
  0xff   : > { %v1479_v5 = vpop.f32.mrb[5].mxu1 }
 0x100   : > { %v705_v7 = vpop.f32.mrb[6].mxu1 }
 0x101   : > { %v1480_v1 = vpop.f32.mrb[7].mxu1 }
 0x103   : > { %v623_v6 = vpop.f32.mrb[4].mxu0 }
 0x104   : > { %v629_v8 = vadd.f32 %v623_v6, %v546_v63  ;;  %v1467_v9 = vpop.f32.mrb[5].mxu0 }
 0x105   : > { %v626_v10 = vpop.f32.mrb[6].mxu0 }
 0x106   : > { %v708_v11 = vadd.f32 %v702_v4, %v629_v8  ;;  %v1468_v12 = vpop.f32.mrb[7].mxu0 }
 0x10e   : > { %v864_v13 = vpop.f32.mrb[8].mxu1 }
 0x10f   : > { %v1503_v14 = vpop.f32.mrb[9].mxu1 }
 0x110   : > { %v867_v16 = vpop.f32.mrb[10].mxu1 }
 0x111   : > { %v1504_v19 = vpop.f32.mrb[11].mxu1 }
 0x113   : > { %v785_v15 = vpop.f32.mrb[8].mxu0 }
 0x114   : > { %v791_v17 = vadd.f32 %v785_v15, %v708_v11  ;;  %v1491_v18 = vpop.f32.mrb[9].mxu0 }
 0x115   : > { %v788_v20 = vpop.f32.mrb[10].mxu0 }
 0x116   : > { %v870_v21 = vadd.f32 %v864_v13, %v791_v17  ;;  %v1492_v22 = vpop.f32.mrb[11].mxu0 }
 0x11e   : > { %v1026_v23 = vpop.f32.mrb[12].mxu1 }
 0x11f   : > { %v1527_v24 = vpop.f32.mrb[13].mxu1 }
 0x120   : > { %v1029_v26 = vpop.f32.mrb[14].mxu1 }
 0x121   : > { %v1528_v29 = vpop.f32.mrb[15].mxu1 }
 0x123   : > { %v943_v25 = vpop.f32.mrb[12].mxu0 }
 0x124   : > { %v949_v27 = vadd.f32 %v943_v25, %v870_v21  ;;  %v1515_v28 = vpop.f32.mrb[13].mxu0 }
 0x125   : > { %v946_v30 = vpop.f32.mrb[14].mxu0 }
 0x126   : > { %v1032_v31 = vadd.f32 %v1026_v23, %v949_v27  ;;  %v1516_v32 = vpop.f32.mrb[15].mxu0 }
 0x133   : > { %v1105_v33 = vpop.f32.mrb[16].mxu0 }
 0x134   : > { %v1111_v35 = vadd.f32 %v1105_v33, %v1032_v31  ;;  %v1539_v36 = vpop.f32.mrb[17].mxu0 }
 0x135   : > { %v1108_v38 = vpop.f32.mrb[18].mxu0 }
 0x136   : > { %v1119_v39 = vadd.f32 %v1385_v34, %v1111_v35  ;;  %v1540_v40 = vpop.f32.mrb[19].mxu0 }
 0x138   : > { %v1121_v41 = vadd.f32 %v1120_v37, %v1119_v39 }
 0x13a   : > { %1123 = vst.msk [vmem:[%s389_s21] sm:$0xf] %vm1122_vm2, %v1121_v41 }
 0x13b PF: > { %s16_s25 = sadd.s32 1, %s1658_s25   ;;  %s1959_s21 = smov %s1650_s23 }
 0x13c   : > { %p13_p10 = scmp.ge.s32.totalorder %s16_s25, 10   ;;  %s1960_s22 = smov %s1654_s24 }
 0x13d   : > { %s1961_s23 = smov %s1964_s26  ;;  %s1962_s24 = smov %s1968_s27 }
 0x13e   :  { %15 = sbr.rel (!%p13_p10) target bundleno = 3 (0x3), region = 91 }

// kernel: sft_net_forward.24
= control target key start
LH: loop header
LB: loop body
LE: loop exit
PB: predicated region body
PF: predicated region fallthrough
CT: control target
= control target key end

     0   :  { %s2392_s18 = smov 0   ;;  %s2394_s19 = smov 0   ;;  %s2934_s0 = inlined_call_operand.vmem [shape: f32[2,6,6,128], index: 0, kind: input, shape index: {}, may-alias: {0,1,2}]   ;;  %s2935_s1 = inlined_call_operand.vmem [shape: f32[2,6,6,128], index: 1, kind: input, shape index: {}, may-alias: {0,1,2}]   ;;  %s2936_s2 = inlined_call_operand.vmem [shape: f32[2,6,6,128], index: 2, kind: input, shape index: {}, may-alias: {0,1,2}]   ;;  %s2937_s3 = inlined_call_operand.vmem [shape: bf16[9,128,256], index: 3, kind: input, shape index: {}]   ;;  %s2938_s4 = inlined_call_operand.vmem [shape: f32[1,256], index: 4, kind: input, shape index: {}]   ;;  %s2939_s5 = inlined_call_operand.vmem [shape: f32[2,4,4,256], index: 5, kind: output, shape index: {}]  }
   0x1   :  { %s2396_s20 = smov 0   ;;  %s2398_s21 = smov 0  }
   0x2   :  { %s2400_s22 = smov 0  }
   0x3 LB: > { %s24_s23 = sadd.s32 1, %s2351_s20  ;;  %s27_s24 = sadd.s32 1, %s2355_s21  ;;  %s2359_s22 = sphi %s2400_s22, %s15_s22   ;;  %s2355_s21 = sphi %s2398_s21, %s2943_s21   ;;  %s2351_s20 = sphi %s2396_s20, %s2942_s20   ;;  %s2347_s19 = sphi %s2394_s19, %s2941_s19   ;;  %s2343_s18 = sphi %s2392_s18, %s2940_s18  }
   0x4   : > { %p25_p0 = scmp.ge.s32.totalorder %s24_s23, 4  ;;  %p1782_p1 = scmp.ge.s32.totalorder %s2359_s22, 1 }
   0x5   : > { %p244_p2 = scmp.lt.s32.totalorder %s2359_s22, 9 }
   0x6   : > { %s2945_s23 = smov (%p25_p0, %s24_s23), 0  ;;  %s2947_s24 = smov (!%p25_p0, %s27_s24), %s2355_s21 }
   0x7   : > { %p245_p3 = pnand %p1782_p1, %p244_p2  ;;  %p29_p4 = scmp.ge.s32.totalorder %s2947_s24, 2 }
   0x8   : > { %v2105_v0 = vld [vmem:[%s2937_s3 + $0x84] ss:$8 sps:$4 sm:$0xff] (!%p245_p3)   ;;  %p297_p5 = scmp.lt.s32.totalorder (!%p245_p3), %s2347_s19, 1  ;;  %v2361_v2 = vmov (!%p245_p3), 0   ;;  %v2109_v3 = vld [vmem:[%s2937_s3 + $0x80] ss:$8 sps:$4 sm:$0xff] (!%p245_p3)  }
   0x9   : > { %s2949_s24 = smov (%p29_p4, %s2947_s24), 0  ;;  %248 = sbr.rel (%p245_p3) target bundleno = 393 (0x189), region = 40 }
   0xa   : > { %v2107_v1 = vld [vmem:[%s2937_s3 + $0x4] ss:$8 sps:$4 sm:$0xff] (!%p245_p3)   ;;  %490 = vmatprep.mubr.bf16.mxu0 (!%p245_p3), %v2361_v2  ;;  %611 = vmatprep.mubr.bf16.mxu1 (!%p245_p3), %v2361_v2  ;;  %v2110_v4 = vld [vmem:[%s2937_s3] ss:$8 sps:$4 sm:$0xff] (!%p245_p3)   ;;  %p299_p6 = scmp.lt.s32.totalorder (!%p245_p3), %s2343_s18, 5  ;;  %s305_s10 = sadd.s32 (!%p245_p3), 1, %s2343_s18 }
   0xb   : > { %458 = vmatprep.subr.bf16.mxu0 (!%p245_p3), %v2105_v0  ;;  %579 = vmatprep.subr.bf16.mxu1 (!%p245_p3), %v2107_v1  ;;  %v2111_v5 = vld [vmem:[%s2937_s3 + $0x94] ss:$8 sps:$4 sm:$0xff] (!%p245_p3)   ;;  %v2115_v7 = vld [vmem:[%s2937_s3 + $0x90] ss:$8 sps:$4 sm:$0xff] (!%p245_p3)   ;;  %v2117_v9 = vld [vmem:[%s2937_s3 + $0xa4] ss:$8 sps:$4 sm:$0xff] (!%p245_p3)  }
   0xc   : > { %459 = vmatpush1.bf16.msra.mxu0 (!%p245_p3), %v2109_v3  ;;  %580 = vmatpush1.bf16.msra.mxu1 (!%p245_p3), %v2110_v4  ;;  %v2113_v6 = vld [vmem:[%s2937_s3 + $0x14] ss:$8 sps:$4 sm:$0xff] (!%p245_p3)   ;;  %v2116_v8 = vld [vmem:[%s2937_s3 + $0x10] ss:$8 sps:$4 sm:$0xff] (!%p245_p3)   ;;  %v2119_v10 = vld [vmem:[%s2937_s3 + $0x24] ss:$8 sps:$4 sm:$0xff] (!%p245_p3)  }
   0xd   : > { %460 = vmatprep.subr.bf16.mxu0 (!%p245_p3), %v2111_v5  ;;  %581 = vmatprep.subr.bf16.mxu1 (!%p245_p3), %v2113_v6  ;;  %v2121_v11 = vld [vmem:[%s2937_s3 + $0xa0] ss:$8 sps:$4 sm:$0xff] (!%p245_p3)   ;;  %v2123_v13 = vld [vmem:[%s2937_s3 + $0xb4] ss:$8 sps:$4 sm:$0xff] (!%p245_p3)   ;;  %v2127_v15 = vld [vmem:[%s2937_s3 + $0xb0] ss:$8 sps:$4 sm:$0xff] (!%p245_p3)  }
   0xe   : > { %v2122_v12 = vld [vmem:[%s2937_s3 + $0x20] ss:$8 sps:$4 sm:$0xff] (!%p245_p3)   ;;  %v2125_v14 = vld [vmem:[%s2937_s3 + $0x34] ss:$8 sps:$4 sm:$0xff] (!%p245_p3)   ;;  %v2128_v16 = vld [vmem:[%s2937_s3 + $0x30] ss:$8 sps:$4 sm:$0xff] (!%p245_p3)  }
   0xf   : > { %v2129_v17 = vld [vmem:[%s2937_s3 + $0xc4] ss:$8 sps:$4 sm:$0xff] (!%p245_p3)   ;;  %v2133_v19 = vld [vmem:[%s2937_s3 + $0xc0] ss:$8 sps:$4 sm:$0xff] (!%p245_p3)   ;;  %v2135_v21 = vld [vmem:[%s2937_s3 + $0xd4] ss:$8 sps:$4 sm:$0xff] (!%p245_p3)  }
  0x10   : > { %s2951_s19 = smov (!%p297_p5, %s2347_s19), 1  ;;  %461 = vmatpush1.bf16.msra.mxu0 %v2115_v7  ;;  %582 = vmatpush1.bf16.msra.mxu1 %v2116_v8  ;;  %v2131_v18 = vld [vmem:[%s2937_s3 + $0x44] ss:$8 sps:$4 sm:$0xff]   ;;  %v2134_v20 = vld [vmem:[%s2937_s3 + $0x40] ss:$8 sps:$4 sm:$0xff]   ;;  %p308_p7 = scmp.lt.s32.totalorder %s305_s10, 5 }
  0x11   : > { %s300_s25 = scalar_select %p299_p6, %s2343_s18, 5  ;;  %462 = vmatprep.subr.bf16.mxu0 %v2117_v9  ;;  %583 = vmatprep.subr.bf16.mxu1 %v2119_v10  ;;  %v2137_v22 = vld [vmem:[%s2937_s3 + $0x54] ss:$8 sps:$4 sm:$0xff]   ;;  %v2139_v23 = vld [vmem:[%s2937_s3 + $0xd0] ss:$8 sps:$4 sm:$0xff]  }
  0x12   : > { %s2476_s9 = smul.u32 6, %s2951_s19  ;;  %v2140_v24 = vld [vmem:[%s2937_s3 + $0x50] ss:$8 sps:$4 sm:$0xff]   ;;  %v2141_v25 = vld [vmem:[%s2937_s3 + $0xe4] ss:$8 sps:$4 sm:$0xff]   ;;  %s2953_s10 = smov (!%p308_p7, %s305_s10), 5 }
  0x13   : > { %v2143_v26 = vld [vmem:[%s2937_s3 + $0x64] ss:$8 sps:$4 sm:$0xff]   ;;  %v2145_v29 = vld [vmem:[%s2937_s3 + $0xe0] ss:$8 sps:$4 sm:$0xff]   ;;  %v2147_v32 = vld [vmem:[%s2937_s3 + $0xf4] ss:$8 sps:$4 sm:$0xff]  }
  0x14   : > { %463 = vmatpush1.bf16.msra.mxu0 %v2121_v11  ;;  %584 = vmatpush1.bf16.msra.mxu1 %v2122_v12  ;;  %s302_s26 = sadd.s32 %s2476_s9, %s300_s25  ;;  %v2146_v30 = vld [vmem:[%s2937_s3 + $0x60] ss:$8 sps:$4 sm:$0xff]   ;;  %v2149_v33 = vld [vmem:[%s2937_s3 + $0x74] ss:$8 sps:$4 sm:$0xff]   ;;  %v2151_v34 = vld [vmem:[%s2937_s3 + $0xf0] ss:$8 sps:$4 sm:$0xff]   ;;  %s311_s14 = sadd.s32 %s2476_s9, %s2953_s10 }
  0x15   : > { %464 = vmatprep.subr.bf16.mxu0 %v2123_v13  ;;  %585 = vmatprep.subr.bf16.mxu1 %v2125_v14  ;;  %s1783_s8 = sshll.u32 %s302_s26, 3  ;;  %v2152_v37 = vld [vmem:[%s2937_s3 + $0x70] ss:$8 sps:$4 sm:$0xff]   ;;  %v2155_v38 = vld [vmem:[%s2937_s3 + $0x104] ss:$8 sps:$4 sm:$0xff]   ;;  %s1784_s10 = sshll.u32 %s311_s14, 3 }
  0x16   : > { %s304_s15 = scalar_lea.vmem %s2934_s0, %s1783_s8  ;;  %v2158_v39 = vld [vmem:[%s2937_s3 + $0x184] ss:$8 sps:$4 sm:$0xff]   ;;  %v2153_v41 = vld [vmem:[%s2937_s3 + $0x100] ss:$8 sps:$4 sm:$0xff]   ;;  %v2161_v43 = vld [vmem:[%s2937_s3 + $0x114] ss:$8 sps:$4 sm:$0xff]   ;;  %s313_s17 = scalar_lea.vmem %s2935_s1, %s1784_s10 }
  0x17   : > { %v335_v27 = vld [vmem:[%s304_s15] sm:$0x3f]  ;;  %v2164_v44 = vld [vmem:[%s2937_s3 + $0x194] ss:$8 sps:$4 sm:$0xff]   ;;  %v2159_v45 = vld [vmem:[%s2937_s3 + $0x110] ss:$8 sps:$4 sm:$0xff]  }
  0x18   : > { %465 = vmatpush1.bf16.msra.mxu0 %v2127_v15  ;;  %586 = vmatpush1.bf16.msra.mxu1 %v2128_v16  ;;  %v2521_v28 = vpack.c.bf16 %v335_v27, %v335_v27  ;;  %v2156_v42 = vld [vmem:[%s2937_s3 + $0x180] ss:$8 sps:$4 sm:$0xff]   ;;  %v2162_v46 = vld [vmem:[%s2937_s3 + $0x190] ss:$8 sps:$4 sm:$0xff]   ;;  %v2167_v47 = vld [vmem:[%s2937_s3 + $0x124] ss:$8 sps:$4 sm:$0xff]  }
  0x19   : > { %466 = vmatprep.subr.bf16.mxu0 %v2129_v17  ;;  %587 = vmatprep.subr.bf16.mxu1 %v2131_v18  ;;  %v2170_v48 = vld [vmem:[%s2937_s3 + $0x1a4] ss:$8 sps:$4 sm:$0xff]   ;;  %v2165_v49 = vld [vmem:[%s2937_s3 + $0x120] ss:$8 sps:$4 sm:$0xff]   ;;  %v2173_v51 = vld [vmem:[%s2937_s3 + $0x134] ss:$8 sps:$4 sm:$0xff]  }
  0x1a   : > { %v373_v31 = vshll.u32 %v2521_v28, 16  ;;  %v371_v35 = vshrl.u32 %v2521_v28, 16  ;;  %v2168_v50 = vld [vmem:[%s2937_s3 + $0x1a0] ss:$8 sps:$4 sm:$0xff]   ;;  %v2176_v52 = vld [vmem:[%s2937_s3 + $0x1b4] ss:$8 sps:$4 sm:$0xff]  }
  0x1b   : > { %v2171_v53 = vld [vmem:[%s2937_s3 + $0x130] ss:$8 sps:$4 sm:$0xff]   ;;  %v2179_v55 = vld [vmem:[%s2937_s3 + $0x144] ss:$8 sps:$4 sm:$0xff]   ;;  %v2177_v57 = vld [vmem:[%s2937_s3 + $0x140] ss:$8 sps:$4 sm:$0xff]  }
  0x1c   : > { %467 = vmatpush1.bf16.msra.mxu0 %v2133_v19  ;;  %588 = vmatpush1.bf16.msra.mxu1 %v2134_v20  ;;  %v375_v36 = vrot.slane %v373_v31, 1  ;;  %v2174_v54 = vld [vmem:[%s2937_s3 + $0x1b0] ss:$8 sps:$4 sm:$0xff]   ;;  %v2182_v56 = vld [vmem:[%s2937_s3 + $0x1c4] ss:$8 sps:$4 sm:$0xff]   ;;  %v638_v11 = vrot.slane %v2521_v28, 1 }
  0x1d   : > { %468 = vmatprep.subr.bf16.mxu0 %v2135_v21  ;;  %589 = vmatprep.subr.bf16.mxu1 %v2137_v22  ;;  %v2180_v58 = vld [vmem:[%s2937_s3 + $0x1c0] ss:$8 sps:$4 sm:$0xff]   ;;  %v2185_v59 = vld [vmem:[%s2937_s3 + $0x154] ss:$8 sps:$4 sm:$0xff]   ;;  %v2183_v61 = vld [vmem:[%s2937_s3 + $0x150] ss:$8 sps:$4 sm:$0xff]  }
  0x1e   : > { %v376_v40 = vor.u32 %v375_v36, %v371_v35  ;;  %v2188_v60 = vld [vmem:[%s2937_s3 + $0x1d4] ss:$8 sps:$4 sm:$0xff]   ;;  %v2186_v62 = vld [vmem:[%s2937_s3 + $0x1d0] ss:$8 sps:$4 sm:$0xff]   ;;  %v2191_v63 = vld [vmem:[%s2937_s3 + $0x164] ss:$8 sps:$4 sm:$0xff]  }
  0x1f   : > { %v2194_v0 = vld [vmem:[%s2937_s3 + $0x1e4] ss:$8 sps:$4 sm:$0xff]   ;;  %v2189_v1 = vld [vmem:[%s2937_s3 + $0x160] ss:$8 sps:$4 sm:$0xff]   ;;  %v2197_v4 = vld [vmem:[%s2937_s3 + $0x174] ss:$8 sps:$4 sm:$0xff]  }
  0x20   : > { %469 = vmatpush1.bf16.msra.mxu0 %v2139_v23  ;;  %590 = vmatpush1.bf16.msra.mxu1 %v2140_v24  ;;  %v2192_v3 = vld [vmem:[%s2937_s3 + $0x1e0] ss:$8 sps:$4 sm:$0xff]   ;;  %v2200_v5 = vld [vmem:[%s2937_s3 + $0x1f4] ss:$8 sps:$4 sm:$0xff]   ;;  %v2195_v6 = vld [vmem:[%s2937_s3 + $0x170] ss:$8 sps:$4 sm:$0xff]  }
  0x21   : > { %470 = vmatprep.subr.bf16.mxu0 %v2141_v25  ;;  %591 = vmatprep.subr.bf16.mxu1 %v2143_v26  ;;  %v2198_v7 = vld [vmem:[%s2937_s3 + $0x1f0] ss:$8 sps:$4 sm:$0xff]   ;;  %v763_v8 = vld [vmem:[%s313_s17] sm:$0x3f]  ;;  %v2209_v15 = vld [vmem:[%s2937_s3 + $0x214] ss:$8 sps:$4 sm:$0xff]  }
  0x22   : > { %v2203_v9 = vld [vmem:[%s2937_s3 + $0x204] ss:$8 sps:$4 sm:$0xff]   ;;  %v2654_v12 = vpack.c.bf16 %v763_v8, %v763_v8  ;;  %v2201_v13 = vld [vmem:[%s2937_s3 + $0x200] ss:$8 sps:$4 sm:$0xff]   ;;  %v2212_v16 = vld [vmem:[%s2937_s3 + $0x294] ss:$8 sps:$4 sm:$0xff]  }
  0x23   : > { %v2206_v10 = vld [vmem:[%s2937_s3 + $0x284] ss:$8 sps:$4 sm:$0xff]   ;;  %v2204_v14 = vld [vmem:[%s2937_s3 + $0x280] ss:$8 sps:$4 sm:$0xff]   ;;  %v2207_v17 = vld [vmem:[%s2937_s3 + $0x210] ss:$8 sps:$4 sm:$0xff]  }
  0x24   : > { %471 = vmatpush1.bf16.msra.mxu0 %v2145_v29  ;;  %592 = vmatpush1.bf16.msra.mxu1 %v2146_v30  ;;  %v2210_v18 = vld [vmem:[%s2937_s3 + $0x290] ss:$8 sps:$4 sm:$0xff]   ;;  %v2215_v19 = vld [vmem:[%s2937_s3 + $0x224] ss:$8 sps:$4 sm:$0xff]   ;;  %v2213_v21 = vld [vmem:[%s2937_s3 + $0x220] ss:$8 sps:$4 sm:$0xff]  }
  0x25   : > { %472 = vmatprep.subr.bf16.mxu0 %v2147_v32  ;;  %593 = vmatprep.subr.bf16.mxu1 %v2149_v33  ;;  %v2218_v20 = vld [vmem:[%s2937_s3 + $0x2a4] ss:$8 sps:$4 sm:$0xff]   ;;  %v2216_v22 = vld [vmem:[%s2937_s3 + $0x2a0] ss:$8 sps:$4 sm:$0xff]   ;;  %v2221_v23 = vld [vmem:[%s2937_s3 + $0x234] ss:$8 sps:$4 sm:$0xff]  }
  0x26   : > { %v2224_v24 = vld [vmem:[%s2937_s3 + $0x2b4] ss:$8 sps:$4 sm:$0xff]   ;;  %v2219_v25 = vld [vmem:[%s2937_s3 + $0x230] ss:$8 sps:$4 sm:$0xff]   ;;  %v2227_v27 = vld [vmem:[%s2937_s3 + $0x244] ss:$8 sps:$4 sm:$0xff]  }
  0x27   : > { %v2222_v26 = vld [vmem:[%s2937_s3 + $0x2b0] ss:$8 sps:$4 sm:$0xff]   ;;  %v2225_v29 = vld [vmem:[%s2937_s3 + $0x240] ss:$8 sps:$4 sm:$0xff]   ;;  %v2233_v31 = vld [vmem:[%s2937_s3 + $0x254] ss:$8 sps:$4 sm:$0xff]  }
  0x28   : > { %473 = vmatpush1.bf16.msra.mxu0 %v2151_v34  ;;  %594 = vmatpush1.bf16.msra.mxu1 %v2152_v37  ;;  %v2228_v30 = vld [vmem:[%s2937_s3 + $0x2c0] ss:$8 sps:$4 sm:$0xff]   ;;  %v2236_v32 = vld [vmem:[%s2937_s3 + $0x2d4] ss:$8 sps:$4 sm:$0xff]   ;;  %v2231_v33 = vld [vmem:[%s2937_s3 + $0x250] ss:$8 sps:$4 sm:$0xff]  }
  0x29   : > { %720 = vmatprep.subr.bf16.mxu0 %v2155_v38  ;;  %862 = vmatprep.subr.bf16.mxu1 %v2158_v39  ;;  %v2234_v34 = vld [vmem:[%s2937_s3 + $0x2d0] ss:$8 sps:$4 sm:$0xff]   ;;  %v2239_v35 = vld [vmem:[%s2937_s3 + $0x264] ss:$8 sps:$4 sm:$0xff]   ;;  %v2237_v37 = vld [vmem:[%s2937_s3 + $0x260] ss:$8 sps:$4 sm:$0xff]  }
  0x2a   : > { %v2242_v36 = vld [vmem:[%s2937_s3 + $0x2e4] ss:$8 sps:$4 sm:$0xff]   ;;  %v925_v38 = vshll.u32 %v2654_v12, 16  ;;  %v2240_v39 = vld [vmem:[%s2937_s3 + $0x2e0] ss:$8 sps:$4 sm:$0xff]   ;;  %s315_s28 = sadd.s32 2, %s2343_s18 }
  0x2b   : > { %491 = vmatmul.mubr.bf16.vlgmr.msra.gmra.mrb[0].mxu0 %v376_v40  ;;  %612 = vmatmul.mubr.bf16.vlgmr.msra.gmra.mrb[0].mxu1 %v2521_v28  ;;  %v2230_v28 = vld [vmem:[%s2937_s3 + $0x2c4] ss:$8 sps:$4 sm:$0xff]   ;;  %v2245_v40 = vld [vmem:[%s2937_s3 + $0x274] ss:$8 sps:$4 sm:$0xff]   ;;  %p318_p8 = scmp.lt.s32.totalorder %s315_s28, 5  ;;  %p327_p9 = scmp.lt.s32.totalorder %s2343_s18, 3 }
  0x2c   : > { %721 = vmatpush1.bf16.msra.mxu0 %v2153_v41  ;;  %863 = vmatpush1.bf16.msra.mxu1 %v2156_v42  ;;  %v2248_v41 = vld [vmem:[%s2937_s3 + $0x2f4] ss:$8 sps:$4 sm:$0xff]   ;;  %v2243_v42 = vld [vmem:[%s2937_s3 + $0x270] ss:$8 sps:$4 sm:$0xff]   ;;  %s1787_s16 = sshll.u32 %s2951_s19, 3 }
  0x2d   : > { %722 = vmatprep.subr.bf16.mxu0 %v2161_v43  ;;  %864 = vmatprep.subr.bf16.mxu1 %v2164_v44  ;;  %v923_v43 = vshrl.u32 %v2654_v12, 16  ;;  %v927_v44 = vrot.slane %v925_v38, 1  ;;  %s2955_s28 = smov (!%p318_p8, %s315_s28), 5  ;;  %s2957_s18 = smov (!%p327_p9, %s2343_s18), 3 }
  0x2e   : > { %752 = vmatprep.mubr.bf16.mxu0 %v2361_v2  ;;  %894 = vmatprep.mubr.bf16.mxu1 %v2361_v2  ;;  %s321_s6 = sadd.s32 %s2476_s9, %s2955_s28 }
  0x2f   : > { %s1785_s9 = sshll.u32 %s321_s6, 3 }
  0x30   : > { %723 = vmatpush1.bf16.msra.mxu0 %v2159_v45  ;;  %865 = vmatpush1.bf16.msra.mxu1 %v2162_v46  ;;  %v2246_v45 = vld [vmem:[%s2937_s3 + $0x2f0] ss:$8 sps:$4 sm:$0xff]   ;;  %v2251_v46 = vld [vmem:[%s2937_s3 + $0x304] ss:$8 sps:$4 sm:$0xff]   ;;  %s323_s8 = scalar_lea.vmem %s2936_s2, %s1785_s9  ;;  %s1786_s9 = sshll.u32 %s2957_s18, 1 }
  0x31   : > { %724 = vmatprep.subr.bf16.mxu0 %v2167_v47  ;;  %866 = vmatprep.subr.bf16.mxu1 %v2170_v48  ;;  %v2254_v47 = vld [vmem:[%s2937_s3 + $0x384] ss:$8 sps:$4 sm:$0xff]   ;;  %v928_v48 = vor.u32 %v927_v44, %v923_v43  ;;  %s331_s17 = sadd.s32 %s1787_s16, %s1786_s9 }
  0x32   : > { %s1788_s26 = sshll.u32 %s331_s17, 2 }
  0x33   : > { %s333_s30 = scalar_lea.vmem %s2939_s5, %s1788_s26 }
  0x34   : > { %725 = vmatpush1.bf16.msra.mxu0 %v2165_v49  ;;  %867 = vmatpush1.bf16.msra.mxu1 %v2168_v50  ;;  %v1071_v49 = vrot.slane %v2654_v12, 1  ;;  %v2249_v50 = vld [vmem:[%s2937_s3 + $0x300] ss:$8 sps:$4 sm:$0xff]  }
  0x35   : > { %726 = vmatprep.subr.bf16.mxu0 %v2173_v51  ;;  %868 = vmatprep.subr.bf16.mxu1 %v2176_v52  ;;  %v2252_v51 = vld [vmem:[%s2937_s3 + $0x380] ss:$8 sps:$4 sm:$0xff]   ;;  %v2257_v52 = vld [vmem:[%s2937_s3 + $0x314] ss:$8 sps:$4 sm:$0xff]  }
  0x38   : > { %727 = vmatpush1.bf16.msra.mxu0 %v2171_v53  ;;  %869 = vmatpush1.bf16.msra.mxu1 %v2174_v54  ;;  %v2260_v53 = vld [vmem:[%s2937_s3 + $0x394] ss:$8 sps:$4 sm:$0xff]   ;;  %v2255_v54 = vld [vmem:[%s2937_s3 + $0x310] ss:$8 sps:$4 sm:$0xff]  }
  0x39   : > { %728 = vmatprep.subr.bf16.mxu0 %v2179_v55  ;;  %870 = vmatprep.subr.bf16.mxu1 %v2182_v56  ;;  %v2258_v55 = vld [vmem:[%s2937_s3 + $0x390] ss:$8 sps:$4 sm:$0xff]   ;;  %v2263_v56 = vld [vmem:[%s2937_s3 + $0x324] ss:$8 sps:$4 sm:$0xff]  }
  0x3c   : > { %729 = vmatpush1.bf16.msra.mxu0 %v2177_v57  ;;  %871 = vmatpush1.bf16.msra.mxu1 %v2180_v58  ;;  %v2266_v57 = vld [vmem:[%s2937_s3 + $0x3a4] ss:$8 sps:$4 sm:$0xff]   ;;  %v2261_v58 = vld [vmem:[%s2937_s3 + $0x320] ss:$8 sps:$4 sm:$0xff]  }
  0x3d   : > { %730 = vmatprep.subr.bf16.mxu0 %v2185_v59  ;;  %872 = vmatprep.subr.bf16.mxu1 %v2188_v60  ;;  %v2264_v59 = vld [vmem:[%s2937_s3 + $0x3a0] ss:$8 sps:$4 sm:$0xff]   ;;  %v2269_v60 = vld [vmem:[%s2937_s3 + $0x334] ss:$8 sps:$4 sm:$0xff]  }
  0x40   : > { %731 = vmatpush1.bf16.msra.mxu0 %v2183_v61  ;;  %873 = vmatpush1.bf16.msra.mxu1 %v2186_v62  ;;  %v2272_v61 = vld [vmem:[%s2937_s3 + $0x3b4] ss:$8 sps:$4 sm:$0xff]   ;;  %v2267_v62 = vld [vmem:[%s2937_s3 + $0x330] ss:$8 sps:$4 sm:$0xff]  }
  0x41   : > { %732 = vmatprep.subr.bf16.mxu0 %v2191_v63  ;;  %874 = vmatprep.subr.bf16.mxu1 %v2194_v0  ;;  %v2270_v63 = vld [vmem:[%s2937_s3 + $0x3b0] ss:$8 sps:$4 sm:$0xff]   ;;  %v2275_v0 = vld [vmem:[%s2937_s3 + $0x344] ss:$8 sps:$4 sm:$0xff]  }
  0x44   : > { %733 = vmatpush1.bf16.msra.mxu0 %v2189_v1  ;;  %875 = vmatpush1.bf16.msra.mxu1 %v2192_v3  ;;  %v2278_v1 = vld [vmem:[%s2937_s3 + $0x3c4] ss:$8 sps:$4 sm:$0xff]   ;;  %v2273_v3 = vld [vmem:[%s2937_s3 + $0x340] ss:$8 sps:$4 sm:$0xff]  }
  0x45   : > { %734 = vmatprep.subr.bf16.mxu0 %v2197_v4  ;;  %876 = vmatprep.subr.bf16.mxu1 %v2200_v5  ;;  %v2276_v4 = vld [vmem:[%s2937_s3 + $0x3c0] ss:$8 sps:$4 sm:$0xff]  }
  0x46   : > { %v1196_v5 = vld [vmem:[%s323_s8] sm:$0x3f] }
  0x47   : > { %v2825_v8 = vpack.c.bf16 %v1196_v5, %v1196_v5 }
  0x48   : > { %735 = vmatpush1.bf16.msra.mxu0 %v2195_v6  ;;  %877 = vmatpush1.bf16.msra.mxu1 %v2198_v7  ;;  %v2281_v6 = vld [vmem:[%s2937_s3 + $0x354] ss:$8 sps:$4 sm:$0xff]  }
  0x49   : > { %1010 = vmatprep.subr.bf16.mxu0 %v2203_v9  ;;  %1153 = vmatprep.subr.bf16.mxu1 %v2206_v10  ;;  %v2284_v7 = vld [vmem:[%s2937_s3 + $0x3d4] ss:$8 sps:$4 sm:$0xff]   ;;  %v2279_v9 = vld [vmem:[%s2937_s3 + $0x350] ss:$8 sps:$4 sm:$0xff]   ;;  %v1504_v38 = vrot.slane %v2825_v8, 1 }
  0x4a   : > { %v2282_v10 = vld [vmem:[%s2937_s3 + $0x3d0] ss:$8 sps:$4 sm:$0xff]  }
  0x4b   : > { %753 = vmatmul.mubr.bf16.vlgmr.msra.gmra.mrb[4].mxu0 %v638_v11  ;;  %895 = vmatmul.mubr.bf16.vlgmr.msra.gmra.mrb[4].mxu1 %v2654_v12  ;;  %v2287_v11 = vld [vmem:[%s2937_s3 + $0x364] ss:$8 sps:$4 sm:$0xff]  }
  0x4c   : > { %1011 = vmatpush1.bf16.msra.mxu0 %v2201_v13  ;;  %1154 = vmatpush1.bf16.msra.mxu1 %v2204_v14  ;;  %v2290_v12 = vld [vmem:[%s2937_s3 + $0x3e4] ss:$8 sps:$4 sm:$0xff]   ;;  %v1358_v13 = vshll.u32 %v2825_v8, 16  ;;  %v2285_v14 = vld [vmem:[%s2937_s3 + $0x360] ss:$8 sps:$4 sm:$0xff]  }
  0x4d   : > { %1012 = vmatprep.subr.bf16.mxu0 %v2209_v15  ;;  %1155 = vmatprep.subr.bf16.mxu1 %v2212_v16  ;;  %v2288_v15 = vld [vmem:[%s2937_s3 + $0x3e0] ss:$8 sps:$4 sm:$0xff]   ;;  %v2293_v16 = vld [vmem:[%s2937_s3 + $0x374] ss:$8 sps:$4 sm:$0xff]  }
  0x4e   : > { %1042 = vmatprep.mubr.bf16.mxu0 %v2361_v2  ;;  %1185 = vmatprep.mubr.bf16.mxu1 %v2361_v2 }
  0x50   : > { %1013 = vmatpush1.bf16.msra.mxu0 %v2207_v17  ;;  %1156 = vmatpush1.bf16.msra.mxu1 %v2210_v18  ;;  %v2296_v17 = vld [vmem:[%s2937_s3 + $0x3f4] ss:$8 sps:$4 sm:$0xff]   ;;  %v1356_v18 = vshrl.u32 %v2825_v8, 16 }
  0x51   : > { %1014 = vmatprep.subr.bf16.mxu0 %v2215_v19  ;;  %1157 = vmatprep.subr.bf16.mxu1 %v2218_v20  ;;  %v1360_v19 = vrot.slane %v1358_v13, 1  ;;  %v2291_v20 = vld [vmem:[%s2937_s3 + $0x370] ss:$8 sps:$4 sm:$0xff]  }
  0x54   : > { %1015 = vmatpush1.bf16.msra.mxu0 %v2213_v21  ;;  %1158 = vmatpush1.bf16.msra.mxu1 %v2216_v22  ;;  %v2294_v21 = vld [vmem:[%s2937_s3 + $0x3f0] ss:$8 sps:$4 sm:$0xff]   ;;  %v2299_v22 = vld [vmem:[%s2937_s3 + $0x404] ss:$8 sps:$4 sm:$0xff]  }
  0x55   : > { %1016 = vmatprep.subr.bf16.mxu0 %v2221_v23  ;;  %1159 = vmatprep.subr.bf16.mxu1 %v2224_v24  ;;  %v1361_v23 = vor.u32 %v1360_v19, %v1356_v18  ;;  %v2297_v24 = vld [vmem:[%s2937_s3 + $0x400] ss:$8 sps:$4 sm:$0xff]  }
  0x58   : > { %1017 = vmatpush1.bf16.msra.mxu0 %v2219_v25  ;;  %1160 = vmatpush1.bf16.msra.mxu1 %v2222_v26  ;;  %v2302_v25 = vld [vmem:[%s2937_s3 + $0x414] ss:$8 sps:$4 sm:$0xff]   ;;  %v2300_v26 = vld [vmem:[%s2937_s3 + $0x410] ss:$8 sps:$4 sm:$0xff]  }
  0x59   : > { %1018 = vmatprep.subr.bf16.mxu0 %v2227_v27  ;;  %1161 = vmatprep.subr.bf16.mxu1 %v2230_v28  ;;  %v2305_v27 = vld [vmem:[%s2937_s3 + $0x424] ss:$8 sps:$4 sm:$0xff]   ;;  %v2303_v28 = vld [vmem:[%s2937_s3 + $0x420] ss:$8 sps:$4 sm:$0xff]  }
  0x5c   : > { %1019 = vmatpush1.bf16.msra.mxu0 %v2225_v29  ;;  %1162 = vmatpush1.bf16.msra.mxu1 %v2228_v30  ;;  %v2308_v29 = vld [vmem:[%s2937_s3 + $0x434] ss:$8 sps:$4 sm:$0xff]   ;;  %v2311_v30 = vld [vmem:[%s2937_s3 + $0x444] ss:$8 sps:$4 sm:$0xff]  }
  0x5d   : > { %1020 = vmatprep.subr.bf16.mxu0 %v2233_v31  ;;  %1163 = vmatprep.subr.bf16.mxu1 %v2236_v32  ;;  %v2309_v31 = vld [vmem:[%s2937_s3 + $0x440] ss:$8 sps:$4 sm:$0xff]   ;;  %v2314_v32 = vld [vmem:[%s2937_s3 + $0x454] ss:$8 sps:$4 sm:$0xff]  }
  0x60   : > { %1021 = vmatpush1.bf16.msra.mxu0 %v2231_v33  ;;  %1164 = vmatpush1.bf16.msra.mxu1 %v2234_v34  ;;  %v2312_v33 = vld [vmem:[%s2937_s3 + $0x450] ss:$8 sps:$4 sm:$0xff]   ;;  %v2317_v34 = vld [vmem:[%s2937_s3 + $0x464] ss:$8 sps:$4 sm:$0xff]  }
  0x61   : > { %1022 = vmatprep.subr.bf16.mxu0 %v2239_v35  ;;  %1165 = vmatprep.subr.bf16.mxu1 %v2242_v36  ;;  %v2315_v35 = vld [vmem:[%s2937_s3 + $0x460] ss:$8 sps:$4 sm:$0xff]   ;;  %v2320_v36 = vld [vmem:[%s2937_s3 + $0x474] ss:$8 sps:$4 sm:$0xff]  }
  0x64   : > { %1023 = vmatpush1.bf16.msra.mxu0 %v2237_v37  ;;  %1166 = vmatpush1.bf16.msra.mxu1 %v2240_v39  ;;  %v2318_v37 = vld [vmem:[%s2937_s3 + $0x470] ss:$8 sps:$4 sm:$0xff]  }
  0x65   : > { %1024 = vmatprep.subr.bf16.mxu0 %v2245_v40  ;;  %1167 = vmatprep.subr.bf16.mxu1 %v2248_v41 }
  0x68   : > { %1025 = vmatpush1.bf16.msra.mxu0 %v2243_v42  ;;  %1168 = vmatpush1.bf16.msra.mxu1 %v2246_v45 }
  0x69   : > { %1295 = vmatprep.subr.bf16.mxu0 %v2251_v46  ;;  %1443 = vmatprep.subr.bf16.mxu1 %v2254_v47 }
  0x6b   : > { %1043 = vmatmul.mubr.bf16.vlgmr.msra.gmra.mrb[8].mxu0 %v928_v48  ;;  %1186 = vmatmul.mubr.bf16.vlgmr.msra.gmra.mrb[8].mxu1 %v1071_v49 }
  0x6c   : > { %1296 = vmatpush1.bf16.msra.mxu0 %v2249_v50  ;;  %1444 = vmatpush1.bf16.msra.mxu1 %v2252_v51 }
  0x6d   : > { %1297 = vmatprep.subr.bf16.mxu0 %v2257_v52  ;;  %1445 = vmatprep.subr.bf16.mxu1 %v2260_v53 }
  0x6e   : > { %1327 = vmatprep.mubr.bf16.mxu0 %v2361_v2  ;;  %1475 = vmatprep.mubr.bf16.mxu1 %v2361_v2 }
  0x70   : > { %1298 = vmatpush1.bf16.msra.mxu0 %v2255_v54  ;;  %1446 = vmatpush1.bf16.msra.mxu1 %v2258_v55 }
  0x71   : > { %1299 = vmatprep.subr.bf16.mxu0 %v2263_v56  ;;  %1447 = vmatprep.subr.bf16.mxu1 %v2266_v57 }
  0x74   : > { %1300 = vmatpush1.bf16.msra.mxu0 %v2261_v58  ;;  %1448 = vmatpush1.bf16.msra.mxu1 %v2264_v59 }
  0x75   : > { %1301 = vmatprep.subr.bf16.mxu0 %v2269_v60  ;;  %1449 = vmatprep.subr.bf16.mxu1 %v2272_v61 }
  0x78   : > { %1302 = vmatpush1.bf16.msra.mxu0 %v2267_v62  ;;  %1450 = vmatpush1.bf16.msra.mxu1 %v2270_v63 }
  0x79   : > { %1303 = vmatprep.subr.bf16.mxu0 %v2275_v0  ;;  %1451 = vmatprep.subr.bf16.mxu1 %v2278_v1 }
  0x7c   : > { %1304 = vmatpush1.bf16.msra.mxu0 %v2273_v3  ;;  %1452 = vmatpush1.bf16.msra.mxu1 %v2276_v4 }
  0x7d   : > { %1305 = vmatprep.subr.bf16.mxu0 %v2281_v6  ;;  %1453 = vmatprep.subr.bf16.mxu1 %v2284_v7 }
  0x80   : > { %1306 = vmatpush1.bf16.msra.mxu0 %v2279_v9  ;;  %1454 = vmatpush1.bf16.msra.mxu1 %v2282_v10 }
  0x81   : > { %1307 = vmatprep.subr.bf16.mxu0 %v2287_v11  ;;  %1455 = vmatprep.subr.bf16.mxu1 %v2290_v12 }
  0x84   : > { %1308 = vmatpush1.bf16.msra.mxu0 %v2285_v14  ;;  %1456 = vmatpush1.bf16.msra.mxu1 %v2288_v15 }
  0x85   : > { %1309 = vmatprep.subr.bf16.mxu0 %v2293_v16  ;;  %1457 = vmatprep.subr.bf16.mxu1 %v2296_v17 }
  0x88   : > { %1310 = vmatpush1.bf16.msra.mxu0 %v2291_v20  ;;  %1458 = vmatpush1.bf16.msra.mxu1 %v2294_v21 }
  0x89   : > { %1586 = vmatprep.subr.bf16.mxu0 %v2299_v22  ;;  %v1631_v22 = vlaneseq }
  0x8b   : > { %1328 = vmatmul.mubr.bf16.vlgmr.msra.gmra.mrb[12].mxu0 %v2825_v8  ;;  %1476 = vmatmul.mubr.bf16.vlgmr.msra.gmra.mrb[12].mxu1 %v1361_v23  ;;  %v1632_v23 = vshrl.u32 %v1631_v22, 7 }
  0x8c   : > { %1587 = vmatpush1.bf16.msra.mxu0 %v2297_v24  ;;  %1618 = vmatprep.mubr.bf16.mxu0 %v2361_v2  ;;  %v2306_v2 = vld [vmem:[%s2937_s3 + $0x430] ss:$8 sps:$4 sm:$0xff]  }
  0x8d   : > { %1588 = vmatprep.subr.bf16.mxu0 %v2302_v25  ;;  %v1633_v24 = vsub.s32 0, %v1632_v23  ;;  %v1629_v25 = vld [vmem:[%s2938_s4] sm:$0x3] }
  0x90   : > { %1589 = vmatpush1.bf16.msra.mxu0 %v2300_v26  ;;  %v1637_v26 = vsub.s32 1, %v1632_v23 }
  0x91   : > { %1590 = vmatprep.subr.bf16.mxu0 %v2305_v27  ;;  %v1634_v27 = vrot.slane %v1629_v25, %v1633_v24 }
  0x94   : > { %1591 = vmatpush1.bf16.msra.mxu0 %v2303_v28 }
  0x95   : > { %1592 = vmatprep.subr.bf16.mxu0 %v2308_v29  ;;  %v1638_v29 = vrot.slane %v1629_v25, %v1637_v26 }
  0x98   : > { %1593 = vmatpush1.bf16.msra.mxu0 %v2306_v2 }
  0x99   : > { %1594 = vmatprep.subr.bf16.mxu0 %v2311_v30 }
  0x9c   : > { %1595 = vmatpush1.bf16.msra.mxu0 %v2309_v31 }
  0x9d   : > { %1596 = vmatprep.subr.bf16.mxu0 %v2314_v32 }
  0xa0   : > { %1597 = vmatpush1.bf16.msra.mxu0 %v2312_v33 }
  0xa1   : > { %1598 = vmatprep.subr.bf16.mxu0 %v2317_v34 }
  0xa4   : > { %1599 = vmatpush1.bf16.msra.mxu0 %v2315_v35 }
  0xa5   : > { %1600 = vmatprep.subr.bf16.mxu0 %v2320_v36 }
  0xa8   : > { %1601 = vmatpush1.bf16.msra.mxu0 %v2318_v37 }
  0xab   : > { %1619 = vmatmul.mubr.bf16.vlgmr.msra.gmra.mrb[16].mxu0 %v1504_v38 }
  0xfe   : > { %v492_v39 = vpop.f32.mrb[0].mxu0  ;;  %v613_v40 = vpop.f32.mrb[0].mxu1 }
  0xff   : > { %v614_v41 = vadd.f32 %v613_v40, %v492_v39  ;;  %v494_v42 = vpop.f32.mrb[1].mxu0  ;;  %v615_v43 = vpop.f32.mrb[1].mxu1 }
 0x100   : > { %v616_v44 = vadd.f32 %v615_v43, %v494_v42  ;;  %v496_v45 = vpop.f32.mrb[2].mxu0  ;;  %v617_v46 = vpop.f32.mrb[2].mxu1 }
 0x101   : > { %v497_v47 = vpop.f32.mrb[3].mxu0  ;;  %v618_v48 = vpop.f32.mrb[3].mxu1 }
 0x11e   : > { %v754_v49 = vpop.f32.mrb[4].mxu0  ;;  %v896_v50 = vpop.f32.mrb[4].mxu1 }
 0x11f   : > { %v761_v51 = vadd.f32 %v754_v49, %v614_v41  ;;  %v756_v52 = vpop.f32.mrb[5].mxu0  ;;  %v898_v53 = vpop.f32.mrb[5].mxu1 }
 0x120   : > { %v762_v54 = vadd.f32 %v756_v52, %v616_v44  ;;  %v758_v55 = vpop.f32.mrb[6].mxu0  ;;  %v900_v56 = vpop.f32.mrb[6].mxu1 }
 0x121   : > { %v903_v57 = vadd.f32 %v896_v50, %v761_v51  ;;  %v759_v58 = vpop.f32.mrb[7].mxu0  ;;  %v901_v59 = vpop.f32.mrb[7].mxu1 }
 0x122   : > { %v904_v60 = vadd.f32 %v898_v53, %v762_v54 }
 0x13e   : > { %v1044_v61 = vpop.f32.mrb[8].mxu0  ;;  %v1187_v62 = vpop.f32.mrb[8].mxu1 }
 0x13f   : > { %v1051_v63 = vadd.f32 %v1044_v61, %v903_v57  ;;  %v1046_v0 = vpop.f32.mrb[9].mxu0  ;;  %v1189_v1 = vpop.f32.mrb[9].mxu1 }
 0x140   : > { %v1052_v3 = vadd.f32 %v1046_v0, %v904_v60  ;;  %v1048_v4 = vpop.f32.mrb[10].mxu0  ;;  %v1191_v5 = vpop.f32.mrb[10].mxu1 }
 0x141   : > { %v1194_v6 = vadd.f32 %v1187_v62, %v1051_v63  ;;  %v1049_v7 = vpop.f32.mrb[11].mxu0  ;;  %v1192_v8 = vpop.f32.mrb[11].mxu1 }
 0x142   : > { %v1195_v9 = vadd.f32 %v1189_v1, %v1052_v3 }
 0x15e   : > { %v1329_v10 = vpop.f32.mrb[12].mxu0  ;;  %v1477_v11 = vpop.f32.mrb[12].mxu1 }
 0x15f   : > { %v1336_v12 = vadd.f32 %v1329_v10, %v1194_v6  ;;  %v1331_v13 = vpop.f32.mrb[13].mxu0  ;;  %v1479_v14 = vpop.f32.mrb[13].mxu1 }
 0x160   : > { %v1337_v15 = vadd.f32 %v1331_v13, %v1195_v9  ;;  %v1333_v16 = vpop.f32.mrb[14].mxu0  ;;  %v1481_v17 = vpop.f32.mrb[14].mxu1 }
 0x161   : > { %v1484_v18 = vadd.f32 %v1477_v11, %v1336_v12  ;;  %v1334_v19 = vpop.f32.mrb[15].mxu0  ;;  %v1482_v20 = vpop.f32.mrb[15].mxu1 }
 0x162   : > { %v1485_v21 = vadd.f32 %v1479_v14, %v1337_v15 }
 0x17e   : > { %v1620_v28 = vpop.f32.mrb[16].mxu0 }
 0x17f   : > { %v1627_v2 = vadd.f32 %v1620_v28, %v1484_v18  ;;  %v1622_v30 = vpop.f32.mrb[17].mxu0 }
 0x180   : > { %v1628_v31 = vadd.f32 %v1622_v30, %v1485_v21  ;;  %v1624_v32 = vpop.f32.mrb[18].mxu0 }
 0x181   : > { %v1641_v33 = vadd.f32 %v1634_v27, %v1627_v2  ;;  %v1625_v34 = vpop.f32.mrb[19].mxu0 }
 0x182   : > { %v1642_v35 = vadd.f32 %v1638_v29, %v1628_v31 }
 0x183   : > { %v1643_v36 = vmax.f32 %v1641_v33, 0.0 }
 0x184   : > { %v1644_v37 = vmax.f32 %v1642_v35, 0.0 }
 0x186   : > { %v1647_v38 = vcombine.low %v1643_v36, %v1644_v37 }
 0x188   : > { %1649 = vst [vmem:[%s333_s30] sm:$0xff] %v1647_v38 }
 0x189 PF: > { %s15_s22 = sadd.s32 1, %s2359_s22   ;;  %s2940_s18 = smov %s2351_s20 }
 0x18a   : > { %p12_p10 = scmp.ge.s32.totalorder %s15_s22, 10   ;;  %s2941_s19 = smov %s2355_s21 }
 0x18b   : > { %s2942_s20 = smov %s2945_s23  ;;  %s2943_s21 = smov %s2949_s24 }
 0x18c   :  { %14 = sbr.rel (!%p12_p10) target bundleno = 3 (0x3), region = 84 }

// kernel: sft_net_forward.25
= control target key start
LH: loop header
LB: loop body
LE: loop exit
PB: predicated region body
PF: predicated region fallthrough
CT: control target
= control target key end

     0   :  { %s2416_s18 = smov 0   ;;  %s2418_s19 = smov 0   ;;  %s2954_s0 = inlined_call_operand.vmem [shape: f32[2,10,10,128], index: 0, kind: input, shape index: {}, may-alias: {0,1,2}]   ;;  %s2955_s1 = inlined_call_operand.vmem [shape: f32[2,10,10,128], index: 1, kind: input, shape index: {}, may-alias: {0,1,2}]   ;;  %s2956_s2 = inlined_call_operand.vmem [shape: f32[2,10,10,128], index: 2, kind: input, shape index: {}, may-alias: {0,1,2}]   ;;  %s2957_s3 = inlined_call_operand.vmem [shape: bf16[9,128,256], index: 3, kind: input, shape index: {}]   ;;  %s2958_s4 = inlined_call_operand.vmem [shape: f32[1,256], index: 4, kind: input, shape index: {}]   ;;  %s2959_s5 = inlined_call_operand.vmem [shape: f32[2,8,8,256], index: 5, kind: output, shape index: {}]  }
   0x1   :  { %s2420_s20 = smov 0   ;;  %s2422_s21 = smov 0  }
   0x2   :  { %s2424_s22 = smov 0  }
   0x3 LB: > { %s24_s23 = sadd.s32 1, %s2375_s20  ;;  %s27_s24 = sadd.s32 1, %s2379_s21  ;;  %s2383_s22 = sphi %s2424_s22, %s15_s22   ;;  %s2379_s21 = sphi %s2422_s21, %s2963_s21   ;;  %s2375_s20 = sphi %s2420_s20, %s2962_s20   ;;  %s2371_s19 = sphi %s2418_s19, %s2961_s19   ;;  %s2367_s18 = sphi %s2416_s18, %s2960_s18  }
   0x4   : > { %p25_p0 = scmp.ge.s32.totalorder %s24_s23, 8  ;;  %p1803_p1 = scmp.ge.s32.totalorder %s2383_s22, 1 }
   0x5   : > { %p247_p2 = scmp.lt.s32.totalorder %s2383_s22, 17 }
   0x6   : > { %s2965_s23 = smov (%p25_p0, %s24_s23), 0  ;;  %s2967_s24 = smov (!%p25_p0, %s27_s24), %s2379_s21 }
   0x7   : > { %p248_p3 = pnand %p1803_p1, %p247_p2  ;;  %p29_p4 = scmp.ge.s32.totalorder %s2967_s24, 2 }
   0x8   : > { %v2129_v0 = vld [vmem:[%s2957_s3 + $0x84] ss:$8 sps:$4 sm:$0xff] (!%p248_p3)   ;;  %p303_p5 = scmp.lt.s32.totalorder (!%p248_p3), %s2371_s19, 1  ;;  %v2385_v2 = vmov (!%p248_p3), 0   ;;  %p305_p6 = scmp.lt.s32.totalorder (!%p248_p3), %s2367_s18, 9 }
   0x9   : > { %s2969_s24 = smov (%p29_p4, %s2967_s24), 0  ;;  %251 = sbr.rel (%p248_p3) target bundleno = 391 (0x187), region = 40 }
   0xa   : > { %v2131_v1 = vld [vmem:[%s2957_s3 + $0x4] ss:$8 sps:$4 sm:$0xff] (!%p248_p3)   ;;  %501 = vmatprep.mubr.bf16.mxu0 (!%p248_p3), %v2385_v2  ;;  %622 = vmatprep.mubr.bf16.mxu1 (!%p248_p3), %v2385_v2  ;;  %v2133_v3 = vld [vmem:[%s2957_s3 + $0x80] ss:$8 sps:$4 sm:$0xff] (!%p248_p3)   ;;  %v2135_v5 = vld [vmem:[%s2957_s3 + $0x94] ss:$8 sps:$4 sm:$0xff] (!%p248_p3)  }
   0xb   : > { %469 = vmatprep.subr.bf16.mxu0 (!%p248_p3), %v2129_v0  ;;  %v2134_v4 = vld [vmem:[%s2957_s3] ss:$8 sps:$4 sm:$0xff] (!%p248_p3)   ;;  %590 = vmatprep.subr.bf16.mxu1 (!%p248_p3), %v2131_v1  ;;  %v2137_v6 = vld [vmem:[%s2957_s3 + $0x14] ss:$8 sps:$4 sm:$0xff] (!%p248_p3)   ;;  %v2139_v7 = vld [vmem:[%s2957_s3 + $0x90] ss:$8 sps:$4 sm:$0xff] (!%p248_p3)  }
   0xc   : > { %470 = vmatpush1.bf16.msra.mxu0 (!%p248_p3), %v2133_v3  ;;  %591 = vmatpush1.bf16.msra.mxu1 (!%p248_p3), %v2134_v4  ;;  %v2140_v8 = vld [vmem:[%s2957_s3 + $0x10] ss:$8 sps:$4 sm:$0xff] (!%p248_p3)   ;;  %v2141_v9 = vld [vmem:[%s2957_s3 + $0xa4] ss:$8 sps:$4 sm:$0xff] (!%p248_p3)   ;;  %v2145_v11 = vld [vmem:[%s2957_s3 + $0xa0] ss:$8 sps:$4 sm:$0xff] (!%p248_p3)  }
   0xd   : > { %471 = vmatprep.subr.bf16.mxu0 (!%p248_p3), %v2135_v5  ;;  %592 = vmatprep.subr.bf16.mxu1 (!%p248_p3), %v2137_v6  ;;  %v2143_v10 = vld [vmem:[%s2957_s3 + $0x24] ss:$8 sps:$4 sm:$0xff] (!%p248_p3)   ;;  %v2146_v12 = vld [vmem:[%s2957_s3 + $0x20] ss:$8 sps:$4 sm:$0xff] (!%p248_p3)   ;;  %v2147_v13 = vld [vmem:[%s2957_s3 + $0xb4] ss:$8 sps:$4 sm:$0xff] (!%p248_p3)  }
   0xe   : > { %v2149_v14 = vld [vmem:[%s2957_s3 + $0x34] ss:$8 sps:$4 sm:$0xff] (!%p248_p3)   ;;  %v2151_v15 = vld [vmem:[%s2957_s3 + $0xb0] ss:$8 sps:$4 sm:$0xff] (!%p248_p3)   ;;  %v2153_v17 = vld [vmem:[%s2957_s3 + $0xc4] ss:$8 sps:$4 sm:$0xff] (!%p248_p3)  }
   0xf   : > { %v2152_v16 = vld [vmem:[%s2957_s3 + $0x30] ss:$8 sps:$4 sm:$0xff] (!%p248_p3)   ;;  %v2155_v18 = vld [vmem:[%s2957_s3 + $0x44] ss:$8 sps:$4 sm:$0xff] (!%p248_p3)   ;;  %v2157_v19 = vld [vmem:[%s2957_s3 + $0xc0] ss:$8 sps:$4 sm:$0xff] (!%p248_p3)  }
  0x10   : > { %s2971_s19 = smov (!%p303_p5, %s2371_s19), 1  ;;  %472 = vmatpush1.bf16.msra.mxu0 %v2139_v7  ;;  %593 = vmatpush1.bf16.msra.mxu1 %v2140_v8  ;;  %v2158_v20 = vld [vmem:[%s2957_s3 + $0x40] ss:$8 sps:$4 sm:$0xff]   ;;  %v2159_v21 = vld [vmem:[%s2957_s3 + $0xd4] ss:$8 sps:$4 sm:$0xff]   ;;  %s312_s30 = sadd.s32 1, %s2367_s18 }
  0x11   : > { %s306_s16 = scalar_select %p305_p6, %s2367_s18, 9  ;;  %473 = vmatprep.subr.bf16.mxu0 %v2141_v9  ;;  %594 = vmatprep.subr.bf16.mxu1 %v2143_v10  ;;  %v2161_v22 = vld [vmem:[%s2957_s3 + $0x54] ss:$8 sps:$4 sm:$0xff]   ;;  %v2163_v23 = vld [vmem:[%s2957_s3 + $0xd0] ss:$8 sps:$4 sm:$0xff]  }
  0x12   : > { %s2500_s9 = smul.u32 20, %s2971_s19  ;;  %v2164_v24 = vld [vmem:[%s2957_s3 + $0x50] ss:$8 sps:$4 sm:$0xff]   ;;  %v2165_v25 = vld [vmem:[%s2957_s3 + $0xe4] ss:$8 sps:$4 sm:$0xff]   ;;  %p315_p7 = scmp.lt.s32.totalorder %s312_s30, 9 }
  0x13   : > { %s1804_s12 = sshll.u32 %s306_s16, 1  ;;  %v2167_v26 = vld [vmem:[%s2957_s3 + $0x64] ss:$8 sps:$4 sm:$0xff]   ;;  %v2169_v30 = vld [vmem:[%s2957_s3 + $0xe0] ss:$8 sps:$4 sm:$0xff]   ;;  %p336_p9 = scmp.lt.s32.totalorder %s2367_s18, 7 }
  0x14   : > { %474 = vmatpush1.bf16.msra.mxu0 %v2145_v11  ;;  %595 = vmatpush1.bf16.msra.mxu1 %v2146_v12  ;;  %s309_s27 = sadd.s32 %s2500_s9, %s1804_s12  ;;  %v2170_v31 = vld [vmem:[%s2957_s3 + $0x60] ss:$8 sps:$4 sm:$0xff]   ;;  %v2171_v32 = vld [vmem:[%s2957_s3 + $0xf4] ss:$8 sps:$4 sm:$0xff]   ;;  %v2175_v35 = vld [vmem:[%s2957_s3 + $0xf0] ss:$8 sps:$4 sm:$0xff]  }
  0x15   : > { %475 = vmatprep.subr.bf16.mxu0 %v2147_v13  ;;  %596 = vmatprep.subr.bf16.mxu1 %v2149_v14  ;;  %s1805_s8 = sshll.u32 %s309_s27, 3  ;;  %v2173_v34 = vld [vmem:[%s2957_s3 + $0x74] ss:$8 sps:$4 sm:$0xff]   ;;  %v2176_v38 = vld [vmem:[%s2957_s3 + $0x70] ss:$8 sps:$4 sm:$0xff]   ;;  %s2973_s30 = smov (!%p315_p7, %s312_s30), 9 }
  0x16   : > { %s311_s17 = scalar_lea.vmem %s2954_s0, %s1805_s8  ;;  %v2179_v39 = vld [vmem:[%s2957_s3 + $0x104] ss:$8 sps:$4 sm:$0xff]   ;;  %v2177_v43 = vld [vmem:[%s2957_s3 + $0x100] ss:$8 sps:$4 sm:$0xff]   ;;  %v2185_v45 = vld [vmem:[%s2957_s3 + $0x114] ss:$8 sps:$4 sm:$0xff]  }
  0x17   : > { %v344_v27 = vld [vmem:[%s311_s17] sm:$0xff]  ;;  %v345_v28 = vld [vmem:[%s311_s17 + $0x8] sm:$0x3]  ;;  %v2188_v46 = vld [vmem:[%s2957_s3 + $0x194] ss:$8 sps:$4 sm:$0xff]   ;;  %s1806_s11 = sshll.u32 %s2973_s30, 1 }
  0x18   : > { %476 = vmatpush1.bf16.msra.mxu0 %v2151_v15  ;;  %597 = vmatpush1.bf16.msra.mxu1 %v2152_v16  ;;  %v2545_v29 = vpack.c.bf16 %v345_v28, %v344_v27  ;;  %v2182_v40 = vld [vmem:[%s2957_s3 + $0x184] ss:$8 sps:$4 sm:$0xff]   ;;  %v346_v42 = vpack.c.bf16 %v344_v27, %v344_v27  ;;  %v2180_v44 = vld [vmem:[%s2957_s3 + $0x180] ss:$8 sps:$4 sm:$0xff]   ;;  %v2183_v47 = vld [vmem:[%s2957_s3 + $0x110] ss:$8 sps:$4 sm:$0xff]   ;;  %s319_s26 = sadd.s32 %s2500_s9, %s1806_s11 }
  0x19   : > { %477 = vmatprep.subr.bf16.mxu0 %v2153_v17  ;;  %598 = vmatprep.subr.bf16.mxu1 %v2155_v18  ;;  %v2186_v48 = vld [vmem:[%s2957_s3 + $0x190] ss:$8 sps:$4 sm:$0xff]   ;;  %v2191_v49 = vld [vmem:[%s2957_s3 + $0x124] ss:$8 sps:$4 sm:$0xff]   ;;  %v2189_v51 = vld [vmem:[%s2957_s3 + $0x120] ss:$8 sps:$4 sm:$0xff]  }
  0x1a   : > { %v384_v33 = vshll.u32 %v2545_v29, 16  ;;  %v382_v36 = vshrl.u32 %v2545_v29, 16  ;;  %v2194_v50 = vld [vmem:[%s2957_s3 + $0x1a4] ss:$8 sps:$4 sm:$0xff]   ;;  %v2192_v52 = vld [vmem:[%s2957_s3 + $0x1a0] ss:$8 sps:$4 sm:$0xff]  }
  0x1b   : > { %v2197_v53 = vld [vmem:[%s2957_s3 + $0x134] ss:$8 sps:$4 sm:$0xff]   ;;  %v2195_v55 = vld [vmem:[%s2957_s3 + $0x130] ss:$8 sps:$4 sm:$0xff]   ;;  %v2203_v57 = vld [vmem:[%s2957_s3 + $0x144] ss:$8 sps:$4 sm:$0xff]  }
  0x1c   : > { %478 = vmatpush1.bf16.msra.mxu0 %v2157_v19  ;;  %599 = vmatpush1.bf16.msra.mxu1 %v2158_v20  ;;  %v386_v37 = vrot.slane %v384_v33, 1  ;;  %v2200_v54 = vld [vmem:[%s2957_s3 + $0x1b4] ss:$8 sps:$4 sm:$0xff]   ;;  %v2198_v56 = vld [vmem:[%s2957_s3 + $0x1b0] ss:$8 sps:$4 sm:$0xff]   ;;  %s1807_s7 = sshll.u32 %s319_s26, 3 }
  0x1d   : > { %479 = vmatprep.subr.bf16.mxu0 %v2159_v21  ;;  %600 = vmatprep.subr.bf16.mxu1 %v2161_v22  ;;  %v2206_v58 = vld [vmem:[%s2957_s3 + $0x1c4] ss:$8 sps:$4 sm:$0xff]   ;;  %v2201_v59 = vld [vmem:[%s2957_s3 + $0x140] ss:$8 sps:$4 sm:$0xff]   ;;  %v2209_v61 = vld [vmem:[%s2957_s3 + $0x154] ss:$8 sps:$4 sm:$0xff]   ;;  %s2664_s27 = scalar_lea.vmem %s2955_s1, %s1807_s7 }
  0x1e   : > { %v387_v41 = vor.u32 %v386_v37, %v382_v36  ;;  %v2204_v60 = vld [vmem:[%s2957_s3 + $0x1c0] ss:$8 sps:$4 sm:$0xff]   ;;  %v2212_v62 = vld [vmem:[%s2957_s3 + $0x1d4] ss:$8 sps:$4 sm:$0xff]   ;;  %v2207_v63 = vld [vmem:[%s2957_s3 + $0x150] ss:$8 sps:$4 sm:$0xff]  }
  0x1f   : > { %v2210_v0 = vld [vmem:[%s2957_s3 + $0x1d0] ss:$8 sps:$4 sm:$0xff]   ;;  %v2215_v1 = vld [vmem:[%s2957_s3 + $0x164] ss:$8 sps:$4 sm:$0xff]   ;;  %v2213_v4 = vld [vmem:[%s2957_s3 + $0x160] ss:$8 sps:$4 sm:$0xff]  }
  0x20   : > { %480 = vmatpush1.bf16.msra.mxu0 %v2163_v23  ;;  %601 = vmatpush1.bf16.msra.mxu1 %v2164_v24  ;;  %v2218_v3 = vld [vmem:[%s2957_s3 + $0x1e4] ss:$8 sps:$4 sm:$0xff]   ;;  %v2216_v5 = vld [vmem:[%s2957_s3 + $0x1e0] ss:$8 sps:$4 sm:$0xff]   ;;  %v2221_v6 = vld [vmem:[%s2957_s3 + $0x174] ss:$8 sps:$4 sm:$0xff]  }
  0x21   : > { %481 = vmatprep.subr.bf16.mxu0 %v2165_v25  ;;  %602 = vmatprep.subr.bf16.mxu1 %v2167_v26  ;;  %v2224_v7 = vld [vmem:[%s2957_s3 + $0x1f4] ss:$8 sps:$4 sm:$0xff]   ;;  %v2219_v8 = vld [vmem:[%s2957_s3 + $0x170] ss:$8 sps:$4 sm:$0xff]   ;;  %v774_v10 = vld [vmem:[%s2664_s27] sm:$0xff]  ;;  %v649_v13 = vrot.slane %v2545_v29, 1 }
  0x22   : > { %v2222_v9 = vld [vmem:[%s2957_s3 + $0x1f0] ss:$8 sps:$4 sm:$0xff]   ;;  %v2227_v11 = vld [vmem:[%s2957_s3 + $0x204] ss:$8 sps:$4 sm:$0xff]   ;;  %v2225_v14 = vld [vmem:[%s2957_s3 + $0x200] ss:$8 sps:$4 sm:$0xff]   ;;  %v776_v15 = vpack.c.bf16 %v774_v10, %v774_v10 }
  0x23   : > { %v2230_v12 = vld [vmem:[%s2957_s3 + $0x284] ss:$8 sps:$4 sm:$0xff]   ;;  %v2228_v16 = vld [vmem:[%s2957_s3 + $0x280] ss:$8 sps:$4 sm:$0xff]   ;;  %v2233_v17 = vld [vmem:[%s2957_s3 + $0x214] ss:$8 sps:$4 sm:$0xff]  }
  0x24   : > { %482 = vmatpush1.bf16.msra.mxu0 %v2169_v30  ;;  %603 = vmatpush1.bf16.msra.mxu1 %v2170_v31  ;;  %v2236_v18 = vld [vmem:[%s2957_s3 + $0x294] ss:$8 sps:$4 sm:$0xff]   ;;  %v2231_v19 = vld [vmem:[%s2957_s3 + $0x210] ss:$8 sps:$4 sm:$0xff]   ;;  %v2239_v21 = vld [vmem:[%s2957_s3 + $0x224] ss:$8 sps:$4 sm:$0xff]  }
  0x25   : > { %483 = vmatprep.subr.bf16.mxu0 %v2171_v32  ;;  %604 = vmatprep.subr.bf16.mxu1 %v2173_v34  ;;  %v2234_v20 = vld [vmem:[%s2957_s3 + $0x290] ss:$8 sps:$4 sm:$0xff]   ;;  %v2242_v22 = vld [vmem:[%s2957_s3 + $0x2a4] ss:$8 sps:$4 sm:$0xff]   ;;  %v2237_v23 = vld [vmem:[%s2957_s3 + $0x220] ss:$8 sps:$4 sm:$0xff]  }
  0x26   : > { %v2240_v24 = vld [vmem:[%s2957_s3 + $0x2a0] ss:$8 sps:$4 sm:$0xff]   ;;  %v2245_v25 = vld [vmem:[%s2957_s3 + $0x234] ss:$8 sps:$4 sm:$0xff]   ;;  %v2243_v27 = vld [vmem:[%s2957_s3 + $0x230] ss:$8 sps:$4 sm:$0xff]  }
  0x27   : > { %v2248_v26 = vld [vmem:[%s2957_s3 + $0x2b4] ss:$8 sps:$4 sm:$0xff]   ;;  %v2246_v28 = vld [vmem:[%s2957_s3 + $0x2b0] ss:$8 sps:$4 sm:$0xff]   ;;  %v2251_v29 = vld [vmem:[%s2957_s3 + $0x244] ss:$8 sps:$4 sm:$0xff]  }
  0x28   : > { %484 = vmatpush1.bf16.msra.mxu0 %v2175_v35  ;;  %605 = vmatpush1.bf16.msra.mxu1 %v2176_v38  ;;  %v2254_v30 = vld [vmem:[%s2957_s3 + $0x2c4] ss:$8 sps:$4 sm:$0xff]   ;;  %v775_v31 = vld [vmem:[%s2664_s27 + $0x8] sm:$0x3]  ;;  %v2257_v34 = vld [vmem:[%s2957_s3 + $0x254] ss:$8 sps:$4 sm:$0xff]  }
  0x29   : > { %731 = vmatprep.subr.bf16.mxu0 %v2179_v39  ;;  %874 = vmatprep.subr.bf16.mxu1 %v2182_v40  ;;  %v2249_v32 = vld [vmem:[%s2957_s3 + $0x240] ss:$8 sps:$4 sm:$0xff]   ;;  %v2260_v35 = vld [vmem:[%s2957_s3 + $0x2d4] ss:$8 sps:$4 sm:$0xff]   ;;  %v917_v36 = vpack.c.bf16 %v775_v31, %v774_v10  ;;  %v2255_v37 = vld [vmem:[%s2957_s3 + $0x250] ss:$8 sps:$4 sm:$0xff]  }
  0x2a   : > { %v2252_v33 = vld [vmem:[%s2957_s3 + $0x2c0] ss:$8 sps:$4 sm:$0xff]   ;;  %v2258_v38 = vld [vmem:[%s2957_s3 + $0x2d0] ss:$8 sps:$4 sm:$0xff]   ;;  %v2263_v39 = vld [vmem:[%s2957_s3 + $0x264] ss:$8 sps:$4 sm:$0xff]  }
  0x2b   : > { %502 = vmatmul.mubr.bf16.vlgmr.msra.gmra.mrb[0].mxu0 %v387_v41  ;;  %623 = vmatmul.mubr.bf16.vlgmr.msra.gmra.mrb[0].mxu1 %v346_v42  ;;  %v2266_v40 = vld [vmem:[%s2957_s3 + $0x2e4] ss:$8 sps:$4 sm:$0xff]   ;;  %v2261_v41 = vld [vmem:[%s2957_s3 + $0x260] ss:$8 sps:$4 sm:$0xff]   ;;  %v938_v42 = vshll.u32 %v917_v36, 16  ;;  %s323_s26 = sadd.s32 2, %s2367_s18 }
  0x2c   : > { %732 = vmatpush1.bf16.msra.mxu0 %v2177_v43  ;;  %875 = vmatpush1.bf16.msra.mxu1 %v2180_v44  ;;  %v2264_v43 = vld [vmem:[%s2957_s3 + $0x2e0] ss:$8 sps:$4 sm:$0xff]   ;;  %v2269_v44 = vld [vmem:[%s2957_s3 + $0x274] ss:$8 sps:$4 sm:$0xff]   ;;  %p326_p8 = scmp.lt.s32.totalorder %s323_s26, 9  ;;  %s2977_s18 = smov (!%p336_p9, %s2367_s18), 7 }
  0x2d   : > { %733 = vmatprep.subr.bf16.mxu0 %v2185_v45  ;;  %876 = vmatprep.subr.bf16.mxu1 %v2188_v46  ;;  %v2272_v45 = vld [vmem:[%s2957_s3 + $0x2f4] ss:$8 sps:$4 sm:$0xff]   ;;  %v2267_v46 = vld [vmem:[%s2957_s3 + $0x270] ss:$8 sps:$4 sm:$0xff]   ;;  %s1810_s28 = sshll.u32 %s2977_s18, 1 }
  0x2e   : > { %763 = vmatprep.mubr.bf16.mxu0 %v2385_v2  ;;  %906 = vmatprep.mubr.bf16.mxu1 %v2385_v2  ;;  %s2975_s26 = smov (!%p326_p8, %s323_s26), 9  ;;  %v2326_v31 = vld [vmem:[%s2957_s3 + $0x414] ss:$8 sps:$4 sm:$0xff]  }
  0x2f   : > { %s1808_s16 = sshll.u32 %s2975_s26, 1 }
  0x30   : > { %734 = vmatpush1.bf16.msra.mxu0 %v2183_v47  ;;  %877 = vmatpush1.bf16.msra.mxu1 %v2186_v48  ;;  %v936_v47 = vshrl.u32 %v917_v36, 16  ;;  %v940_v48 = vrot.slane %v938_v42, 1  ;;  %s330_s11 = sadd.s32 %s2500_s9, %s1808_s16  ;;  %v2344_v42 = vld [vmem:[%s2957_s3 + $0x474] ss:$8 sps:$4 sm:$0xff]  }
  0x31   : > { %735 = vmatprep.subr.bf16.mxu0 %v2191_v49  ;;  %878 = vmatprep.subr.bf16.mxu1 %v2194_v50  ;;  %v2270_v49 = vld [vmem:[%s2957_s3 + $0x2f0] ss:$8 sps:$4 sm:$0xff]   ;;  %v2275_v50 = vld [vmem:[%s2957_s3 + $0x304] ss:$8 sps:$4 sm:$0xff]   ;;  %s1809_s9 = sshll.u32 %s330_s11, 3 }
  0x32   : > { %s332_s13 = scalar_lea.vmem %s2956_s2, %s1809_s9  ;;  %s1811_s9 = sshll.u32 %s2971_s19, 4 }
  0x33   : > { %v1210_v10 = vld [vmem:[%s332_s13 + $0x8] sm:$0x3]  ;;  %s340_s16 = sadd.s32 %s1811_s9, %s1810_s28 }
  0x34   : > { %736 = vmatpush1.bf16.msra.mxu0 %v2189_v51  ;;  %879 = vmatpush1.bf16.msra.mxu1 %v2192_v52  ;;  %v2278_v51 = vld [vmem:[%s2957_s3 + $0x384] ss:$8 sps:$4 sm:$0xff]   ;;  %v941_v52 = vor.u32 %v940_v48, %v936_v47  ;;  %s1812_s6 = sshll.u32 %s340_s16, 3 }
  0x35   : > { %737 = vmatprep.subr.bf16.mxu0 %v2197_v53  ;;  %880 = vmatprep.subr.bf16.mxu1 %v2200_v54  ;;  %v2273_v53 = vld [vmem:[%s2957_s3 + $0x300] ss:$8 sps:$4 sm:$0xff]   ;;  %v1084_v54 = vrot.slane %v917_v36, 1  ;;  %v2335_v36 = vld [vmem:[%s2957_s3 + $0x444] ss:$8 sps:$4 sm:$0xff]   ;;  %s342_s19 = scalar_lea.vmem %s2959_s5, %s1812_s6 }
  0x38   : > { %738 = vmatpush1.bf16.msra.mxu0 %v2195_v55  ;;  %881 = vmatpush1.bf16.msra.mxu1 %v2198_v56  ;;  %v2276_v55 = vld [vmem:[%s2957_s3 + $0x380] ss:$8 sps:$4 sm:$0xff]   ;;  %v2281_v56 = vld [vmem:[%s2957_s3 + $0x314] ss:$8 sps:$4 sm:$0xff]  }
  0x39   : > { %739 = vmatprep.subr.bf16.mxu0 %v2203_v57  ;;  %882 = vmatprep.subr.bf16.mxu1 %v2206_v58  ;;  %v2284_v57 = vld [vmem:[%s2957_s3 + $0x394] ss:$8 sps:$4 sm:$0xff]   ;;  %v2279_v58 = vld [vmem:[%s2957_s3 + $0x310] ss:$8 sps:$4 sm:$0xff]  }
  0x3c   : > { %740 = vmatpush1.bf16.msra.mxu0 %v2201_v59  ;;  %883 = vmatpush1.bf16.msra.mxu1 %v2204_v60  ;;  %v2282_v59 = vld [vmem:[%s2957_s3 + $0x390] ss:$8 sps:$4 sm:$0xff]   ;;  %v2287_v60 = vld [vmem:[%s2957_s3 + $0x324] ss:$8 sps:$4 sm:$0xff]  }
  0x3d   : > { %741 = vmatprep.subr.bf16.mxu0 %v2209_v61  ;;  %884 = vmatprep.subr.bf16.mxu1 %v2212_v62  ;;  %v2290_v61 = vld [vmem:[%s2957_s3 + $0x3a4] ss:$8 sps:$4 sm:$0xff]   ;;  %v2285_v62 = vld [vmem:[%s2957_s3 + $0x320] ss:$8 sps:$4 sm:$0xff]  }
  0x40   : > { %742 = vmatpush1.bf16.msra.mxu0 %v2207_v63  ;;  %885 = vmatpush1.bf16.msra.mxu1 %v2210_v0  ;;  %v2288_v63 = vld [vmem:[%s2957_s3 + $0x3a0] ss:$8 sps:$4 sm:$0xff]   ;;  %v2293_v0 = vld [vmem:[%s2957_s3 + $0x334] ss:$8 sps:$4 sm:$0xff]  }
  0x41   : > { %743 = vmatprep.subr.bf16.mxu0 %v2215_v1  ;;  %886 = vmatprep.subr.bf16.mxu1 %v2218_v3  ;;  %v2296_v1 = vld [vmem:[%s2957_s3 + $0x3b4] ss:$8 sps:$4 sm:$0xff]   ;;  %v2291_v3 = vld [vmem:[%s2957_s3 + $0x330] ss:$8 sps:$4 sm:$0xff]  }
  0x44   : > { %744 = vmatpush1.bf16.msra.mxu0 %v2213_v4  ;;  %887 = vmatpush1.bf16.msra.mxu1 %v2216_v5  ;;  %v2294_v4 = vld [vmem:[%s2957_s3 + $0x3b0] ss:$8 sps:$4 sm:$0xff]   ;;  %v2299_v5 = vld [vmem:[%s2957_s3 + $0x344] ss:$8 sps:$4 sm:$0xff]  }
  0x45   : > { %745 = vmatprep.subr.bf16.mxu0 %v2221_v6  ;;  %888 = vmatprep.subr.bf16.mxu1 %v2224_v7  ;;  %v2302_v6 = vld [vmem:[%s2957_s3 + $0x3c4] ss:$8 sps:$4 sm:$0xff]   ;;  %v2297_v7 = vld [vmem:[%s2957_s3 + $0x340] ss:$8 sps:$4 sm:$0xff]  }
  0x48   : > { %746 = vmatpush1.bf16.msra.mxu0 %v2219_v8  ;;  %889 = vmatpush1.bf16.msra.mxu1 %v2222_v9  ;;  %v2300_v8 = vld [vmem:[%s2957_s3 + $0x3c0] ss:$8 sps:$4 sm:$0xff]  }
  0x49   : > { %1023 = vmatprep.subr.bf16.mxu0 %v2227_v11  ;;  %1166 = vmatprep.subr.bf16.mxu1 %v2230_v12  ;;  %v1209_v9 = vld [vmem:[%s332_s13] sm:$0xff]  ;;  %v2305_v11 = vld [vmem:[%s2957_s3 + $0x354] ss:$8 sps:$4 sm:$0xff]  }
  0x4a   : > { %v2308_v12 = vld [vmem:[%s2957_s3 + $0x3d4] ss:$8 sps:$4 sm:$0xff]  }
  0x4b   : > { %764 = vmatmul.mubr.bf16.vlgmr.msra.gmra.mrb[4].mxu0 %v649_v13  ;;  %907 = vmatmul.mubr.bf16.vlgmr.msra.gmra.mrb[4].mxu1 %v776_v15  ;;  %v2846_v13 = vpack.c.bf16 %v1210_v10, %v1209_v9  ;;  %v2306_v15 = vld [vmem:[%s2957_s3 + $0x3d0] ss:$8 sps:$4 sm:$0xff]  }
  0x4c   : > { %1024 = vmatpush1.bf16.msra.mxu0 %v2225_v14  ;;  %1167 = vmatpush1.bf16.msra.mxu1 %v2228_v16  ;;  %v2303_v14 = vld [vmem:[%s2957_s3 + $0x350] ss:$8 sps:$4 sm:$0xff]   ;;  %v2311_v16 = vld [vmem:[%s2957_s3 + $0x364] ss:$8 sps:$4 sm:$0xff]  }
  0x4d   : > { %1025 = vmatprep.subr.bf16.mxu0 %v2233_v17  ;;  %1168 = vmatprep.subr.bf16.mxu1 %v2236_v18  ;;  %v2314_v17 = vld [vmem:[%s2957_s3 + $0x3e4] ss:$8 sps:$4 sm:$0xff]   ;;  %v1373_v18 = vshll.u32 %v2846_v13, 16 }
  0x4e   : > { %1055 = vmatprep.mubr.bf16.mxu0 %v2385_v2  ;;  %1198 = vmatprep.mubr.bf16.mxu1 %v2385_v2 }
  0x50   : > { %1026 = vmatpush1.bf16.msra.mxu0 %v2231_v19  ;;  %1169 = vmatpush1.bf16.msra.mxu1 %v2234_v20  ;;  %v2309_v19 = vld [vmem:[%s2957_s3 + $0x360] ss:$8 sps:$4 sm:$0xff]  }
  0x51   : > { %1027 = vmatprep.subr.bf16.mxu0 %v2239_v21  ;;  %1170 = vmatprep.subr.bf16.mxu1 %v2242_v22  ;;  %v2312_v20 = vld [vmem:[%s2957_s3 + $0x3e0] ss:$8 sps:$4 sm:$0xff]   ;;  %v2317_v21 = vld [vmem:[%s2957_s3 + $0x374] ss:$8 sps:$4 sm:$0xff]  }
  0x52   : > { %v2320_v22 = vld [vmem:[%s2957_s3 + $0x3f4] ss:$8 sps:$4 sm:$0xff]  }
  0x54   : > { %1028 = vmatpush1.bf16.msra.mxu0 %v2237_v23  ;;  %1171 = vmatpush1.bf16.msra.mxu1 %v2240_v24  ;;  %v1371_v23 = vshrl.u32 %v2846_v13, 16  ;;  %v1375_v24 = vrot.slane %v1373_v18, 1 }
  0x55   : > { %1029 = vmatprep.subr.bf16.mxu0 %v2245_v25  ;;  %1172 = vmatprep.subr.bf16.mxu1 %v2248_v26  ;;  %v2315_v25 = vld [vmem:[%s2957_s3 + $0x370] ss:$8 sps:$4 sm:$0xff]  }
  0x56   : > { %v2318_v26 = vld [vmem:[%s2957_s3 + $0x3f0] ss:$8 sps:$4 sm:$0xff]  }
  0x58   : > { %1030 = vmatpush1.bf16.msra.mxu0 %v2243_v27  ;;  %1173 = vmatpush1.bf16.msra.mxu1 %v2246_v28  ;;  %v2323_v27 = vld [vmem:[%s2957_s3 + $0x404] ss:$8 sps:$4 sm:$0xff]   ;;  %v1211_v28 = vpack.c.bf16 %v1209_v9, %v1209_v9 }
  0x59   : > { %1031 = vmatprep.subr.bf16.mxu0 %v2251_v29  ;;  %1174 = vmatprep.subr.bf16.mxu1 %v2254_v30  ;;  %v1376_v29 = vor.u32 %v1375_v24, %v1371_v23  ;;  %v2321_v30 = vld [vmem:[%s2957_s3 + $0x400] ss:$8 sps:$4 sm:$0xff]  }
  0x5c   : > { %1032 = vmatpush1.bf16.msra.mxu0 %v2249_v32  ;;  %1175 = vmatpush1.bf16.msra.mxu1 %v2252_v33  ;;  %v2324_v32 = vld [vmem:[%s2957_s3 + $0x410] ss:$8 sps:$4 sm:$0xff]   ;;  %v2329_v33 = vld [vmem:[%s2957_s3 + $0x424] ss:$8 sps:$4 sm:$0xff]  }
  0x5d   : > { %1033 = vmatprep.subr.bf16.mxu0 %v2257_v34  ;;  %1176 = vmatprep.subr.bf16.mxu1 %v2260_v35  ;;  %v2327_v34 = vld [vmem:[%s2957_s3 + $0x420] ss:$8 sps:$4 sm:$0xff]   ;;  %v2332_v35 = vld [vmem:[%s2957_s3 + $0x434] ss:$8 sps:$4 sm:$0xff]  }
  0x60   : > { %1034 = vmatpush1.bf16.msra.mxu0 %v2255_v37  ;;  %1177 = vmatpush1.bf16.msra.mxu1 %v2258_v38  ;;  %v2333_v37 = vld [vmem:[%s2957_s3 + $0x440] ss:$8 sps:$4 sm:$0xff]   ;;  %v2338_v38 = vld [vmem:[%s2957_s3 + $0x454] ss:$8 sps:$4 sm:$0xff]  }
  0x61   : > { %1035 = vmatprep.subr.bf16.mxu0 %v2263_v39  ;;  %1178 = vmatprep.subr.bf16.mxu1 %v2266_v40  ;;  %v2336_v39 = vld [vmem:[%s2957_s3 + $0x450] ss:$8 sps:$4 sm:$0xff]   ;;  %v2341_v40 = vld [vmem:[%s2957_s3 + $0x464] ss:$8 sps:$4 sm:$0xff]  }
  0x64   : > { %1036 = vmatpush1.bf16.msra.mxu0 %v2261_v41  ;;  %1179 = vmatpush1.bf16.msra.mxu1 %v2264_v43  ;;  %v2339_v41 = vld [vmem:[%s2957_s3 + $0x460] ss:$8 sps:$4 sm:$0xff]   ;;  %v2342_v43 = vld [vmem:[%s2957_s3 + $0x470] ss:$8 sps:$4 sm:$0xff]  }
  0x65   : > { %1037 = vmatprep.subr.bf16.mxu0 %v2269_v44  ;;  %1180 = vmatprep.subr.bf16.mxu1 %v2272_v45  ;;  %v1519_v44 = vrot.slane %v2846_v13, 1 }
  0x68   : > { %1038 = vmatpush1.bf16.msra.mxu0 %v2267_v46  ;;  %1181 = vmatpush1.bf16.msra.mxu1 %v2270_v49 }
  0x69   : > { %1309 = vmatprep.subr.bf16.mxu0 %v2275_v50  ;;  %1458 = vmatprep.subr.bf16.mxu1 %v2278_v51 }
  0x6b   : > { %1056 = vmatmul.mubr.bf16.vlgmr.msra.gmra.mrb[8].mxu0 %v941_v52  ;;  %1199 = vmatmul.mubr.bf16.vlgmr.msra.gmra.mrb[8].mxu1 %v1084_v54 }
  0x6c   : > { %1310 = vmatpush1.bf16.msra.mxu0 %v2273_v53  ;;  %1459 = vmatpush1.bf16.msra.mxu1 %v2276_v55 }
  0x6d   : > { %1311 = vmatprep.subr.bf16.mxu0 %v2281_v56  ;;  %1460 = vmatprep.subr.bf16.mxu1 %v2284_v57 }
  0x6e   : > { %1341 = vmatprep.mubr.bf16.mxu0 %v2385_v2  ;;  %1490 = vmatprep.mubr.bf16.mxu1 %v2385_v2 }
  0x70   : > { %1312 = vmatpush1.bf16.msra.mxu0 %v2279_v58  ;;  %1461 = vmatpush1.bf16.msra.mxu1 %v2282_v59 }
  0x71   : > { %1313 = vmatprep.subr.bf16.mxu0 %v2287_v60  ;;  %1462 = vmatprep.subr.bf16.mxu1 %v2290_v61 }
  0x74   : > { %1314 = vmatpush1.bf16.msra.mxu0 %v2285_v62  ;;  %1463 = vmatpush1.bf16.msra.mxu1 %v2288_v63 }
  0x75   : > { %1315 = vmatprep.subr.bf16.mxu0 %v2293_v0  ;;  %1464 = vmatprep.subr.bf16.mxu1 %v2296_v1 }
  0x78   : > { %1316 = vmatpush1.bf16.msra.mxu0 %v2291_v3  ;;  %1465 = vmatpush1.bf16.msra.mxu1 %v2294_v4 }
  0x79   : > { %1317 = vmatprep.subr.bf16.mxu0 %v2299_v5  ;;  %1466 = vmatprep.subr.bf16.mxu1 %v2302_v6 }
  0x7c   : > { %1318 = vmatpush1.bf16.msra.mxu0 %v2297_v7  ;;  %1467 = vmatpush1.bf16.msra.mxu1 %v2300_v8 }
  0x7d   : > { %1319 = vmatprep.subr.bf16.mxu0 %v2305_v11  ;;  %1468 = vmatprep.subr.bf16.mxu1 %v2308_v12 }
  0x80   : > { %1320 = vmatpush1.bf16.msra.mxu0 %v2303_v14  ;;  %1469 = vmatpush1.bf16.msra.mxu1 %v2306_v15 }
  0x81   : > { %1321 = vmatprep.subr.bf16.mxu0 %v2311_v16  ;;  %1470 = vmatprep.subr.bf16.mxu1 %v2314_v17 }
  0x84   : > { %1322 = vmatpush1.bf16.msra.mxu0 %v2309_v19  ;;  %1471 = vmatpush1.bf16.msra.mxu1 %v2312_v20 }
  0x85   : > { %1323 = vmatprep.subr.bf16.mxu0 %v2317_v21  ;;  %1472 = vmatprep.subr.bf16.mxu1 %v2320_v22 }
  0x88   : > { %1324 = vmatpush1.bf16.msra.mxu0 %v2315_v25  ;;  %1473 = vmatpush1.bf16.msra.mxu1 %v2318_v26 }
  0x89   : > { %1601 = vmatprep.subr.bf16.mxu0 %v2323_v27 }
  0x8b   : > { %1342 = vmatmul.mubr.bf16.vlgmr.msra.gmra.mrb[12].mxu0 %v1211_v28  ;;  %1491 = vmatmul.mubr.bf16.vlgmr.msra.gmra.mrb[12].mxu1 %v1376_v29  ;;  %v1646_v28 = vlaneseq }
  0x8c   : > { %1602 = vmatpush1.bf16.msra.mxu0 %v2321_v30  ;;  %1633 = vmatprep.mubr.bf16.mxu0 %v2385_v2  ;;  %v2330_v2 = vld [vmem:[%s2957_s3 + $0x430] ss:$8 sps:$4 sm:$0xff]  }
  0x8d   : > { %1603 = vmatprep.subr.bf16.mxu0 %v2326_v31  ;;  %v1647_v29 = vshrl.u32 %v1646_v28, 7  ;;  %v1644_v31 = vld [vmem:[%s2958_s4] sm:$0x3] }
  0x8f   : > { %v1648_v30 = vsub.s32 0, %v1647_v29 }
  0x90   : > { %1604 = vmatpush1.bf16.msra.mxu0 %v2324_v32  ;;  %v1652_v32 = vsub.s32 1, %v1647_v29 }
  0x91   : > { %1605 = vmatprep.subr.bf16.mxu0 %v2329_v33  ;;  %v1649_v33 = vrot.slane %v1644_v31, %v1648_v30 }
  0x94   : > { %1606 = vmatpush1.bf16.msra.mxu0 %v2327_v34 }
  0x95   : > { %1607 = vmatprep.subr.bf16.mxu0 %v2332_v35  ;;  %v1653_v35 = vrot.slane %v1644_v31, %v1652_v32 }
  0x98   : > { %1608 = vmatpush1.bf16.msra.mxu0 %v2330_v2 }
  0x99   : > { %1609 = vmatprep.subr.bf16.mxu0 %v2335_v36 }
  0x9c   : > { %1610 = vmatpush1.bf16.msra.mxu0 %v2333_v37 }
  0x9d   : > { %1611 = vmatprep.subr.bf16.mxu0 %v2338_v38 }
  0xa0   : > { %1612 = vmatpush1.bf16.msra.mxu0 %v2336_v39 }
  0xa1   : > { %1613 = vmatprep.subr.bf16.mxu0 %v2341_v40 }
  0xa4   : > { %1614 = vmatpush1.bf16.msra.mxu0 %v2339_v41 }
  0xa5   : > { %1615 = vmatprep.subr.bf16.mxu0 %v2344_v42 }
  0xa8   : > { %1616 = vmatpush1.bf16.msra.mxu0 %v2342_v43 }
  0xab   : > { %1634 = vmatmul.mubr.bf16.vlgmr.msra.gmra.mrb[16].mxu0 %v1519_v44 }
  0xfe   : > { %v503_v45 = vpop.f32.mrb[0].mxu0  ;;  %v624_v46 = vpop.f32.mrb[0].mxu1 }
  0xff   : > { %v625_v47 = vadd.f32 %v624_v46, %v503_v45  ;;  %v505_v48 = vpop.f32.mrb[1].mxu0  ;;  %v626_v49 = vpop.f32.mrb[1].mxu1 }
 0x100   : > { %v627_v50 = vadd.f32 %v626_v49, %v505_v48  ;;  %v507_v51 = vpop.f32.mrb[2].mxu0  ;;  %v628_v52 = vpop.f32.mrb[2].mxu1 }
 0x101   : > { %v508_v53 = vpop.f32.mrb[3].mxu0  ;;  %v629_v54 = vpop.f32.mrb[3].mxu1 }
 0x11e   : > { %v765_v55 = vpop.f32.mrb[4].mxu0  ;;  %v908_v56 = vpop.f32.mrb[4].mxu1 }
 0x11f   : > { %v772_v57 = vadd.f32 %v765_v55, %v625_v47  ;;  %v767_v58 = vpop.f32.mrb[5].mxu0  ;;  %v910_v59 = vpop.f32.mrb[5].mxu1 }
 0x120   : > { %v773_v60 = vadd.f32 %v767_v58, %v627_v50  ;;  %v769_v61 = vpop.f32.mrb[6].mxu0  ;;  %v912_v62 = vpop.f32.mrb[6].mxu1 }
 0x121   : > { %v915_v63 = vadd.f32 %v908_v56, %v772_v57  ;;  %v770_v0 = vpop.f32.mrb[7].mxu0  ;;  %v913_v1 = vpop.f32.mrb[7].mxu1 }
 0x122   : > { %v916_v3 = vadd.f32 %v910_v59, %v773_v60 }
 0x13e   : > { %v1057_v4 = vpop.f32.mrb[8].mxu0  ;;  %v1200_v5 = vpop.f32.mrb[8].mxu1 }
 0x13f   : > { %v1064_v6 = vadd.f32 %v1057_v4, %v915_v63  ;;  %v1059_v7 = vpop.f32.mrb[9].mxu0  ;;  %v1202_v8 = vpop.f32.mrb[9].mxu1 }
 0x140   : > { %v1065_v9 = vadd.f32 %v1059_v7, %v916_v3  ;;  %v1061_v10 = vpop.f32.mrb[10].mxu0  ;;  %v1204_v11 = vpop.f32.mrb[10].mxu1 }
 0x141   : > { %v1207_v12 = vadd.f32 %v1200_v5, %v1064_v6  ;;  %v1062_v13 = vpop.f32.mrb[11].mxu0  ;;  %v1205_v14 = vpop.f32.mrb[11].mxu1 }
 0x142   : > { %v1208_v15 = vadd.f32 %v1202_v8, %v1065_v9 }
 0x15e   : > { %v1343_v16 = vpop.f32.mrb[12].mxu0  ;;  %v1492_v17 = vpop.f32.mrb[12].mxu1 }
 0x15f   : > { %v1350_v18 = vadd.f32 %v1343_v16, %v1207_v12  ;;  %v1345_v19 = vpop.f32.mrb[13].mxu0  ;;  %v1494_v20 = vpop.f32.mrb[13].mxu1 }
 0x160   : > { %v1351_v21 = vadd.f32 %v1345_v19, %v1208_v15  ;;  %v1347_v22 = vpop.f32.mrb[14].mxu0  ;;  %v1496_v23 = vpop.f32.mrb[14].mxu1 }
 0x161   : > { %v1499_v24 = vadd.f32 %v1492_v17, %v1350_v18  ;;  %v1348_v25 = vpop.f32.mrb[15].mxu0  ;;  %v1497_v26 = vpop.f32.mrb[15].mxu1 }
 0x162   : > { %v1500_v27 = vadd.f32 %v1494_v20, %v1351_v21 }
 0x17e   : > { %v1635_v34 = vpop.f32.mrb[16].mxu0 }
 0x17f   : > { %v1642_v2 = vadd.f32 %v1635_v34, %v1499_v24  ;;  %v1637_v36 = vpop.f32.mrb[17].mxu0 }
 0x180   : > { %v1643_v37 = vadd.f32 %v1637_v36, %v1500_v27  ;;  %v1639_v38 = vpop.f32.mrb[18].mxu0 }
 0x181   : > { %v1656_v39 = vadd.f32 %v1649_v33, %v1642_v2  ;;  %v1640_v40 = vpop.f32.mrb[19].mxu0 }
 0x182   : > { %v1657_v41 = vadd.f32 %v1653_v35, %v1643_v37 }
 0x183   : > { %v1658_v42 = vmax.f32 %v1656_v39, 0.0 }
 0x184   : > { %v1659_v43 = vmax.f32 %v1657_v41, 0.0 }
 0x185   : > { %1660 = vst [vmem:[%s342_s19] sm:$0xff] %v1658_v42 }
 0x186   : > { %1661 = vst [vmem:[%s342_s19 + $0x8] sm:$0xff] %v1659_v43 }
 0x187 PF: > { %s15_s22 = sadd.s32 1, %s2383_s22   ;;  %s2960_s18 = smov %s2375_s20 }
 0x188   : > { %p12_p10 = scmp.ge.s32.totalorder %s15_s22, 18   ;;  %s2961_s19 = smov %s2379_s21 }
 0x189   : > { %s2962_s20 = smov %s2965_s23  ;;  %s2963_s21 = smov %s2969_s24 }
 0x18a   :  { %14 = sbr.rel (!%p12_p10) target bundleno = 3 (0x3), region = 84 }

// kernel: sft_net_forward.26
= control target key start
LH: loop header
LB: loop body
LE: loop exit
PB: predicated region body
PF: predicated region fallthrough
CT: control target
= control target key end

     0   :  { %s2201_s18 = smov 0   ;;  %s2203_s19 = smov 0   ;;  %s2627_s0 = inlined_call_operand.vmem [shape: f32[2,18,18,128], index: 0, kind: input, shape index: {}, may-alias: {0,1,2}]   ;;  %s2628_s1 = inlined_call_operand.vmem [shape: f32[2,18,18,128], index: 1, kind: input, shape index: {}, may-alias: {0,1,2}]   ;;  %s2629_s2 = inlined_call_operand.vmem [shape: f32[2,18,18,128], index: 2, kind: input, shape index: {}, may-alias: {0,1,2}]   ;;  %s2630_s3 = inlined_call_operand.vmem [shape: bf16[9,128,64], index: 3, kind: input, shape index: {}]   ;;  %s2631_s4 = inlined_call_operand.vmem [shape: f32[1,64], index: 4, kind: input, shape index: {}]   ;;  %s2632_s5 = inlined_call_operand.vmem [shape: f32[2,16,16,64], index: 5, kind: output, shape index: {}]  }
   0x1   :  { %s2205_s20 = smov 0   ;;  %s2207_s21 = smov 0  }
   0x2   :  { %s2209_s22 = smov 0  }
   0x3 LB: > { %s24_s23 = sadd.s32 1, %s2159_s20  ;;  %s27_s24 = sadd.s32 1, %s2163_s21  ;;  %s2167_s22 = sphi %s2209_s22, %s15_s22   ;;  %s2163_s21 = sphi %s2207_s21, %s2636_s21   ;;  %s2159_s20 = sphi %s2205_s20, %s2635_s20   ;;  %s2155_s19 = sphi %s2203_s19, %s2634_s19   ;;  %s2151_s18 = sphi %s2201_s18, %s2633_s18  }
   0x4   : > { %p25_p0 = scmp.ge.s32.totalorder %s24_s23, 16  ;;  %p1540_p1 = scmp.ge.s32.totalorder %s2167_s22, 1 }
   0x5   : > { %p247_p2 = scmp.lt.s32.totalorder %s2167_s22, 33 }
   0x6   : > { %s2638_s23 = smov (%p25_p0, %s24_s23), 0  ;;  %s2640_s24 = smov (!%p25_p0, %s27_s24), %s2163_s21 }
   0x7   : > { %p248_p3 = pnand %p1540_p1, %p247_p2  ;;  %p29_p4 = scmp.ge.s32.totalorder %s2640_s24, 2 }
   0x8   : > { %v2057_v0 = vld [vmem:[%s2630_s3 + $0x40] sm:$0xff] (!%p248_p3)   ;;  %v2169_v1 = vmov (!%p248_p3), 0.0   ;;  %v2059_v3 = vld [vmem:[%s2630_s3 + $0x48] sm:$0xff] (!%p248_p3)   ;;  %vm2170_vm0 = vmmov (!%p248_p3), 0   ;;  %p303_p5 = scmp.lt.s32.totalorder (!%p248_p3), %s2155_s19, 1  ;;  %p305_p6 = scmp.lt.s32.totalorder (!%p248_p3), %s2151_s18, 17 }
   0x9   : > { %s2642_s24 = smov (%p29_p4, %s2640_s24), 0  ;;  %251 = sbr.rel (%p248_p3) target bundleno = 391 (0x187), region = 40 }
   0xa   : > { %1831 = vmatprep.subr.bf16.mxu0 (!%p248_p3), %v2169_v1  ;;  %1851 = vmatprep.subr.bf16.mxu1 (!%p248_p3), %v2169_v1  ;;  %v2058_v2 = vld [vmem:[%s2630_s3] sm:$0xff] (!%p248_p3)   ;;  %v2060_v4 = vld [vmem:[%s2630_s3 + $0x8] sm:$0xff] (!%p248_p3)   ;;  %v2061_v5 = vld [vmem:[%s2630_s3 + $0x50] sm:$0xff] (!%p248_p3)   ;;  %vm382_vm1 = vsmask.f32 (!%p248_p3), 7424  ;;  %s312_s9 = sadd.s32 (!%p248_p3), 1, %s2151_s18 }
   0xb   : > { %1832 = vmatpush3.bf16.msra.mxu0 (!%p248_p3), %v2057_v0  ;;  %1847 = vmatprep.mubr.msk.bf16.mxu0 (!%p248_p3), %vm2170_vm0, %v2169_v1  ;;  %v2062_v6 = vld [vmem:[%s2630_s3 + $0x10] sm:$0xff] (!%p248_p3)   ;;  %v2063_v7 = vld [vmem:[%s2630_s3 + $0x58] sm:$0xff] (!%p248_p3)   ;;  %v2065_v9 = vld [vmem:[%s2630_s3 + $0x60] sm:$0xff] (!%p248_p3)   ;;  %p315_p7 = scmp.lt.s32.totalorder (!%p248_p3), %s312_s9, 17  ;;  %s323_s28 = sadd.s32 (!%p248_p3), 2, %s2151_s18  ;;  %vm593_vm2 = vcmask (!%p248_p3), 1046528  }
   0xc   : > { %1852 = vmatpush3.bf16.msra.mxu1 (!%p248_p3), %v2058_v2  ;;  %1833 = vmatprep.subr.bf16.mxu0 (!%p248_p3), %v2169_v1  ;;  %v2064_v8 = vld [vmem:[%s2630_s3 + $0x18] sm:$0xff] (!%p248_p3)   ;;  %v2066_v10 = vld [vmem:[%s2630_s3 + $0x20] sm:$0xff] (!%p248_p3)   ;;  %v2067_v16 = vld [vmem:[%s2630_s3 + $0x68] sm:$0xff] (!%p248_p3)   ;;  %p326_p8 = scmp.lt.s32.totalorder (!%p248_p3), %s323_s28, 17  ;;  %p336_p9 = scmp.lt.s32.totalorder (!%p248_p3), %s2151_s18, 15  ;;  %vm1396_vm3 = vcmask (!%p248_p3), 523264  }
   0xd   : > { %1853 = vmatprep.subr.bf16.mxu1 (!%p248_p3), %v2169_v1  ;;  %1867 = vmatprep.mubr.msk.bf16.mxu1 (!%p248_p3), %vm2170_vm0, %v2169_v1  ;;  %v2068_v17 = vld [vmem:[%s2630_s3 + $0x28] sm:$0xff] (!%p248_p3)   ;;  %v2069_v19 = vld [vmem:[%s2630_s3 + $0x70] sm:$0xff] (!%p248_p3)   ;;  %v2071_v24 = vld [vmem:[%s2630_s3 + $0x78] sm:$0xff] (!%p248_p3)  }
   0xe   : > { %v2070_v23 = vld [vmem:[%s2630_s3 + $0x30] sm:$0xff] (!%p248_p3)   ;;  %v2072_v25 = vld [vmem:[%s2630_s3 + $0x38] sm:$0xff] (!%p248_p3)   ;;  %v2073_v29 = vld [vmem:[%s2630_s3 + $0x80] sm:$0xff] (!%p248_p3)  }
   0xf   : > { %1834 = vmatpush3.bf16.msra.mxu0 (!%p248_p3), %v2059_v3  ;;  %v2074_v30 = vld [vmem:[%s2630_s3 + $0xc0] sm:$0xff] (!%p248_p3)   ;;  %v2075_v31 = vld [vmem:[%s2630_s3 + $0x88] sm:$0xff] (!%p248_p3)   ;;  %v2077_v33 = vld [vmem:[%s2630_s3 + $0x90] sm:$0xff] (!%p248_p3)  }
  0x10   : > { %s2644_s19 = smov (!%p303_p5, %s2155_s19), 1  ;;  %1854 = vmatpush3.bf16.msra.mxu1 %v2060_v4  ;;  %1835 = vmatprep.subr.bf16.mxu0 %v2169_v1  ;;  %v2076_v32 = vld [vmem:[%s2630_s3 + $0xc8] sm:$0xff]   ;;  %v2078_v34 = vld [vmem:[%s2630_s3 + $0xd0] sm:$0xff]   ;;  %s2646_s9 = smov (!%p315_p7, %s312_s9), 17  ;;  %v2079_v35 = vld [vmem:[%s2630_s3 + $0x98] sm:$0xff]  }
  0x11   : > { %s306_s8 = scalar_select %p305_p6, %s2151_s18, 17  ;;  %1855 = vmatprep.subr.bf16.mxu1 %v2169_v1  ;;  %v2080_v36 = vld [vmem:[%s2630_s3 + $0xd8] sm:$0xff]   ;;  %v2081_v37 = vld [vmem:[%s2630_s3 + $0xa0] sm:$0xff]   ;;  %v2083_v39 = vld [vmem:[%s2630_s3 + $0xa8] sm:$0xff]  }
  0x12   : > { %s2265_s11 = smul.u32 54, %s2644_s19  ;;  %v2082_v38 = vld [vmem:[%s2630_s3 + $0xe0] sm:$0xff]   ;;  %s2648_s28 = smov (!%p326_p8, %s323_s28), 17  ;;  %v2084_v40 = vld [vmem:[%s2630_s3 + $0xe8] sm:$0xff]   ;;  %v2085_v41 = vld [vmem:[%s2630_s3 + $0xb0] sm:$0xff]  }
  0x13   : > { %s2011_s14 = smul.u32 3, %s306_s8  ;;  %1836 = vmatpush3.bf16.msra.mxu0 %v2061_v5  ;;  %v2086_v42 = vld [vmem:[%s2630_s3 + $0xf0] sm:$0xff]   ;;  %v2087_v43 = vld [vmem:[%s2630_s3 + $0xb8] sm:$0xff]   ;;  %v2089_v50 = vld [vmem:[%s2630_s3 + $0x100] sm:$0xff]   ;;  %s2650_s18 = smov (!%p336_p9, %s2151_s18), 15 }
  0x14   : > { %1856 = vmatpush3.bf16.msra.mxu1 %v2062_v6  ;;  %1837 = vmatprep.subr.bf16.mxu0 %v2169_v1  ;;  %s2013_s6 = smul.u32 3, %s2646_s9  ;;  %v2088_v44 = vld [vmem:[%s2630_s3 + $0xf8] sm:$0xff]   ;;  %v2090_v52 = vld [vmem:[%s2630_s3 + $0x140] sm:$0xff]   ;;  %v2091_v53 = vld [vmem:[%s2630_s3 + $0x108] sm:$0xff]   ;;  %s1544_s10 = sshll.u32 %s2650_s18, 1 }
  0x15   : > { %s309_s15 = sadd.s32 %s2265_s11, %s2011_s14  ;;  %1857 = vmatprep.subr.bf16.mxu1 %v2169_v1  ;;  %s2014_s27 = smul.u32 3, %s2648_s28  ;;  %v2092_v56 = vld [vmem:[%s2630_s3 + $0x148] sm:$0xff]   ;;  %v2093_v59 = vld [vmem:[%s2630_s3 + $0x110] sm:$0xff]   ;;  %v2095_v5 = vld [vmem:[%s2630_s3 + $0x118] sm:$0xff]  }
  0x16   : > { %s1541_s25 = sshll.u32 %s309_s15, 3  ;;  %s319_s13 = sadd.s32 %s2013_s6, %s2265_s11  ;;  %v2094_v63 = vld [vmem:[%s2630_s3 + $0x150] sm:$0xff]  }
  0x17   : > { %s311_s30 = scalar_lea.vmem %s2627_s0, %s1541_s25  ;;  %1838 = vmatpush3.bf16.msra.mxu0 %v2063_v7  ;;  %s1542_s17 = sshll.u32 %s319_s13, 3  ;;  %v2096_v7 = vld [vmem:[%s2630_s3 + $0x158] sm:$0xff]  }
  0x18   : > { %1858 = vmatpush3.bf16.msra.mxu1 %v2064_v8  ;;  %1839 = vmatprep.subr.bf16.mxu0 %v2169_v1  ;;  %v344_v11 = vld [vmem:[%s311_s30] sm:$0xff]  ;;  %v345_v12 = vld [vmem:[%s311_s30 + $0x8] sm:$0xff]  ;;  %v346_v13 = vld [vmem:[%s311_s30 + $0x10] sm:$0x3]  ;;  %s2390_s8 = scalar_lea.vmem %s2628_s1, %s1542_s17  ;;  %s330_s14 = sadd.s32 %s2014_s27, %s2265_s11 }
  0x19   : > { %1859 = vmatprep.subr.bf16.mxu1 %v2169_v1  ;;  %v2292_v14 = vpack.c.bf16 %v345_v12, %v344_v11  ;;  %v2294_v15 = vpack.c.bf16 %v346_v13, %v346_v13  ;;  %v689_v47 = vld [vmem:[%s2390_s8] sm:$0xff]  ;;  %v690_v48 = vld [vmem:[%s2390_s8 + $0x8] sm:$0xff]  ;;  %s1543_s9 = sshll.u32 %s330_s14, 3  ;;  %v691_v13 = vld [vmem:[%s2390_s8 + $0x10] sm:$0x3]  ;;  %s1545_s12 = sshll.u32 %s2644_s19, 5 }
  0x1a   : > { %v2410_v51 = vpack.c.bf16 %v690_v48, %v689_v47  ;;  %s332_s27 = scalar_lea.vmem %s2629_s2, %s1543_s9  ;;  %v2097_v11 = vld [vmem:[%s2630_s3 + $0x120] sm:$0xff]   ;;  %v2122_v48 = vld [vmem:[%s2630_s3 + $0x208] sm:$0xff]   ;;  %s340_s28 = sadd.s32 %s1545_s12, %s1544_s10 }
  0x1b   : > { %1840 = vmatpush3.bf16.msra.mxu0 %v2065_v9  ;;  %v386_v18 = vshll.u32 %v2292_v14, 16  ;;  %v384_v20 = vshrl.u32 %v2292_v14, 16  ;;  %v391_v22 = vshll.u32 %v2294_v15, 16  ;;  %v594_v45 = vrot.slane %v2292_v14, 1  ;;  %v1037_v54 = vld [vmem:[%s332_s27] sm:$0xff]  ;;  %v1038_v55 = vld [vmem:[%s332_s27 + $0x8] sm:$0xff] }
  0x1c   : > { %1860 = vmatpush3.bf16.msra.mxu1 %v2066_v10  ;;  %1841 = vmatprep.subr.bf16.mxu0 %v2169_v1  ;;  %v595_v46 = vrot.slane %v2294_v15, 1  ;;  %v2428_v57 = vpack.c.bf16 %v1038_v55, %v1037_v54  ;;  %v1039_v58 = vld [vmem:[%s332_s27 + $0x10] sm:$0x3]  ;;  %v2098_v12 = vld [vmem:[%s2630_s3 + $0x160] sm:$0xff]   ;;  %v801_v15 = vpack.c.bf16 %v691_v13, %v691_v13  ;;  %v2128_v54 = vld [vmem:[%s2630_s3 + $0x238] sm:$0xff]   ;;  %s1546_s9 = sshll.u32 %s340_s28, 3 }
  0x1d   : > { %1861 = vmatprep.subr.bf16.mxu1 %v2169_v1  ;;  %v388_v21 = vrot.slane %v386_v18, 1  ;;  %v393_v27 = vrot.slane %v391_v22, 1  ;;  %v1149_v60 = vpack.c.bf16 %v1039_v58, %v1039_v58  ;;  %v2101_v18 = vld [vmem:[%s2630_s3 + $0x130] sm:$0xff]   ;;  %v2121_v47 = vld [vmem:[%s2630_s3 + $0x200] sm:$0xff]   ;;  %s342_s11 = scalar_lea.vmem %s2632_s5, %s1546_s9 }
  0x1e   : > { %v596_v49 = vsel %vm593_vm2, %v594_v45, %v595_v46  ;;  %v1168_v61 = vshrl.u32 %v2428_v57, 16  ;;  %v1170_v62 = vshll.u32 %v2428_v57, 16  ;;  %v1290_v6 = vrot.slane %v2428_v57, 1  ;;  %v2102_v22 = vld [vmem:[%s2630_s3 + $0x170] sm:$0xff]   ;;  %v2119_v45 = vld [vmem:[%s2630_s3 + $0x1b8] sm:$0xff]  }
  0x1f   : > { %1842 = vmatpush3.bf16.msra.mxu0 %v2067_v16  ;;  %v389_v26 = vor.u32 %v388_v21, %v384_v20  ;;  %v1175_v2 = vshll.u32 %v1149_v60, 16  ;;  %v1291_v9 = vrot.slane %v1149_v60, 1  ;;  %v822_v16 = vshll.u32 %v2410_v51, 16  ;;  %v2120_v46 = vld [vmem:[%s2630_s3 + $0x1f8] sm:$0xff]  }
  0x20   : > { %1862 = vmatpush3.bf16.msra.mxu1 %v2068_v17  ;;  %1843 = vmatprep.subr.bf16.mxu0 %v2169_v1  ;;  %v1172_v0 = vrot.slane %v1170_v62, 1  ;;  %v2100_v17 = vld [vmem:[%s2630_s3 + $0x168] sm:$0xff]   ;;  %v827_v21 = vshll.u32 %v801_v15, 16 }
  0x21   : > { %1863 = vmatprep.subr.bf16.mxu1 %v2169_v1  ;;  %v394_v28 = vsel %vm382_vm1, %v389_v26, %v393_v27  ;;  %v1177_v4 = vrot.slane %v1175_v2, 1  ;;  %v2458_v10 = vsel %vm593_vm2, %v1290_v6, %v1291_v9  ;;  %v824_v20 = vrot.slane %v822_v16, 1  ;;  %v2104_v26 = vld [vmem:[%s2630_s3 + $0x178] sm:$0xff]  }
  0x22   : > { %v1173_v3 = vor.u32 %v1172_v0, %v1168_v61  ;;  %v942_v27 = vrot.slane %v2410_v51, 1 }
  0x23   : > { %1844 = vmatpush3.bf16.msra.mxu0 %v2069_v19  ;;  %v820_v19 = vshrl.u32 %v2410_v51, 16 }
  0x24   : > { %1864 = vmatpush3.bf16.msra.mxu1 %v2070_v23  ;;  %1845 = vmatprep.subr.bf16.mxu0 %v2169_v1  ;;  %v2454_v8 = vsel %vm382_vm1, %v1173_v3, %v1177_v4  ;;  %v2103_v23 = vld [vmem:[%s2630_s3 + $0x138] sm:$0xff]  }
  0x25   : > { %1865 = vmatprep.subr.bf16.mxu1 %v2169_v1 }
  0x27   : > { %1846 = vmatpush3.bf16.msra.mxu0 %v2071_v24  ;;  %v825_v24 = vor.u32 %v824_v20, %v820_v19 }
  0x28   : > { %1866 = vmatpush3.bf16.msra.mxu1 %v2072_v25  ;;  %1871 = vmatprep.subr.bf16.mxu0 %v2169_v1  ;;  %v829_v25 = vrot.slane %v827_v21, 1 }
  0x29   : > { %1891 = vmatprep.subr.bf16.mxu1 %v2169_v1 }
  0x2a   : > { %1848 = vmatmul.mubr.bf16.vlgmr.msra.gmra.mrb[0].mxu0 %v394_v28  ;;  %v943_v28 = vrot.slane %v801_v15, 1 }
  0x2b   : > { %1868 = vmatmul.mubr.bf16.vlgmr.msra.gmra.mrb[0].mxu1 %v2292_v14  ;;  %1872 = vmatpush3.bf16.msra.mxu0 %v2073_v29  ;;  %v2099_v14 = vld [vmem:[%s2630_s3 + $0x128] sm:$0xff]   ;;  %v830_v29 = vsel %vm382_vm1, %v825_v24, %v829_v25 }
  0x2c   : > { %1892 = vmatpush3.bf16.msra.mxu1 %v2074_v30  ;;  %1873 = vmatprep.subr.bf16.mxu0 %v2169_v1  ;;  %v2105_v30 = vld [vmem:[%s2630_s3 + $0x180] sm:$0xff]  }
  0x2d   : > { %1893 = vmatprep.subr.bf16.mxu1 %v2169_v1  ;;  %1887 = vmatprep.mubr.msk.bf16.mxu0 %vm2170_vm0, %v2169_v1 }
  0x2e   : > { %1907 = vmatprep.mubr.msk.bf16.mxu1 %vm2170_vm0, %v2169_v1 }
  0x2f   : > { %1874 = vmatpush3.bf16.msra.mxu0 %v2075_v31  ;;  %v944_v31 = vsel %vm593_vm2, %v942_v27, %v943_v28 }
  0x30   : > { %1894 = vmatpush3.bf16.msra.mxu1 %v2076_v32  ;;  %1875 = vmatprep.subr.bf16.mxu0 %v2169_v1  ;;  %v2106_v32 = vld [vmem:[%s2630_s3 + $0x1c0] sm:$0xff]  }
  0x31   : > { %1895 = vmatprep.subr.bf16.mxu1 %v2169_v1 }
  0x33   : > { %1876 = vmatpush3.bf16.msra.mxu0 %v2077_v33  ;;  %v2107_v33 = vld [vmem:[%s2630_s3 + $0x188] sm:$0xff]  }
  0x34   : > { %1896 = vmatpush3.bf16.msra.mxu1 %v2078_v34  ;;  %1877 = vmatprep.subr.bf16.mxu0 %v2169_v1  ;;  %v2108_v34 = vld [vmem:[%s2630_s3 + $0x1c8] sm:$0xff]  }
  0x35   : > { %1897 = vmatprep.subr.bf16.mxu1 %v2169_v1 }
  0x37   : > { %1878 = vmatpush3.bf16.msra.mxu0 %v2079_v35  ;;  %v2109_v35 = vld [vmem:[%s2630_s3 + $0x190] sm:$0xff]  }
  0x38   : > { %1898 = vmatpush3.bf16.msra.mxu1 %v2080_v36  ;;  %1879 = vmatprep.subr.bf16.mxu0 %v2169_v1  ;;  %v2110_v36 = vld [vmem:[%s2630_s3 + $0x1d0] sm:$0xff]  }
  0x39   : > { %1899 = vmatprep.subr.bf16.mxu1 %v2169_v1 }
  0x3b   : > { %1880 = vmatpush3.bf16.msra.mxu0 %v2081_v37  ;;  %v2111_v37 = vld [vmem:[%s2630_s3 + $0x198] sm:$0xff]  }
  0x3c   : > { %1900 = vmatpush3.bf16.msra.mxu1 %v2082_v38  ;;  %1881 = vmatprep.subr.bf16.mxu0 %v2169_v1  ;;  %v2112_v38 = vld [vmem:[%s2630_s3 + $0x1d8] sm:$0xff]  }
  0x3d   : > { %1901 = vmatprep.subr.bf16.mxu1 %v2169_v1 }
  0x3f   : > { %1882 = vmatpush3.bf16.msra.mxu0 %v2083_v39  ;;  %v2113_v39 = vld [vmem:[%s2630_s3 + $0x1a0] sm:$0xff]  }
  0x40   : > { %1902 = vmatpush3.bf16.msra.mxu1 %v2084_v40  ;;  %1883 = vmatprep.subr.bf16.mxu0 %v2169_v1  ;;  %v2114_v40 = vld [vmem:[%s2630_s3 + $0x1e0] sm:$0xff]  }
  0x41   : > { %1903 = vmatprep.subr.bf16.mxu1 %v2169_v1 }
  0x43   : > { %1884 = vmatpush3.bf16.msra.mxu0 %v2085_v41  ;;  %v2115_v41 = vld [vmem:[%s2630_s3 + $0x1a8] sm:$0xff]  }
  0x44   : > { %1904 = vmatpush3.bf16.msra.mxu1 %v2086_v42  ;;  %1885 = vmatprep.subr.bf16.mxu0 %v2169_v1  ;;  %v2116_v42 = vld [vmem:[%s2630_s3 + $0x1e8] sm:$0xff]  }
  0x45   : > { %1905 = vmatprep.subr.bf16.mxu1 %v2169_v1 }
  0x47   : > { %1886 = vmatpush3.bf16.msra.mxu0 %v2087_v43  ;;  %v2117_v43 = vld [vmem:[%s2630_s3 + $0x1b0] sm:$0xff]  }
  0x48   : > { %1906 = vmatpush3.bf16.msra.mxu1 %v2088_v44  ;;  %1911 = vmatprep.subr.bf16.mxu0 %v2169_v1  ;;  %v2118_v44 = vld [vmem:[%s2630_s3 + $0x1f0] sm:$0xff]  }
  0x49   : > { %1931 = vmatprep.subr.bf16.mxu1 %v2169_v1 }
  0x4a   : > { %1888 = vmatmul.mubr.bf16.vlgmr.msra.gmra.mrb[4].mxu0 %v596_v49  ;;  %v2123_v49 = vld [vmem:[%s2630_s3 + $0x210] sm:$0xff]  }
  0x4b   : > { %1912 = vmatpush3.bf16.msra.mxu0 %v2089_v50  ;;  %1908 = vmatmul.mubr.bf16.vlgmr.msra.gmra.mrb[4].mxu1 %v2410_v51  ;;  %v2124_v50 = vld [vmem:[%s2630_s3 + $0x218] sm:$0xff]   ;;  %v2125_v51 = vld [vmem:[%s2630_s3 + $0x220] sm:$0xff]  }
  0x4c   : > { %1932 = vmatpush3.bf16.msra.mxu1 %v2090_v52  ;;  %1913 = vmatprep.subr.bf16.mxu0 %v2169_v1  ;;  %v2126_v52 = vld [vmem:[%s2630_s3 + $0x228] sm:$0xff]  }
  0x4d   : > { %1933 = vmatprep.subr.bf16.mxu1 %v2169_v1  ;;  %1927 = vmatprep.mubr.msk.bf16.mxu0 %vm2170_vm0, %v2169_v1 }
  0x4e   : > { %1947 = vmatprep.mubr.msk.bf16.mxu1 %vm2170_vm0, %v2169_v1 }
  0x4f   : > { %1914 = vmatpush3.bf16.msra.mxu0 %v2091_v53  ;;  %v2127_v53 = vld [vmem:[%s2630_s3 + $0x230] sm:$0xff]  }
  0x50   : > { %1934 = vmatpush3.bf16.msra.mxu1 %v2092_v56  ;;  %1915 = vmatprep.subr.bf16.mxu0 %v2169_v1 }
  0x51   : > { %1935 = vmatprep.subr.bf16.mxu1 %v2169_v1 }
  0x53   : > { %1916 = vmatpush3.bf16.msra.mxu0 %v2093_v59 }
  0x54   : > { %1936 = vmatpush3.bf16.msra.mxu1 %v2094_v63  ;;  %1917 = vmatprep.subr.bf16.mxu0 %v2169_v1 }
  0x55   : > { %1937 = vmatprep.subr.bf16.mxu1 %v2169_v1 }
  0x57   : > { %1918 = vmatpush3.bf16.msra.mxu0 %v2095_v5 }
  0x58   : > { %1938 = vmatpush3.bf16.msra.mxu1 %v2096_v7  ;;  %1919 = vmatprep.subr.bf16.mxu0 %v2169_v1 }
  0x59   : > { %1939 = vmatprep.subr.bf16.mxu1 %v2169_v1 }
  0x5b   : > { %1920 = vmatpush3.bf16.msra.mxu0 %v2097_v11 }
  0x5c   : > { %1940 = vmatpush3.bf16.msra.mxu1 %v2098_v12  ;;  %1921 = vmatprep.subr.bf16.mxu0 %v2169_v1 }
  0x5d   : > { %1941 = vmatprep.subr.bf16.mxu1 %v2169_v1 }
  0x5f   : > { %1922 = vmatpush3.bf16.msra.mxu0 %v2099_v14 }
  0x60   : > { %1942 = vmatpush3.bf16.msra.mxu1 %v2100_v17  ;;  %1923 = vmatprep.subr.bf16.mxu0 %v2169_v1 }
  0x61   : > { %1943 = vmatprep.subr.bf16.mxu1 %v2169_v1 }
  0x63   : > { %1924 = vmatpush3.bf16.msra.mxu0 %v2101_v18 }
  0x64   : > { %1944 = vmatpush3.bf16.msra.mxu1 %v2102_v22  ;;  %1925 = vmatprep.subr.bf16.mxu0 %v2169_v1 }
  0x65   : > { %1945 = vmatprep.subr.bf16.mxu1 %v2169_v1 }
  0x67   : > { %1926 = vmatpush3.bf16.msra.mxu0 %v2103_v23 }
  0x68   : > { %1946 = vmatpush3.bf16.msra.mxu1 %v2104_v26  ;;  %1951 = vmatprep.subr.bf16.mxu0 %v2169_v1 }
  0x69   : > { %1971 = vmatprep.subr.bf16.mxu1 %v2169_v1 }
  0x6a   : > { %1928 = vmatmul.mubr.bf16.vlgmr.msra.gmra.mrb[8].mxu0 %v830_v29 }
  0x6b   : > { %1952 = vmatpush3.bf16.msra.mxu0 %v2105_v30  ;;  %1948 = vmatmul.mubr.bf16.vlgmr.msra.gmra.mrb[8].mxu1 %v944_v31 }
  0x6c   : > { %1972 = vmatpush3.bf16.msra.mxu1 %v2106_v32  ;;  %1953 = vmatprep.subr.bf16.mxu0 %v2169_v1 }
  0x6d   : > { %1973 = vmatprep.subr.bf16.mxu1 %v2169_v1  ;;  %1967 = vmatprep.mubr.msk.bf16.mxu0 %vm2170_vm0, %v2169_v1 }
  0x6e   : > { %1987 = vmatprep.mubr.msk.bf16.mxu1 %vm2170_vm0, %v2169_v1 }
  0x6f   : > { %1954 = vmatpush3.bf16.msra.mxu0 %v2107_v33 }
  0x70   : > { %1974 = vmatpush3.bf16.msra.mxu1 %v2108_v34  ;;  %1955 = vmatprep.subr.bf16.mxu0 %v2169_v1 }
  0x71   : > { %1975 = vmatprep.subr.bf16.mxu1 %v2169_v1 }
  0x73   : > { %1956 = vmatpush3.bf16.msra.mxu0 %v2109_v35 }
  0x74   : > { %1976 = vmatpush3.bf16.msra.mxu1 %v2110_v36  ;;  %1957 = vmatprep.subr.bf16.mxu0 %v2169_v1 }
  0x75   : > { %1977 = vmatprep.subr.bf16.mxu1 %v2169_v1 }
  0x77   : > { %1958 = vmatpush3.bf16.msra.mxu0 %v2111_v37 }
  0x78   : > { %1978 = vmatpush3.bf16.msra.mxu1 %v2112_v38  ;;  %1959 = vmatprep.subr.bf16.mxu0 %v2169_v1  ;;  %v1747_v38 = vld [vmem:[%s2631_s4] ss:$0 sm:$0xff] }
  0x79   : > { %1979 = vmatprep.subr.bf16.mxu1 %v2169_v1 }
  0x7b   : > { %1960 = vmatpush3.bf16.msra.mxu0 %v2113_v39 }
  0x7c   : > { %1980 = vmatpush3.bf16.msra.mxu1 %v2114_v40  ;;  %1961 = vmatprep.subr.bf16.mxu0 %v2169_v1 }
  0x7d   : > { %1981 = vmatprep.subr.bf16.mxu1 %v2169_v1 }
  0x7f   : > { %1962 = vmatpush3.bf16.msra.mxu0 %v2115_v41 }
  0x80   : > { %1982 = vmatpush3.bf16.msra.mxu1 %v2116_v42  ;;  %1963 = vmatprep.subr.bf16.mxu0 %v2169_v1 }
  0x81   : > { %1983 = vmatprep.subr.bf16.mxu1 %v2169_v1 }
  0x83   : > { %1964 = vmatpush3.bf16.msra.mxu0 %v2117_v43 }
  0x84   : > { %1984 = vmatpush3.bf16.msra.mxu1 %v2118_v44  ;;  %1965 = vmatprep.subr.bf16.mxu0 %v2169_v1 }
  0x85   : > { %1985 = vmatprep.subr.bf16.mxu1 %v2169_v1 }
  0x87   : > { %1966 = vmatpush3.bf16.msra.mxu0 %v2119_v45 }
  0x88   : > { %1986 = vmatpush3.bf16.msra.mxu1 %v2120_v46  ;;  %1991 = vmatprep.subr.bf16.mxu0 %v2169_v1 }
  0x8a   : > { %1968 = vmatmul.mubr.bf16.vlgmr.msra.gmra.mrb[12].mxu0 %v2428_v57 }
  0x8b   : > { %1992 = vmatpush3.bf16.msra.mxu0 %v2121_v47  ;;  %1988 = vmatmul.mubr.bf16.vlgmr.msra.gmra.mrb[12].mxu1 %v2454_v8 }
  0x8c   : > { %1993 = vmatprep.subr.bf16.mxu0 %v2169_v1  ;;  %2007 = vmatprep.mubr.msk.bf16.mxu0 %vm2170_vm0, %v2169_v1 }
  0x8f   : > { %1994 = vmatpush3.bf16.msra.mxu0 %v2122_v48 }
  0x90   : > { %1995 = vmatprep.subr.bf16.mxu0 %v2169_v1 }
  0x93   : > { %1996 = vmatpush3.bf16.msra.mxu0 %v2123_v49 }
  0x94   : > { %1997 = vmatprep.subr.bf16.mxu0 %v2169_v1 }
  0x97   : > { %1998 = vmatpush3.bf16.msra.mxu0 %v2124_v50 }
  0x98   : > { %1999 = vmatprep.subr.bf16.mxu0 %v2169_v1 }
  0x9b   : > { %2000 = vmatpush3.bf16.msra.mxu0 %v2125_v51 }
  0x9c   : > { %2001 = vmatprep.subr.bf16.mxu0 %v2169_v1 }
  0x9f   : > { %2002 = vmatpush3.bf16.msra.mxu0 %v2126_v52 }
  0xa0   : > { %2003 = vmatprep.subr.bf16.mxu0 %v2169_v1 }
  0xa3   : > { %2004 = vmatpush3.bf16.msra.mxu0 %v2127_v53 }
  0xa4   : > { %2005 = vmatprep.subr.bf16.mxu0 %v2169_v1 }
  0xa7   : > { %2006 = vmatpush3.bf16.msra.mxu0 %v2128_v54 }
  0xaa   : > { %2008 = vmatmul.mubr.bf16.vlgmr.msra.gmra.mrb[16].mxu0 %v2458_v10 }
  0xfd   : > { %v478_v55 = vpop.f32.mrb[0].mxu0 }
  0xfe   : > { %v567_v56 = vpop.f32.mrb[0].mxu1  ;;  %v1849_v57 = vpop.f32.mrb[1].mxu0 }
  0xff   : > { %v568_v58 = vadd.f32 %v567_v56, %v478_v55  ;;  %v1869_v59 = vpop.f32.mrb[1].mxu1  ;;  %v481_v60 = vpop.f32.mrb[2].mxu0 }
 0x100   : > { %v570_v61 = vpop.f32.mrb[2].mxu1  ;;  %v1850_v62 = vpop.f32.mrb[3].mxu0 }
 0x101   : > { %v571_v63 = vadd.f32 %v570_v61, %v481_v60  ;;  %v1870_v0 = vpop.f32.mrb[3].mxu1 }
 0x11d   : > { %v680_v2 = vpop.f32.mrb[4].mxu0 }
 0x11e   : > { %v687_v3 = vadd.f32 %v680_v2, %v568_v58  ;;  %v1889_v4 = vpop.f32.mrb[5].mxu0  ;;  %v792_v5 = vpop.f32.mrb[4].mxu1 }
 0x11f   : > { %v683_v6 = vpop.f32.mrb[6].mxu0  ;;  %v1909_v7 = vpop.f32.mrb[5].mxu1 }
 0x120   : > { %v688_v1 = vadd.f32 %v683_v6, %v571_v63  ;;  %v799_v8 = vadd.f32 %v792_v5, %v687_v3  ;;  %v1890_v9 = vpop.f32.mrb[7].mxu0  ;;  %v795_v10 = vpop.f32.mrb[6].mxu1 }
 0x121   : > { %v1910_v11 = vpop.f32.mrb[7].mxu1 }
 0x122   : > { %v800_v12 = vadd.f32 %v795_v10, %v688_v1 }
 0x13d   : > { %v914_v13 = vpop.f32.mrb[8].mxu0 }
 0x13e   : > { %v921_v14 = vadd.f32 %v914_v13, %v799_v8  ;;  %v1929_v15 = vpop.f32.mrb[9].mxu0  ;;  %v1028_v16 = vpop.f32.mrb[8].mxu1 }
 0x13f   : > { %v917_v17 = vpop.f32.mrb[10].mxu0  ;;  %v1949_v18 = vpop.f32.mrb[9].mxu1 }
 0x140   : > { %v922_v19 = vadd.f32 %v917_v17, %v800_v12  ;;  %v1035_v20 = vadd.f32 %v1028_v16, %v921_v14  ;;  %v1930_v21 = vpop.f32.mrb[11].mxu0  ;;  %v1031_v22 = vpop.f32.mrb[10].mxu1 }
 0x141   : > { %v1950_v23 = vpop.f32.mrb[11].mxu1 }
 0x142   : > { %v1036_v24 = vadd.f32 %v1031_v22, %v922_v19 }
 0x15d   : > { %v1140_v25 = vpop.f32.mrb[12].mxu0 }
 0x15e   : > { %v1147_v26 = vadd.f32 %v1140_v25, %v1035_v20  ;;  %v1969_v27 = vpop.f32.mrb[13].mxu0  ;;  %v1262_v28 = vpop.f32.mrb[12].mxu1 }
 0x15f   : > { %v1143_v29 = vpop.f32.mrb[14].mxu0  ;;  %v1989_v30 = vpop.f32.mrb[13].mxu1 }
 0x160   : > { %v1148_v31 = vadd.f32 %v1143_v29, %v1036_v24  ;;  %v1269_v32 = vadd.f32 %v1262_v28, %v1147_v26  ;;  %v1970_v33 = vpop.f32.mrb[15].mxu0  ;;  %v1265_v34 = vpop.f32.mrb[14].mxu1 }
 0x161   : > { %v1990_v35 = vpop.f32.mrb[15].mxu1 }
 0x162   : > { %v1270_v36 = vadd.f32 %v1265_v34, %v1148_v31 }
 0x17d   : > { %v1376_v37 = vpop.f32.mrb[16].mxu0 }
 0x17e   : > { %v1383_v39 = vadd.f32 %v1376_v37, %v1269_v32  ;;  %v2009_v40 = vpop.f32.mrb[17].mxu0 }
 0x17f   : > { %v1379_v41 = vpop.f32.mrb[18].mxu0 }
 0x180   : > { %v1392_v42 = vadd.f32 %v1747_v38, %v1383_v39  ;;  %v1384_v43 = vadd.f32 %v1379_v41, %v1270_v36  ;;  %v2010_v44 = vpop.f32.mrb[19].mxu0 }
 0x182   : > { %v1394_v45 = vmax.f32 %v1392_v42, 0.0  ;;  %v1393_v46 = vadd.f32 %v1747_v38, %v1384_v43 }
 0x184   : > { %1397 = vst.msk [vmem:[%s342_s11] sm:$0xff] %vm1396_vm3, %v1394_v45  ;;  %v1395_v47 = vmax.f32 %v1393_v46, 0.0 }
 0x186   : > { %1398 = vst.msk [vmem:[%s342_s11 + $0x8] sm:$0xff] %vm1396_vm3, %v1395_v47 }
 0x187 PF: > { %s15_s22 = sadd.s32 1, %s2167_s22   ;;  %s2633_s18 = smov %s2159_s20 }
 0x188   : > { %p12_p10 = scmp.ge.s32.totalorder %s15_s22, 34   ;;  %s2634_s19 = smov %s2163_s21 }
 0x189   : > { %s2635_s20 = smov %s2638_s23  ;;  %s2636_s21 = smov %s2642_s24 }
 0x18a   :  { %14 = sbr.rel (!%p12_p10) target bundleno = 3 (0x3), region = 84 }

// kernel: sft_net_forward.27
= control target key start
LH: loop header
LB: loop body
LE: loop exit
PB: predicated region body
PF: predicated region fallthrough
CT: control target
= control target key end

     0   :  { %s1695_s18 = smov 0   ;;  %s1697_s19 = smov 0   ;;  %s1964_s0 = inlined_call_operand.vmem [shape: f32[2,18,18,64], index: 0, kind: input, shape index: {}, may-alias: {0,1,2}]   ;;  %s1965_s1 = inlined_call_operand.vmem [shape: f32[2,18,18,64], index: 1, kind: input, shape index: {}, may-alias: {0,1,2}]   ;;  %s1966_s2 = inlined_call_operand.vmem [shape: f32[2,18,18,64], index: 2, kind: input, shape index: {}, may-alias: {0,1,2}]   ;;  %s1967_s3 = inlined_call_operand.vmem [shape: bf16[9,64,8], index: 3, kind: input, shape index: {}]   ;;  %s1968_s4 = inlined_call_operand.vmem [shape: f32[1,8], index: 4, kind: input, shape index: {}]   ;;  %s1969_s5 = inlined_call_operand.vmem [shape: f32[2,16,16,8], index: 5, kind: output, shape index: {}]  }
   0x1   :  { %s1699_s20 = smov 0   ;;  %s1701_s21 = smov 0  }
   0x2   :  { %s1703_s22 = smov 0  }
   0x3 LB: > { %s24_s23 = sadd.s32 1, %s1653_s20  ;;  %s27_s24 = sadd.s32 1, %s1657_s21  ;;  %s1661_s22 = sphi %s1703_s22, %s15_s22   ;;  %s1657_s21 = sphi %s1701_s21, %s1974_s21   ;;  %s1653_s20 = sphi %s1699_s20, %s1973_s20   ;;  %s1649_s19 = sphi %s1697_s19, %s1972_s19   ;;  %s1645_s18 = sphi %s1695_s18, %s1971_s18  }
   0x4   : > { %p25_p0 = scmp.ge.s32.totalorder %s24_s23, 16  ;;  %p1269_p1 = scmp.ge.s32.totalorder %s1661_s22, 1 }
   0x5   : > { %p247_p2 = scmp.lt.s32.totalorder %s1661_s22, 33 }
   0x6   : > { %s1976_s23 = smov (%p25_p0, %s24_s23), 0  ;;  %s1978_s24 = smov (!%p25_p0, %s27_s24), %s1657_s21 }
   0x7   : > { %p248_p3 = pnand %p1269_p1, %p247_p2  ;;  %p29_p4 = scmp.ge.s32.totalorder %s1978_s24, 2 }
   0x8   : > { %v1587_v0 = vld [vmem:[%s1967_s3 + $0x20] sm:$0xff] (!%p248_p3)   ;;  %v1663_v1 = vmov (!%p248_p3), 0.0   ;;  %v1589_v3 = vld [vmem:[%s1967_s3 + $0x28] sm:$0xff] (!%p248_p3)   ;;  %vm1664_vm0 = vmmov (!%p248_p3), 0   ;;  %p303_p5 = scmp.lt.s32.totalorder (!%p248_p3), %s1649_s19, 1  ;;  %p305_p6 = scmp.lt.s32.totalorder (!%p248_p3), %s1645_s18, 17 }
   0x9   : > { %s1980_s24 = smov (%p29_p4, %s1978_s24), 0  ;;  %251 = sbr.rel (%p248_p3) target bundleno = 317 (0x13d), region = 40 }
   0xa   : > { %1433 = vmatprep.subr.bf16.mxu0 (!%p248_p3), %v1663_v1  ;;  %1445 = vmatprep.subr.bf16.mxu1 (!%p248_p3), %v1663_v1  ;;  %v1588_v2 = vld [vmem:[%s1967_s3] sm:$0xff] (!%p248_p3)   ;;  %v1590_v4 = vld [vmem:[%s1967_s3 + $0x8] sm:$0xff] (!%p248_p3)   ;;  %v1591_v5 = vld [vmem:[%s1967_s3 + $0x30] sm:$0xff] (!%p248_p3)   ;;  %s312_s6 = sadd.s32 (!%p248_p3), 1, %s1645_s18  ;;  %vm403_vm1 = vcmask (!%p248_p3), 523264   ;;  %vm526_vm3 = vcmask (!%p248_p3), 1046528  }
   0xb   : > { %1434 = vmatpush3.bf16.msra.mxu0 (!%p248_p3), %v1587_v0  ;;  %1441 = vmatprep.mubr.msk.bf16.mxu0 (!%p248_p3), %vm1664_vm0, %v1663_v1  ;;  %v1592_v6 = vld [vmem:[%s1967_s3 + $0x10] sm:$0xff] (!%p248_p3)   ;;  %v1593_v7 = vld [vmem:[%s1967_s3 + $0x38] sm:$0xff] (!%p248_p3)   ;;  %p315_p7 = scmp.lt.s32.totalorder (!%p248_p3), %s312_s6, 17  ;;  %v1596_v17 = vld [vmem:[%s1967_s3 + $0x60] sm:$0xff] (!%p248_p3)   ;;  %vm366_vm2 = vsmask.f32 (!%p248_p3), 7424 }
   0xc   : > { %1446 = vmatpush3.bf16.msra.mxu1 (!%p248_p3), %v1588_v2  ;;  %1435 = vmatprep.subr.bf16.mxu0 (!%p248_p3), %v1663_v1  ;;  %v1594_v8 = vld [vmem:[%s1967_s3 + $0x18] sm:$0xff] (!%p248_p3)   ;;  %v1595_v20 = vld [vmem:[%s1967_s3 + $0x40] sm:$0xff] (!%p248_p3)   ;;  %v1598_v22 = vld [vmem:[%s1967_s3 + $0x68] sm:$0xff] (!%p248_p3)   ;;  %p336_p9 = scmp.lt.s32.totalorder (!%p248_p3), %s1645_s18, 15  ;;  %vm1125_vm4 = vcmask (!%p248_p3), 64512  }
   0xd   : > { %1447 = vmatprep.subr.bf16.mxu1 (!%p248_p3), %v1663_v1  ;;  %1453 = vmatprep.mubr.msk.bf16.mxu1 (!%p248_p3), %vm1664_vm0, %v1663_v1  ;;  %v1597_v24 = vld [vmem:[%s1967_s3 + $0x48] sm:$0xff] (!%p248_p3)   ;;  %v1600_v25 = vld [vmem:[%s1967_s3 + $0x70] sm:$0xff] (!%p248_p3)   ;;  %v1602_v27 = vld [vmem:[%s1967_s3 + $0x78] sm:$0xff] (!%p248_p3)  }
   0xe   : > { %v1599_v26 = vld [vmem:[%s1967_s3 + $0x50] sm:$0xff] (!%p248_p3)   ;;  %v1601_v30 = vld [vmem:[%s1967_s3 + $0x58] sm:$0xff] (!%p248_p3)   ;;  %v1604_v34 = vld [vmem:[%s1967_s3 + $0xa0] sm:$0xff] (!%p248_p3)  }
   0xf   : > { %1436 = vmatpush3.bf16.msra.mxu0 (!%p248_p3), %v1589_v3  ;;  %v1603_v36 = vld [vmem:[%s1967_s3 + $0x80] sm:$0xff] (!%p248_p3)   ;;  %v1606_v37 = vld [vmem:[%s1967_s3 + $0xa8] sm:$0xff] (!%p248_p3)   ;;  %v1608_v40 = vld [vmem:[%s1967_s3 + $0xb0] sm:$0xff] (!%p248_p3)  }
  0x10   : > { %s1982_s19 = smov (!%p303_p5, %s1649_s19), 1  ;;  %1448 = vmatpush3.bf16.msra.mxu1 %v1590_v4  ;;  %1437 = vmatprep.subr.bf16.mxu0 %v1663_v1  ;;  %s1984_s6 = smov (!%p315_p7, %s312_s6), 17  ;;  %v1605_v39 = vld [vmem:[%s1967_s3 + $0x88] sm:$0xff]   ;;  %v1607_v44 = vld [vmem:[%s1967_s3 + $0x90] sm:$0xff]   ;;  %v1610_v45 = vld [vmem:[%s1967_s3 + $0xb8] sm:$0xff]  }
  0x11   : > { %s306_s8 = scalar_select %p305_p6, %s1645_s18, 17  ;;  %1449 = vmatprep.subr.bf16.mxu1 %v1663_v1  ;;  %v1609_v52 = vld [vmem:[%s1967_s3 + $0x98] sm:$0xff]   ;;  %v1612_v56 = vld [vmem:[%s1967_s3 + $0xe0] sm:$0xff]   ;;  %v1614_v61 = vld [vmem:[%s1967_s3 + $0xe8] sm:$0xff]  }
  0x12   : > { %s1759_s11 = smul.u32 54, %s1982_s19  ;;  %v1611_v60 = vld [vmem:[%s1967_s3 + $0xc0] sm:$0xff]   ;;  %v1613_v0 = vld [vmem:[%s1967_s3 + $0xc8] sm:$0xff]   ;;  %v1616_v2 = vld [vmem:[%s1967_s3 + $0xf0] sm:$0xff]   ;;  %s1274_s9 = sshll.u32 %s1982_s19, 5 }
  0x13   : > { %s1541_s14 = smul.u32 3, %s306_s8  ;;  %1438 = vmatpush3.bf16.msra.mxu0 %v1591_v5 }
  0x14   : > { %1450 = vmatpush3.bf16.msra.mxu1 %v1592_v6  ;;  %1439 = vmatprep.subr.bf16.mxu0 %v1663_v1  ;;  %v1615_v6 = vld [vmem:[%s1967_s3 + $0xd0] sm:$0xff]  }
  0x15   : > { %s309_s15 = sadd.s32 %s1759_s11, %s1541_s14  ;;  %1451 = vmatprep.subr.bf16.mxu1 %v1663_v1  ;;  %s323_s14 = sadd.s32 2, %s1645_s18 }
  0x16   : > { %s1270_s25 = sshll.u32 %s309_s15, 3  ;;  %s1543_s15 = smul.u32 3, %s1984_s6 }
  0x17   : > { %s311_s30 = scalar_lea.vmem %s1964_s0, %s1270_s25  ;;  %1440 = vmatpush3.bf16.msra.mxu0 %v1593_v7  ;;  %p1801_p8 = scmp.lt.s32.totalorder %s323_s14, 17  ;;  %v1618_v7 = vld [vmem:[%s1967_s3 + $0xf8] sm:$0xff]  }
  0x18   : > { %v344_v9 = vld [vmem:[%s311_s30] sm:$0xff]  ;;  %v345_v10 = vld [vmem:[%s311_s30 + $0x8] sm:$0xff]  ;;  %v346_v11 = vld [vmem:[%s311_s30 + $0x10] sm:$0x3]  ;;  %1452 = vmatpush3.bf16.msra.mxu1 %v1594_v8  ;;  %1457 = vmatprep.subr.bf16.mxu0 %v1663_v1  ;;  %s319_s25 = sadd.s32 %s1543_s15, %s1759_s11  ;;  %s1988_s18 = smov (!%p336_p9, %s1645_s18), 15 }
  0x19   : > { %v347_v12 = vpack.c.bf16 %v345_v10, %v344_v9  ;;  %v356_v13 = vpack.c.bf16 %v346_v11, %v346_v11  ;;  %1469 = vmatprep.subr.bf16.mxu1 %v1663_v1  ;;  %s1271_s29 = sshll.u32 %s319_s25, 3  ;;  %s1986_s14 = smov (!%p1801_p8, %s323_s14), 17  ;;  %v1617_v10 = vld [vmem:[%s1967_s3 + $0xd8] sm:$0xff]  }
  0x1a   : > { %s1813_s7 = scalar_lea.vmem %s1965_s1, %s1271_s29  ;;  %s1544_s25 = smul.u32 3, %s1986_s14 }
  0x1b   : > { %v368_v14 = vshrl.u32 %v347_v12, 16  ;;  %v370_v15 = vshll.u32 %v347_v12, 16  ;;  %v375_v16 = vshll.u32 %v356_v13, 16  ;;  %1454 = vmatmul.mubr.msk.bf16.vlgmr.msra.gmra.mrb[0].mxu1 %vm403_vm1, %v347_v12  ;;  %v600_v28 = vld [vmem:[%s1813_s7] sm:$0xff]  ;;  %v601_v29 = vld [vmem:[%s1813_s7 + $0x8] sm:$0xff]  ;;  %v527_v31 = vrot.slane %v347_v12, 1 }
  0x1c   : > { %1470 = vmatpush3.bf16.msra.mxu1 %v1596_v17  ;;  %1477 = vmatprep.mubr.msk.bf16.mxu1 %vm1664_vm0, %v1663_v1  ;;  %v528_v32 = vrot.slane %v356_v13, 1  ;;  %v603_v33 = vpack.c.bf16 %v601_v29, %v600_v28  ;;  %s330_s14 = sadd.s32 %s1544_s25, %s1759_s11  ;;  %v602_v38 = vld [vmem:[%s1813_s7 + $0x10] sm:$0x3]  ;;  %v1619_v12 = vld [vmem:[%s1967_s3 + $0x100] sm:$0xff]   ;;  %v1620_v13 = vld [vmem:[%s1967_s3 + $0x108] sm:$0xff]   ;;  %s1273_s8 = sshll.u32 %s1988_s18, 1 }
  0x1d   : > { %v372_v18 = vrot.slane %v370_v15, 1  ;;  %v377_v19 = vrot.slane %v375_v16, 1  ;;  %1471 = vmatprep.subr.bf16.mxu1 %v1663_v1  ;;  %s1272_s30 = sshll.u32 %s330_s14, 3  ;;  %v683_v41 = vpack.c.bf16 %v602_v38, %v602_v38  ;;  %v1622_v15 = vld [vmem:[%s1967_s3 + $0x118] sm:$0xff]   ;;  %s340_s10 = sadd.s32 %s1274_s9, %s1273_s8 }
  0x1e   : > { %v529_v35 = vsel %vm526_vm3, %v527_v31, %v528_v32  ;;  %v695_v42 = vshll.u32 %v603_v33, 16  ;;  %s332_s12 = scalar_lea.vmem %s1966_s2, %s1272_s30  ;;  %v693_v43 = vshrl.u32 %v603_v33, 16  ;;  %v785_v48 = vrot.slane %v603_v33, 1  ;;  %s1275_s11 = sshll.u32 %s340_s10, 3 }
  0x1f   : > { %v373_v21 = vor.u32 %v372_v18, %v368_v14  ;;  %v700_v47 = vshll.u32 %v683_v41, 16  ;;  %v786_v49 = vrot.slane %v683_v41, 1  ;;  %v858_v50 = vld [vmem:[%s332_s12] sm:$0xff]  ;;  %v859_v51 = vld [vmem:[%s332_s12 + $0x8] sm:$0xff]  ;;  %v860_v58 = vld [vmem:[%s332_s12 + $0x10] sm:$0x3]  ;;  %s342_s16 = scalar_lea.vmem %s1969_s5, %s1275_s11 }
  0x20   : > { %1472 = vmatpush3.bf16.msra.mxu1 %v1598_v22  ;;  %v697_v46 = vrot.slane %v695_v42, 1  ;;  %v861_v57 = vpack.c.bf16 %v859_v51, %v858_v50  ;;  %v941_v62 = vpack.c.bf16 %v860_v58, %v860_v58  ;;  %v1621_v14 = vld [vmem:[%s1967_s3 + $0x110] sm:$0xff]  }
  0x21   : > { %v378_v23 = vsel %vm366_vm2, %v373_v21, %v377_v19  ;;  %1473 = vmatprep.subr.bf16.mxu1 %v1663_v1  ;;  %v702_v54 = vrot.slane %v700_v47, 1  ;;  %v787_v55 = vsel %vm526_vm3, %v785_v48, %v786_v49 }
  0x22   : > { %1442 = vmatmul.mubr.msk.bf16.vlgmr.msra.gmra.mrb[0].mxu0 %vm403_vm1, %v378_v23  ;;  %v698_v53 = vor.u32 %v697_v46, %v693_v43  ;;  %v953_v63 = vshll.u32 %v861_v57, 16  ;;  %v951_v3 = vshrl.u32 %v861_v57, 16  ;;  %v958_v5 = vshll.u32 %v941_v62, 16 }
  0x23   : > { %1458 = vmatpush3.bf16.msra.mxu0 %v1595_v20  ;;  %1465 = vmatprep.mubr.msk.bf16.mxu0 %vm1664_vm0, %v1663_v1  ;;  %v1043_v16 = vrot.slane %v861_v57, 1  ;;  %v1044_v17 = vrot.slane %v941_v62, 1 }
  0x24   : > { %1459 = vmatprep.subr.bf16.mxu0 %v1663_v1  ;;  %1474 = vmatpush3.bf16.msra.mxu1 %v1600_v25  ;;  %v703_v59 = vsel %vm366_vm2, %v698_v53, %v702_v54  ;;  %v955_v4 = vrot.slane %v953_v63, 1  ;;  %v960_v9 = vrot.slane %v958_v5, 1 }
  0x25   : > { %1475 = vmatprep.subr.bf16.mxu1 %v1663_v1  ;;  %v1045_v18 = vsel %vm526_vm3, %v1043_v16, %v1044_v17 }
  0x26   : > { %v956_v8 = vor.u32 %v955_v4, %v951_v3 }
  0x27   : > { %1460 = vmatpush3.bf16.msra.mxu0 %v1597_v24 }
  0x28   : > { %1461 = vmatprep.subr.bf16.mxu0 %v1663_v1  ;;  %1476 = vmatpush3.bf16.msra.mxu1 %v1602_v27  ;;  %v961_v11 = vsel %vm366_vm2, %v956_v8, %v960_v9 }
  0x29   : > { %1493 = vmatprep.subr.bf16.mxu1 %v1663_v1 }
  0x2b   : > { %1462 = vmatpush3.bf16.msra.mxu0 %v1599_v26  ;;  %1478 = vmatmul.mubr.msk.bf16.vlgmr.msra.gmra.mrb[4].mxu1 %vm403_vm1, %v603_v33 }
  0x2c   : > { %1463 = vmatprep.subr.bf16.mxu0 %v1663_v1  ;;  %1494 = vmatpush3.bf16.msra.mxu1 %v1604_v34 }
  0x2d   : > { %1495 = vmatprep.subr.bf16.mxu1 %v1663_v1  ;;  %1501 = vmatprep.mubr.msk.bf16.mxu1 %vm1664_vm0, %v1663_v1 }
  0x2f   : > { %1464 = vmatpush3.bf16.msra.mxu0 %v1601_v30 }
  0x30   : > { %1481 = vmatprep.subr.bf16.mxu0 %v1663_v1  ;;  %1496 = vmatpush3.bf16.msra.mxu1 %v1606_v37 }
  0x31   : > { %1497 = vmatprep.subr.bf16.mxu1 %v1663_v1 }
  0x32   : > { %1466 = vmatmul.mubr.msk.bf16.vlgmr.msra.gmra.mrb[4].mxu0 %vm403_vm1, %v529_v35 }
  0x33   : > { %1482 = vmatpush3.bf16.msra.mxu0 %v1603_v36  ;;  %1489 = vmatprep.mubr.msk.bf16.mxu0 %vm1664_vm0, %v1663_v1 }
  0x34   : > { %1483 = vmatprep.subr.bf16.mxu0 %v1663_v1  ;;  %1498 = vmatpush3.bf16.msra.mxu1 %v1608_v40 }
  0x35   : > { %1499 = vmatprep.subr.bf16.mxu1 %v1663_v1 }
  0x37   : > { %1484 = vmatpush3.bf16.msra.mxu0 %v1605_v39 }
  0x38   : > { %1485 = vmatprep.subr.bf16.mxu0 %v1663_v1  ;;  %1500 = vmatpush3.bf16.msra.mxu1 %v1610_v45 }
  0x39   : > { %1517 = vmatprep.subr.bf16.mxu1 %v1663_v1 }
  0x3b   : > { %1486 = vmatpush3.bf16.msra.mxu0 %v1607_v44  ;;  %1502 = vmatmul.mubr.msk.bf16.vlgmr.msra.gmra.mrb[8].mxu1 %vm403_vm1, %v787_v55 }
  0x3c   : > { %1487 = vmatprep.subr.bf16.mxu0 %v1663_v1  ;;  %1518 = vmatpush3.bf16.msra.mxu1 %v1612_v56 }
  0x3d   : > { %1519 = vmatprep.subr.bf16.mxu1 %v1663_v1  ;;  %1525 = vmatprep.mubr.msk.bf16.mxu1 %vm1664_vm0, %v1663_v1 }
  0x3f   : > { %1488 = vmatpush3.bf16.msra.mxu0 %v1609_v52 }
  0x40   : > { %1505 = vmatprep.subr.bf16.mxu0 %v1663_v1  ;;  %1520 = vmatpush3.bf16.msra.mxu1 %v1614_v61 }
  0x41   : > { %1521 = vmatprep.subr.bf16.mxu1 %v1663_v1 }
  0x42   : > { %1490 = vmatmul.mubr.msk.bf16.vlgmr.msra.gmra.mrb[8].mxu0 %vm403_vm1, %v703_v59 }
  0x43   : > { %1506 = vmatpush3.bf16.msra.mxu0 %v1611_v60  ;;  %1513 = vmatprep.mubr.msk.bf16.mxu0 %vm1664_vm0, %v1663_v1 }
  0x44   : > { %1507 = vmatprep.subr.bf16.mxu0 %v1663_v1  ;;  %1522 = vmatpush3.bf16.msra.mxu1 %v1616_v2  ;;  %v1385_v2 = vld [vmem:[%s1968_s4] ss:$0 sm:$0xff] }
  0x45   : > { %1523 = vmatprep.subr.bf16.mxu1 %v1663_v1 }
  0x47   : > { %1508 = vmatpush3.bf16.msra.mxu0 %v1613_v0 }
  0x48   : > { %1509 = vmatprep.subr.bf16.mxu0 %v1663_v1  ;;  %1524 = vmatpush3.bf16.msra.mxu1 %v1618_v7 }
  0x4b   : > { %1510 = vmatpush3.bf16.msra.mxu0 %v1615_v6  ;;  %1526 = vmatmul.mubr.msk.bf16.vlgmr.msra.gmra.mrb[12].mxu1 %vm403_vm1, %v961_v11 }
  0x4c   : > { %1511 = vmatprep.subr.bf16.mxu0 %v1663_v1 }
  0x4f   : > { %1512 = vmatpush3.bf16.msra.mxu0 %v1617_v10 }
  0x50   : > { %1529 = vmatprep.subr.bf16.mxu0 %v1663_v1 }
  0x52   : > { %1514 = vmatmul.mubr.msk.bf16.vlgmr.msra.gmra.mrb[12].mxu0 %vm403_vm1, %v861_v57 }
  0x53   : > { %1530 = vmatpush3.bf16.msra.mxu0 %v1619_v12  ;;  %1537 = vmatprep.mubr.msk.bf16.mxu0 %vm1664_vm0, %v1663_v1 }
  0x54   : > { %1531 = vmatprep.subr.bf16.mxu0 %v1663_v1 }
  0x57   : > { %1532 = vmatpush3.bf16.msra.mxu0 %v1620_v13 }
  0x58   : > { %1533 = vmatprep.subr.bf16.mxu0 %v1663_v1 }
  0x5b   : > { %1534 = vmatpush3.bf16.msra.mxu0 %v1621_v14 }
  0x5c   : > { %1535 = vmatprep.subr.bf16.mxu0 %v1663_v1 }
  0x5f   : > { %1536 = vmatpush3.bf16.msra.mxu0 %v1622_v15 }
  0x62   : > { %1538 = vmatmul.mubr.msk.bf16.vlgmr.msra.gmra.mrb[16].mxu0 %vm403_vm1, %v1045_v18 }
  0xee   : > { %v508_v19 = vpop.f32.mrb[0].mxu1 }
  0xef   : > { %v1455_v20 = vpop.f32.mrb[1].mxu1 }
  0xf0   : > { %v511_v21 = vpop.f32.mrb[2].mxu1 }
  0xf1   : > { %v1456_v22 = vpop.f32.mrb[3].mxu1 }
  0xf5   : > { %v441_v23 = vpop.f32.mrb[0].mxu0 }
  0xf6   : > { %v509_v24 = vadd.f32 %v508_v19, %v441_v23  ;;  %v1443_v25 = vpop.f32.mrb[1].mxu0 }
  0xf7   : > { %v444_v26 = vpop.f32.mrb[2].mxu0 }
  0xf8   : > { %v512_v27 = vadd.f32 %v511_v21, %v444_v26  ;;  %v1444_v28 = vpop.f32.mrb[3].mxu0 }
  0xfe   : > { %v674_v29 = vpop.f32.mrb[4].mxu1 }
  0xff   : > { %v1479_v30 = vpop.f32.mrb[5].mxu1 }
 0x100   : > { %v677_v31 = vpop.f32.mrb[6].mxu1 }
 0x101   : > { %v1480_v32 = vpop.f32.mrb[7].mxu1 }
 0x105   : > { %v591_v1 = vpop.f32.mrb[4].mxu0 }
 0x106   : > { %v598_v33 = vadd.f32 %v591_v1, %v509_v24  ;;  %v1467_v34 = vpop.f32.mrb[5].mxu0 }
 0x107   : > { %v594_v35 = vpop.f32.mrb[6].mxu0 }
 0x108   : > { %v599_v36 = vadd.f32 %v594_v35, %v512_v27  ;;  %v681_v37 = vadd.f32 %v674_v29, %v598_v33  ;;  %v1468_v38 = vpop.f32.mrb[7].mxu0 }
 0x10a   : > { %v682_v39 = vadd.f32 %v677_v31, %v599_v36 }
 0x10e   : > { %v849_v40 = vpop.f32.mrb[8].mxu1 }
 0x10f   : > { %v1503_v41 = vpop.f32.mrb[9].mxu1 }
 0x110   : > { %v852_v42 = vpop.f32.mrb[10].mxu1 }
 0x111   : > { %v1504_v43 = vpop.f32.mrb[11].mxu1 }
 0x115   : > { %v765_v44 = vpop.f32.mrb[8].mxu0 }
 0x116   : > { %v772_v45 = vadd.f32 %v765_v44, %v681_v37  ;;  %v1491_v46 = vpop.f32.mrb[9].mxu0 }
 0x117   : > { %v768_v47 = vpop.f32.mrb[10].mxu0 }
 0x118   : > { %v773_v48 = vadd.f32 %v768_v47, %v682_v39  ;;  %v856_v49 = vadd.f32 %v849_v40, %v772_v45  ;;  %v1492_v50 = vpop.f32.mrb[11].mxu0 }
 0x11a   : > { %v857_v51 = vadd.f32 %v852_v42, %v773_v48 }
 0x11e   : > { %v1023_v52 = vpop.f32.mrb[12].mxu1 }
 0x11f   : > { %v1527_v53 = vpop.f32.mrb[13].mxu1 }
 0x120   : > { %v1026_v54 = vpop.f32.mrb[14].mxu1 }
 0x121   : > { %v1528_v55 = vpop.f32.mrb[15].mxu1 }
 0x125   : > { %v932_v56 = vpop.f32.mrb[12].mxu0 }
 0x126   : > { %v939_v57 = vadd.f32 %v932_v56, %v856_v49  ;;  %v1515_v58 = vpop.f32.mrb[13].mxu0 }
 0x127   : > { %v935_v59 = vpop.f32.mrb[14].mxu0 }
 0x128   : > { %v940_v60 = vadd.f32 %v935_v59, %v857_v51  ;;  %v1030_v61 = vadd.f32 %v1023_v52, %v939_v57  ;;  %v1516_v62 = vpop.f32.mrb[15].mxu0 }
 0x12a   : > { %v1031_v63 = vadd.f32 %v1026_v54, %v940_v60 }
 0x135   : > { %v1107_v0 = vpop.f32.mrb[16].mxu0 }
 0x136   : > { %v1114_v3 = vadd.f32 %v1107_v0, %v1030_v61  ;;  %v1539_v4 = vpop.f32.mrb[17].mxu0 }
 0x137   : > { %v1110_v5 = vpop.f32.mrb[18].mxu0 }
 0x138   : > { %v1123_v6 = vadd.f32 %v1385_v2, %v1114_v3  ;;  %v1115_v7 = vadd.f32 %v1110_v5, %v1031_v63  ;;  %v1540_v8 = vpop.f32.mrb[19].mxu0 }
 0x13a   : > { %1126 = vst.msk [vmem:[%s342_s16] sm:$0xff] %vm1125_vm4, %v1123_v6  ;;  %v1124_v9 = vadd.f32 %v1385_v2, %v1115_v7 }
 0x13c   : > { %1127 = vst.msk [vmem:[%s342_s16 + $0x8] sm:$0xff] %vm1125_vm4, %v1124_v9 }
 0x13d PF: > { %s15_s22 = sadd.s32 1, %s1661_s22   ;;  %s1971_s18 = smov %s1653_s20 }
 0x13e   : > { %p12_p10 = scmp.ge.s32.totalorder %s15_s22, 34   ;;  %s1972_s19 = smov %s1657_s21 }
 0x13f   : > { %s1973_s20 = smov %s1976_s23  ;;  %s1974_s21 = smov %s1980_s24 }
 0x140   :  { %14 = sbr.rel (!%p12_p10) target bundleno = 3 (0x3), region = 84 }

</bundles_post_ra>
